<compile_context>
chip_gen: v5e
topology: v5e:2x2
jax: 0.10.0
libtpu: 0.0.40
codegen_flags: <defaults>
</compile_context>

<pallas_src>
import functools

import numpy as np
import jax
import jax.numpy as jnp
from jax import lax
from jax.experimental import pallas as pl
from jax.experimental.pallas import tpu as pltpu  # noqa: F401

_EPS = 1e-5


# ---------------------------------------------------------------------------
# host-side (numpy) constant builders: gather / scatter selection matrices
# ---------------------------------------------------------------------------

def _gather_3x3_np(N, H, W):
    """G[t] @ act == zero-padded tap t of a 3x3 / stride-1 / pad-1 im2col.

    Activation rows are (n, h, w) raster order at resolution HxW; t = ty*3+tx.
    """
    M = N * H * W
    G = np.zeros((9, M, M), np.float32)
    for n in range(N):
        for h in range(H):
            for w in range(W):
                m = (n * H + h) * W + w
                for ty in range(3):
                    for tx in range(3):
                        y, x = h + ty - 1, w + tx - 1
                        if 0 <= y < H and 0 <= x < W:
                            G[ty * 3 + tx, m, (n * H + y) * W + x] = 1.0
    return G


def _gather_s2k4_np(N, H, W):
    """Gather matrices for a 4x4 / stride-2 / pad-1 conv (input rows HxW raster)."""
    Ho, Wo = H // 2, W // 2
    Mo, Mi = N * Ho * Wo, N * H * W
    G = np.zeros((16, Mo, Mi), np.float32)
    for n in range(N):
        for p in range(Ho):
            for q in range(Wo):
                m = (n * Ho + p) * Wo + q
                for i in range(4):
                    for j in range(4):
                        y, x = 2 * p + i - 1, 2 * q + j - 1
                        if 0 <= y < H and 0 <= x < W:
                            G[i * 4 + j, m, (n * H + y) * W + x] = 1.0
    return G


def _scatter_up2_np(N, H, W):
    """P[a*2+b] scatters phase (a, b) rows (HxW raster) into the 2H x 2W raster."""
    Mo, Mi = N * 4 * H * W, N * H * W
    P = np.zeros((4, Mo, Mi), np.float32)
    for n in range(N):
        for h in range(H):
            for w in range(W):
                mi = (n * H + h) * W + w
                for a in range(2):
                    for b in range(2):
                        mo = (n * 2 * H + 2 * h + a) * 2 * W + 2 * w + b
                        P[a * 2 + b, mo, mi] = 1.0
    return P


@functools.lru_cache(maxsize=None)
def _selection_constants(N, H, W):
    H2, W2, H4, W4 = H // 2, W // 2, H // 4, W // 4
    return dict(
        gc2=jnp.asarray(_gather_s2k4_np(N, H2, W2)),   # (16, M4, M8)
        g4=jnp.asarray(_gather_3x3_np(N, H4, W4)),     # (9,  M4, M4)
        g8=jnp.asarray(_gather_3x3_np(N, H2, W2)),     # (9,  M8, M8)
        p48=jnp.asarray(_scatter_up2_np(N, H4, W4)),   # (4,  M8, M4)
    )


# ---------------------------------------------------------------------------
# one-time weight packing (outside jit)
# ---------------------------------------------------------------------------

def _conv_wmat_np(w):
    # (Cout, Cin, kh, kw) -> (kh*kw*Cin, Cout), rows ordered (ty, tx, cin).
    cout, cin, kh, kw = w.shape
    return np.transpose(w, (2, 3, 1, 0)).reshape(kh * kw * cin, cout)


def _ct_phase_wmat_np(w):
    # ConvTranspose2d(k=4, s=2, p=1) weight (Cin, Cout, 4, 4) -> per-phase
    # 3x3 / stride-1 / pad-1 conv weights, shape (4, 9*Cin, Cout); ph = a*2+b.
    cin, cout = w.shape[0], w.shape[1]
    out = np.zeros((4, 9 * cin, cout), np.float32)
    for a in range(2):
        for b in range(2):
            for dy in range(2):
                for dx in range(2):
                    t = (a + dy) * 3 + (b + dx)
                    out[a * 2 + b, t * cin:(t + 1) * cin, :] = \
                        w[:, :, 3 - a - 2 * dy, 3 - b - 2 * dx]
    return out


def pack_params(params):
    """One-time repacking of CAE parameters for the fused kernel (call outside jit)."""
    d = params["enc_c1_w"].shape[0]
    nc = params["enc_c1_w"].shape[1]

    def f(a):
        return np.asarray(a, np.float32)

    def cw(w):
        return _conv_wmat_np(f(w))

    res_keys = ("enc_res1", "enc_res2", "dec_res1", "dec_res2")
    w3 = np.stack([cw(params[k]["c1_w"]) for k in res_keys])       # (4, 9d, d)
    w11 = np.stack([cw(params[k]["c2_w"]) for k in res_keys])      # (4, d, d)

    # BN (gamma, beta) pairs, in network order.  Biases immediately followed by
    # BN (enc convs, enc-res c1/c2, dec_res1 c2, ct1) are dropped: the BN mean
    # subtraction cancels them exactly.
    gb = np.stack([
        f(params["enc_bn1_g"]), f(params["enc_bn1_b"]),
        f(params["enc_bn2_g"]), f(params["enc_bn2_b"]),
        f(params["enc_res1"]["bn_g"]), f(params["enc_res1"]["bn_b"]),
        f(params["enc_bn3_g"]), f(params["enc_bn3_b"]),
        f(params["enc_res2"]["bn_g"]), f(params["enc_res2"]["bn_b"]),
        f(params["enc_bn4_g"]), f(params["enc_bn4_b"]),
        f(params["dec_bn1_g"]), f(params["dec_bn1_b"]),
        f(params["dec_bn2_g"]), f(params["dec_bn2_b"]),
    ])                                                             # (16, d)

    br = np.stack([
        f(params["dec_res1"]["c1_b"]),        # kept: ReLU follows (no BN)
        f(params["dec_res2"]["c1_b"]),        # kept: ReLU follows (no BN)
        f(params["dec_res2"]["c2_b"]),        # kept: ConvT follows (no BN)
        np.zeros((d,), np.float32),
    ])                                                             # (4, d)

    return dict(
        w1=jnp.asarray(cw(params["enc_c1_w"])),                    # (16*nc, d)
        w2=jnp.asarray(cw(params["enc_c2_w"])),                    # (16*d, d)
        w3=jnp.asarray(w3),
        w11=jnp.asarray(w11),
        wct1=jnp.asarray(_ct_phase_wmat_np(f(params["dec_ct1_w"]))),   # (4, 9d, d)
        wct2=jnp.asarray(_ct_phase_wmat_np(f(params["dec_ct2_w"]))),   # (4, 9d, nc)
        gb=jnp.asarray(gb.reshape(16, 1, d)),
        br=jnp.asarray(br.reshape(4, 1, d)),
        bct2=jnp.asarray(f(params["dec_ct2_b"]).reshape(1, nc)),
    )


# ---------------------------------------------------------------------------
# the fused Pallas kernel
# ---------------------------------------------------------------------------

def _bn_rows(v, g, b):
    # Training-mode BatchNorm over rows (N*H*W) per channel, centered two-pass.
    m = v.shape[0]
    mean = jnp.sum(v, axis=0, keepdims=True) * (1.0 / m)
    c = v - mean
    var = jnp.sum(c * c, axis=0, keepdims=True) * (1.0 / m)
    return c * lax.rsqrt(var + _EPS) * g + b


def _relu(v):
    return jnp.maximum(v, 0.0)


def _cae_kernel(cols0_ref, w1_ref, w2_ref, w3_ref, w11_ref, wct1_ref, wct2_ref,
                gb_ref, br_ref, bct2_ref, gc2_ref, g4_ref, g8_ref, p48_ref,
                o_ref):
    def gam(i):
        return gb_ref[i, :, :]                       # (1, d)

    def mm(a, b):
        return jnp.dot(a, b, preferred_element_type=jnp.float32)

    def im2col3(a, g_ref):
        # in-kernel 3x3/stride-1/pad-1 im2col via 0/1 gather matrices on the MXU
        taps = [mm(g_ref[t, :, :], a) for t in range(9)]
        return jnp.concatenate(taps, axis=1)         # (M, 9*d)

    def resblock(x, k, inner=None, b1=None, b2=None):
        # x + Conv1x1(ReLU([BN](Conv3x3(ReLU(x)) [+ b1])) ) [+ b2]
        a = _relu(x)
        t = mm(im2col3(a, g4_ref), w3_ref[k, :, :])
        if b1 is not None:
            t = t + b1
        if inner is not None:
            t = _bn_rows(t, inner[0], inner[1])
        t = _relu(t)
        u = mm(t, w11_ref[k, :, :])
        if b2 is not None:
            u = u + b2
        return x + u

    # -------------------------------- encoder --------------------------------
    # Conv(nc->d, k4, s2, p1) + BN + ReLU (bias dropped: BN follows)
    h = _relu(_bn_rows(mm(cols0_ref[...], w1_ref[...]), gam(0), gam(1)))
    # Conv(d->d, k4, s2, p1) + BN + ReLU, in-kernel gather-im2col
    cols = jnp.concatenate([mm(gc2_ref[t, :, :], h) for t in range(16)], axis=1)
    h = _relu(_bn_rows(mm(cols, w2_ref[...]), gam(2), gam(3)))
    # ResBlock(bn=True) + BN, twice
    h = _bn_rows(resblock(h, 0, inner=(gam(4), gam(5))), gam(6), gam(7))
    z = _bn_rows(resblock(h, 1, inner=(gam(8), gam(9))), gam(10), gam(11))

    # -------------------------------- decoder --------------------------------
    h = _bn_rows(resblock(z, 2, b1=br_ref[0, :, :]), gam(12), gam(13))
    h = resblock(h, 3, b1=br_ref[1, :, :], b2=br_ref[2, :, :])

    # ConvTranspose(d->d, k4, s2, p1) as sub-pixel 3x3 conv + phase scatter,
    # then BN + ReLU on the full 2H x 2W image rows (bias dropped: BN follows).
    cols = im2col3(h, g4_ref)                        # (M4, 9d)
    y8 = None
    for ph in range(4):
        s = mm(p48_ref[ph, :, :], mm(cols, wct1_ref[ph, :, :]))    # (M8, d)
        y8 = s if y8 is None else y8 + s
    y8 = _relu(_bn_rows(y8, gam(14), gam(15)))

    # ConvTranspose(d->nc, k4, s2, p1) sub-pixel + bias + tanh; the 4 phases
    # stay packed along lanes (image rearrangement happens in the XLA epilogue).
    cols = im2col3(y8, g8_ref)                       # (M8, 9d)
    bct = bct2_ref[...]                              # (1, nc)
    outs = [jnp.tanh(mm(cols, wct2_ref[ph, :, :]) + bct) for ph in range(4)]
    o_ref[...] = jnp.concatenate(outs, axis=1)       # (M8, 4*nc)


# ---------------------------------------------------------------------------
# XLA-side glue (prologue im2col of the raw input, epilogue layout fix)
# ---------------------------------------------------------------------------

def _im2col_s2k4(x):
    # x: (N, H, W, C) NHWC -> (N*(H/2)*(W/2), 16*C) for k=4, s=2, p=1.
    N, H, W, C = x.shape
    Ho, Wo = H // 2, W // 2
    xp = jnp.pad(x, ((0, 0), (1, 1), (1, 1), (0, 0)))
    taps = [xp[:, i:i + 2 * Ho:2, j:j + 2 * Wo:2, :]
            for i in range(4) for j in range(4)]
    patches = jnp.stack(taps, axis=3)                # (N, Ho, Wo, 16, C)
    return patches.reshape(N * Ho * Wo, 16 * C)


def cae_forward(x_nchw, packed):
    """CAE.forward: returns (decode(encode(x)), None, None, None)."""
    N, nc, H, W = x_nchw.shape
    x = jnp.transpose(x_nchw, (0, 2, 3, 1)).astype(jnp.float32)   # NCHW -> NHWC
    cols0 = _im2col_s2k4(x)                                       # (N*H/2*W/2, 16*nc)
    c = _selection_constants(N, H, W)
    H2, W2 = H // 2, W // 2
    M8 = N * H2 * W2

    o = pl.pallas_call(
        _cae_kernel,
        out_shape=jax.ShapeDtypeStruct((M8, 4 * nc), jnp.float32),
    )(cols0, packed["w1"], packed["w2"], packed["w3"], packed["w11"],
      packed["wct1"], packed["wct2"], packed["gb"], packed["br"], packed["bct2"],
      c["gc2"], c["g4"], c["g8"], c["p48"])

    # phase layout -> image: rows are (n, h, w) at H2 x W2, cols are (a, b, c).
    y = o.reshape(N, H2, W2, 2, 2, nc)
    recon = jnp.transpose(y, (0, 5, 1, 3, 2, 4)).reshape(N, nc, H, W)
    return recon, None, None, None


# ---------------------------------------------------------------------------
# parameter init (mirrors the PyTorch module's layer shapes)
# ---------------------------------------------------------------------------

def init_params(key, d, num_channels):
    keys = iter(jax.random.split(key, 48))

    def nrm(shape, s=0.02):
        return jax.random.normal(next(keys), shape, jnp.float32) * s

    def ones():
        return jnp.ones((d,), jnp.float32)

    def res(bn):
        p = {"c1_w": nrm((d, d, 3, 3)), "c1_b": nrm((d,), 0.01),
             "c2_w": nrm((d, d, 1, 1)), "c2_b": nrm((d,), 0.01)}
        if bn:
            p["bn_g"] = ones()
            p["bn_b"] = nrm((d,), 0.01)
        return p

    # NOTE: biases that feed directly into BatchNorm (enc convs, enc-res c1/c2,
    # dec_res1 c2, dec_ct1) are kept in the param dict for parity but are
    # mathematically cancelled by the BN that follows, so pack_params drops them.
    return {
        "enc_c1_w": nrm((d, num_channels, 4, 4)), "enc_c1_b": nrm((d,), 0.01),
        "enc_bn1_g": ones(), "enc_bn1_b": nrm((d,), 0.01),
        "enc_c2_w": nrm((d, d, 4, 4)), "enc_c2_b": nrm((d,), 0.01),
        "enc_bn2_g": ones(), "enc_bn2_b": nrm((d,), 0.01),
        "enc_res1": res(True),
        "enc_bn3_g": ones(), "enc_bn3_b": nrm((d,), 0.01),
        "enc_res2": res(True),
        "enc_bn4_g": ones(), "enc_bn4_b": nrm((d,), 0.01),
        "dec_res1": res(False),
        "dec_bn1_g": ones(), "dec_bn1_b": nrm((d,), 0.01),
        "dec_res2": res(False),
        "dec_ct1_w": nrm((d, d, 4, 4)), "dec_ct1_b": nrm((d,), 0.01),
        "dec_bn2_g": ones(), "dec_bn2_b": nrm((d,), 0.01),
        "dec_ct2_w": nrm((d, num_channels, 4, 4)),
        "dec_ct2_b": nrm((num_channels,), 0.01),
    }


# ----------------------------------- main -----------------------------------

if __name__ == "__main__":
    d, num_channels = 16, 3
    root = jax.random.PRNGKey(0)
    kp, kx = jax.random.split(root)
    params = init_params(kp, d=d, num_channels=num_channels)
    packed = pack_params(params)                       # one-time, outside jit
    x = jax.random.normal(kx, (2, num_channels, 16, 16), jnp.float32)

    fwd = jax.jit(cae_forward)
    recon, a, b, c = fwd(x, packed)
    jax.block_until_ready(recon)

    assert recon.shape == (2, num_channels, 16, 16)
    assert a is None and b is None and c is None
    assert bool(jnp.all(jnp.isfinite(recon)))
    assert bool(jnp.max(jnp.abs(recon)) <= 1.0)        # tanh output range
    print("KERNEL_OK")
</pallas_src>

<mosaic_0001>
module attributes {stable_mosaic.version = 11 : i64} {
  func.func @_cae_kernel(%arg0: memref<128x48xf32, #tpu.memory_space<vmem>>, %arg1: memref<48x16xf32, #tpu.memory_space<vmem>>, %arg2: memref<256x16xf32, #tpu.memory_space<vmem>>, %arg3: memref<4x144x16xf32, #tpu.memory_space<vmem>>, %arg4: memref<4x16x16xf32, #tpu.memory_space<vmem>>, %arg5: memref<4x144x16xf32, #tpu.memory_space<vmem>>, %arg6: memref<4x144x3xf32, #tpu.memory_space<vmem>>, %arg7: memref<16x1x16xf32, #tpu.memory_space<vmem>>, %arg8: memref<4x1x16xf32, #tpu.memory_space<vmem>>, %arg9: memref<1x3xf32, #tpu.memory_space<vmem>>, %arg10: memref<16x32x128xf32, #tpu.memory_space<vmem>>, %arg11: memref<9x32x32xf32, #tpu.memory_space<vmem>>, %arg12: memref<9x128x128xf32, #tpu.memory_space<vmem>>, %arg13: memref<4x128x32xf32, #tpu.memory_space<vmem>>, %arg14: memref<128x12xf32, #tpu.memory_space<vmem>>) attributes {dimension_semantics = [], scalar_prefetch = 0 : i64, scratch_operands = 0 : i64, tpu.core_type = #tpu.core_type<tc>} {
    %c0 = arith.constant 0 : index
    %c0_0 = arith.constant 0 : index
    %0 = vector.load %arg0[%c0, %c0_0] : memref<128x48xf32, #tpu.memory_space<vmem>>, vector<128x48xf32>
    %c0_1 = arith.constant 0 : index
    %c0_2 = arith.constant 0 : index
    %1 = vector.load %arg1[%c0_1, %c0_2] : memref<48x16xf32, #tpu.memory_space<vmem>>, vector<48x16xf32>
    %cst = arith.constant dense<0.000000e+00> : vector<128x16xf32>
    %2 = tpu.matmul %0, %1, %cst {dimension_numbers = #tpu.dot_dimension_numbers<[1], [0], [0], [1], [0, 0, 1, 1], [], []>} : vector<128x48xf32>, vector<48x16xf32>, vector<128x16xf32> -> vector<128x16xf32>
    %c0_3 = arith.constant 0 : index
    %c0_4 = arith.constant 0 : index
    %c0_5 = arith.constant 0 : index
    %3 = vector.load %arg7[%c0_3, %c0_4, %c0_5] : memref<16x1x16xf32, #tpu.memory_space<vmem>>, vector<1x1x16xf32>
    %4 = vector.shape_cast %3 : vector<1x1x16xf32> to vector<1x16xf32>
    %c1 = arith.constant 1 : index
    %c0_6 = arith.constant 0 : index
    %c0_7 = arith.constant 0 : index
    %5 = vector.load %arg7[%c1, %c0_6, %c0_7] : memref<16x1x16xf32, #tpu.memory_space<vmem>>, vector<1x1x16xf32>
    %6 = vector.shape_cast %5 : vector<1x1x16xf32> to vector<1x16xf32>
    %cst_8 = arith.constant dense<0.000000e+00> : vector<16xf32>
    %7 = vector.multi_reduction <add>, %2, %cst_8 [0] : vector<128x16xf32> to vector<16xf32>
    %8 = vector.shape_cast %7 : vector<16xf32> to vector<1x16xf32>
    %cst_9 = arith.constant 7.812500e-03 : f32
    %9 = vector.broadcast %cst_9 : f32 to vector<1x16xf32>
    %10 = arith.mulf %8, %9 : vector<1x16xf32>
    %11 = vector.broadcast %10 : vector<1x16xf32> to vector<128x16xf32>
    %12 = arith.subf %2, %11 : vector<128x16xf32>
    %13 = arith.mulf %12, %12 : vector<128x16xf32>
    %cst_10 = arith.constant dense<0.000000e+00> : vector<16xf32>
    %14 = vector.multi_reduction <add>, %13, %cst_10 [0] : vector<128x16xf32> to vector<16xf32>
    %15 = vector.shape_cast %14 : vector<16xf32> to vector<1x16xf32>
    %cst_11 = arith.constant 7.812500e-03 : f32
    %16 = vector.broadcast %cst_11 : f32 to vector<1x16xf32>
    %17 = arith.mulf %15, %16 : vector<1x16xf32>
    %cst_12 = arith.constant 9.99999974E-6 : f32
    %18 = vector.broadcast %cst_12 : f32 to vector<1x16xf32>
    %19 = arith.addf %17, %18 : vector<1x16xf32>
    %20 = math.rsqrt %19 : vector<1x16xf32>
    %21 = vector.broadcast %20 : vector<1x16xf32> to vector<128x16xf32>
    %22 = arith.mulf %12, %21 : vector<128x16xf32>
    %23 = vector.broadcast %4 : vector<1x16xf32> to vector<128x16xf32>
    %24 = arith.mulf %22, %23 : vector<128x16xf32>
    %25 = vector.broadcast %6 : vector<1x16xf32> to vector<128x16xf32>
    %26 = arith.addf %24, %25 : vector<128x16xf32>
    %cst_13 = arith.constant 0.000000e+00 : f32
    %27 = vector.broadcast %cst_13 : f32 to vector<128x16xf32>
    %28 = arith.maximumf %26, %27 : vector<128x16xf32>
    %c0_14 = arith.constant 0 : index
    %c0_15 = arith.constant 0 : index
    %c0_16 = arith.constant 0 : index
    %29 = vector.load %arg10[%c0_14, %c0_15, %c0_16] : memref<16x32x128xf32, #tpu.memory_space<vmem>>, vector<1x32x128xf32>
    %30 = vector.shape_cast %29 : vector<1x32x128xf32> to vector<32x128xf32>
    %cst_17 = arith.constant dense<0.000000e+00> : vector<32x16xf32>
    %31 = tpu.matmul %30, %28, %cst_17 {dimension_numbers = #tpu.dot_dimension_numbers<[1], [0], [0], [1], [0, 0, 1, 1], [], []>} : vector<32x128xf32>, vector<128x16xf32>, vector<32x16xf32> -> vector<32x16xf32>
    %c1_18 = arith.constant 1 : index
    %c0_19 = arith.constant 0 : index
    %c0_20 = arith.constant 0 : index
    %32 = vector.load %arg10[%c1_18, %c0_19, %c0_20] : memref<16x32x128xf32, #tpu.memory_space<vmem>>, vector<1x32x128xf32>
    %33 = vector.shape_cast %32 : vector<1x32x128xf32> to vector<32x128xf32>
    %cst_21 = arith.constant dense<0.000000e+00> : vector<32x16xf32>
    %34 = tpu.matmul %33, %28, %cst_21 {dimension_numbers = #tpu.dot_dimension_numbers<[1], [0], [0], [1], [0, 0, 1, 1], [], []>} : vector<32x128xf32>, vector<128x16xf32>, vector<32x16xf32> -> vector<32x16xf32>
    %c2 = arith.constant 2 : index
    %c0_22 = arith.constant 0 : index
    %c0_23 = arith.constant 0 : index
    %35 = vector.load %arg10[%c2, %c0_22, %c0_23] : memref<16x32x128xf32, #tpu.memory_space<vmem>>, vector<1x32x128xf32>
    %36 = vector.shape_cast %35 : vector<1x32x128xf32> to vector<32x128xf32>
    %cst_24 = arith.constant dense<0.000000e+00> : vector<32x16xf32>
    %37 = tpu.matmul %36, %28, %cst_24 {dimension_numbers = #tpu.dot_dimension_numbers<[1], [0], [0], [1], [0, 0, 1, 1], [], []>} : vector<32x128xf32>, vector<128x16xf32>, vector<32x16xf32> -> vector<32x16xf32>
    %c3 = arith.constant 3 : index
    %c0_25 = arith.constant 0 : index
    %c0_26 = arith.constant 0 : index
    %38 = vector.load %arg10[%c3, %c0_25, %c0_26] : memref<16x32x128xf32, #tpu.memory_space<vmem>>, vector<1x32x128xf32>
    %39 = vector.shape_cast %38 : vector<1x32x128xf32> to vector<32x128xf32>
    %cst_27 = arith.constant dense<0.000000e+00> : vector<32x16xf32>
    %40 = tpu.matmul %39, %28, %cst_27 {dimension_numbers = #tpu.dot_dimension_numbers<[1], [0], [0], [1], [0, 0, 1, 1], [], []>} : vector<32x128xf32>, vector<128x16xf32>, vector<32x16xf32> -> vector<32x16xf32>
    %c4 = arith.constant 4 : index
    %c0_28 = arith.constant 0 : index
    %c0_29 = arith.constant 0 : index
    %41 = vector.load %arg10[%c4, %c0_28, %c0_29] : memref<16x32x128xf32, #tpu.memory_space<vmem>>, vector<1x32x128xf32>
    %42 = vector.shape_cast %41 : vector<1x32x128xf32> to vector<32x128xf32>
    %cst_30 = arith.constant dense<0.000000e+00> : vector<32x16xf32>
    %43 = tpu.matmul %42, %28, %cst_30 {dimension_numbers = #tpu.dot_dimension_numbers<[1], [0], [0], [1], [0, 0, 1, 1], [], []>} : vector<32x128xf32>, vector<128x16xf32>, vector<32x16xf32> -> vector<32x16xf32>
    %c5 = arith.constant 5 : index
    %c0_31 = arith.constant 0 : index
    %c0_32 = arith.constant 0 : index
    %44 = vector.load %arg10[%c5, %c0_31, %c0_32] : memref<16x32x128xf32, #tpu.memory_space<vmem>>, vector<1x32x128xf32>
    %45 = vector.shape_cast %44 : vector<1x32x128xf32> to vector<32x128xf32>
    %cst_33 = arith.constant dense<0.000000e+00> : vector<32x16xf32>
    %46 = tpu.matmul %45, %28, %cst_33 {dimension_numbers = #tpu.dot_dimension_numbers<[1], [0], [0], [1], [0, 0, 1, 1], [], []>} : vector<32x128xf32>, vector<128x16xf32>, vector<32x16xf32> -> vector<32x16xf32>
    %c6 = arith.constant 6 : index
    %c0_34 = arith.constant 0 : index
    %c0_35 = arith.constant 0 : index
    %47 = vector.load %arg10[%c6, %c0_34, %c0_35] : memref<16x32x128xf32, #tpu.memory_space<vmem>>, vector<1x32x128xf32>
    %48 = vector.shape_cast %47 : vector<1x32x128xf32> to vector<32x128xf32>
    %cst_36 = arith.constant dense<0.000000e+00> : vector<32x16xf32>
    %49 = tpu.matmul %48, %28, %cst_36 {dimension_numbers = #tpu.dot_dimension_numbers<[1], [0], [0], [1], [0, 0, 1, 1], [], []>} : vector<32x128xf32>, vector<128x16xf32>, vector<32x16xf32> -> vector<32x16xf32>
    %c7 = arith.constant 7 : index
    %c0_37 = arith.constant 0 : index
    %c0_38 = arith.constant 0 : index
    %50 = vector.load %arg10[%c7, %c0_37, %c0_38] : memref<16x32x128xf32, #tpu.memory_space<vmem>>, vector<1x32x128xf32>
    %51 = vector.shape_cast %50 : vector<1x32x128xf32> to vector<32x128xf32>
    %cst_39 = arith.constant dense<0.000000e+00> : vector<32x16xf32>
    %52 = tpu.matmul %51, %28, %cst_39 {dimension_numbers = #tpu.dot_dimension_numbers<[1], [0], [0], [1], [0, 0, 1, 1], [], []>} : vector<32x128xf32>, vector<128x16xf32>, vector<32x16xf32> -> vector<32x16xf32>
    %c8 = arith.constant 8 : index
    %c0_40 = arith.constant 0 : index
    %c0_41 = arith.constant 0 : index
    %53 = vector.load %arg10[%c8, %c0_40, %c0_41] : memref<16x32x128xf32, #tpu.memory_space<vmem>>, vector<1x32x128xf32>
    %54 = vector.shape_cast %53 : vector<1x32x128xf32> to vector<32x128xf32>
    %cst_42 = arith.constant dense<0.000000e+00> : vector<32x16xf32>
    %55 = tpu.matmul %54, %28, %cst_42 {dimension_numbers = #tpu.dot_dimension_numbers<[1], [0], [0], [1], [0, 0, 1, 1], [], []>} : vector<32x128xf32>, vector<128x16xf32>, vector<32x16xf32> -> vector<32x16xf32>
    %c9 = arith.constant 9 : index
    %c0_43 = arith.constant 0 : index
    %c0_44 = arith.constant 0 : index
    %56 = vector.load %arg10[%c9, %c0_43, %c0_44] : memref<16x32x128xf32, #tpu.memory_space<vmem>>, vector<1x32x128xf32>
    %57 = vector.shape_cast %56 : vector<1x32x128xf32> to vector<32x128xf32>
    %cst_45 = arith.constant dense<0.000000e+00> : vector<32x16xf32>
    %58 = tpu.matmul %57, %28, %cst_45 {dimension_numbers = #tpu.dot_dimension_numbers<[1], [0], [0], [1], [0, 0, 1, 1], [], []>} : vector<32x128xf32>, vector<128x16xf32>, vector<32x16xf32> -> vector<32x16xf32>
    %c10 = arith.constant 10 : index
    %c0_46 = arith.constant 0 : index
    %c0_47 = arith.constant 0 : index
    %59 = vector.load %arg10[%c10, %c0_46, %c0_47] : memref<16x32x128xf32, #tpu.memory_space<vmem>>, vector<1x32x128xf32>
    %60 = vector.shape_cast %59 : vector<1x32x128xf32> to vector<32x128xf32>
    %cst_48 = arith.constant dense<0.000000e+00> : vector<32x16xf32>
    %61 = tpu.matmul %60, %28, %cst_48 {dimension_numbers = #tpu.dot_dimension_numbers<[1], [0], [0], [1], [0, 0, 1, 1], [], []>} : vector<32x128xf32>, vector<128x16xf32>, vector<32x16xf32> -> vector<32x16xf32>
    %c11 = arith.constant 11 : index
    %c0_49 = arith.constant 0 : index
    %c0_50 = arith.constant 0 : index
    %62 = vector.load %arg10[%c11, %c0_49, %c0_50] : memref<16x32x128xf32, #tpu.memory_space<vmem>>, vector<1x32x128xf32>
    %63 = vector.shape_cast %62 : vector<1x32x128xf32> to vector<32x128xf32>
    %cst_51 = arith.constant dense<0.000000e+00> : vector<32x16xf32>
    %64 = tpu.matmul %63, %28, %cst_51 {dimension_numbers = #tpu.dot_dimension_numbers<[1], [0], [0], [1], [0, 0, 1, 1], [], []>} : vector<32x128xf32>, vector<128x16xf32>, vector<32x16xf32> -> vector<32x16xf32>
    %c12 = arith.constant 12 : index
    %c0_52 = arith.constant 0 : index
    %c0_53 = arith.constant 0 : index
    %65 = vector.load %arg10[%c12, %c0_52, %c0_53] : memref<16x32x128xf32, #tpu.memory_space<vmem>>, vector<1x32x128xf32>
    %66 = vector.shape_cast %65 : vector<1x32x128xf32> to vector<32x128xf32>
    %cst_54 = arith.constant dense<0.000000e+00> : vector<32x16xf32>
    %67 = tpu.matmul %66, %28, %cst_54 {dimension_numbers = #tpu.dot_dimension_numbers<[1], [0], [0], [1], [0, 0, 1, 1], [], []>} : vector<32x128xf32>, vector<128x16xf32>, vector<32x16xf32> -> vector<32x16xf32>
    %c13 = arith.constant 13 : index
    %c0_55 = arith.constant 0 : index
    %c0_56 = arith.constant 0 : index
    %68 = vector.load %arg10[%c13, %c0_55, %c0_56] : memref<16x32x128xf32, #tpu.memory_space<vmem>>, vector<1x32x128xf32>
    %69 = vector.shape_cast %68 : vector<1x32x128xf32> to vector<32x128xf32>
    %cst_57 = arith.constant dense<0.000000e+00> : vector<32x16xf32>
    %70 = tpu.matmul %69, %28, %cst_57 {dimension_numbers = #tpu.dot_dimension_numbers<[1], [0], [0], [1], [0, 0, 1, 1], [], []>} : vector<32x128xf32>, vector<128x16xf32>, vector<32x16xf32> -> vector<32x16xf32>
    %c14 = arith.constant 14 : index
    %c0_58 = arith.constant 0 : index
    %c0_59 = arith.constant 0 : index
    %71 = vector.load %arg10[%c14, %c0_58, %c0_59] : memref<16x32x128xf32, #tpu.memory_space<vmem>>, vector<1x32x128xf32>
    %72 = vector.shape_cast %71 : vector<1x32x128xf32> to vector<32x128xf32>
    %cst_60 = arith.constant dense<0.000000e+00> : vector<32x16xf32>
    %73 = tpu.matmul %72, %28, %cst_60 {dimension_numbers = #tpu.dot_dimension_numbers<[1], [0], [0], [1], [0, 0, 1, 1], [], []>} : vector<32x128xf32>, vector<128x16xf32>, vector<32x16xf32> -> vector<32x16xf32>
    %c15 = arith.constant 15 : index
    %c0_61 = arith.constant 0 : index
    %c0_62 = arith.constant 0 : index
    %74 = vector.load %arg10[%c15, %c0_61, %c0_62] : memref<16x32x128xf32, #tpu.memory_space<vmem>>, vector<1x32x128xf32>
    %75 = vector.shape_cast %74 : vector<1x32x128xf32> to vector<32x128xf32>
    %cst_63 = arith.constant dense<0.000000e+00> : vector<32x16xf32>
    %76 = tpu.matmul %75, %28, %cst_63 {dimension_numbers = #tpu.dot_dimension_numbers<[1], [0], [0], [1], [0, 0, 1, 1], [], []>} : vector<32x128xf32>, vector<128x16xf32>, vector<32x16xf32> -> vector<32x16xf32>
    %77 = tpu.concatenate %31, %34, %37, %40, %43, %46, %49, %52, %55, %58, %61, %64, %67, %70, %73, %76 in 1 : vector<32x16xf32>, vector<32x16xf32>, vector<32x16xf32>, vector<32x16xf32>, vector<32x16xf32>, vector<32x16xf32>, vector<32x16xf32>, vector<32x16xf32>, vector<32x16xf32>, vector<32x16xf32>, vector<32x16xf32>, vector<32x16xf32>, vector<32x16xf32>, vector<32x16xf32>, vector<32x16xf32>, vector<32x16xf32> -> vector<32x256xf32>
    %c0_64 = arith.constant 0 : index
    %c0_65 = arith.constant 0 : index
    %78 = vector.load %arg2[%c0_64, %c0_65] : memref<256x16xf32, #tpu.memory_space<vmem>>, vector<256x16xf32>
    %cst_66 = arith.constant dense<0.000000e+00> : vector<32x16xf32>
    %79 = tpu.matmul %77, %78, %cst_66 {dimension_numbers = #tpu.dot_dimension_numbers<[1], [0], [0], [1], [0, 0, 1, 1], [], []>} : vector<32x256xf32>, vector<256x16xf32>, vector<32x16xf32> -> vector<32x16xf32>
    %c2_67 = arith.constant 2 : index
    %c0_68 = arith.constant 0 : index
    %c0_69 = arith.constant 0 : index
    %80 = vector.load %arg7[%c2_67, %c0_68, %c0_69] : memref<16x1x16xf32, #tpu.memory_space<vmem>>, vector<1x1x16xf32>
    %81 = vector.shape_cast %80 : vector<1x1x16xf32> to vector<1x16xf32>
    %c3_70 = arith.constant 3 : index
    %c0_71 = arith.constant 0 : index
    %c0_72 = arith.constant 0 : index
    %82 = vector.load %arg7[%c3_70, %c0_71, %c0_72] : memref<16x1x16xf32, #tpu.memory_space<vmem>>, vector<1x1x16xf32>
    %83 = vector.shape_cast %82 : vector<1x1x16xf32> to vector<1x16xf32>
    %cst_73 = arith.constant dense<0.000000e+00> : vector<16xf32>
    %84 = vector.multi_reduction <add>, %79, %cst_73 [0] : vector<32x16xf32> to vector<16xf32>
    %85 = vector.shape_cast %84 : vector<16xf32> to vector<1x16xf32>
    %cst_74 = arith.constant 3.125000e-02 : f32
    %86 = vector.broadcast %cst_74 : f32 to vector<1x16xf32>
    %87 = arith.mulf %85, %86 : vector<1x16xf32>
    %88 = vector.broadcast %87 : vector<1x16xf32> to vector<32x16xf32>
    %89 = arith.subf %79, %88 : vector<32x16xf32>
    %90 = arith.mulf %89, %89 : vector<32x16xf32>
    %cst_75 = arith.constant dense<0.000000e+00> : vector<16xf32>
    %91 = vector.multi_reduction <add>, %90, %cst_75 [0] : vector<32x16xf32> to vector<16xf32>
    %92 = vector.shape_cast %91 : vector<16xf32> to vector<1x16xf32>
    %cst_76 = arith.constant 3.125000e-02 : f32
    %93 = vector.broadcast %cst_76 : f32 to vector<1x16xf32>
    %94 = arith.mulf %92, %93 : vector<1x16xf32>
    %cst_77 = arith.constant 9.99999974E-6 : f32
    %95 = vector.broadcast %cst_77 : f32 to vector<1x16xf32>
    %96 = arith.addf %94, %95 : vector<1x16xf32>
    %97 = math.rsqrt %96 : vector<1x16xf32>
    %98 = vector.broadcast %97 : vector<1x16xf32> to vector<32x16xf32>
    %99 = arith.mulf %89, %98 : vector<32x16xf32>
    %100 = vector.broadcast %81 : vector<1x16xf32> to vector<32x16xf32>
    %101 = arith.mulf %99, %100 : vector<32x16xf32>
    %102 = vector.broadcast %83 : vector<1x16xf32> to vector<32x16xf32>
    %103 = arith.addf %101, %102 : vector<32x16xf32>
    %cst_78 = arith.constant 0.000000e+00 : f32
    %104 = vector.broadcast %cst_78 : f32 to vector<32x16xf32>
    %105 = arith.maximumf %103, %104 : vector<32x16xf32>
    %c4_79 = arith.constant 4 : index
    %c0_80 = arith.constant 0 : index
    %c0_81 = arith.constant 0 : index
    %106 = vector.load %arg7[%c4_79, %c0_80, %c0_81] : memref<16x1x16xf32, #tpu.memory_space<vmem>>, vector<1x1x16xf32>
    %107 = vector.shape_cast %106 : vector<1x1x16xf32> to vector<1x16xf32>
    %c5_82 = arith.constant 5 : index
    %c0_83 = arith.constant 0 : index
    %c0_84 = arith.constant 0 : index
    %108 = vector.load %arg7[%c5_82, %c0_83, %c0_84] : memref<16x1x16xf32, #tpu.memory_space<vmem>>, vector<1x1x16xf32>
    %109 = vector.shape_cast %108 : vector<1x1x16xf32> to vector<1x16xf32>
    %cst_85 = arith.constant 0.000000e+00 : f32
    %110 = vector.broadcast %cst_85 : f32 to vector<32x16xf32>
    %111 = arith.maximumf %105, %110 : vector<32x16xf32>
    %c0_86 = arith.constant 0 : index
    %c0_87 = arith.constant 0 : index
    %c0_88 = arith.constant 0 : index
    %112 = vector.load %arg11[%c0_86, %c0_87, %c0_88] : memref<9x32x32xf32, #tpu.memory_space<vmem>>, vector<1x32x32xf32>
    %113 = vector.shape_cast %112 : vector<1x32x32xf32> to vector<32x32xf32>
    %cst_89 = arith.constant dense<0.000000e+00> : vector<32x16xf32>
    %114 = tpu.matmul %113, %111, %cst_89 {dimension_numbers = #tpu.dot_dimension_numbers<[1], [0], [0], [1], [0, 0, 1, 1], [], []>} : vector<32x32xf32>, vector<32x16xf32>, vector<32x16xf32> -> vector<32x16xf32>
    %c1_90 = arith.constant 1 : index
    %c0_91 = arith.constant 0 : index
    %c0_92 = arith.constant 0 : index
    %115 = vector.load %arg11[%c1_90, %c0_91, %c0_92] : memref<9x32x32xf32, #tpu.memory_space<vmem>>, vector<1x32x32xf32>
    %116 = vector.shape_cast %115 : vector<1x32x32xf32> to vector<32x32xf32>
    %cst_93 = arith.constant dense<0.000000e+00> : vector<32x16xf32>
    %117 = tpu.matmul %116, %111, %cst_93 {dimension_numbers = #tpu.dot_dimension_numbers<[1], [0], [0], [1], [0, 0, 1, 1], [], []>} : vector<32x32xf32>, vector<32x16xf32>, vector<32x16xf32> -> vector<32x16xf32>
    %c2_94 = arith.constant 2 : index
    %c0_95 = arith.constant 0 : index
    %c0_96 = arith.constant 0 : index
    %118 = vector.load %arg11[%c2_94, %c0_95, %c0_96] : memref<9x32x32xf32, #tpu.memory_space<vmem>>, vector<1x32x32xf32>
    %119 = vector.shape_cast %118 : vector<1x32x32xf32> to vector<32x32xf32>
    %cst_97 = arith.constant dense<0.000000e+00> : vector<32x16xf32>
    %120 = tpu.matmul %119, %111, %cst_97 {dimension_numbers = #tpu.dot_dimension_numbers<[1], [0], [0], [1], [0, 0, 1, 1], [], []>} : vector<32x32xf32>, vector<32x16xf32>, vector<32x16xf32> -> vector<32x16xf32>
    %c3_98 = arith.constant 3 : index
    %c0_99 = arith.constant 0 : index
    %c0_100 = arith.constant 0 : index
    %121 = vector.load %arg11[%c3_98, %c0_99, %c0_100] : memref<9x32x32xf32, #tpu.memory_space<vmem>>, vector<1x32x32xf32>
    %122 = vector.shape_cast %121 : vector<1x32x32xf32> to vector<32x32xf32>
    %cst_101 = arith.constant dense<0.000000e+00> : vector<32x16xf32>
    %123 = tpu.matmul %122, %111, %cst_101 {dimension_numbers = #tpu.dot_dimension_numbers<[1], [0], [0], [1], [0, 0, 1, 1], [], []>} : vector<32x32xf32>, vector<32x16xf32>, vector<32x16xf32> -> vector<32x16xf32>
    %c4_102 = arith.constant 4 : index
    %c0_103 = arith.constant 0 : index
    %c0_104 = arith.constant 0 : index
    %124 = vector.load %arg11[%c4_102, %c0_103, %c0_104] : memref<9x32x32xf32, #tpu.memory_space<vmem>>, vector<1x32x32xf32>
    %125 = vector.shape_cast %124 : vector<1x32x32xf32> to vector<32x32xf32>
    %cst_105 = arith.constant dense<0.000000e+00> : vector<32x16xf32>
    %126 = tpu.matmul %125, %111, %cst_105 {dimension_numbers = #tpu.dot_dimension_numbers<[1], [0], [0], [1], [0, 0, 1, 1], [], []>} : vector<32x32xf32>, vector<32x16xf32>, vector<32x16xf32> -> vector<32x16xf32>
    %c5_106 = arith.constant 5 : index
    %c0_107 = arith.constant 0 : index
    %c0_108 = arith.constant 0 : index
    %127 = vector.load %arg11[%c5_106, %c0_107, %c0_108] : memref<9x32x32xf32, #tpu.memory_space<vmem>>, vector<1x32x32xf32>
    %128 = vector.shape_cast %127 : vector<1x32x32xf32> to vector<32x32xf32>
    %cst_109 = arith.constant dense<0.000000e+00> : vector<32x16xf32>
    %129 = tpu.matmul %128, %111, %cst_109 {dimension_numbers = #tpu.dot_dimension_numbers<[1], [0], [0], [1], [0, 0, 1, 1], [], []>} : vector<32x32xf32>, vector<32x16xf32>, vector<32x16xf32> -> vector<32x16xf32>
    %c6_110 = arith.constant 6 : index
    %c0_111 = arith.constant 0 : index
    %c0_112 = arith.constant 0 : index
    %130 = vector.load %arg11[%c6_110, %c0_111, %c0_112] : memref<9x32x32xf32, #tpu.memory_space<vmem>>, vector<1x32x32xf32>
    %131 = vector.shape_cast %130 : vector<1x32x32xf32> to vector<32x32xf32>
    %cst_113 = arith.constant dense<0.000000e+00> : vector<32x16xf32>
    %132 = tpu.matmul %131, %111, %cst_113 {dimension_numbers = #tpu.dot_dimension_numbers<[1], [0], [0], [1], [0, 0, 1, 1], [], []>} : vector<32x32xf32>, vector<32x16xf32>, vector<32x16xf32> -> vector<32x16xf32>
    %c7_114 = arith.constant 7 : index
    %c0_115 = arith.constant 0 : index
    %c0_116 = arith.constant 0 : index
    %133 = vector.load %arg11[%c7_114, %c0_115, %c0_116] : memref<9x32x32xf32, #tpu.memory_space<vmem>>, vector<1x32x32xf32>
    %134 = vector.shape_cast %133 : vector<1x32x32xf32> to vector<32x32xf32>
    %cst_117 = arith.constant dense<0.000000e+00> : vector<32x16xf32>
    %135 = tpu.matmul %134, %111, %cst_117 {dimension_numbers = #tpu.dot_dimension_numbers<[1], [0], [0], [1], [0, 0, 1, 1], [], []>} : vector<32x32xf32>, vector<32x16xf32>, vector<32x16xf32> -> vector<32x16xf32>
    %c8_118 = arith.constant 8 : index
    %c0_119 = arith.constant 0 : index
    %c0_120 = arith.constant 0 : index
    %136 = vector.load %arg11[%c8_118, %c0_119, %c0_120] : memref<9x32x32xf32, #tpu.memory_space<vmem>>, vector<1x32x32xf32>
    %137 = vector.shape_cast %136 : vector<1x32x32xf32> to vector<32x32xf32>
    %cst_121 = arith.constant dense<0.000000e+00> : vector<32x16xf32>
    %138 = tpu.matmul %137, %111, %cst_121 {dimension_numbers = #tpu.dot_dimension_numbers<[1], [0], [0], [1], [0, 0, 1, 1], [], []>} : vector<32x32xf32>, vector<32x16xf32>, vector<32x16xf32> -> vector<32x16xf32>
    %139 = tpu.concatenate %114, %117, %120, %123, %126, %129, %132, %135, %138 in 1 : vector<32x16xf32>, vector<32x16xf32>, vector<32x16xf32>, vector<32x16xf32>, vector<32x16xf32>, vector<32x16xf32>, vector<32x16xf32>, vector<32x16xf32>, vector<32x16xf32> -> vector<32x144xf32>
    %c0_122 = arith.constant 0 : index
    %c0_123 = arith.constant 0 : index
    %c0_124 = arith.constant 0 : index
    %140 = vector.load %arg3[%c0_122, %c0_123, %c0_124] : memref<4x144x16xf32, #tpu.memory_space<vmem>>, vector<1x144x16xf32>
    %141 = vector.shape_cast %140 : vector<1x144x16xf32> to vector<144x16xf32>
    %cst_125 = arith.constant dense<0.000000e+00> : vector<32x16xf32>
    %142 = tpu.matmul %139, %141, %cst_125 {dimension_numbers = #tpu.dot_dimension_numbers<[1], [0], [0], [1], [0, 0, 1, 1], [], []>} : vector<32x144xf32>, vector<144x16xf32>, vector<32x16xf32> -> vector<32x16xf32>
    %cst_126 = arith.constant dense<0.000000e+00> : vector<16xf32>
    %143 = vector.multi_reduction <add>, %142, %cst_126 [0] : vector<32x16xf32> to vector<16xf32>
    %144 = vector.shape_cast %143 : vector<16xf32> to vector<1x16xf32>
    %cst_127 = arith.constant 3.125000e-02 : f32
    %145 = vector.broadcast %cst_127 : f32 to vector<1x16xf32>
    %146 = arith.mulf %144, %145 : vector<1x16xf32>
    %147 = vector.broadcast %146 : vector<1x16xf32> to vector<32x16xf32>
    %148 = arith.subf %142, %147 : vector<32x16xf32>
    %149 = arith.mulf %148, %148 : vector<32x16xf32>
    %cst_128 = arith.constant dense<0.000000e+00> : vector<16xf32>
    %150 = vector.multi_reduction <add>, %149, %cst_128 [0] : vector<32x16xf32> to vector<16xf32>
    %151 = vector.shape_cast %150 : vector<16xf32> to vector<1x16xf32>
    %cst_129 = arith.constant 3.125000e-02 : f32
    %152 = vector.broadcast %cst_129 : f32 to vector<1x16xf32>
    %153 = arith.mulf %151, %152 : vector<1x16xf32>
    %cst_130 = arith.constant 9.99999974E-6 : f32
    %154 = vector.broadcast %cst_130 : f32 to vector<1x16xf32>
    %155 = arith.addf %153, %154 : vector<1x16xf32>
    %156 = math.rsqrt %155 : vector<1x16xf32>
    %157 = vector.broadcast %156 : vector<1x16xf32> to vector<32x16xf32>
    %158 = arith.mulf %148, %157 : vector<32x16xf32>
    %159 = vector.broadcast %107 : vector<1x16xf32> to vector<32x16xf32>
    %160 = arith.mulf %158, %159 : vector<32x16xf32>
    %161 = vector.broadcast %109 : vector<1x16xf32> to vector<32x16xf32>
    %162 = arith.addf %160, %161 : vector<32x16xf32>
    %cst_131 = arith.constant 0.000000e+00 : f32
    %163 = vector.broadcast %cst_131 : f32 to vector<32x16xf32>
    %164 = arith.maximumf %162, %163 : vector<32x16xf32>
    %c0_132 = arith.constant 0 : index
    %c0_133 = arith.constant 0 : index
    %c0_134 = arith.constant 0 : index
    %165 = vector.load %arg4[%c0_132, %c0_133, %c0_134] : memref<4x16x16xf32, #tpu.memory_space<vmem>>, vector<1x16x16xf32>
    %166 = vector.shape_cast %165 : vector<1x16x16xf32> to vector<16x16xf32>
    %cst_135 = arith.constant dense<0.000000e+00> : vector<32x16xf32>
    %167 = tpu.matmul %164, %166, %cst_135 {dimension_numbers = #tpu.dot_dimension_numbers<[1], [0], [0], [1], [0, 0, 1, 1], [], []>} : vector<32x16xf32>, vector<16x16xf32>, vector<32x16xf32> -> vector<32x16xf32>
    %168 = arith.addf %105, %167 : vector<32x16xf32>
    %c6_136 = arith.constant 6 : index
    %c0_137 = arith.constant 0 : index
    %c0_138 = arith.constant 0 : index
    %169 = vector.load %arg7[%c6_136, %c0_137, %c0_138] : memref<16x1x16xf32, #tpu.memory_space<vmem>>, vector<1x1x16xf32>
    %170 = vector.shape_cast %169 : vector<1x1x16xf32> to vector<1x16xf32>
    %c7_139 = arith.constant 7 : index
    %c0_140 = arith.constant 0 : index
    %c0_141 = arith.constant 0 : index
    %171 = vector.load %arg7[%c7_139, %c0_140, %c0_141] : memref<16x1x16xf32, #tpu.memory_space<vmem>>, vector<1x1x16xf32>
    %172 = vector.shape_cast %171 : vector<1x1x16xf32> to vector<1x16xf32>
    %cst_142 = arith.constant dense<0.000000e+00> : vector<16xf32>
    %173 = vector.multi_reduction <add>, %168, %cst_142 [0] : vector<32x16xf32> to vector<16xf32>
    %174 = vector.shape_cast %173 : vector<16xf32> to vector<1x16xf32>
    %cst_143 = arith.constant 3.125000e-02 : f32
    %175 = vector.broadcast %cst_143 : f32 to vector<1x16xf32>
    %176 = arith.mulf %174, %175 : vector<1x16xf32>
    %177 = vector.broadcast %176 : vector<1x16xf32> to vector<32x16xf32>
    %178 = arith.subf %168, %177 : vector<32x16xf32>
    %179 = arith.mulf %178, %178 : vector<32x16xf32>
    %cst_144 = arith.constant dense<0.000000e+00> : vector<16xf32>
    %180 = vector.multi_reduction <add>, %179, %cst_144 [0] : vector<32x16xf32> to vector<16xf32>
    %181 = vector.shape_cast %180 : vector<16xf32> to vector<1x16xf32>
    %cst_145 = arith.constant 3.125000e-02 : f32
    %182 = vector.broadcast %cst_145 : f32 to vector<1x16xf32>
    %183 = arith.mulf %181, %182 : vector<1x16xf32>
    %cst_146 = arith.constant 9.99999974E-6 : f32
    %184 = vector.broadcast %cst_146 : f32 to vector<1x16xf32>
    %185 = arith.addf %183, %184 : vector<1x16xf32>
    %186 = math.rsqrt %185 : vector<1x16xf32>
    %187 = vector.broadcast %186 : vector<1x16xf32> to vector<32x16xf32>
    %188 = arith.mulf %178, %187 : vector<32x16xf32>
    %189 = vector.broadcast %170 : vector<1x16xf32> to vector<32x16xf32>
    %190 = arith.mulf %188, %189 : vector<32x16xf32>
    %191 = vector.broadcast %172 : vector<1x16xf32> to vector<32x16xf32>
    %192 = arith.addf %190, %191 : vector<32x16xf32>
    %c8_147 = arith.constant 8 : index
    %c0_148 = arith.constant 0 : index
    %c0_149 = arith.constant 0 : index
    %193 = vector.load %arg7[%c8_147, %c0_148, %c0_149] : memref<16x1x16xf32, #tpu.memory_space<vmem>>, vector<1x1x16xf32>
    %194 = vector.shape_cast %193 : vector<1x1x16xf32> to vector<1x16xf32>
    %c9_150 = arith.constant 9 : index
    %c0_151 = arith.constant 0 : index
    %c0_152 = arith.constant 0 : index
    %195 = vector.load %arg7[%c9_150, %c0_151, %c0_152] : memref<16x1x16xf32, #tpu.memory_space<vmem>>, vector<1x1x16xf32>
    %196 = vector.shape_cast %195 : vector<1x1x16xf32> to vector<1x16xf32>
    %cst_153 = arith.constant 0.000000e+00 : f32
    %197 = vector.broadcast %cst_153 : f32 to vector<32x16xf32>
    %198 = arith.maximumf %192, %197 : vector<32x16xf32>
    %c0_154 = arith.constant 0 : index
    %c0_155 = arith.constant 0 : index
    %c0_156 = arith.constant 0 : index
    %199 = vector.load %arg11[%c0_154, %c0_155, %c0_156] : memref<9x32x32xf32, #tpu.memory_space<vmem>>, vector<1x32x32xf32>
    %200 = vector.shape_cast %199 : vector<1x32x32xf32> to vector<32x32xf32>
    %cst_157 = arith.constant dense<0.000000e+00> : vector<32x16xf32>
    %201 = tpu.matmul %200, %198, %cst_157 {dimension_numbers = #tpu.dot_dimension_numbers<[1], [0], [0], [1], [0, 0, 1, 1], [], []>} : vector<32x32xf32>, vector<32x16xf32>, vector<32x16xf32> -> vector<32x16xf32>
    %c1_158 = arith.constant 1 : index
    %c0_159 = arith.constant 0 : index
    %c0_160 = arith.constant 0 : index
    %202 = vector.load %arg11[%c1_158, %c0_159, %c0_160] : memref<9x32x32xf32, #tpu.memory_space<vmem>>, vector<1x32x32xf32>
    %203 = vector.shape_cast %202 : vector<1x32x32xf32> to vector<32x32xf32>
    %cst_161 = arith.constant dense<0.000000e+00> : vector<32x16xf32>
    %204 = tpu.matmul %203, %198, %cst_161 {dimension_numbers = #tpu.dot_dimension_numbers<[1], [0], [0], [1], [0, 0, 1, 1], [], []>} : vector<32x32xf32>, vector<32x16xf32>, vector<32x16xf32> -> vector<32x16xf32>
    %c2_162 = arith.constant 2 : index
    %c0_163 = arith.constant 0 : index
    %c0_164 = arith.constant 0 : index
    %205 = vector.load %arg11[%c2_162, %c0_163, %c0_164] : memref<9x32x32xf32, #tpu.memory_space<vmem>>, vector<1x32x32xf32>
    %206 = vector.shape_cast %205 : vector<1x32x32xf32> to vector<32x32xf32>
    %cst_165 = arith.constant dense<0.000000e+00> : vector<32x16xf32>
    %207 = tpu.matmul %206, %198, %cst_165 {dimension_numbers = #tpu.dot_dimension_numbers<[1], [0], [0], [1], [0, 0, 1, 1], [], []>} : vector<32x32xf32>, vector<32x16xf32>, vector<32x16xf32> -> vector<32x16xf32>
    %c3_166 = arith.constant 3 : index
    %c0_167 = arith.constant 0 : index
    %c0_168 = arith.constant 0 : index
    %208 = vector.load %arg11[%c3_166, %c0_167, %c0_168] : memref<9x32x32xf32, #tpu.memory_space<vmem>>, vector<1x32x32xf32>
    %209 = vector.shape_cast %208 : vector<1x32x32xf32> to vector<32x32xf32>
    %cst_169 = arith.constant dense<0.000000e+00> : vector<32x16xf32>
    %210 = tpu.matmul %209, %198, %cst_169 {dimension_numbers = #tpu.dot_dimension_numbers<[1], [0], [0], [1], [0, 0, 1, 1], [], []>} : vector<32x32xf32>, vector<32x16xf32>, vector<32x16xf32> -> vector<32x16xf32>
    %c4_170 = arith.constant 4 : index
    %c0_171 = arith.constant 0 : index
    %c0_172 = arith.constant 0 : index
    %211 = vector.load %arg11[%c4_170, %c0_171, %c0_172] : memref<9x32x32xf32, #tpu.memory_space<vmem>>, vector<1x32x32xf32>
    %212 = vector.shape_cast %211 : vector<1x32x32xf32> to vector<32x32xf32>
    %cst_173 = arith.constant dense<0.000000e+00> : vector<32x16xf32>
    %213 = tpu.matmul %212, %198, %cst_173 {dimension_numbers = #tpu.dot_dimension_numbers<[1], [0], [0], [1], [0, 0, 1, 1], [], []>} : vector<32x32xf32>, vector<32x16xf32>, vector<32x16xf32> -> vector<32x16xf32>
    %c5_174 = arith.constant 5 : index
    %c0_175 = arith.constant 0 : index
    %c0_176 = arith.constant 0 : index
    %214 = vector.load %arg11[%c5_174, %c0_175, %c0_176] : memref<9x32x32xf32, #tpu.memory_space<vmem>>, vector<1x32x32xf32>
    %215 = vector.shape_cast %214 : vector<1x32x32xf32> to vector<32x32xf32>
    %cst_177 = arith.constant dense<0.000000e+00> : vector<32x16xf32>
    %216 = tpu.matmul %215, %198, %cst_177 {dimension_numbers = #tpu.dot_dimension_numbers<[1], [0], [0], [1], [0, 0, 1, 1], [], []>} : vector<32x32xf32>, vector<32x16xf32>, vector<32x16xf32> -> vector<32x16xf32>
    %c6_178 = arith.constant 6 : index
    %c0_179 = arith.constant 0 : index
    %c0_180 = arith.constant 0 : index
    %217 = vector.load %arg11[%c6_178, %c0_179, %c0_180] : memref<9x32x32xf32, #tpu.memory_space<vmem>>, vector<1x32x32xf32>
    %218 = vector.shape_cast %217 : vector<1x32x32xf32> to vector<32x32xf32>
    %cst_181 = arith.constant dense<0.000000e+00> : vector<32x16xf32>
    %219 = tpu.matmul %218, %198, %cst_181 {dimension_numbers = #tpu.dot_dimension_numbers<[1], [0], [0], [1], [0, 0, 1, 1], [], []>} : vector<32x32xf32>, vector<32x16xf32>, vector<32x16xf32> -> vector<32x16xf32>
    %c7_182 = arith.constant 7 : index
    %c0_183 = arith.constant 0 : index
    %c0_184 = arith.constant 0 : index
    %220 = vector.load %arg11[%c7_182, %c0_183, %c0_184] : memref<9x32x32xf32, #tpu.memory_space<vmem>>, vector<1x32x32xf32>
    %221 = vector.shape_cast %220 : vector<1x32x32xf32> to vector<32x32xf32>
    %cst_185 = arith.constant dense<0.000000e+00> : vector<32x16xf32>
    %222 = tpu.matmul %221, %198, %cst_185 {dimension_numbers = #tpu.dot_dimension_numbers<[1], [0], [0], [1], [0, 0, 1, 1], [], []>} : vector<32x32xf32>, vector<32x16xf32>, vector<32x16xf32> -> vector<32x16xf32>
    %c8_186 = arith.constant 8 : index
    %c0_187 = arith.constant 0 : index
    %c0_188 = arith.constant 0 : index
    %223 = vector.load %arg11[%c8_186, %c0_187, %c0_188] : memref<9x32x32xf32, #tpu.memory_space<vmem>>, vector<1x32x32xf32>
    %224 = vector.shape_cast %223 : vector<1x32x32xf32> to vector<32x32xf32>
    %cst_189 = arith.constant dense<0.000000e+00> : vector<32x16xf32>
    %225 = tpu.matmul %224, %198, %cst_189 {dimension_numbers = #tpu.dot_dimension_numbers<[1], [0], [0], [1], [0, 0, 1, 1], [], []>} : vector<32x32xf32>, vector<32x16xf32>, vector<32x16xf32> -> vector<32x16xf32>
    %226 = tpu.concatenate %201, %204, %207, %210, %213, %216, %219, %222, %225 in 1 : vector<32x16xf32>, vector<32x16xf32>, vector<32x16xf32>, vector<32x16xf32>, vector<32x16xf32>, vector<32x16xf32>, vector<32x16xf32>, vector<32x16xf32>, vector<32x16xf32> -> vector<32x144xf32>
    %c1_190 = arith.constant 1 : index
    %c0_191 = arith.constant 0 : index
    %c0_192 = arith.constant 0 : index
    %227 = vector.load %arg3[%c1_190, %c0_191, %c0_192] : memref<4x144x16xf32, #tpu.memory_space<vmem>>, vector<1x144x16xf32>
    %228 = vector.shape_cast %227 : vector<1x144x16xf32> to vector<144x16xf32>
    %cst_193 = arith.constant dense<0.000000e+00> : vector<32x16xf32>
    %229 = tpu.matmul %226, %228, %cst_193 {dimension_numbers = #tpu.dot_dimension_numbers<[1], [0], [0], [1], [0, 0, 1, 1], [], []>} : vector<32x144xf32>, vector<144x16xf32>, vector<32x16xf32> -> vector<32x16xf32>
    %cst_194 = arith.constant dense<0.000000e+00> : vector<16xf32>
    %230 = vector.multi_reduction <add>, %229, %cst_194 [0] : vector<32x16xf32> to vector<16xf32>
    %231 = vector.shape_cast %230 : vector<16xf32> to vector<1x16xf32>
    %cst_195 = arith.constant 3.125000e-02 : f32
    %232 = vector.broadcast %cst_195 : f32 to vector<1x16xf32>
    %233 = arith.mulf %231, %232 : vector<1x16xf32>
    %234 = vector.broadcast %233 : vector<1x16xf32> to vector<32x16xf32>
    %235 = arith.subf %229, %234 : vector<32x16xf32>
    %236 = arith.mulf %235, %235 : vector<32x16xf32>
    %cst_196 = arith.constant dense<0.000000e+00> : vector<16xf32>
    %237 = vector.multi_reduction <add>, %236, %cst_196 [0] : vector<32x16xf32> to vector<16xf32>
    %238 = vector.shape_cast %237 : vector<16xf32> to vector<1x16xf32>
    %cst_197 = arith.constant 3.125000e-02 : f32
    %239 = vector.broadcast %cst_197 : f32 to vector<1x16xf32>
    %240 = arith.mulf %238, %239 : vector<1x16xf32>
    %cst_198 = arith.constant 9.99999974E-6 : f32
    %241 = vector.broadcast %cst_198 : f32 to vector<1x16xf32>
    %242 = arith.addf %240, %241 : vector<1x16xf32>
    %243 = math.rsqrt %242 : vector<1x16xf32>
    %244 = vector.broadcast %243 : vector<1x16xf32> to vector<32x16xf32>
    %245 = arith.mulf %235, %244 : vector<32x16xf32>
    %246 = vector.broadcast %194 : vector<1x16xf32> to vector<32x16xf32>
    %247 = arith.mulf %245, %246 : vector<32x16xf32>
    %248 = vector.broadcast %196 : vector<1x16xf32> to vector<32x16xf32>
    %249 = arith.addf %247, %248 : vector<32x16xf32>
    %cst_199 = arith.constant 0.000000e+00 : f32
    %250 = vector.broadcast %cst_199 : f32 to vector<32x16xf32>
    %251 = arith.maximumf %249, %250 : vector<32x16xf32>
    %c1_200 = arith.constant 1 : index
    %c0_201 = arith.constant 0 : index
    %c0_202 = arith.constant 0 : index
    %252 = vector.load %arg4[%c1_200, %c0_201, %c0_202] : memref<4x16x16xf32, #tpu.memory_space<vmem>>, vector<1x16x16xf32>
    %253 = vector.shape_cast %252 : vector<1x16x16xf32> to vector<16x16xf32>
    %cst_203 = arith.constant dense<0.000000e+00> : vector<32x16xf32>
    %254 = tpu.matmul %251, %253, %cst_203 {dimension_numbers = #tpu.dot_dimension_numbers<[1], [0], [0], [1], [0, 0, 1, 1], [], []>} : vector<32x16xf32>, vector<16x16xf32>, vector<32x16xf32> -> vector<32x16xf32>
    %255 = arith.addf %192, %254 : vector<32x16xf32>
    %c10_204 = arith.constant 10 : index
    %c0_205 = arith.constant 0 : index
    %c0_206 = arith.constant 0 : index
    %256 = vector.load %arg7[%c10_204, %c0_205, %c0_206] : memref<16x1x16xf32, #tpu.memory_space<vmem>>, vector<1x1x16xf32>
    %257 = vector.shape_cast %256 : vector<1x1x16xf32> to vector<1x16xf32>
    %c11_207 = arith.constant 11 : index
    %c0_208 = arith.constant 0 : index
    %c0_209 = arith.constant 0 : index
    %258 = vector.load %arg7[%c11_207, %c0_208, %c0_209] : memref<16x1x16xf32, #tpu.memory_space<vmem>>, vector<1x1x16xf32>
    %259 = vector.shape_cast %258 : vector<1x1x16xf32> to vector<1x16xf32>
    %cst_210 = arith.constant dense<0.000000e+00> : vector<16xf32>
    %260 = vector.multi_reduction <add>, %255, %cst_210 [0] : vector<32x16xf32> to vector<16xf32>
    %261 = vector.shape_cast %260 : vector<16xf32> to vector<1x16xf32>
    %cst_211 = arith.constant 3.125000e-02 : f32
    %262 = vector.broadcast %cst_211 : f32 to vector<1x16xf32>
    %263 = arith.mulf %261, %262 : vector<1x16xf32>
    %264 = vector.broadcast %263 : vector<1x16xf32> to vector<32x16xf32>
    %265 = arith.subf %255, %264 : vector<32x16xf32>
    %266 = arith.mulf %265, %265 : vector<32x16xf32>
    %cst_212 = arith.constant dense<0.000000e+00> : vector<16xf32>
    %267 = vector.multi_reduction <add>, %266, %cst_212 [0] : vector<32x16xf32> to vector<16xf32>
    %268 = vector.shape_cast %267 : vector<16xf32> to vector<1x16xf32>
    %cst_213 = arith.constant 3.125000e-02 : f32
    %269 = vector.broadcast %cst_213 : f32 to vector<1x16xf32>
    %270 = arith.mulf %268, %269 : vector<1x16xf32>
    %cst_214 = arith.constant 9.99999974E-6 : f32
    %271 = vector.broadcast %cst_214 : f32 to vector<1x16xf32>
    %272 = arith.addf %270, %271 : vector<1x16xf32>
    %273 = math.rsqrt %272 : vector<1x16xf32>
    %274 = vector.broadcast %273 : vector<1x16xf32> to vector<32x16xf32>
    %275 = arith.mulf %265, %274 : vector<32x16xf32>
    %276 = vector.broadcast %257 : vector<1x16xf32> to vector<32x16xf32>
    %277 = arith.mulf %275, %276 : vector<32x16xf32>
    %278 = vector.broadcast %259 : vector<1x16xf32> to vector<32x16xf32>
    %279 = arith.addf %277, %278 : vector<32x16xf32>
    %c0_215 = arith.constant 0 : index
    %c0_216 = arith.constant 0 : index
    %c0_217 = arith.constant 0 : index
    %280 = vector.load %arg8[%c0_215, %c0_216, %c0_217] : memref<4x1x16xf32, #tpu.memory_space<vmem>>, vector<1x1x16xf32>
    %281 = vector.shape_cast %280 : vector<1x1x16xf32> to vector<1x16xf32>
    %cst_218 = arith.constant 0.000000e+00 : f32
    %282 = vector.broadcast %cst_218 : f32 to vector<32x16xf32>
    %283 = arith.maximumf %279, %282 : vector<32x16xf32>
    %c0_219 = arith.constant 0 : index
    %c0_220 = arith.constant 0 : index
    %c0_221 = arith.constant 0 : index
    %284 = vector.load %arg11[%c0_219, %c0_220, %c0_221] : memref<9x32x32xf32, #tpu.memory_space<vmem>>, vector<1x32x32xf32>
    %285 = vector.shape_cast %284 : vector<1x32x32xf32> to vector<32x32xf32>
    %cst_222 = arith.constant dense<0.000000e+00> : vector<32x16xf32>
    %286 = tpu.matmul %285, %283, %cst_222 {dimension_numbers = #tpu.dot_dimension_numbers<[1], [0], [0], [1], [0, 0, 1, 1], [], []>} : vector<32x32xf32>, vector<32x16xf32>, vector<32x16xf32> -> vector<32x16xf32>
    %c1_223 = arith.constant 1 : index
    %c0_224 = arith.constant 0 : index
    %c0_225 = arith.constant 0 : index
    %287 = vector.load %arg11[%c1_223, %c0_224, %c0_225] : memref<9x32x32xf32, #tpu.memory_space<vmem>>, vector<1x32x32xf32>
    %288 = vector.shape_cast %287 : vector<1x32x32xf32> to vector<32x32xf32>
    %cst_226 = arith.constant dense<0.000000e+00> : vector<32x16xf32>
    %289 = tpu.matmul %288, %283, %cst_226 {dimension_numbers = #tpu.dot_dimension_numbers<[1], [0], [0], [1], [0, 0, 1, 1], [], []>} : vector<32x32xf32>, vector<32x16xf32>, vector<32x16xf32> -> vector<32x16xf32>
    %c2_227 = arith.constant 2 : index
    %c0_228 = arith.constant 0 : index
    %c0_229 = arith.constant 0 : index
    %290 = vector.load %arg11[%c2_227, %c0_228, %c0_229] : memref<9x32x32xf32, #tpu.memory_space<vmem>>, vector<1x32x32xf32>
    %291 = vector.shape_cast %290 : vector<1x32x32xf32> to vector<32x32xf32>
    %cst_230 = arith.constant dense<0.000000e+00> : vector<32x16xf32>
    %292 = tpu.matmul %291, %283, %cst_230 {dimension_numbers = #tpu.dot_dimension_numbers<[1], [0], [0], [1], [0, 0, 1, 1], [], []>} : vector<32x32xf32>, vector<32x16xf32>, vector<32x16xf32> -> vector<32x16xf32>
    %c3_231 = arith.constant 3 : index
    %c0_232 = arith.constant 0 : index
    %c0_233 = arith.constant 0 : index
    %293 = vector.load %arg11[%c3_231, %c0_232, %c0_233] : memref<9x32x32xf32, #tpu.memory_space<vmem>>, vector<1x32x32xf32>
    %294 = vector.shape_cast %293 : vector<1x32x32xf32> to vector<32x32xf32>
    %cst_234 = arith.constant dense<0.000000e+00> : vector<32x16xf32>
    %295 = tpu.matmul %294, %283, %cst_234 {dimension_numbers = #tpu.dot_dimension_numbers<[1], [0], [0], [1], [0, 0, 1, 1], [], []>} : vector<32x32xf32>, vector<32x16xf32>, vector<32x16xf32> -> vector<32x16xf32>
    %c4_235 = arith.constant 4 : index
    %c0_236 = arith.constant 0 : index
    %c0_237 = arith.constant 0 : index
    %296 = vector.load %arg11[%c4_235, %c0_236, %c0_237] : memref<9x32x32xf32, #tpu.memory_space<vmem>>, vector<1x32x32xf32>
    %297 = vector.shape_cast %296 : vector<1x32x32xf32> to vector<32x32xf32>
    %cst_238 = arith.constant dense<0.000000e+00> : vector<32x16xf32>
    %298 = tpu.matmul %297, %283, %cst_238 {dimension_numbers = #tpu.dot_dimension_numbers<[1], [0], [0], [1], [0, 0, 1, 1], [], []>} : vector<32x32xf32>, vector<32x16xf32>, vector<32x16xf32> -> vector<32x16xf32>
    %c5_239 = arith.constant 5 : index
    %c0_240 = arith.constant 0 : index
    %c0_241 = arith.constant 0 : index
    %299 = vector.load %arg11[%c5_239, %c0_240, %c0_241] : memref<9x32x32xf32, #tpu.memory_space<vmem>>, vector<1x32x32xf32>
    %300 = vector.shape_cast %299 : vector<1x32x32xf32> to vector<32x32xf32>
    %cst_242 = arith.constant dense<0.000000e+00> : vector<32x16xf32>
    %301 = tpu.matmul %300, %283, %cst_242 {dimension_numbers = #tpu.dot_dimension_numbers<[1], [0], [0], [1], [0, 0, 1, 1], [], []>} : vector<32x32xf32>, vector<32x16xf32>, vector<32x16xf32> -> vector<32x16xf32>
    %c6_243 = arith.constant 6 : index
    %c0_244 = arith.constant 0 : index
    %c0_245 = arith.constant 0 : index
    %302 = vector.load %arg11[%c6_243, %c0_244, %c0_245] : memref<9x32x32xf32, #tpu.memory_space<vmem>>, vector<1x32x32xf32>
    %303 = vector.shape_cast %302 : vector<1x32x32xf32> to vector<32x32xf32>
    %cst_246 = arith.constant dense<0.000000e+00> : vector<32x16xf32>
    %304 = tpu.matmul %303, %283, %cst_246 {dimension_numbers = #tpu.dot_dimension_numbers<[1], [0], [0], [1], [0, 0, 1, 1], [], []>} : vector<32x32xf32>, vector<32x16xf32>, vector<32x16xf32> -> vector<32x16xf32>
    %c7_247 = arith.constant 7 : index
    %c0_248 = arith.constant 0 : index
    %c0_249 = arith.constant 0 : index
    %305 = vector.load %arg11[%c7_247, %c0_248, %c0_249] : memref<9x32x32xf32, #tpu.memory_space<vmem>>, vector<1x32x32xf32>
    %306 = vector.shape_cast %305 : vector<1x32x32xf32> to vector<32x32xf32>
    %cst_250 = arith.constant dense<0.000000e+00> : vector<32x16xf32>
    %307 = tpu.matmul %306, %283, %cst_250 {dimension_numbers = #tpu.dot_dimension_numbers<[1], [0], [0], [1], [0, 0, 1, 1], [], []>} : vector<32x32xf32>, vector<32x16xf32>, vector<32x16xf32> -> vector<32x16xf32>
    %c8_251 = arith.constant 8 : index
    %c0_252 = arith.constant 0 : index
    %c0_253 = arith.constant 0 : index
    %308 = vector.load %arg11[%c8_251, %c0_252, %c0_253] : memref<9x32x32xf32, #tpu.memory_space<vmem>>, vector<1x32x32xf32>
    %309 = vector.shape_cast %308 : vector<1x32x32xf32> to vector<32x32xf32>
    %cst_254 = arith.constant dense<0.000000e+00> : vector<32x16xf32>
    %310 = tpu.matmul %309, %283, %cst_254 {dimension_numbers = #tpu.dot_dimension_numbers<[1], [0], [0], [1], [0, 0, 1, 1], [], []>} : vector<32x32xf32>, vector<32x16xf32>, vector<32x16xf32> -> vector<32x16xf32>
    %311 = tpu.concatenate %286, %289, %292, %295, %298, %301, %304, %307, %310 in 1 : vector<32x16xf32>, vector<32x16xf32>, vector<32x16xf32>, vector<32x16xf32>, vector<32x16xf32>, vector<32x16xf32>, vector<32x16xf32>, vector<32x16xf32>, vector<32x16xf32> -> vector<32x144xf32>
    %c2_255 = arith.constant 2 : index
    %c0_256 = arith.constant 0 : index
    %c0_257 = arith.constant 0 : index
    %312 = vector.load %arg3[%c2_255, %c0_256, %c0_257] : memref<4x144x16xf32, #tpu.memory_space<vmem>>, vector<1x144x16xf32>
    %313 = vector.shape_cast %312 : vector<1x144x16xf32> to vector<144x16xf32>
    %cst_258 = arith.constant dense<0.000000e+00> : vector<32x16xf32>
    %314 = tpu.matmul %311, %313, %cst_258 {dimension_numbers = #tpu.dot_dimension_numbers<[1], [0], [0], [1], [0, 0, 1, 1], [], []>} : vector<32x144xf32>, vector<144x16xf32>, vector<32x16xf32> -> vector<32x16xf32>
    %315 = vector.broadcast %281 : vector<1x16xf32> to vector<32x16xf32>
    %316 = arith.addf %314, %315 : vector<32x16xf32>
    %cst_259 = arith.constant 0.000000e+00 : f32
    %317 = vector.broadcast %cst_259 : f32 to vector<32x16xf32>
    %318 = arith.maximumf %316, %317 : vector<32x16xf32>
    %c2_260 = arith.constant 2 : index
    %c0_261 = arith.constant 0 : index
    %c0_262 = arith.constant 0 : index
    %319 = vector.load %arg4[%c2_260, %c0_261, %c0_262] : memref<4x16x16xf32, #tpu.memory_space<vmem>>, vector<1x16x16xf32>
    %320 = vector.shape_cast %319 : vector<1x16x16xf32> to vector<16x16xf32>
    %cst_263 = arith.constant dense<0.000000e+00> : vector<32x16xf32>
    %321 = tpu.matmul %318, %320, %cst_263 {dimension_numbers = #tpu.dot_dimension_numbers<[1], [0], [0], [1], [0, 0, 1, 1], [], []>} : vector<32x16xf32>, vector<16x16xf32>, vector<32x16xf32> -> vector<32x16xf32>
    %322 = arith.addf %279, %321 : vector<32x16xf32>
    %c12_264 = arith.constant 12 : index
    %c0_265 = arith.constant 0 : index
    %c0_266 = arith.constant 0 : index
    %323 = vector.load %arg7[%c12_264, %c0_265, %c0_266] : memref<16x1x16xf32, #tpu.memory_space<vmem>>, vector<1x1x16xf32>
    %324 = vector.shape_cast %323 : vector<1x1x16xf32> to vector<1x16xf32>
    %c13_267 = arith.constant 13 : index
    %c0_268 = arith.constant 0 : index
    %c0_269 = arith.constant 0 : index
    %325 = vector.load %arg7[%c13_267, %c0_268, %c0_269] : memref<16x1x16xf32, #tpu.memory_space<vmem>>, vector<1x1x16xf32>
    %326 = vector.shape_cast %325 : vector<1x1x16xf32> to vector<1x16xf32>
    %cst_270 = arith.constant dense<0.000000e+00> : vector<16xf32>
    %327 = vector.multi_reduction <add>, %322, %cst_270 [0] : vector<32x16xf32> to vector<16xf32>
    %328 = vector.shape_cast %327 : vector<16xf32> to vector<1x16xf32>
    %cst_271 = arith.constant 3.125000e-02 : f32
    %329 = vector.broadcast %cst_271 : f32 to vector<1x16xf32>
    %330 = arith.mulf %328, %329 : vector<1x16xf32>
    %331 = vector.broadcast %330 : vector<1x16xf32> to vector<32x16xf32>
    %332 = arith.subf %322, %331 : vector<32x16xf32>
    %333 = arith.mulf %332, %332 : vector<32x16xf32>
    %cst_272 = arith.constant dense<0.000000e+00> : vector<16xf32>
    %334 = vector.multi_reduction <add>, %333, %cst_272 [0] : vector<32x16xf32> to vector<16xf32>
    %335 = vector.shape_cast %334 : vector<16xf32> to vector<1x16xf32>
    %cst_273 = arith.constant 3.125000e-02 : f32
    %336 = vector.broadcast %cst_273 : f32 to vector<1x16xf32>
    %337 = arith.mulf %335, %336 : vector<1x16xf32>
    %cst_274 = arith.constant 9.99999974E-6 : f32
    %338 = vector.broadcast %cst_274 : f32 to vector<1x16xf32>
    %339 = arith.addf %337, %338 : vector<1x16xf32>
    %340 = math.rsqrt %339 : vector<1x16xf32>
    %341 = vector.broadcast %340 : vector<1x16xf32> to vector<32x16xf32>
    %342 = arith.mulf %332, %341 : vector<32x16xf32>
    %343 = vector.broadcast %324 : vector<1x16xf32> to vector<32x16xf32>
    %344 = arith.mulf %342, %343 : vector<32x16xf32>
    %345 = vector.broadcast %326 : vector<1x16xf32> to vector<32x16xf32>
    %346 = arith.addf %344, %345 : vector<32x16xf32>
    %c1_275 = arith.constant 1 : index
    %c0_276 = arith.constant 0 : index
    %c0_277 = arith.constant 0 : index
    %347 = vector.load %arg8[%c1_275, %c0_276, %c0_277] : memref<4x1x16xf32, #tpu.memory_space<vmem>>, vector<1x1x16xf32>
    %348 = vector.shape_cast %347 : vector<1x1x16xf32> to vector<1x16xf32>
    %c2_278 = arith.constant 2 : index
    %c0_279 = arith.constant 0 : index
    %c0_280 = arith.constant 0 : index
    %349 = vector.load %arg8[%c2_278, %c0_279, %c0_280] : memref<4x1x16xf32, #tpu.memory_space<vmem>>, vector<1x1x16xf32>
    %350 = vector.shape_cast %349 : vector<1x1x16xf32> to vector<1x16xf32>
    %cst_281 = arith.constant 0.000000e+00 : f32
    %351 = vector.broadcast %cst_281 : f32 to vector<32x16xf32>
    %352 = arith.maximumf %346, %351 : vector<32x16xf32>
    %c0_282 = arith.constant 0 : index
    %c0_283 = arith.constant 0 : index
    %c0_284 = arith.constant 0 : index
    %353 = vector.load %arg11[%c0_282, %c0_283, %c0_284] : memref<9x32x32xf32, #tpu.memory_space<vmem>>, vector<1x32x32xf32>
    %354 = vector.shape_cast %353 : vector<1x32x32xf32> to vector<32x32xf32>
    %cst_285 = arith.constant dense<0.000000e+00> : vector<32x16xf32>
    %355 = tpu.matmul %354, %352, %cst_285 {dimension_numbers = #tpu.dot_dimension_numbers<[1], [0], [0], [1], [0, 0, 1, 1], [], []>} : vector<32x32xf32>, vector<32x16xf32>, vector<32x16xf32> -> vector<32x16xf32>
    %c1_286 = arith.constant 1 : index
    %c0_287 = arith.constant 0 : index
    %c0_288 = arith.constant 0 : index
    %356 = vector.load %arg11[%c1_286, %c0_287, %c0_288] : memref<9x32x32xf32, #tpu.memory_space<vmem>>, vector<1x32x32xf32>
    %357 = vector.shape_cast %356 : vector<1x32x32xf32> to vector<32x32xf32>
    %cst_289 = arith.constant dense<0.000000e+00> : vector<32x16xf32>
    %358 = tpu.matmul %357, %352, %cst_289 {dimension_numbers = #tpu.dot_dimension_numbers<[1], [0], [0], [1], [0, 0, 1, 1], [], []>} : vector<32x32xf32>, vector<32x16xf32>, vector<32x16xf32> -> vector<32x16xf32>
    %c2_290 = arith.constant 2 : index
    %c0_291 = arith.constant 0 : index
    %c0_292 = arith.constant 0 : index
    %359 = vector.load %arg11[%c2_290, %c0_291, %c0_292] : memref<9x32x32xf32, #tpu.memory_space<vmem>>, vector<1x32x32xf32>
    %360 = vector.shape_cast %359 : vector<1x32x32xf32> to vector<32x32xf32>
    %cst_293 = arith.constant dense<0.000000e+00> : vector<32x16xf32>
    %361 = tpu.matmul %360, %352, %cst_293 {dimension_numbers = #tpu.dot_dimension_numbers<[1], [0], [0], [1], [0, 0, 1, 1], [], []>} : vector<32x32xf32>, vector<32x16xf32>, vector<32x16xf32> -> vector<32x16xf32>
    %c3_294 = arith.constant 3 : index
    %c0_295 = arith.constant 0 : index
    %c0_296 = arith.constant 0 : index
    %362 = vector.load %arg11[%c3_294, %c0_295, %c0_296] : memref<9x32x32xf32, #tpu.memory_space<vmem>>, vector<1x32x32xf32>
    %363 = vector.shape_cast %362 : vector<1x32x32xf32> to vector<32x32xf32>
    %cst_297 = arith.constant dense<0.000000e+00> : vector<32x16xf32>
    %364 = tpu.matmul %363, %352, %cst_297 {dimension_numbers = #tpu.dot_dimension_numbers<[1], [0], [0], [1], [0, 0, 1, 1], [], []>} : vector<32x32xf32>, vector<32x16xf32>, vector<32x16xf32> -> vector<32x16xf32>
    %c4_298 = arith.constant 4 : index
    %c0_299 = arith.constant 0 : index
    %c0_300 = arith.constant 0 : index
    %365 = vector.load %arg11[%c4_298, %c0_299, %c0_300] : memref<9x32x32xf32, #tpu.memory_space<vmem>>, vector<1x32x32xf32>
    %366 = vector.shape_cast %365 : vector<1x32x32xf32> to vector<32x32xf32>
    %cst_301 = arith.constant dense<0.000000e+00> : vector<32x16xf32>
    %367 = tpu.matmul %366, %352, %cst_301 {dimension_numbers = #tpu.dot_dimension_numbers<[1], [0], [0], [1], [0, 0, 1, 1], [], []>} : vector<32x32xf32>, vector<32x16xf32>, vector<32x16xf32> -> vector<32x16xf32>
    %c5_302 = arith.constant 5 : index
    %c0_303 = arith.constant 0 : index
    %c0_304 = arith.constant 0 : index
    %368 = vector.load %arg11[%c5_302, %c0_303, %c0_304] : memref<9x32x32xf32, #tpu.memory_space<vmem>>, vector<1x32x32xf32>
    %369 = vector.shape_cast %368 : vector<1x32x32xf32> to vector<32x32xf32>
    %cst_305 = arith.constant dense<0.000000e+00> : vector<32x16xf32>
    %370 = tpu.matmul %369, %352, %cst_305 {dimension_numbers = #tpu.dot_dimension_numbers<[1], [0], [0], [1], [0, 0, 1, 1], [], []>} : vector<32x32xf32>, vector<32x16xf32>, vector<32x16xf32> -> vector<32x16xf32>
    %c6_306 = arith.constant 6 : index
    %c0_307 = arith.constant 0 : index
    %c0_308 = arith.constant 0 : index
    %371 = vector.load %arg11[%c6_306, %c0_307, %c0_308] : memref<9x32x32xf32, #tpu.memory_space<vmem>>, vector<1x32x32xf32>
    %372 = vector.shape_cast %371 : vector<1x32x32xf32> to vector<32x32xf32>
    %cst_309 = arith.constant dense<0.000000e+00> : vector<32x16xf32>
    %373 = tpu.matmul %372, %352, %cst_309 {dimension_numbers = #tpu.dot_dimension_numbers<[1], [0], [0], [1], [0, 0, 1, 1], [], []>} : vector<32x32xf32>, vector<32x16xf32>, vector<32x16xf32> -> vector<32x16xf32>
    %c7_310 = arith.constant 7 : index
    %c0_311 = arith.constant 0 : index
    %c0_312 = arith.constant 0 : index
    %374 = vector.load %arg11[%c7_310, %c0_311, %c0_312] : memref<9x32x32xf32, #tpu.memory_space<vmem>>, vector<1x32x32xf32>
    %375 = vector.shape_cast %374 : vector<1x32x32xf32> to vector<32x32xf32>
    %cst_313 = arith.constant dense<0.000000e+00> : vector<32x16xf32>
    %376 = tpu.matmul %375, %352, %cst_313 {dimension_numbers = #tpu.dot_dimension_numbers<[1], [0], [0], [1], [0, 0, 1, 1], [], []>} : vector<32x32xf32>, vector<32x16xf32>, vector<32x16xf32> -> vector<32x16xf32>
    %c8_314 = arith.constant 8 : index
    %c0_315 = arith.constant 0 : index
    %c0_316 = arith.constant 0 : index
    %377 = vector.load %arg11[%c8_314, %c0_315, %c0_316] : memref<9x32x32xf32, #tpu.memory_space<vmem>>, vector<1x32x32xf32>
    %378 = vector.shape_cast %377 : vector<1x32x32xf32> to vector<32x32xf32>
    %cst_317 = arith.constant dense<0.000000e+00> : vector<32x16xf32>
    %379 = tpu.matmul %378, %352, %cst_317 {dimension_numbers = #tpu.dot_dimension_numbers<[1], [0], [0], [1], [0, 0, 1, 1], [], []>} : vector<32x32xf32>, vector<32x16xf32>, vector<32x16xf32> -> vector<32x16xf32>
    %380 = tpu.concatenate %355, %358, %361, %364, %367, %370, %373, %376, %379 in 1 : vector<32x16xf32>, vector<32x16xf32>, vector<32x16xf32>, vector<32x16xf32>, vector<32x16xf32>, vector<32x16xf32>, vector<32x16xf32>, vector<32x16xf32>, vector<32x16xf32> -> vector<32x144xf32>
    %c3_318 = arith.constant 3 : index
    %c0_319 = arith.constant 0 : index
    %c0_320 = arith.constant 0 : index
    %381 = vector.load %arg3[%c3_318, %c0_319, %c0_320] : memref<4x144x16xf32, #tpu.memory_space<vmem>>, vector<1x144x16xf32>
    %382 = vector.shape_cast %381 : vector<1x144x16xf32> to vector<144x16xf32>
    %cst_321 = arith.constant dense<0.000000e+00> : vector<32x16xf32>
    %383 = tpu.matmul %380, %382, %cst_321 {dimension_numbers = #tpu.dot_dimension_numbers<[1], [0], [0], [1], [0, 0, 1, 1], [], []>} : vector<32x144xf32>, vector<144x16xf32>, vector<32x16xf32> -> vector<32x16xf32>
    %384 = vector.broadcast %348 : vector<1x16xf32> to vector<32x16xf32>
    %385 = arith.addf %383, %384 : vector<32x16xf32>
    %cst_322 = arith.constant 0.000000e+00 : f32
    %386 = vector.broadcast %cst_322 : f32 to vector<32x16xf32>
    %387 = arith.maximumf %385, %386 : vector<32x16xf32>
    %c3_323 = arith.constant 3 : index
    %c0_324 = arith.constant 0 : index
    %c0_325 = arith.constant 0 : index
    %388 = vector.load %arg4[%c3_323, %c0_324, %c0_325] : memref<4x16x16xf32, #tpu.memory_space<vmem>>, vector<1x16x16xf32>
    %389 = vector.shape_cast %388 : vector<1x16x16xf32> to vector<16x16xf32>
    %cst_326 = arith.constant dense<0.000000e+00> : vector<32x16xf32>
    %390 = tpu.matmul %387, %389, %cst_326 {dimension_numbers = #tpu.dot_dimension_numbers<[1], [0], [0], [1], [0, 0, 1, 1], [], []>} : vector<32x16xf32>, vector<16x16xf32>, vector<32x16xf32> -> vector<32x16xf32>
    %391 = vector.broadcast %350 : vector<1x16xf32> to vector<32x16xf32>
    %392 = arith.addf %390, %391 : vector<32x16xf32>
    %393 = arith.addf %346, %392 : vector<32x16xf32>
    %c0_327 = arith.constant 0 : index
    %c0_328 = arith.constant 0 : index
    %c0_329 = arith.constant 0 : index
    %394 = vector.load %arg11[%c0_327, %c0_328, %c0_329] : memref<9x32x32xf32, #tpu.memory_space<vmem>>, vector<1x32x32xf32>
    %395 = vector.shape_cast %394 : vector<1x32x32xf32> to vector<32x32xf32>
    %cst_330 = arith.constant dense<0.000000e+00> : vector<32x16xf32>
    %396 = tpu.matmul %395, %393, %cst_330 {dimension_numbers = #tpu.dot_dimension_numbers<[1], [0], [0], [1], [0, 0, 1, 1], [], []>} : vector<32x32xf32>, vector<32x16xf32>, vector<32x16xf32> -> vector<32x16xf32>
    %c1_331 = arith.constant 1 : index
    %c0_332 = arith.constant 0 : index
    %c0_333 = arith.constant 0 : index
    %397 = vector.load %arg11[%c1_331, %c0_332, %c0_333] : memref<9x32x32xf32, #tpu.memory_space<vmem>>, vector<1x32x32xf32>
    %398 = vector.shape_cast %397 : vector<1x32x32xf32> to vector<32x32xf32>
    %cst_334 = arith.constant dense<0.000000e+00> : vector<32x16xf32>
    %399 = tpu.matmul %398, %393, %cst_334 {dimension_numbers = #tpu.dot_dimension_numbers<[1], [0], [0], [1], [0, 0, 1, 1], [], []>} : vector<32x32xf32>, vector<32x16xf32>, vector<32x16xf32> -> vector<32x16xf32>
    %c2_335 = arith.constant 2 : index
    %c0_336 = arith.constant 0 : index
    %c0_337 = arith.constant 0 : index
    %400 = vector.load %arg11[%c2_335, %c0_336, %c0_337] : memref<9x32x32xf32, #tpu.memory_space<vmem>>, vector<1x32x32xf32>
    %401 = vector.shape_cast %400 : vector<1x32x32xf32> to vector<32x32xf32>
    %cst_338 = arith.constant dense<0.000000e+00> : vector<32x16xf32>
    %402 = tpu.matmul %401, %393, %cst_338 {dimension_numbers = #tpu.dot_dimension_numbers<[1], [0], [0], [1], [0, 0, 1, 1], [], []>} : vector<32x32xf32>, vector<32x16xf32>, vector<32x16xf32> -> vector<32x16xf32>
    %c3_339 = arith.constant 3 : index
    %c0_340 = arith.constant 0 : index
    %c0_341 = arith.constant 0 : index
    %403 = vector.load %arg11[%c3_339, %c0_340, %c0_341] : memref<9x32x32xf32, #tpu.memory_space<vmem>>, vector<1x32x32xf32>
    %404 = vector.shape_cast %403 : vector<1x32x32xf32> to vector<32x32xf32>
    %cst_342 = arith.constant dense<0.000000e+00> : vector<32x16xf32>
    %405 = tpu.matmul %404, %393, %cst_342 {dimension_numbers = #tpu.dot_dimension_numbers<[1], [0], [0], [1], [0, 0, 1, 1], [], []>} : vector<32x32xf32>, vector<32x16xf32>, vector<32x16xf32> -> vector<32x16xf32>
    %c4_343 = arith.constant 4 : index
    %c0_344 = arith.constant 0 : index
    %c0_345 = arith.constant 0 : index
    %406 = vector.load %arg11[%c4_343, %c0_344, %c0_345] : memref<9x32x32xf32, #tpu.memory_space<vmem>>, vector<1x32x32xf32>
    %407 = vector.shape_cast %406 : vector<1x32x32xf32> to vector<32x32xf32>
    %cst_346 = arith.constant dense<0.000000e+00> : vector<32x16xf32>
    %408 = tpu.matmul %407, %393, %cst_346 {dimension_numbers = #tpu.dot_dimension_numbers<[1], [0], [0], [1], [0, 0, 1, 1], [], []>} : vector<32x32xf32>, vector<32x16xf32>, vector<32x16xf32> -> vector<32x16xf32>
    %c5_347 = arith.constant 5 : index
    %c0_348 = arith.constant 0 : index
    %c0_349 = arith.constant 0 : index
    %409 = vector.load %arg11[%c5_347, %c0_348, %c0_349] : memref<9x32x32xf32, #tpu.memory_space<vmem>>, vector<1x32x32xf32>
    %410 = vector.shape_cast %409 : vector<1x32x32xf32> to vector<32x32xf32>
    %cst_350 = arith.constant dense<0.000000e+00> : vector<32x16xf32>
    %411 = tpu.matmul %410, %393, %cst_350 {dimension_numbers = #tpu.dot_dimension_numbers<[1], [0], [0], [1], [0, 0, 1, 1], [], []>} : vector<32x32xf32>, vector<32x16xf32>, vector<32x16xf32> -> vector<32x16xf32>
    %c6_351 = arith.constant 6 : index
    %c0_352 = arith.constant 0 : index
    %c0_353 = arith.constant 0 : index
    %412 = vector.load %arg11[%c6_351, %c0_352, %c0_353] : memref<9x32x32xf32, #tpu.memory_space<vmem>>, vector<1x32x32xf32>
    %413 = vector.shape_cast %412 : vector<1x32x32xf32> to vector<32x32xf32>
    %cst_354 = arith.constant dense<0.000000e+00> : vector<32x16xf32>
    %414 = tpu.matmul %413, %393, %cst_354 {dimension_numbers = #tpu.dot_dimension_numbers<[1], [0], [0], [1], [0, 0, 1, 1], [], []>} : vector<32x32xf32>, vector<32x16xf32>, vector<32x16xf32> -> vector<32x16xf32>
    %c7_355 = arith.constant 7 : index
    %c0_356 = arith.constant 0 : index
    %c0_357 = arith.constant 0 : index
    %415 = vector.load %arg11[%c7_355, %c0_356, %c0_357] : memref<9x32x32xf32, #tpu.memory_space<vmem>>, vector<1x32x32xf32>
    %416 = vector.shape_cast %415 : vector<1x32x32xf32> to vector<32x32xf32>
    %cst_358 = arith.constant dense<0.000000e+00> : vector<32x16xf32>
    %417 = tpu.matmul %416, %393, %cst_358 {dimension_numbers = #tpu.dot_dimension_numbers<[1], [0], [0], [1], [0, 0, 1, 1], [], []>} : vector<32x32xf32>, vector<32x16xf32>, vector<32x16xf32> -> vector<32x16xf32>
    %c8_359 = arith.constant 8 : index
    %c0_360 = arith.constant 0 : index
    %c0_361 = arith.constant 0 : index
    %418 = vector.load %arg11[%c8_359, %c0_360, %c0_361] : memref<9x32x32xf32, #tpu.memory_space<vmem>>, vector<1x32x32xf32>
    %419 = vector.shape_cast %418 : vector<1x32x32xf32> to vector<32x32xf32>
    %cst_362 = arith.constant dense<0.000000e+00> : vector<32x16xf32>
    %420 = tpu.matmul %419, %393, %cst_362 {dimension_numbers = #tpu.dot_dimension_numbers<[1], [0], [0], [1], [0, 0, 1, 1], [], []>} : vector<32x32xf32>, vector<32x16xf32>, vector<32x16xf32> -> vector<32x16xf32>
    %421 = tpu.concatenate %396, %399, %402, %405, %408, %411, %414, %417, %420 in 1 : vector<32x16xf32>, vector<32x16xf32>, vector<32x16xf32>, vector<32x16xf32>, vector<32x16xf32>, vector<32x16xf32>, vector<32x16xf32>, vector<32x16xf32>, vector<32x16xf32> -> vector<32x144xf32>
    %c0_363 = arith.constant 0 : index
    %c0_364 = arith.constant 0 : index
    %c0_365 = arith.constant 0 : index
    %422 = vector.load %arg13[%c0_363, %c0_364, %c0_365] : memref<4x128x32xf32, #tpu.memory_space<vmem>>, vector<1x128x32xf32>
    %423 = vector.shape_cast %422 : vector<1x128x32xf32> to vector<128x32xf32>
    %c0_366 = arith.constant 0 : index
    %c0_367 = arith.constant 0 : index
    %c0_368 = arith.constant 0 : index
    %424 = vector.load %arg5[%c0_366, %c0_367, %c0_368] : memref<4x144x16xf32, #tpu.memory_space<vmem>>, vector<1x144x16xf32>
    %425 = vector.shape_cast %424 : vector<1x144x16xf32> to vector<144x16xf32>
    %cst_369 = arith.constant dense<0.000000e+00> : vector<32x16xf32>
    %426 = tpu.matmul %421, %425, %cst_369 {dimension_numbers = #tpu.dot_dimension_numbers<[1], [0], [0], [1], [0, 0, 1, 1], [], []>} : vector<32x144xf32>, vector<144x16xf32>, vector<32x16xf32> -> vector<32x16xf32>
    %cst_370 = arith.constant dense<0.000000e+00> : vector<128x16xf32>
    %427 = tpu.matmul %423, %426, %cst_370 {dimension_numbers = #tpu.dot_dimension_numbers<[1], [0], [0], [1], [0, 0, 1, 1], [], []>} : vector<128x32xf32>, vector<32x16xf32>, vector<128x16xf32> -> vector<128x16xf32>
    %c1_371 = arith.constant 1 : index
    %c0_372 = arith.constant 0 : index
    %c0_373 = arith.constant 0 : index
    %428 = vector.load %arg13[%c1_371, %c0_372, %c0_373] : memref<4x128x32xf32, #tpu.memory_space<vmem>>, vector<1x128x32xf32>
    %429 = vector.shape_cast %428 : vector<1x128x32xf32> to vector<128x32xf32>
    %c1_374 = arith.constant 1 : index
    %c0_375 = arith.constant 0 : index
    %c0_376 = arith.constant 0 : index
    %430 = vector.load %arg5[%c1_374, %c0_375, %c0_376] : memref<4x144x16xf32, #tpu.memory_space<vmem>>, vector<1x144x16xf32>
    %431 = vector.shape_cast %430 : vector<1x144x16xf32> to vector<144x16xf32>
    %cst_377 = arith.constant dense<0.000000e+00> : vector<32x16xf32>
    %432 = tpu.matmul %421, %431, %cst_377 {dimension_numbers = #tpu.dot_dimension_numbers<[1], [0], [0], [1], [0, 0, 1, 1], [], []>} : vector<32x144xf32>, vector<144x16xf32>, vector<32x16xf32> -> vector<32x16xf32>
    %cst_378 = arith.constant dense<0.000000e+00> : vector<128x16xf32>
    %433 = tpu.matmul %429, %432, %cst_378 {dimension_numbers = #tpu.dot_dimension_numbers<[1], [0], [0], [1], [0, 0, 1, 1], [], []>} : vector<128x32xf32>, vector<32x16xf32>, vector<128x16xf32> -> vector<128x16xf32>
    %434 = arith.addf %427, %433 : vector<128x16xf32>
    %c2_379 = arith.constant 2 : index
    %c0_380 = arith.constant 0 : index
    %c0_381 = arith.constant 0 : index
    %435 = vector.load %arg13[%c2_379, %c0_380, %c0_381] : memref<4x128x32xf32, #tpu.memory_space<vmem>>, vector<1x128x32xf32>
    %436 = vector.shape_cast %435 : vector<1x128x32xf32> to vector<128x32xf32>
    %c2_382 = arith.constant 2 : index
    %c0_383 = arith.constant 0 : index
    %c0_384 = arith.constant 0 : index
    %437 = vector.load %arg5[%c2_382, %c0_383, %c0_384] : memref<4x144x16xf32, #tpu.memory_space<vmem>>, vector<1x144x16xf32>
    %438 = vector.shape_cast %437 : vector<1x144x16xf32> to vector<144x16xf32>
    %cst_385 = arith.constant dense<0.000000e+00> : vector<32x16xf32>
    %439 = tpu.matmul %421, %438, %cst_385 {dimension_numbers = #tpu.dot_dimension_numbers<[1], [0], [0], [1], [0, 0, 1, 1], [], []>} : vector<32x144xf32>, vector<144x16xf32>, vector<32x16xf32> -> vector<32x16xf32>
    %cst_386 = arith.constant dense<0.000000e+00> : vector<128x16xf32>
    %440 = tpu.matmul %436, %439, %cst_386 {dimension_numbers = #tpu.dot_dimension_numbers<[1], [0], [0], [1], [0, 0, 1, 1], [], []>} : vector<128x32xf32>, vector<32x16xf32>, vector<128x16xf32> -> vector<128x16xf32>
    %441 = arith.addf %434, %440 : vector<128x16xf32>
    %c3_387 = arith.constant 3 : index
    %c0_388 = arith.constant 0 : index
    %c0_389 = arith.constant 0 : index
    %442 = vector.load %arg13[%c3_387, %c0_388, %c0_389] : memref<4x128x32xf32, #tpu.memory_space<vmem>>, vector<1x128x32xf32>
    %443 = vector.shape_cast %442 : vector<1x128x32xf32> to vector<128x32xf32>
    %c3_390 = arith.constant 3 : index
    %c0_391 = arith.constant 0 : index
    %c0_392 = arith.constant 0 : index
    %444 = vector.load %arg5[%c3_390, %c0_391, %c0_392] : memref<4x144x16xf32, #tpu.memory_space<vmem>>, vector<1x144x16xf32>
    %445 = vector.shape_cast %444 : vector<1x144x16xf32> to vector<144x16xf32>
    %cst_393 = arith.constant dense<0.000000e+00> : vector<32x16xf32>
    %446 = tpu.matmul %421, %445, %cst_393 {dimension_numbers = #tpu.dot_dimension_numbers<[1], [0], [0], [1], [0, 0, 1, 1], [], []>} : vector<32x144xf32>, vector<144x16xf32>, vector<32x16xf32> -> vector<32x16xf32>
    %cst_394 = arith.constant dense<0.000000e+00> : vector<128x16xf32>
    %447 = tpu.matmul %443, %446, %cst_394 {dimension_numbers = #tpu.dot_dimension_numbers<[1], [0], [0], [1], [0, 0, 1, 1], [], []>} : vector<128x32xf32>, vector<32x16xf32>, vector<128x16xf32> -> vector<128x16xf32>
    %448 = arith.addf %441, %447 : vector<128x16xf32>
    %c14_395 = arith.constant 14 : index
    %c0_396 = arith.constant 0 : index
    %c0_397 = arith.constant 0 : index
    %449 = vector.load %arg7[%c14_395, %c0_396, %c0_397] : memref<16x1x16xf32, #tpu.memory_space<vmem>>, vector<1x1x16xf32>
    %450 = vector.shape_cast %449 : vector<1x1x16xf32> to vector<1x16xf32>
    %c15_398 = arith.constant 15 : index
    %c0_399 = arith.constant 0 : index
    %c0_400 = arith.constant 0 : index
    %451 = vector.load %arg7[%c15_398, %c0_399, %c0_400] : memref<16x1x16xf32, #tpu.memory_space<vmem>>, vector<1x1x16xf32>
    %452 = vector.shape_cast %451 : vector<1x1x16xf32> to vector<1x16xf32>
    %cst_401 = arith.constant dense<0.000000e+00> : vector<16xf32>
    %453 = vector.multi_reduction <add>, %448, %cst_401 [0] : vector<128x16xf32> to vector<16xf32>
    %454 = vector.shape_cast %453 : vector<16xf32> to vector<1x16xf32>
    %cst_402 = arith.constant 7.812500e-03 : f32
    %455 = vector.broadcast %cst_402 : f32 to vector<1x16xf32>
    %456 = arith.mulf %454, %455 : vector<1x16xf32>
    %457 = vector.broadcast %456 : vector<1x16xf32> to vector<128x16xf32>
    %458 = arith.subf %448, %457 : vector<128x16xf32>
    %459 = arith.mulf %458, %458 : vector<128x16xf32>
    %cst_403 = arith.constant dense<0.000000e+00> : vector<16xf32>
    %460 = vector.multi_reduction <add>, %459, %cst_403 [0] : vector<128x16xf32> to vector<16xf32>
    %461 = vector.shape_cast %460 : vector<16xf32> to vector<1x16xf32>
    %cst_404 = arith.constant 7.812500e-03 : f32
    %462 = vector.broadcast %cst_404 : f32 to vector<1x16xf32>
    %463 = arith.mulf %461, %462 : vector<1x16xf32>
    %cst_405 = arith.constant 9.99999974E-6 : f32
    %464 = vector.broadcast %cst_405 : f32 to vector<1x16xf32>
    %465 = arith.addf %463, %464 : vector<1x16xf32>
    %466 = math.rsqrt %465 : vector<1x16xf32>
    %467 = vector.broadcast %466 : vector<1x16xf32> to vector<128x16xf32>
    %468 = arith.mulf %458, %467 : vector<128x16xf32>
    %469 = vector.broadcast %450 : vector<1x16xf32> to vector<128x16xf32>
    %470 = arith.mulf %468, %469 : vector<128x16xf32>
    %471 = vector.broadcast %452 : vector<1x16xf32> to vector<128x16xf32>
    %472 = arith.addf %470, %471 : vector<128x16xf32>
    %cst_406 = arith.constant 0.000000e+00 : f32
    %473 = vector.broadcast %cst_406 : f32 to vector<128x16xf32>
    %474 = arith.maximumf %472, %473 : vector<128x16xf32>
    %c0_407 = arith.constant 0 : index
    %c0_408 = arith.constant 0 : index
    %c0_409 = arith.constant 0 : index
    %475 = vector.load %arg12[%c0_407, %c0_408, %c0_409] : memref<9x128x128xf32, #tpu.memory_space<vmem>>, vector<1x128x128xf32>
    %476 = vector.shape_cast %475 : vector<1x128x128xf32> to vector<128x128xf32>
    %cst_410 = arith.constant dense<0.000000e+00> : vector<128x16xf32>
    %477 = tpu.matmul %476, %474, %cst_410 {dimension_numbers = #tpu.dot_dimension_numbers<[1], [0], [0], [1], [0, 0, 1, 1], [], []>} : vector<128x128xf32>, vector<128x16xf32>, vector<128x16xf32> -> vector<128x16xf32>
    %c1_411 = arith.constant 1 : index
    %c0_412 = arith.constant 0 : index
    %c0_413 = arith.constant 0 : index
    %478 = vector.load %arg12[%c1_411, %c0_412, %c0_413] : memref<9x128x128xf32, #tpu.memory_space<vmem>>, vector<1x128x128xf32>
    %479 = vector.shape_cast %478 : vector<1x128x128xf32> to vector<128x128xf32>
    %cst_414 = arith.constant dense<0.000000e+00> : vector<128x16xf32>
    %480 = tpu.matmul %479, %474, %cst_414 {dimension_numbers = #tpu.dot_dimension_numbers<[1], [0], [0], [1], [0, 0, 1, 1], [], []>} : vector<128x128xf32>, vector<128x16xf32>, vector<128x16xf32> -> vector<128x16xf32>
    %c2_415 = arith.constant 2 : index
    %c0_416 = arith.constant 0 : index
    %c0_417 = arith.constant 0 : index
    %481 = vector.load %arg12[%c2_415, %c0_416, %c0_417] : memref<9x128x128xf32, #tpu.memory_space<vmem>>, vector<1x128x128xf32>
    %482 = vector.shape_cast %481 : vector<1x128x128xf32> to vector<128x128xf32>
    %cst_418 = arith.constant dense<0.000000e+00> : vector<128x16xf32>
    %483 = tpu.matmul %482, %474, %cst_418 {dimension_numbers = #tpu.dot_dimension_numbers<[1], [0], [0], [1], [0, 0, 1, 1], [], []>} : vector<128x128xf32>, vector<128x16xf32>, vector<128x16xf32> -> vector<128x16xf32>
    %c3_419 = arith.constant 3 : index
    %c0_420 = arith.constant 0 : index
    %c0_421 = arith.constant 0 : index
    %484 = vector.load %arg12[%c3_419, %c0_420, %c0_421] : memref<9x128x128xf32, #tpu.memory_space<vmem>>, vector<1x128x128xf32>
    %485 = vector.shape_cast %484 : vector<1x128x128xf32> to vector<128x128xf32>
    %cst_422 = arith.constant dense<0.000000e+00> : vector<128x16xf32>
    %486 = tpu.matmul %485, %474, %cst_422 {dimension_numbers = #tpu.dot_dimension_numbers<[1], [0], [0], [1], [0, 0, 1, 1], [], []>} : vector<128x128xf32>, vector<128x16xf32>, vector<128x16xf32> -> vector<128x16xf32>
    %c4_423 = arith.constant 4 : index
    %c0_424 = arith.constant 0 : index
    %c0_425 = arith.constant 0 : index
    %487 = vector.load %arg12[%c4_423, %c0_424, %c0_425] : memref<9x128x128xf32, #tpu.memory_space<vmem>>, vector<1x128x128xf32>
    %488 = vector.shape_cast %487 : vector<1x128x128xf32> to vector<128x128xf32>
    %cst_426 = arith.constant dense<0.000000e+00> : vector<128x16xf32>
    %489 = tpu.matmul %488, %474, %cst_426 {dimension_numbers = #tpu.dot_dimension_numbers<[1], [0], [0], [1], [0, 0, 1, 1], [], []>} : vector<128x128xf32>, vector<128x16xf32>, vector<128x16xf32> -> vector<128x16xf32>
    %c5_427 = arith.constant 5 : index
    %c0_428 = arith.constant 0 : index
    %c0_429 = arith.constant 0 : index
    %490 = vector.load %arg12[%c5_427, %c0_428, %c0_429] : memref<9x128x128xf32, #tpu.memory_space<vmem>>, vector<1x128x128xf32>
    %491 = vector.shape_cast %490 : vector<1x128x128xf32> to vector<128x128xf32>
    %cst_430 = arith.constant dense<0.000000e+00> : vector<128x16xf32>
    %492 = tpu.matmul %491, %474, %cst_430 {dimension_numbers = #tpu.dot_dimension_numbers<[1], [0], [0], [1], [0, 0, 1, 1], [], []>} : vector<128x128xf32>, vector<128x16xf32>, vector<128x16xf32> -> vector<128x16xf32>
    %c6_431 = arith.constant 6 : index
    %c0_432 = arith.constant 0 : index
    %c0_433 = arith.constant 0 : index
    %493 = vector.load %arg12[%c6_431, %c0_432, %c0_433] : memref<9x128x128xf32, #tpu.memory_space<vmem>>, vector<1x128x128xf32>
    %494 = vector.shape_cast %493 : vector<1x128x128xf32> to vector<128x128xf32>
    %cst_434 = arith.constant dense<0.000000e+00> : vector<128x16xf32>
    %495 = tpu.matmul %494, %474, %cst_434 {dimension_numbers = #tpu.dot_dimension_numbers<[1], [0], [0], [1], [0, 0, 1, 1], [], []>} : vector<128x128xf32>, vector<128x16xf32>, vector<128x16xf32> -> vector<128x16xf32>
    %c7_435 = arith.constant 7 : index
    %c0_436 = arith.constant 0 : index
    %c0_437 = arith.constant 0 : index
    %496 = vector.load %arg12[%c7_435, %c0_436, %c0_437] : memref<9x128x128xf32, #tpu.memory_space<vmem>>, vector<1x128x128xf32>
    %497 = vector.shape_cast %496 : vector<1x128x128xf32> to vector<128x128xf32>
    %cst_438 = arith.constant dense<0.000000e+00> : vector<128x16xf32>
    %498 = tpu.matmul %497, %474, %cst_438 {dimension_numbers = #tpu.dot_dimension_numbers<[1], [0], [0], [1], [0, 0, 1, 1], [], []>} : vector<128x128xf32>, vector<128x16xf32>, vector<128x16xf32> -> vector<128x16xf32>
    %c8_439 = arith.constant 8 : index
    %c0_440 = arith.constant 0 : index
    %c0_441 = arith.constant 0 : index
    %499 = vector.load %arg12[%c8_439, %c0_440, %c0_441] : memref<9x128x128xf32, #tpu.memory_space<vmem>>, vector<1x128x128xf32>
    %500 = vector.shape_cast %499 : vector<1x128x128xf32> to vector<128x128xf32>
    %cst_442 = arith.constant dense<0.000000e+00> : vector<128x16xf32>
    %501 = tpu.matmul %500, %474, %cst_442 {dimension_numbers = #tpu.dot_dimension_numbers<[1], [0], [0], [1], [0, 0, 1, 1], [], []>} : vector<128x128xf32>, vector<128x16xf32>, vector<128x16xf32> -> vector<128x16xf32>
    %502 = tpu.concatenate %477, %480, %483, %486, %489, %492, %495, %498, %501 in 1 : vector<128x16xf32>, vector<128x16xf32>, vector<128x16xf32>, vector<128x16xf32>, vector<128x16xf32>, vector<128x16xf32>, vector<128x16xf32>, vector<128x16xf32>, vector<128x16xf32> -> vector<128x144xf32>
    %c0_443 = arith.constant 0 : index
    %c0_444 = arith.constant 0 : index
    %503 = vector.load %arg9[%c0_443, %c0_444] : memref<1x3xf32, #tpu.memory_space<vmem>>, vector<1x3xf32>
    %c0_445 = arith.constant 0 : index
    %c0_446 = arith.constant 0 : index
    %c0_447 = arith.constant 0 : index
    %504 = vector.load %arg6[%c0_445, %c0_446, %c0_447] : memref<4x144x3xf32, #tpu.memory_space<vmem>>, vector<1x144x3xf32>
    %505 = vector.shape_cast %504 : vector<1x144x3xf32> to vector<144x3xf32>
    %cst_448 = arith.constant dense<0.000000e+00> : vector<128x3xf32>
    %506 = tpu.matmul %502, %505, %cst_448 {dimension_numbers = #tpu.dot_dimension_numbers<[1], [0], [0], [1], [0, 0, 1, 1], [], []>} : vector<128x144xf32>, vector<144x3xf32>, vector<128x3xf32> -> vector<128x3xf32>
    %507 = vector.broadcast %503 : vector<1x3xf32> to vector<128x3xf32>
    %508 = arith.addf %506, %507 : vector<128x3xf32>
    %509 = math.tanh %508 : vector<128x3xf32>
    %c1_449 = arith.constant 1 : index
    %c0_450 = arith.constant 0 : index
    %c0_451 = arith.constant 0 : index
    %510 = vector.load %arg6[%c1_449, %c0_450, %c0_451] : memref<4x144x3xf32, #tpu.memory_space<vmem>>, vector<1x144x3xf32>
    %511 = vector.shape_cast %510 : vector<1x144x3xf32> to vector<144x3xf32>
    %cst_452 = arith.constant dense<0.000000e+00> : vector<128x3xf32>
    %512 = tpu.matmul %502, %511, %cst_452 {dimension_numbers = #tpu.dot_dimension_numbers<[1], [0], [0], [1], [0, 0, 1, 1], [], []>} : vector<128x144xf32>, vector<144x3xf32>, vector<128x3xf32> -> vector<128x3xf32>
    %513 = vector.broadcast %503 : vector<1x3xf32> to vector<128x3xf32>
    %514 = arith.addf %512, %513 : vector<128x3xf32>
    %515 = math.tanh %514 : vector<128x3xf32>
    %c2_453 = arith.constant 2 : index
    %c0_454 = arith.constant 0 : index
    %c0_455 = arith.constant 0 : index
    %516 = vector.load %arg6[%c2_453, %c0_454, %c0_455] : memref<4x144x3xf32, #tpu.memory_space<vmem>>, vector<1x144x3xf32>
    %517 = vector.shape_cast %516 : vector<1x144x3xf32> to vector<144x3xf32>
    %cst_456 = arith.constant dense<0.000000e+00> : vector<128x3xf32>
    %518 = tpu.matmul %502, %517, %cst_456 {dimension_numbers = #tpu.dot_dimension_numbers<[1], [0], [0], [1], [0, 0, 1, 1], [], []>} : vector<128x144xf32>, vector<144x3xf32>, vector<128x3xf32> -> vector<128x3xf32>
    %519 = vector.broadcast %503 : vector<1x3xf32> to vector<128x3xf32>
    %520 = arith.addf %518, %519 : vector<128x3xf32>
    %521 = math.tanh %520 : vector<128x3xf32>
    %c3_457 = arith.constant 3 : index
    %c0_458 = arith.constant 0 : index
    %c0_459 = arith.constant 0 : index
    %522 = vector.load %arg6[%c3_457, %c0_458, %c0_459] : memref<4x144x3xf32, #tpu.memory_space<vmem>>, vector<1x144x3xf32>
    %523 = vector.shape_cast %522 : vector<1x144x3xf32> to vector<144x3xf32>
    %cst_460 = arith.constant dense<0.000000e+00> : vector<128x3xf32>
    %524 = tpu.matmul %502, %523, %cst_460 {dimension_numbers = #tpu.dot_dimension_numbers<[1], [0], [0], [1], [0, 0, 1, 1], [], []>} : vector<128x144xf32>, vector<144x3xf32>, vector<128x3xf32> -> vector<128x3xf32>
    %525 = vector.broadcast %503 : vector<1x3xf32> to vector<128x3xf32>
    %526 = arith.addf %524, %525 : vector<128x3xf32>
    %527 = math.tanh %526 : vector<128x3xf32>
    %528 = tpu.concatenate %509, %515, %521, %527 in 1 : vector<128x3xf32>, vector<128x3xf32>, vector<128x3xf32>, vector<128x3xf32> -> vector<128x12xf32>
    %c0_461 = arith.constant 0 : index
    %c0_462 = arith.constant 0 : index
    %529 = vector.load %arg14[%c0_461, %c0_462] : memref<128x12xf32, #tpu.memory_space<vmem>>, vector<128x12xf32>
    tpu.vector_store %arg14[%c0_461, %c0_462], %528 {strides = array<i32>} : memref<128x12xf32, #tpu.memory_space<vmem>>, vector<128x12xf32>,
    return
  }
}

</mosaic_0001>

<bundles_post_ra>
// kernel: cae_forward.1
= control target key start
LH: loop header
LB: loop body
LE: loop exit
PB: predicated region body
PF: predicated region fallthrough
CT: control target
= control target key end

     0   :  { %vm69_vm0 = vcmask 392192   ;;  %vm186_vm1 = vcmask 130048   ;;  %s9560_s28 = smov 64   ;;  %s9562_s29 = smov 32   ;;  %vm1147_vm5 = vcmask 261120   ;;  %vm1156_vm6 = vcmask 523264   ;;  %s14866_s1 = inlined_call_operand.vmem [shape: f32[48,16], index: 1, kind: input, shape index: {}]   ;;  %s14867_s0 = inlined_call_operand.vmem [shape: f32[128,48], index: 0, kind: input, shape index: {}]   ;;  %s14868_s7 = inlined_call_operand.vmem [shape: f32[16,1,16], index: 7, kind: input, shape index: {}]   ;;  %s14869_s10 = inlined_call_operand.vmem [shape: f32[16,32,128], index: 10, kind: input, shape index: {}]   ;;  %s14870_s2 = inlined_call_operand.vmem [shape: f32[256,16], index: 2, kind: input, shape index: {}]   ;;  %s14871_s11 = inlined_call_operand.vmem [shape: f32[9,32,32], index: 11, kind: input, shape index: {}]   ;;  %s14872_s3 = inlined_call_operand.vmem [shape: f32[4,144,16], index: 3, kind: input, shape index: {}]   ;;  %s14873_s4 = inlined_call_operand.vmem [shape: f32[4,16,16], index: 4, kind: input, shape index: {}]   ;;  %s14874_s8 = inlined_call_operand.vmem [shape: f32[4,1,16], index: 8, kind: input, shape index: {}]   ;;  %s14875_s5 = inlined_call_operand.vmem [shape: f32[4,144,16], index: 5, kind: input, shape index: {}]   ;;  %s14876_s13 = inlined_call_operand.vmem [shape: f32[4,128,32], index: 13, kind: input, shape index: {}]   ;;  %s14877_s12 = inlined_call_operand.vmem [shape: f32[9,128,128], index: 12, kind: input, shape index: {}]   ;;  %s14878_s6 = inlined_call_operand.vmem [shape: f32[4,144,3], index: 6, kind: input, shape index: {}]   ;;  %s14879_s9 = inlined_call_operand.vmem [shape: f32[1,3], index: 9, kind: input, shape index: {}]   ;;  %s14880_s14 = inlined_call_operand.vmem [shape: f32[128,12], index: 14, kind: output, shape index: {}]  }
   0x1   :  { %v68_v0 = vld [vmem:[%s14866_s1 + $0x28] sm:$0xff]  ;;  %v67_v1 = vld [vmem:[%s14866_s1 + $0x20] sm:$0xff]  ;;  %v66_v2 = vld [vmem:[%s14866_s1 + $0x18] sm:$0xff]  ;;  %s9563_s30 = smov 48   ;;  %s9565_s15 = smov 112   ;;  %vm1161_vm7 = vcmask 654336  }
   0x2   :  { %128 = vmatpush.msra.mxu0 %v68_v0  ;;  %v65_v3 = vld [vmem:[%s14866_s1 + $0x10] sm:$0xff]  ;;  %v64_v4 = vld [vmem:[%s14866_s1 + $0x8] sm:$0xff]  ;;  %v63_v5 = vld [vmem:[%s14866_s1] sm:$0xff]  ;;  %s9564_s1 = smov 80   ;;  %s9566_s16 = smov 96   ;;  %vm1166_vm8 = vcmask 785408  }
   0x3   :  { %v47_v6 = vld [vmem:[%s14867_s0] sm:$0xff]  ;;  %v48_v7 = vld [vmem:[%s14867_s0 + $0x8] sm:$0xff]  ;;  %v49_v8 = vld [vmem:[%s14867_s0 + $0x10] sm:$0xff]  ;;  %vm1171_vm9 = vcmask 916480   ;;  %s9567_s22 = smov 3   ;;  %s9569_s23 = smov 9  }
   0x4   :  { %129 = vmatpush.msra.mxu0 %v67_v1  ;;  %v50_v9 = vld [vmem:[%s14867_s0 + $0x18] sm:$0xff]  ;;  %v51_v10 = vld [vmem:[%s14867_s0 + $0x20] sm:$0xff]  ;;  %v52_v11 = vld [vmem:[%s14867_s0 + $0x28] sm:$0xff] }
   0x5   :  { %v53_v12 = vld [vmem:[%s14867_s0 + $0x30] sm:$0xff]  ;;  %v54_v13 = vld [vmem:[%s14867_s0 + $0x38] sm:$0xff]  ;;  %v55_v14 = vld [vmem:[%s14867_s0 + $0x40] sm:$0xff] }
   0x6   :  { %130 = vmatpush.msra.mxu0 %v66_v2  ;;  %v56_v15 = vld [vmem:[%s14867_s0 + $0x48] sm:$0xff]  ;;  %v57_v16 = vld [vmem:[%s14867_s0 + $0x50] sm:$0xff]  ;;  %v58_v17 = vld [vmem:[%s14867_s0 + $0x58] sm:$0xff] }
   0x7   :  { %v59_v18 = vld [vmem:[%s14867_s0 + $0x60] sm:$0xff]  ;;  %v60_v19 = vld [vmem:[%s14867_s0 + $0x68] sm:$0xff]  ;;  %v61_v20 = vld [vmem:[%s14867_s0 + $0x70] sm:$0xff] }
   0x8   :  { %131 = vmatpush.msra.mxu0 %v65_v3  ;;  %v62_v21 = vld [vmem:[%s14867_s0 + $0x78] sm:$0xff]  ;;  %s9568_s0 = smov 6  }
   0xa   :  { %132 = vmatpush.msra.mxu0 %v64_v4 }
   0xc   :  { %133 = vmatpush.msra.mxu0 %v63_v5 }
   0xd   :  { %7796 = vmatmul.msk.f32.vlgmr.msra.gmra.mxu0 %vm69_vm0, %v47_v6 }
  0x15   :  { %7797 = vmatmul.msk.f32.gmra.mxu0 %vm69_vm0, %v48_v7 }
  0x1d   :  { %7798 = vmatmul.msk.f32.gmra.mxu0 %vm69_vm0, %v49_v8 }
  0x25   :  { %7799 = vmatmul.msk.f32.gmra.mxu0 %vm69_vm0, %v50_v9 }
  0x2d   :  { %7800 = vmatmul.msk.f32.gmra.mxu0 %vm69_vm0, %v51_v10 }
  0x35   :  { %7801 = vmatmul.msk.f32.gmra.mxu0 %vm69_vm0, %v52_v11 }
  0x3d   :  { %7802 = vmatmul.msk.f32.gmra.mxu0 %vm69_vm0, %v53_v12 }
  0x45   :  { %7803 = vmatmul.msk.f32.gmra.mxu0 %vm69_vm0, %v54_v13 }
  0x4d   :  { %7804 = vmatmul.msk.f32.gmra.mxu0 %vm69_vm0, %v55_v14 }
  0x55   :  { %7805 = vmatmul.msk.f32.gmra.mxu0 %vm69_vm0, %v56_v15 }
  0x5d   :  { %7806 = vmatmul.msk.f32.gmra.mxu0 %vm69_vm0, %v57_v16 }
  0x65   :  { %7807 = vmatmul.msk.f32.gmra.mxu0 %vm69_vm0, %v58_v17 }
  0x6d   :  { %7808 = vmatmul.msk.f32.gmra.mxu0 %vm69_vm0, %v59_v18 }
  0x75   :  { %7809 = vmatmul.msk.f32.gmra.mxu0 %vm69_vm0, %v60_v19 }
  0x7d   :  { %7810 = vmatmul.msk.f32.gmra.mxu0 %vm69_vm0, %v61_v20 }
  0x85   :  { %7811 = vmatmul.msk.f32.gmra.mxu0 %vm69_vm0, %v62_v21 }
  0x8a   :  { %v135_v22 = vpop.f32.mrf.mxu0 }
  0x8b   :  { %v187_v35 = vsel %vm186_vm1, %v135_v22, 0.0 }
  0x92   :  { %v138_v23 = vpop.f32.mrf.mxu0 }
  0x93   :  { %v188_v34 = vsel %vm186_vm1, %v138_v23, 0.0 }
  0x94   :  { %v189_v37 = vadd.f32 %v188_v34, %v187_v35 }
  0x9a   :  { %v141_v24 = vpop.f32.mrf.mxu0 }
  0x9b   :  { %v190_v36 = vsel %vm186_vm1, %v141_v24, 0.0 }
  0x9c   :  { %v191_v39 = vadd.f32 %v190_v36, %v189_v37 }
  0xa2   :  { %v144_v25 = vpop.f32.mrf.mxu0 }
  0xa3   :  { %v192_v38 = vsel %vm186_vm1, %v144_v25, 0.0 }
  0xa4   :  { %v193_v42 = vadd.f32 %v192_v38, %v191_v39 }
  0xaa   :  { %v147_v26 = vpop.f32.mrf.mxu0 }
  0xab   :  { %v194_v41 = vsel %vm186_vm1, %v147_v26, 0.0 }
  0xac   :  { %v195_v44 = vadd.f32 %v194_v41, %v193_v42 }
  0xb2   :  { %v150_v27 = vpop.f32.mrf.mxu0 }
  0xb3   :  { %v196_v43 = vsel %vm186_vm1, %v150_v27, 0.0 }
  0xb4   :  { %v197_v46 = vadd.f32 %v196_v43, %v195_v44 }
  0xba   :  { %v153_v28 = vpop.f32.mrf.mxu0 }
  0xbb   :  { %v198_v45 = vsel %vm186_vm1, %v153_v28, 0.0 }
  0xbc   :  { %v199_v48 = vadd.f32 %v198_v45, %v197_v46 }
  0xc2   :  { %v9727_v29 = vpop.f32.mrf.mxu0 }
  0xc3   :  { %v200_v47 = vsel %vm186_vm1, %v9727_v29, 0.0 }
  0xc4   :  { %v201_v51 = vadd.f32 %v200_v47, %v199_v48 }
  0xca   :  { %v9729_v30 = vpop.f32.mrf.mxu0 }
  0xcb   :  { %v202_v50 = vsel %vm186_vm1, %v9729_v30, 0.0 }
  0xcc   :  { %v203_v53 = vadd.f32 %v202_v50, %v201_v51 }
  0xd2   :  { %v9731_v31 = vpop.f32.mrf.mxu0 }
  0xd3   :  { %v204_v52 = vsel %vm186_vm1, %v9731_v31, 0.0 }
  0xd4   :  { %v205_v55 = vadd.f32 %v204_v52, %v203_v53 }
  0xda   :  { %v9733_v32 = vpop.f32.mrf.mxu0 }
  0xdb   :  { %v206_v54 = vsel %vm186_vm1, %v9733_v32, 0.0 }
  0xdc   :  { %v207_v57 = vadd.f32 %v206_v54, %v205_v55 }
  0xe2   :  { %v9735_v33 = vpop.f32.mrf.mxu0 }
  0xe3   :  { %v208_v56 = vsel %vm186_vm1, %v9735_v33, 0.0 }
  0xe4   :  { %v209_v60 = vadd.f32 %v208_v56, %v207_v57 }
  0xea   :  { %v9741_v40 = vpop.f32.mrf.mxu0 }
  0xeb   :  { %v210_v59 = vsel %vm186_vm1, %v9741_v40, 0.0 }
  0xec   :  { %v211_v62 = vadd.f32 %v210_v59, %v209_v60 }
  0xf2   :  { %v9748_v49 = vpop.f32.mrf.mxu0 }
  0xf3   :  { %v212_v61 = vsel %vm186_vm1, %v9748_v49, 0.0 }
  0xf4   :  { %v213_v0 = vadd.f32 %v212_v61, %v211_v62 }
  0xfa   :  { %v9758_v58 = vpop.f32.mrf.mxu0 }
  0xfb   :  { %v214_v63 = vsel %vm186_vm1, %v9758_v58, 0.0 }
  0xfc   :  { %v215_v1 = vadd.f32 %v214_v63, %v213_v0 }
 0x102   :  { %v180_v2 = vpop.f32.mrf.mxu0 }
 0x103   :  { %v216_v3 = vsel %vm186_vm1, %v180_v2, 0.0 }
 0x104   :  { %v217_v4 = vadd.f32 %v216_v3, %v215_v1 }
 0x106   :  { %v218_v5 = vrot.slane %v217_v4, 4 }
 0x108   :  { %v219_v6 = vadd.f32 %v218_v5, %v217_v4 }
 0x10a   :  { %v220_v7 = vrot.slane %v219_v6, 2 }
 0x10c   :  { %v221_v8 = vadd.f32 %v220_v7, %v219_v6 }
 0x10e   :  { %v222_v9 = vrot.slane %v221_v8, 1 }
 0x110   :  { %v223_v10 = vadd.f32 %v222_v9, %v221_v8 }
 0x112   :  { %v224_v11 = vmul.f32 0.0078125, %v223_v10 }
 0x114   :  { %v9767_v12 = vsub.f32 %v135_v22, %v224_v11  ;;  %v9769_v13 = vsub.f32 %v138_v23, %v224_v11  ;;  %v9771_v14 = vsub.f32 %v141_v24, %v224_v11  ;;  %v9773_v15 = vsub.f32 %v144_v25, %v224_v11 }
 0x115   :  { %v9779_v18 = vsub.f32 %v147_v26, %v224_v11  ;;  %v9783_v20 = vsub.f32 %v150_v27, %v224_v11  ;;  %v9789_v25 = vsub.f32 %v153_v28, %v224_v11  ;;  %v9795_v36 = vsub.f32 %v9727_v29, %v224_v11 }
 0x116   :  { %v241_v16 = vmul.f32 %v9767_v12, %v9767_v12  ;;  %v242_v17 = vmul.f32 %v9769_v13, %v9769_v13  ;;  %v243_v19 = vmul.f32 %v9771_v14, %v9771_v14  ;;  %v244_v21 = vmul.f32 %v9773_v15, %v9773_v15 }
 0x117   :  { %v245_v34 = vmul.f32 %v9779_v18, %v9779_v18  ;;  %v246_v27 = vmul.f32 %v9783_v20, %v9783_v20  ;;  %v9801_v39 = vsub.f32 %v9729_v30, %v224_v11  ;;  %v247_v28 = vmul.f32 %v9789_v25, %v9789_v25 }
 0x118   :  { %v257_v22 = vsel %vm186_vm1, %v241_v16, 0.0  ;;  %v258_v23 = vsel %vm186_vm1, %v242_v17, 0.0  ;;  %v260_v26 = vsel %vm186_vm1, %v243_v19, 0.0  ;;  %v262_v37 = vsel %vm186_vm1, %v244_v21, 0.0 }
 0x119   :  { %v259_v24 = vadd.f32 %v258_v23, %v257_v22  ;;  %v264_v41 = vsel %vm186_vm1, %v245_v34, 0.0  ;;  %v9807_v43 = vsub.f32 %v9731_v31, %v224_v11  ;;  %v248_v29 = vmul.f32 %v9795_v36, %v9795_v36 }
 0x11a   :  { %v266_v44 = vsel %vm186_vm1, %v246_v27, 0.0  ;;  %v9813_v46 = vsub.f32 %v9733_v32, %v224_v11  ;;  %v249_v30 = vmul.f32 %v9801_v39, %v9801_v39  ;;  %v268_v47 = vsel %vm186_vm1, %v247_v28, 0.0 }
 0x11b   :  { %v261_v35 = vadd.f32 %v260_v26, %v259_v24  ;;  %v236_v50 = vsub.f32 %v9735_v33, %v224_v11  ;;  %v250_v31 = vmul.f32 %v9807_v43, %v9807_v43  ;;  %v270_v51 = vsel %vm186_vm1, %v248_v29, 0.0 }
 0x11c   :  { %v237_v53 = vsub.f32 %v9741_v40, %v224_v11  ;;  %v251_v32 = vmul.f32 %v9813_v46, %v9813_v46  ;;  %v272_v54 = vsel %vm186_vm1, %v249_v30, 0.0  ;;  %v238_v56 = vsub.f32 %v9748_v49, %v224_v11  ;;  %v9849_v30 = vld [vmem:[%s14868_s7 + $0x1] ss:$0 sm:$0xff] }
 0x11d   :  { %v263_v38 = vadd.f32 %v262_v37, %v261_v35  ;;  %v252_v57 = vmul.f32 %v236_v50, %v236_v50  ;;  %v274_v59 = vsel %vm186_vm1, %v250_v31, 0.0  ;;  %v239_v60 = vsub.f32 %v9758_v58, %v224_v11 }
 0x11e   :  { %v253_v61 = vmul.f32 %v237_v53, %v237_v53  ;;  %v276_v62 = vsel %vm186_vm1, %v251_v32, 0.0  ;;  %v240_v0 = vsub.f32 %v180_v2, %v224_v11  ;;  %v254_v40 = vmul.f32 %v238_v56, %v238_v56 }
 0x11f   :  { %v265_v42 = vadd.f32 %v264_v41, %v263_v38  ;;  %v278_v1 = vsel %vm186_vm1, %v252_v57, 0.0  ;;  %v255_v4 = vmul.f32 %v239_v60, %v239_v60 }
 0x120   :  { %v280_v5 = vsel %vm186_vm1, %v253_v61, 0.0  ;;  %v256_v49 = vmul.f32 %v240_v0, %v240_v0  ;;  %v282_v7 = vsel %vm186_vm1, %v254_v40, 0.0 }
 0x121   :  { %v267_v45 = vadd.f32 %v266_v44, %v265_v42  ;;  %v284_v9 = vsel %vm186_vm1, %v255_v4, 0.0  ;;  %v9841_v42 = vld [vmem:[%s14868_s7] ss:$0 sm:$0xff] }
 0x122   :  { %v286_v10 = vsel %vm186_vm1, %v256_v49, 0.0 }
 0x123   :  { %v269_v48 = vadd.f32 %v268_v47, %v267_v45 }
 0x125   :  { %v271_v52 = vadd.f32 %v270_v51, %v269_v48 }
 0x127   :  { %v273_v55 = vadd.f32 %v272_v54, %v271_v52 }
 0x129   :  { %v275_v33 = vadd.f32 %v274_v59, %v273_v55 }
 0x12b   :  { %v277_v63 = vadd.f32 %v276_v62, %v275_v33 }
 0x12d   :  { %v279_v3 = vadd.f32 %v278_v1, %v277_v63 }
 0x12f   :  { %v281_v6 = vadd.f32 %v280_v5, %v279_v3 }
 0x131   :  { %v283_v8 = vadd.f32 %v282_v7, %v281_v6 }
 0x133   :  { %v285_v58 = vadd.f32 %v284_v9, %v283_v8 }
 0x135   :  { %v287_v16 = vadd.f32 %v286_v10, %v285_v58 }
 0x137   :  { %v288_v17 = vrot.slane %v287_v16, 4 }
 0x139   :  { %v289_v2 = vadd.f32 %v288_v17, %v287_v16 }
 0x13b   :  { %v290_v11 = vrot.slane %v289_v2, 2 }
 0x13d   :  { %v291_v19 = vadd.f32 %v290_v11, %v289_v2 }
 0x13f   :  { %v292_v21 = vrot.slane %v291_v19, 1 }
 0x141   :  { %v293_v22 = vadd.f32 %v292_v21, %v291_v19 }
 0x143   :  { %v294_v23 = vmul.f32 0.0078125, %v293_v22 }
 0x145   :  { %v295_v24 = vadd.f32 1e-05, %v294_v23 }
 0x147   :  { %9343 = vrsqrt.f32 %v295_v24  ;;  %vm302_vm3 = vweird.f32 %v295_v24 }
 0x14d   :  { %v9344_v34 = vpop.eup %9343 }
 0x14e   :  { %v297_v26 = vmul.f32 %v9344_v34, %v295_v24  ;;  %vm303_vm2 = vweird.f32 %v9344_v34 }
 0x14f   :  { %vm304_vm4 = vmor %vm302_vm3, %vm303_vm2 }
 0x150   :  { %v298_v35 = vmul.f32 %v9344_v34, %v297_v26 }
 0x152   :  { %v299_v27 = vmul.f32 0.5, %v298_v35 }
 0x154   :  { %v300_v37 = vsub.f32 1.5, %v299_v27 }
 0x156   :  { %v301_v38 = vmul.f32 %v9344_v34, %v300_v37 }
 0x158   :  { %v9835_v28 = vsel %vm304_vm4, %v9344_v34, %v301_v38 }
 0x159   :  { %v321_v41 = vmul.f32 %v9835_v28, %v240_v0  ;;  %v320_v29 = vmul.f32 %v9835_v28, %v239_v60  ;;  %v319_v44 = vmul.f32 %v9835_v28, %v238_v56  ;;  %v318_v47 = vmul.f32 %v9835_v28, %v237_v53 }
 0x15a   :  { %v317_v31 = vmul.f32 %v9835_v28, %v236_v50  ;;  %v316_v32 = vmul.f32 %v9835_v28, %v9813_v46  ;;  %v315_v56 = vmul.f32 %v9835_v28, %v9807_v43  ;;  %v314_v50 = vmul.f32 %v9835_v28, %v9801_v39 }
 0x15b   :  { %v340_v45 = vmul.f32 %v9841_v42, %v321_v41  ;;  %v339_v48 = vmul.f32 %v9841_v42, %v320_v29  ;;  %v338_v51 = vmul.f32 %v9841_v42, %v319_v44  ;;  %v337_v54 = vmul.f32 %v9841_v42, %v318_v47  ;;  %v376_v29 = vld [vmem:[%s14869_s10] sm:$0xff]  ;;  %v7814_v47 = vld [vmem:[%s14869_s10 + $0x28] sm:$0xff] }
 0x15c   :  { %v336_v53 = vmul.f32 %v9841_v42, %v317_v31  ;;  %v335_v33 = vmul.f32 %v9841_v42, %v316_v32  ;;  %v313_v43 = vmul.f32 %v9835_v28, %v9795_v36  ;;  %v334_v61 = vmul.f32 %v9841_v42, %v315_v56  ;;  %v7813_v44 = vld [vmem:[%s14869_s10 + $0x20] sm:$0xff]  ;;  %v378_v31 = vld [vmem:[%s14869_s10 + $0x10] sm:$0xff]  ;;  %v7858_v56 = vld [vmem:[%s14869_s10 + $0x188] sm:$0xff] }
 0x15d   :  { %v359_v52 = vadd.f32 %v9849_v30, %v340_v45  ;;  %v358_v55 = vadd.f32 %v9849_v30, %v339_v48  ;;  %v357_v57 = vadd.f32 %v9849_v30, %v338_v51  ;;  %v356_v46 = vadd.f32 %v9849_v30, %v337_v54  ;;  %v7817_v45 = vld [vmem:[%s14869_s10 + $0x40] sm:$0xff]  ;;  %v7818_v48 = vld [vmem:[%s14869_s10 + $0x48] sm:$0xff]  ;;  %v7815_v51 = vld [vmem:[%s14869_s10 + $0x30] sm:$0xff] }
 0x15e   :  { %v355_v39 = vadd.f32 %v9849_v30, %v336_v53  ;;  %v312_v63 = vmul.f32 %v9835_v28, %v9789_v25  ;;  %v333_v0 = vmul.f32 %v9841_v42, %v314_v50  ;;  %v354_v36 = vadd.f32 %v9849_v30, %v335_v33  ;;  %v7819_v32 = vld [vmem:[%s14869_s10 + $0x50] sm:$0xff]  ;;  %v379_v54 = vld [vmem:[%s14869_s10 + $0x18] sm:$0xff]  ;;  %v7821_v50 = vld [vmem:[%s14869_s10 + $0x60] sm:$0xff] }
 0x15f   :  { %v9864_v59 = vmax.f32 %v359_v52, 0.0  ;;  %v9870_v60 = vmax.f32 %v358_v55, 0.0  ;;  %v9880_v62 = vmax.f32 %v357_v57, 0.0  ;;  %v9890_v40 = vmax.f32 %v356_v46, 0.0  ;;  %v7857_v52 = vld [vmem:[%s14869_s10 + $0x180] sm:$0xff]  ;;  %v7816_v55 = vld [vmem:[%s14869_s10 + $0x38] sm:$0xff] }
 0x160   :  { %v311_v1 = vmul.f32 %v9835_v28, %v9783_v20  ;;  %v332_v3 = vmul.f32 %v9841_v42, %v313_v43  ;;  %v353_v25 = vadd.f32 %v9849_v30, %v334_v61  ;;  %v9900_v4 = vmax.f32 %v355_v39, 0.0  ;;  %v7820_v53 = vld [vmem:[%s14869_s10 + $0x58] sm:$0xff]  ;;  %v7859_v57 = vld [vmem:[%s14869_s10 + $0x190] sm:$0xff]  ;;  %v7825_v33 = vld [vmem:[%s14869_s10 + $0x80] sm:$0xff] }
 0x161   :  { %380 = vmatpush.msra.mxu1 %v9864_v59  ;;  %414 = vmatpush.msra.mxu2 %v9864_v59  ;;  %v310_v5 = vmul.f32 %v9835_v28, %v9779_v18  ;;  %v331_v6 = vmul.f32 %v9841_v42, %v312_v63  ;;  %v352_v20 = vadd.f32 %v9849_v30, %v333_v0  ;;  %v9910_v49 = vmax.f32 %v354_v36, 0.0  ;;  %v7829_v46 = vld [vmem:[%s14869_s10 + $0xa0] sm:$0xff]  ;;  %v7860_v43 = vld [vmem:[%s14869_s10 + $0x198] sm:$0xff]  ;;  %v7822_v61 = vld [vmem:[%s14869_s10 + $0x68] sm:$0xff] }
 0x162   :  { %448 = vmatpush.msra.mxu3 %v9864_v59  ;;  %788 = vmatpush.msrb.mxu0 %v9864_v59  ;;  %v309_v7 = vmul.f32 %v9835_v28, %v9773_v15  ;;  %v330_v8 = vmul.f32 %v9841_v42, %v311_v1  ;;  %v351_v18 = vadd.f32 %v9849_v30, %v332_v3  ;;  %v9920_v9 = vmax.f32 %v353_v25, 0.0  ;;  %v7826_v39 = vld [vmem:[%s14869_s10 + $0x88] sm:$0xff]  ;;  %v7823_v0 = vld [vmem:[%s14869_s10 + $0x70] sm:$0xff]  ;;  %v7824_v3 = vld [vmem:[%s14869_s10 + $0x78] sm:$0xff] }
 0x163   :  { %381 = vmatpush.msra.mxu1 %v9870_v60  ;;  %415 = vmatpush.msra.mxu2 %v9870_v60  ;;  %v308_v58 = vmul.f32 %v9835_v28, %v9771_v14  ;;  %v329_v10 = vmul.f32 %v9841_v42, %v310_v5  ;;  %v350_v15 = vadd.f32 %v9849_v30, %v331_v6  ;;  %v9930_v16 = vmax.f32 %v352_v20, 0.0  ;;  %v7830_v63 = vld [vmem:[%s14869_s10 + $0xa8] sm:$0xff]  ;;  %v7827_v36 = vld [vmem:[%s14869_s10 + $0x90] sm:$0xff]  ;;  %v7828_v25 = vld [vmem:[%s14869_s10 + $0x98] sm:$0xff] }
 0x164   :  { %449 = vmatpush.msra.mxu3 %v9870_v60  ;;  %789 = vmatpush.msrb.mxu0 %v9870_v60  ;;  %v307_v17 = vmul.f32 %v9835_v28, %v9769_v13  ;;  %v328_v2 = vmul.f32 %v9841_v42, %v309_v7  ;;  %v349_v14 = vadd.f32 %v9849_v30, %v330_v8  ;;  %v9940_v11 = vmax.f32 %v351_v18, 0.0  ;;  %v7831_v1 = vld [vmem:[%s14869_s10 + $0xb0] sm:$0xff]  ;;  %v7832_v5 = vld [vmem:[%s14869_s10 + $0xb8] sm:$0xff]  ;;  %v7833_v6 = vld [vmem:[%s14869_s10 + $0xc0] sm:$0xff] }
 0x165   :  { %382 = vmatpush.msra.mxu1 %v9880_v62  ;;  %416 = vmatpush.msra.mxu2 %v9880_v62  ;;  %v306_v19 = vmul.f32 %v9835_v28, %v9767_v12  ;;  %v327_v21 = vmul.f32 %v9841_v42, %v308_v58  ;;  %v348_v13 = vadd.f32 %v9849_v30, %v329_v10  ;;  %v9950_v22 = vmax.f32 %v350_v15, 0.0  ;;  %v7837_v20 = vld [vmem:[%s14869_s10 + $0xe0] sm:$0xff]  ;;  %v7834_v8 = vld [vmem:[%s14869_s10 + $0xc8] sm:$0xff]  ;;  %v7835_v10 = vld [vmem:[%s14869_s10 + $0xd0] sm:$0xff] }
 0x166   :  { %450 = vmatpush.msra.mxu3 %v9880_v62  ;;  %790 = vmatpush.msrb.mxu0 %v9880_v62  ;;  %v326_v23 = vmul.f32 %v9841_v42, %v307_v17  ;;  %v347_v24 = vadd.f32 %v9849_v30, %v328_v2  ;;  %v9958_v34 = vmax.f32 %v349_v14, 0.0  ;;  %v7841_v7 = vld [vmem:[%s14869_s10 + $0x100] sm:$0xff]  ;;  %v7838_v18 = vld [vmem:[%s14869_s10 + $0xe8] sm:$0xff]  ;;  %v7839_v15 = vld [vmem:[%s14869_s10 + $0xf0] sm:$0xff] }
 0x167   :  { %383 = vmatpush.msra.mxu1 %v9890_v40  ;;  %417 = vmatpush.msra.mxu2 %v9890_v40  ;;  %v325_v12 = vmul.f32 %v9841_v42, %v306_v19  ;;  %v346_v26 = vadd.f32 %v9849_v30, %v327_v21  ;;  %v9966_v35 = vmax.f32 %v348_v13, 0.0  ;;  %v7842_v58 = vld [vmem:[%s14869_s10 + $0x108] sm:$0xff]  ;;  %v7843_v17 = vld [vmem:[%s14869_s10 + $0x110] sm:$0xff]  ;;  %v7836_v2 = vld [vmem:[%s14869_s10 + $0xd8] sm:$0xff] }
 0x168   :  { %451 = vmatpush.msra.mxu3 %v9890_v40  ;;  %791 = vmatpush.msrb.mxu0 %v9890_v40  ;;  %v345_v27 = vadd.f32 %v9849_v30, %v326_v23  ;;  %v9973_v37 = vmax.f32 %v347_v24, 0.0  ;;  %v7840_v14 = vld [vmem:[%s14869_s10 + $0xf8] sm:$0xff]  ;;  %v7845_v21 = vld [vmem:[%s14869_s10 + $0x120] sm:$0xff] }
 0x169   :  { %384 = vmatpush.msra.mxu1 %v9900_v4  ;;  %418 = vmatpush.msra.mxu2 %v9900_v4  ;;  %v344_v38 = vadd.f32 %v9849_v30, %v325_v12  ;;  %v9980_v28 = vmax.f32 %v346_v26, 0.0  ;;  %v377_v30 = vld [vmem:[%s14869_s10 + $0x8] sm:$0xff]  ;;  %v7844_v19 = vld [vmem:[%s14869_s10 + $0x118] sm:$0xff]  ;;  %v7849_v13 = vld [vmem:[%s14869_s10 + $0x140] sm:$0xff] }
 0x16a   :  { %452 = vmatpush.msra.mxu3 %v9900_v4  ;;  %792 = vmatpush.msrb.mxu0 %v9900_v4  ;;  %v9986_v41 = vmax.f32 %v345_v27, 0.0  ;;  %v7853_v23 = vld [vmem:[%s14869_s10 + $0x160] sm:$0xff]  ;;  %v7852_v24 = vld [vmem:[%s14869_s10 + $0x158] sm:$0xff] }
 0x16b   :  { %385 = vmatpush.msra.mxu1 %v9910_v49  ;;  %419 = vmatpush.msra.mxu2 %v9910_v49  ;;  %v9992_v42 = vmax.f32 %v344_v38, 0.0  ;;  %v7856_v12 = vld [vmem:[%s14869_s10 + $0x178] sm:$0xff]  ;;  %v7861_v27 = vld [vmem:[%s14869_s10 + $0x1a0] sm:$0xff] }
 0x16c   :  { %453 = vmatpush.msra.mxu3 %v9910_v49  ;;  %793 = vmatpush.msrb.mxu0 %v9910_v49  ;;  %v7869_v38 = vld [vmem:[%s14869_s10 + $0x1e0] sm:$0xff] }
 0x16d   :  { %386 = vmatpush.msra.mxu1 %v9920_v9  ;;  %420 = vmatpush.msra.mxu2 %v9920_v9 }
 0x16e   :  { %454 = vmatpush.msra.mxu3 %v9920_v9  ;;  %794 = vmatpush.msrb.mxu0 %v9920_v9 }
 0x16f   :  { %387 = vmatpush.msra.mxu1 %v9930_v16  ;;  %421 = vmatpush.msra.mxu2 %v9930_v16 }
 0x170   :  { %455 = vmatpush.msra.mxu3 %v9930_v16  ;;  %795 = vmatpush.msrb.mxu0 %v9930_v16 }
 0x171   :  { %388 = vmatpush.msra.mxu1 %v9940_v11  ;;  %422 = vmatpush.msra.mxu2 %v9940_v11 }
 0x172   :  { %456 = vmatpush.msra.mxu3 %v9940_v11  ;;  %796 = vmatpush.msrb.mxu0 %v9940_v11 }
 0x173   :  { %389 = vmatpush.msra.mxu1 %v9950_v22  ;;  %423 = vmatpush.msra.mxu2 %v9950_v22 }
 0x174   :  { %457 = vmatpush.msra.mxu3 %v9950_v22  ;;  %797 = vmatpush.msrb.mxu0 %v9950_v22 }
 0x175   :  { %390 = vmatpush.msra.mxu1 %v9958_v34  ;;  %424 = vmatpush.msra.mxu2 %v9958_v34 }
 0x176   :  { %458 = vmatpush.msra.mxu3 %v9958_v34  ;;  %798 = vmatpush.msrb.mxu0 %v9958_v34 }
 0x177   :  { %391 = vmatpush.msra.mxu1 %v9966_v35  ;;  %425 = vmatpush.msra.mxu2 %v9966_v35 }
 0x178   :  { %459 = vmatpush.msra.mxu3 %v9966_v35  ;;  %799 = vmatpush.msrb.mxu0 %v9966_v35 }
 0x179   :  { %392 = vmatpush.msra.mxu1 %v9973_v37  ;;  %426 = vmatpush.msra.mxu2 %v9973_v37 }
 0x17a   :  { %460 = vmatpush.msra.mxu3 %v9973_v37  ;;  %800 = vmatpush.msrb.mxu0 %v9973_v37 }
 0x17b   :  { %393 = vmatpush.msra.mxu1 %v9980_v28  ;;  %427 = vmatpush.msra.mxu2 %v9980_v28 }
 0x17c   :  { %461 = vmatpush.msra.mxu3 %v9980_v28  ;;  %801 = vmatpush.msrb.mxu0 %v9980_v28 }
 0x17d   :  { %394 = vmatpush.msra.mxu1 %v9986_v41  ;;  %428 = vmatpush.msra.mxu2 %v9986_v41 }
 0x17e   :  { %462 = vmatpush.msra.mxu3 %v9986_v41  ;;  %802 = vmatpush.msrb.mxu0 %v9986_v41 }
 0x17f   :  { %395 = vmatpush.msra.mxu1 %v9992_v42  ;;  %429 = vmatpush.msra.mxu2 %v9992_v42 }
 0x180   :  { %463 = vmatpush.msra.mxu3 %v9992_v42  ;;  %803 = vmatpush.msrb.mxu0 %v9992_v42 }
 0x181   :  { %396 = vmatmul.f32.vlgmr.msra.gmra.mxu1 %v376_v29  ;;  %430 = vmatmul.f32.vlgmr.msra.gmra.mxu2 %v7813_v44  ;;  %v7866_v29 = vld [vmem:[%s14869_s10 + $0x1c8] sm:$0xff] }
 0x182   :  { %464 = vmatmul.f32.vlgmr.msra.gmra.mxu3 %v7817_v45  ;;  %482 = vmatpush.msrb.mxu1 %v9864_v59  ;;  %v7870_v45 = vld [vmem:[%s14869_s10 + $0x1e8] sm:$0xff] }
 0x183   :  { %516 = vmatpush.msrb.mxu2 %v9864_v59  ;;  %550 = vmatpush.msrb.mxu3 %v9864_v59 }
 0x184   :  { %483 = vmatpush.msrb.mxu1 %v9870_v60  ;;  %804 = vmatmul.f32.vlgmr.msrb.gmra.mxu0 %v7857_v52 }
 0x185   :  { %517 = vmatpush.msrb.mxu2 %v9870_v60  ;;  %551 = vmatpush.msrb.mxu3 %v9870_v60 }
 0x186   :  { %484 = vmatpush.msrb.mxu1 %v9880_v62 }
 0x187   :  { %518 = vmatpush.msrb.mxu2 %v9880_v62  ;;  %552 = vmatpush.msrb.mxu3 %v9880_v62 }
 0x188   :  { %485 = vmatpush.msrb.mxu1 %v9890_v40 }
 0x189   :  { %519 = vmatpush.msrb.mxu2 %v9890_v40  ;;  %553 = vmatpush.msrb.mxu3 %v9890_v40 }
 0x18a   :  { %399 = vmatmul.f32.gmra.mxu1 %v377_v30  ;;  %433 = vmatmul.f32.gmra.mxu2 %v7814_v47  ;;  %v7863_v47 = vld [vmem:[%s14869_s10 + $0x1b0] sm:$0xff] }
 0x18b   :  { %467 = vmatmul.f32.gmra.mxu3 %v7818_v48  ;;  %486 = vmatpush.msrb.mxu1 %v9900_v4  ;;  %v7867_v48 = vld [vmem:[%s14869_s10 + $0x1d0] sm:$0xff] }
 0x18c   :  { %520 = vmatpush.msrb.mxu2 %v9900_v4  ;;  %554 = vmatpush.msrb.mxu3 %v9900_v4 }
 0x18d   :  { %487 = vmatpush.msrb.mxu1 %v9910_v49  ;;  %807 = vmatmul.f32.gmra.mxu0 %v7858_v56  ;;  %v7868_v56 = vld [vmem:[%s14869_s10 + $0x1d8] sm:$0xff] }
 0x18e   :  { %521 = vmatpush.msrb.mxu2 %v9910_v49  ;;  %555 = vmatpush.msrb.mxu3 %v9910_v49 }
 0x18f   :  { %488 = vmatpush.msrb.mxu1 %v9920_v9 }
 0x190   :  { %522 = vmatpush.msrb.mxu2 %v9920_v9  ;;  %556 = vmatpush.msrb.mxu3 %v9920_v9 }
 0x191   :  { %489 = vmatpush.msrb.mxu1 %v9930_v16 }
 0x192   :  { %523 = vmatpush.msrb.mxu2 %v9930_v16  ;;  %557 = vmatpush.msrb.mxu3 %v9930_v16 }
 0x193   :  { %402 = vmatmul.f32.gmra.mxu1 %v378_v31  ;;  %436 = vmatmul.f32.gmra.mxu2 %v7815_v51  ;;  %v7871_v31 = vld [vmem:[%s14869_s10 + $0x1f0] sm:$0xff] }
 0x194   :  { %470 = vmatmul.f32.gmra.mxu3 %v7819_v32  ;;  %490 = vmatpush.msrb.mxu1 %v9940_v11 }
 0x195   :  { %524 = vmatpush.msrb.mxu2 %v9940_v11  ;;  %558 = vmatpush.msrb.mxu3 %v9940_v11 }
 0x196   :  { %491 = vmatpush.msrb.mxu1 %v9950_v22  ;;  %810 = vmatmul.f32.gmra.mxu0 %v7859_v57 }
 0x197   :  { %525 = vmatpush.msrb.mxu2 %v9950_v22  ;;  %559 = vmatpush.msrb.mxu3 %v9950_v22 }
 0x198   :  { %492 = vmatpush.msrb.mxu1 %v9958_v34 }
 0x199   :  { %526 = vmatpush.msrb.mxu2 %v9958_v34  ;;  %560 = vmatpush.msrb.mxu3 %v9958_v34 }
 0x19a   :  { %493 = vmatpush.msrb.mxu1 %v9966_v35 }
 0x19b   :  { %527 = vmatpush.msrb.mxu2 %v9966_v35  ;;  %561 = vmatpush.msrb.mxu3 %v9966_v35 }
 0x19c   :  { %405 = vmatmul.f32.gmra.mxu1 %v379_v54  ;;  %439 = vmatmul.f32.gmra.mxu2 %v7816_v55  ;;  %v7864_v55 = vld [vmem:[%s14869_s10 + $0x1b8] sm:$0xff] }
 0x19d   :  { %473 = vmatmul.f32.gmra.mxu3 %v7820_v53  ;;  %494 = vmatpush.msrb.mxu1 %v9973_v37  ;;  %v7872_v53 = vld [vmem:[%s14869_s10 + $0x1f8] sm:$0xff] }
 0x19e   :  { %528 = vmatpush.msrb.mxu2 %v9973_v37  ;;  %562 = vmatpush.msrb.mxu3 %v9973_v37 }
 0x19f   :  { %495 = vmatpush.msrb.mxu1 %v9980_v28  ;;  %813 = vmatmul.f32.gmra.mxu0 %v7860_v43 }
 0x1a0   :  { %529 = vmatpush.msrb.mxu2 %v9980_v28  ;;  %563 = vmatpush.msrb.mxu3 %v9980_v28 }
 0x1a1   :  { %496 = vmatpush.msrb.mxu1 %v9986_v41 }
 0x1a2   :  { %530 = vmatpush.msrb.mxu2 %v9986_v41  ;;  %564 = vmatpush.msrb.mxu3 %v9986_v41 }
 0x1a3   :  { %497 = vmatpush.msrb.mxu1 %v9992_v42 }
 0x1a4   :  { %531 = vmatpush.msrb.mxu2 %v9992_v42  ;;  %565 = vmatpush.msrb.mxu3 %v9992_v42 }
 0x1a5   :  { %584 = vmatpush.msra.mxu1 %v9864_v59  ;;  %532 = vmatmul.f32.vlgmr.msrb.gmra.mxu2 %v7825_v33 }
 0x1a6   :  { %618 = vmatpush.msra.mxu2 %v9864_v59  ;;  %652 = vmatpush.msra.mxu3 %v9864_v59 }
 0x1a7   :  { %498 = vmatmul.f32.vlgmr.msrb.gmra.mxu1 %v7821_v50  ;;  %566 = vmatmul.f32.vlgmr.msrb.gmra.mxu3 %v7829_v46 }
 0x1a8   :  { %585 = vmatpush.msra.mxu1 %v9870_v60  ;;  %619 = vmatpush.msra.mxu2 %v9870_v60 }
 0x1a9   :  { %653 = vmatpush.msra.mxu3 %v9870_v60 }
 0x1aa   :  { %586 = vmatpush.msra.mxu1 %v9880_v62  ;;  %620 = vmatpush.msra.mxu2 %v9880_v62 }
 0x1ab   :  { %654 = vmatpush.msra.mxu3 %v9880_v62 }
 0x1ac   :  { %587 = vmatpush.msra.mxu1 %v9890_v40  ;;  %621 = vmatpush.msra.mxu2 %v9890_v40 }
 0x1ad   :  { %655 = vmatpush.msra.mxu3 %v9890_v40  ;;  %535 = vmatmul.f32.gmra.mxu2 %v7826_v39 }
 0x1ae   :  { %588 = vmatpush.msra.mxu1 %v9900_v4  ;;  %622 = vmatpush.msra.mxu2 %v9900_v4 }
 0x1af   :  { %656 = vmatpush.msra.mxu3 %v9900_v4  ;;  %501 = vmatmul.f32.gmra.mxu1 %v7822_v61 }
 0x1b0   :  { %569 = vmatmul.f32.gmra.mxu3 %v7830_v63  ;;  %589 = vmatpush.msra.mxu1 %v9910_v49 }
 0x1b1   :  { %623 = vmatpush.msra.mxu2 %v9910_v49  ;;  %657 = vmatpush.msra.mxu3 %v9910_v49 }
 0x1b2   :  { %590 = vmatpush.msra.mxu1 %v9920_v9 }
 0x1b3   :  { %624 = vmatpush.msra.mxu2 %v9920_v9  ;;  %658 = vmatpush.msra.mxu3 %v9920_v9 }
 0x1b4   :  { %591 = vmatpush.msra.mxu1 %v9930_v16 }
 0x1b5   :  { %625 = vmatpush.msra.mxu2 %v9930_v16  ;;  %659 = vmatpush.msra.mxu3 %v9930_v16 }
 0x1b6   :  { %592 = vmatpush.msra.mxu1 %v9940_v11  ;;  %538 = vmatmul.f32.gmra.mxu2 %v7827_v36 }
 0x1b7   :  { %626 = vmatpush.msra.mxu2 %v9940_v11  ;;  %660 = vmatpush.msra.mxu3 %v9940_v11 }
 0x1b8   :  { %504 = vmatmul.f32.gmra.mxu1 %v7823_v0  ;;  %572 = vmatmul.f32.gmra.mxu3 %v7831_v1 }
 0x1b9   :  { %593 = vmatpush.msra.mxu1 %v9950_v22  ;;  %627 = vmatpush.msra.mxu2 %v9950_v22 }
 0x1ba   :  { %661 = vmatpush.msra.mxu3 %v9950_v22 }
 0x1bb   :  { %594 = vmatpush.msra.mxu1 %v9958_v34  ;;  %628 = vmatpush.msra.mxu2 %v9958_v34 }
 0x1bc   :  { %662 = vmatpush.msra.mxu3 %v9958_v34 }
 0x1bd   :  { %595 = vmatpush.msra.mxu1 %v9966_v35  ;;  %629 = vmatpush.msra.mxu2 %v9966_v35 }
 0x1be   :  { %663 = vmatpush.msra.mxu3 %v9966_v35  ;;  %541 = vmatmul.f32.gmra.mxu2 %v7828_v25 }
 0x1bf   :  { %596 = vmatpush.msra.mxu1 %v9973_v37  ;;  %630 = vmatpush.msra.mxu2 %v9973_v37 }
 0x1c0   :  { %664 = vmatpush.msra.mxu3 %v9973_v37  ;;  %507 = vmatmul.f32.gmra.mxu1 %v7824_v3 }
 0x1c1   :  { %575 = vmatmul.f32.gmra.mxu3 %v7832_v5  ;;  %597 = vmatpush.msra.mxu1 %v9980_v28 }
 0x1c2   :  { %631 = vmatpush.msra.mxu2 %v9980_v28  ;;  %665 = vmatpush.msra.mxu3 %v9980_v28 }
 0x1c3   :  { %598 = vmatpush.msra.mxu1 %v9986_v41 }
 0x1c4   :  { %632 = vmatpush.msra.mxu2 %v9986_v41  ;;  %666 = vmatpush.msra.mxu3 %v9986_v41 }
 0x1c5   :  { %599 = vmatpush.msra.mxu1 %v9992_v42 }
 0x1c6   :  { %633 = vmatpush.msra.mxu2 %v9992_v42  ;;  %667 = vmatpush.msra.mxu3 %v9992_v42 }
 0x1c7   :  { %686 = vmatpush.msrb.mxu1 %v9864_v59  ;;  %634 = vmatmul.f32.vlgmr.msra.gmra.mxu2 %v7837_v20 }
 0x1c8   :  { %720 = vmatpush.msrb.mxu2 %v9864_v59  ;;  %754 = vmatpush.msrb.mxu3 %v9864_v59 }
 0x1c9   :  { %600 = vmatmul.f32.vlgmr.msra.gmra.mxu1 %v7833_v6  ;;  %668 = vmatmul.f32.vlgmr.msra.gmra.mxu3 %v7841_v7 }
 0x1ca   :  { %687 = vmatpush.msrb.mxu1 %v9870_v60  ;;  %721 = vmatpush.msrb.mxu2 %v9870_v60 }
 0x1cb   :  { %755 = vmatpush.msrb.mxu3 %v9870_v60 }
 0x1cc   :  { %688 = vmatpush.msrb.mxu1 %v9880_v62  ;;  %722 = vmatpush.msrb.mxu2 %v9880_v62 }
 0x1cd   :  { %756 = vmatpush.msrb.mxu3 %v9880_v62 }
 0x1ce   :  { %689 = vmatpush.msrb.mxu1 %v9890_v40  ;;  %723 = vmatpush.msrb.mxu2 %v9890_v40 }
 0x1cf   :  { %757 = vmatpush.msrb.mxu3 %v9890_v40  ;;  %637 = vmatmul.f32.gmra.mxu2 %v7838_v18 }
 0x1d0   :  { %690 = vmatpush.msrb.mxu1 %v9900_v4  ;;  %724 = vmatpush.msrb.mxu2 %v9900_v4 }
 0x1d1   :  { %758 = vmatpush.msrb.mxu3 %v9900_v4  ;;  %603 = vmatmul.f32.gmra.mxu1 %v7834_v8 }
 0x1d2   :  { %671 = vmatmul.f32.gmra.mxu3 %v7842_v58  ;;  %691 = vmatpush.msrb.mxu1 %v9910_v49 }
 0x1d3   :  { %725 = vmatpush.msrb.mxu2 %v9910_v49  ;;  %759 = vmatpush.msrb.mxu3 %v9910_v49 }
 0x1d4   :  { %692 = vmatpush.msrb.mxu1 %v9920_v9 }
 0x1d5   :  { %726 = vmatpush.msrb.mxu2 %v9920_v9  ;;  %760 = vmatpush.msrb.mxu3 %v9920_v9 }
 0x1d6   :  { %693 = vmatpush.msrb.mxu1 %v9930_v16 }
 0x1d7   :  { %727 = vmatpush.msrb.mxu2 %v9930_v16  ;;  %761 = vmatpush.msrb.mxu3 %v9930_v16 }
 0x1d8   :  { %694 = vmatpush.msrb.mxu1 %v9940_v11  ;;  %640 = vmatmul.f32.gmra.mxu2 %v7839_v15 }
 0x1d9   :  { %728 = vmatpush.msrb.mxu2 %v9940_v11  ;;  %762 = vmatpush.msrb.mxu3 %v9940_v11 }
 0x1da   :  { %606 = vmatmul.f32.gmra.mxu1 %v7835_v10  ;;  %674 = vmatmul.f32.gmra.mxu3 %v7843_v17 }
 0x1db   :  { %695 = vmatpush.msrb.mxu1 %v9950_v22  ;;  %729 = vmatpush.msrb.mxu2 %v9950_v22 }
 0x1dc   :  { %763 = vmatpush.msrb.mxu3 %v9950_v22 }
 0x1dd   :  { %696 = vmatpush.msrb.mxu1 %v9958_v34  ;;  %730 = vmatpush.msrb.mxu2 %v9958_v34 }
 0x1de   :  { %764 = vmatpush.msrb.mxu3 %v9958_v34 }
 0x1df   :  { %697 = vmatpush.msrb.mxu1 %v9966_v35  ;;  %731 = vmatpush.msrb.mxu2 %v9966_v35 }
 0x1e0   :  { %765 = vmatpush.msrb.mxu3 %v9966_v35  ;;  %643 = vmatmul.f32.gmra.mxu2 %v7840_v14 }
 0x1e1   :  { %698 = vmatpush.msrb.mxu1 %v9973_v37  ;;  %732 = vmatpush.msrb.mxu2 %v9973_v37 }
 0x1e2   :  { %766 = vmatpush.msrb.mxu3 %v9973_v37  ;;  %609 = vmatmul.f32.gmra.mxu1 %v7836_v2 }
 0x1e3   :  { %677 = vmatmul.f32.gmra.mxu3 %v7844_v19  ;;  %699 = vmatpush.msrb.mxu1 %v9980_v28 }
 0x1e4   :  { %733 = vmatpush.msrb.mxu2 %v9980_v28  ;;  %767 = vmatpush.msrb.mxu3 %v9980_v28 }
 0x1e5   :  { %700 = vmatpush.msrb.mxu1 %v9986_v41 }
 0x1e6   :  { %734 = vmatpush.msrb.mxu2 %v9986_v41  ;;  %768 = vmatpush.msrb.mxu3 %v9986_v41 }
 0x1e7   :  { %701 = vmatpush.msrb.mxu1 %v9992_v42 }
 0x1e8   :  { %735 = vmatpush.msrb.mxu2 %v9992_v42  ;;  %769 = vmatpush.msrb.mxu3 %v9992_v42 }
 0x1e9   :  { %822 = vmatpush.msra.mxu1 %v9864_v59  ;;  %736 = vmatmul.f32.vlgmr.msrb.gmra.mxu2 %v7849_v13 }
 0x1ea   :  { %856 = vmatpush.msra.mxu2 %v9864_v59  ;;  %890 = vmatpush.msra.mxu3 %v9864_v59  ;;  %v7846_v59 = vld [vmem:[%s14869_s10 + $0x128] sm:$0xff] }
 0x1eb   :  { %702 = vmatmul.f32.vlgmr.msrb.gmra.mxu1 %v7845_v21  ;;  %770 = vmatmul.f32.vlgmr.msrb.gmra.mxu3 %v7853_v23 }
 0x1ec   :  { %823 = vmatpush.msra.mxu1 %v9870_v60  ;;  %857 = vmatpush.msra.mxu2 %v9870_v60 }
 0x1ed   :  { %891 = vmatpush.msra.mxu3 %v9870_v60  ;;  %v7850_v60 = vld [vmem:[%s14869_s10 + $0x148] sm:$0xff] }
 0x1ee   :  { %824 = vmatpush.msra.mxu1 %v9880_v62  ;;  %858 = vmatpush.msra.mxu2 %v9880_v62 }
 0x1ef   :  { %892 = vmatpush.msra.mxu3 %v9880_v62  ;;  %v7854_v62 = vld [vmem:[%s14869_s10 + $0x168] sm:$0xff] }
 0x1f0   :  { %825 = vmatpush.msra.mxu1 %v9890_v40  ;;  %859 = vmatpush.msra.mxu2 %v9890_v40 }
 0x1f1   :  { %893 = vmatpush.msra.mxu3 %v9890_v40  ;;  %739 = vmatmul.f32.gmra.mxu2 %v7850_v60  ;;  %v7847_v40 = vld [vmem:[%s14869_s10 + $0x130] sm:$0xff] }
 0x1f2   :  { %826 = vmatpush.msra.mxu1 %v9900_v4  ;;  %860 = vmatpush.msra.mxu2 %v9900_v4 }
 0x1f3   :  { %894 = vmatpush.msra.mxu3 %v9900_v4  ;;  %705 = vmatmul.f32.gmra.mxu1 %v7846_v59  ;;  %v7851_v4 = vld [vmem:[%s14869_s10 + $0x150] sm:$0xff] }
 0x1f4   :  { %827 = vmatpush.msra.mxu1 %v9910_v49  ;;  %861 = vmatpush.msra.mxu2 %v9910_v49 }
 0x1f5   :  { %895 = vmatpush.msra.mxu3 %v9910_v49 }
 0x1f6   :  { %773 = vmatmul.f32.gmra.mxu3 %v7854_v62  ;;  %828 = vmatpush.msra.mxu1 %v9920_v9 }
 0x1f7   :  { %862 = vmatpush.msra.mxu2 %v9920_v9  ;;  %896 = vmatpush.msra.mxu3 %v9920_v9  ;;  %v7855_v9 = vld [vmem:[%s14869_s10 + $0x170] sm:$0xff] }
 0x1f8   :  { %829 = vmatpush.msra.mxu1 %v9930_v16 }
 0x1f9   :  { %863 = vmatpush.msra.mxu2 %v9930_v16  ;;  %897 = vmatpush.msra.mxu3 %v9930_v16 }
 0x1fa   :  { %830 = vmatpush.msra.mxu1 %v9940_v11  ;;  %742 = vmatmul.f32.gmra.mxu2 %v7851_v4 }
 0x1fb   :  { %864 = vmatpush.msra.mxu2 %v9940_v11  ;;  %898 = vmatpush.msra.mxu3 %v9940_v11 }
 0x1fc   :  { %831 = vmatpush.msra.mxu1 %v9950_v22 }
 0x1fd   :  { %865 = vmatpush.msra.mxu2 %v9950_v22  ;;  %899 = vmatpush.msra.mxu3 %v9950_v22  ;;  %v7848_v22 = vld [vmem:[%s14869_s10 + $0x138] sm:$0xff] }
 0x1fe   :  { %v10317_v49 = vpop.f32.mrf.mxu1  ;;  %708 = vmatmul.f32.gmra.mxu1 %v7847_v40  ;;  %776 = vmatmul.f32.gmra.mxu3 %v7855_v9 }
 0x1ff   :  { %832 = vmatpush.msra.mxu1 %v9958_v34  ;;  %866 = vmatpush.msra.mxu2 %v9958_v34 }
 0x200   :  { %900 = vmatpush.msra.mxu3 %v9958_v34 }
 0x201   :  { %833 = vmatpush.msra.mxu1 %v9966_v35  ;;  %867 = vmatpush.msra.mxu2 %v9966_v35  ;;  %v805_v54 = vpop.f32.mrf.mxu0 }
 0x202   :  { %901 = vmatpush.msra.mxu3 %v9966_v35  ;;  %745 = vmatmul.f32.gmra.mxu2 %v7852_v24 }
 0x203   :  { %834 = vmatpush.msra.mxu1 %v9973_v37  ;;  %868 = vmatpush.msra.mxu2 %v9973_v37 }
 0x204   :  { %v10329_v16 = vpop.f32.mrf.mxu2  ;;  %902 = vmatpush.msra.mxu3 %v9973_v37  ;;  %v7865_v37 = vld [vmem:[%s14869_s10 + $0x1c0] sm:$0xff] }
 0x205   :  { %v10333_v11 = vpop.f32.mrf.mxu3  ;;  %835 = vmatpush.msra.mxu1 %v9980_v28  ;;  %869 = vmatpush.msra.mxu2 %v9980_v28 }
 0x206   :  { %903 = vmatpush.msra.mxu3 %v9980_v28  ;;  %711 = vmatmul.f32.gmra.mxu1 %v7848_v22 }
 0x207   :  { %v10344_v34 = vpop.f32.mrf.mxu1  ;;  %779 = vmatmul.f32.gmra.mxu3 %v7856_v12  ;;  %836 = vmatpush.msra.mxu1 %v9986_v41 }
 0x208   :  { %870 = vmatpush.msra.mxu2 %v9986_v41  ;;  %904 = vmatpush.msra.mxu3 %v9986_v41 }
 0x209   :  { %837 = vmatpush.msra.mxu1 %v9992_v42 }
 0x20a   :  { %871 = vmatpush.msra.mxu2 %v9992_v42  ;;  %905 = vmatpush.msra.mxu3 %v9992_v42  ;;  %v7862_v42 = vld [vmem:[%s14869_s10 + $0x1a8] sm:$0xff]  ;;  %v808_v43 = vpop.f32.mrf.mxu0  ;;  %s9561_s10 = smov 16  }
 0x20b   :  { %872 = vmatmul.f32.vlgmr.msra.gmra.mxu2 %v7865_v37 }
 0x20d   :  { %v10356_v26 = vpop.f32.mrf.mxu2 }
 0x20e   :  { %v10360_v35 = vpop.f32.mrf.mxu3  ;;  %838 = vmatmul.f32.vlgmr.msra.gmra.mxu1 %v7861_v27 }
 0x20f   :  { %906 = vmatmul.f32.vlgmr.msra.gmra.mxu3 %v7869_v38 }
 0x210   :  { %v10371_v28 = vpop.f32.mrf.mxu1 }
 0x213   :  { %875 = vmatmul.f32.gmra.mxu2 %v7866_v29  ;;  %v811_v36 = vpop.f32.mrf.mxu0 }
 0x216   :  { %v10373_v41 = vpop.f32.mrf.mxu2  ;;  %841 = vmatmul.f32.gmra.mxu1 %v7862_v42 }
 0x217   :  { %v10381_v44 = vpop.f32.mrf.mxu3  ;;  %909 = vmatmul.f32.gmra.mxu3 %v7870_v45 }
 0x219   :  { %v10386_v30 = vpop.f32.mrf.mxu1 }
 0x21b   :  { %878 = vmatmul.f32.gmra.mxu2 %v7867_v48 }
 0x21e   :  { %844 = vmatmul.f32.gmra.mxu1 %v7863_v47 }
 0x21f   :  { %v10397_v51 = vpop.f32.mrf.mxu2  ;;  %912 = vmatmul.f32.gmra.mxu3 %v7871_v31 }
 0x220   :  { %v10399_v52 = vpop.f32.mrf.mxu3 }
 0x223   :  { %881 = vmatmul.f32.gmra.mxu2 %v7868_v56 }
 0x224   :  { %v499_v32 = vpop.f32.mrf.mxu1 }
 0x226   :  { %847 = vmatmul.f32.gmra.mxu1 %v7864_v55 }
 0x227   :  { %915 = vmatmul.f32.gmra.mxu3 %v7872_v53 }
 0x228   :  { %v533_v57 = vpop.f32.mrf.mxu2 }
 0x229   :  { %v8643_v33 = vpack.i.bf16 %v805_v54, %v533_v57 }
 0x22a   :  { %v10410_v50 = vpop.f32.mrf.mxu3 }
 0x22b   :  { %8644 = vrot.lane.b32.xlu1 %v8643_v33, %s9560_s28 }
 0x22c   :  { %v502_v46 = vpop.f32.mrf.mxu1 }
 0x230   :  { %v536_v61 = vpop.f32.mrf.mxu2 }
 0x231   :  { %v8648_v63 = vpack.i.bf16 %v808_v43, %v536_v61 }
 0x233   :  { %v10413_v39 = vpop.f32.mrf.mxu3  ;;  %8649 = vrot.lane.b32.xlu1 %v8648_v63, %s9560_s28 }
 0x235   :  { %v505_v0 = vpop.f32.mrf.mxu1 }
 0x239   :  { %v539_v1 = vpop.f32.mrf.mxu2 }
 0x23a   :  { %v8653_v25 = vpack.i.bf16 %v811_v36, %v539_v1 }
 0x23b   :  { %v10416_v3 = vpop.f32.mrf.mxu3 }
 0x23c   :  { %8654 = vrot.lane.b32.xlu2 %v8653_v25, %s9560_s28 }
 0x23d   :  { %v10418_v5 = vpop.f32.mrf.mxu1 }
 0x241   :  { %v10421_v6 = vpop.f32.mrf.mxu2 }
 0x244   :  { %v10423_v20 = vpop.f32.mrf.mxu3 }
 0x246   :  { %v601_v7 = vpop.f32.mrf.mxu1 }
 0x24a   :  { %v635_v8 = vpop.f32.mrf.mxu2 }
 0x24c   :  { %v10425_v18 = vpop.f32.mrf.mxu3 }
 0x24e   :  { %v10427_v58 = vpop.f32.mrf.mxu1 }
 0x252   :  { %v10429_v10 = vpop.f32.mrf.mxu2 }
 0x255   :  { %v10431_v15 = vpop.f32.mrf.mxu3 }
 0x257   :  { %v10433_v17 = vpop.f32.mrf.mxu1 }
 0x25b   :  { %v10435_v2 = vpop.f32.mrf.mxu2 }
 0x25d   :  { %v10437_v14 = vpop.f32.mrf.mxu3 }
 0x25f   :  { %v10439_v19 = vpop.f32.mrf.mxu1 }
 0x263   :  { %v10441_v21 = vpop.f32.mrf.mxu2 }
 0x266   :  { %v10443_v13 = vpop.f32.mrf.mxu3 }
 0x268   :  { %v703_v23 = vpop.f32.mrf.mxu1 }
 0x269   :  { %v8658_v59 = vpack.i.bf16 %v703_v23, %v10329_v16  ;;  %v1216_v23 = vld [vmem:[%s14870_s2 + $0x60] sm:$0xff] }
 0x26b   :  { %8659 = vrot.lane.b32.xlu0 %v8658_v59, %s9561_s10  ;;  %v1232_v59 = vld [vmem:[%s14870_s2 + $0xe0] sm:$0xff] }
 0x26c   :  { %v737_v60 = vpop.f32.mrf.mxu2 }
 0x26d   :  { %v8663_v62 = vpack.i.bf16 %v737_v60, %v10333_v11  ;;  %v1215_v60 = vld [vmem:[%s14870_s2 + $0x58] sm:$0xff] }
 0x26e   :  { %v771_v40 = vpop.f32.mrf.mxu3 }
 0x26f   :  { %v8668_v4 = vpack.i.bf16 %v771_v40, %v499_v32 }
 0x270   :  { %v706_v9 = vpop.f32.mrf.mxu1 }
 0x271   :  { %8669 = vrot.lane.b32.xlu1 %v8668_v4, %s9563_s30  ;;  %v8673_v24 = vpack.i.bf16 %v706_v9, %v10356_v26  ;;  %v1214_v9 = vld [vmem:[%s14870_s2 + $0x50] sm:$0xff] }
 0x273   :  { %8664 = vrot.lane.b32.xlu0 %v8663_v62, %s9562_s29  ;;  %v1231_v62 = vld [vmem:[%s14870_s2 + $0xd8] sm:$0xff] }
 0x274   :  { %v740_v22 = vpop.f32.mrf.mxu2 }
 0x275   :  { %v8678_v16 = vpack.i.bf16 %v740_v22, %v10360_v35  ;;  %v1230_v22 = vld [vmem:[%s14870_s2 + $0xd0] sm:$0xff] }
 0x277   :  { %8679 = vrot.lane.b32.xlu2 %v8678_v16, %s9562_s29  ;;  %v1229_v16 = vld [vmem:[%s14870_s2 + $0xc8] sm:$0xff] }
 0x279   :  { %v774_v12 = vpop.f32.mrf.mxu3  ;;  %8674 = vrot.lane.b32.xlu1 %v8673_v24, %s9561_s10  ;;  %v1213_v24 = vld [vmem:[%s14870_s2 + $0x48] sm:$0xff] }
 0x27a   :  { %v8683_v27 = vpack.i.bf16 %v774_v12, %v502_v46  ;;  %v1212_v12 = vld [vmem:[%s14870_s2 + $0x40] sm:$0xff] }
 0x27b   :  { %v709_v37 = vpop.f32.mrf.mxu1 }
 0x27c   :  { %8684 = vrot.lane.b32.xlu0 %v8683_v27, %s9563_s30  ;;  %v8688_v11 = vpack.i.bf16 %v709_v37, %v10373_v41  ;;  %v1228_v27 = vld [vmem:[%s14870_s2 + $0xc0] sm:$0xff] }
 0x27d   :  { %v743_v38 = vpop.f32.mrf.mxu2 }
 0x27e   :  { %v8693_v42 = vpack.i.bf16 %v743_v38, %v10381_v44  ;;  %v1227_v38 = vld [vmem:[%s14870_s2 + $0xb8] sm:$0xff] }
 0x27f   :  { %8689 = vrot.lane.b32.xlu2 %v8688_v11, %s9561_s10  ;;  %v1211_v11 = vld [vmem:[%s14870_s2 + $0x38] sm:$0xff] }
 0x281   :  { %v777_v29 = vpop.f32.mrf.mxu3 }
 0x282   :  { %v8698_v45 = vpack.i.bf16 %v777_v29, %v505_v0  ;;  %v1210_v29 = vld [vmem:[%s14870_s2 + $0x30] sm:$0xff] }
 0x283   :  { %v712_v26 = vpop.f32.mrf.mxu1 }
 0x284   :  { %8694 = vrot.lane.b32.xlu0 %v8693_v42, %s9562_s29  ;;  %8699 = vrot.lane.b32.xlu1 %v8698_v45, %s9563_s30  ;;  %v8703_v35 = vpack.i.bf16 %v712_v26, %v10397_v51  ;;  %v1226_v45 = vld [vmem:[%s14870_s2 + $0xb0] sm:$0xff] }
 0x285   :  { %v746_v47 = vpop.f32.mrf.mxu2 }
 0x286   :  { %v8708_v48 = vpack.i.bf16 %v746_v47, %v10399_v52  ;;  %v1225_v47 = vld [vmem:[%s14870_s2 + $0xa8] sm:$0xff] }
 0x28a   :  { %v780_v31 = vpop.f32.mrf.mxu3 }
 0x28b   :  { %v839_v32 = vpop.f32.mrf.mxu1  ;;  %v8733_v0 = vpack.i.bf16 %v780_v31, %v10418_v5  ;;  %v1208_v31 = vld [vmem:[%s14870_s2 + $0x20] sm:$0xff] }
 0x28c   :  { %8704 = vrot.lane.b32.xlu0 %v8703_v35, %s9561_s10  ;;  %v8713_v41 = vpack.i.bf16 %v839_v32, %v10410_v50  ;;  %8709 = vrot.lane.b32.xlu1 %v8708_v48, %s9562_s29  ;;  %v1209_v35 = vld [vmem:[%s14870_s2 + $0x28] sm:$0xff]  ;;  %v1224_v32 = vld [vmem:[%s14870_s2 + $0xa0] sm:$0xff] }
 0x28e   :  { %8714 = vrot.lane.b32.xlu2 %v8713_v41, %s9564_s1  ;;  %v873_v44 = vpop.f32.mrf.mxu2  ;;  %v1207_v41 = vld [vmem:[%s14870_s2 + $0x18] sm:$0xff] }
 0x28f   :  { %v8718_v56 = vpack.i.bf16 %v873_v44, %v601_v7  ;;  %v1223_v44 = vld [vmem:[%s14870_s2 + $0x98] sm:$0xff] }
 0x292   :  { %v907_v54 = vpop.f32.mrf.mxu3 }
 0x293   :  { %v8723_v55 = vpack.i.bf16 %v907_v54, %v635_v8  ;;  %v842_v53 = vpop.f32.mrf.mxu1  ;;  %v1206_v54 = vld [vmem:[%s14870_s2 + $0x10] sm:$0xff] }
 0x294   :  { %v8728_v33 = vpack.i.bf16 %v842_v53, %v10413_v39  ;;  %v814_v39 = vpop.f32.mrf.mxu0 }
 0x295   :  { %8724 = vrot.lane.b32.xlu0 %v8723_v55, %s9565_s15  ;;  %v8753_v25 = vpack.i.bf16 %v814_v39, %v10421_v6  ;;  %v1219_v6 = vld [vmem:[%s14870_s2 + $0x78] sm:$0xff]  ;;  %v1222_v55 = vld [vmem:[%s14870_s2 + $0x90] sm:$0xff] }
 0x296   :  { %8719 = vrot.lane.b32.xlu2 %v8718_v56, %s9566_s16  ;;  %v876_v51 = vpop.f32.mrf.mxu2  ;;  %1236 = vmatpush.msra.mxu0 %v1219_v6  ;;  %v10520_v40 = vpop.permute.xlu2 %8654 }
 0x297   :  { %v8738_v57 = vpack.i.bf16 %v876_v51, %v10427_v58  ;;  %v1205_v51 = vld [vmem:[%s14870_s2 + $0x8] sm:$0xff] }
 0x29a   :  { %v910_v52 = vpop.f32.mrf.mxu3 }
 0x29b   :  { %v8743_v50 = vpack.i.bf16 %v910_v52, %v10429_v10  ;;  %v845_v46 = vpop.f32.mrf.mxu1  ;;  %v1221_v52 = vld [vmem:[%s14870_s2 + $0x88] sm:$0xff] }
 0x29c   :  { %v8748_v63 = vpack.i.bf16 %v845_v46, %v10416_v3 }
 0x29d   :  { %8744 = vrot.lane.b32.xlu1 %v8743_v50, %s9565_s15  ;;  %8739 = vrot.lane.b32.xlu0 %v8738_v57, %s9566_s16  ;;  %v10522_v4 = vpop.permute.xlu1 %8644  ;;  %v1204_v57 = vld [vmem:[%s14870_s2] sm:$0xff] }
 0x29e   :  { %8729 = vrot.lane.b32.xlu2 %v8728_v33, %s9564_s1  ;;  %v879_v43 = vpop.f32.mrf.mxu2  ;;  %v1220_v50 = vld [vmem:[%s14870_s2 + $0x80] sm:$0xff] }
 0x29f   :  { %v8758_v61 = vpack.i.bf16 %v879_v43, %v10433_v17  ;;  %v1218_v17 = vld [vmem:[%s14870_s2 + $0x70] sm:$0xff] }
 0x2a0   :  { %1237 = vmatpush.msra.mxu0 %v1218_v17 }
 0x2a2   :  { %v913_v36 = vpop.f32.mrf.mxu3 }
 0x2a3   :  { %v848_v1 = vpop.f32.mrf.mxu1  ;;  %v8763_v8 = vpack.i.bf16 %v913_v36, %v10435_v2  ;;  %v1234_v2 = vld [vmem:[%s14870_s2 + $0xf0] sm:$0xff] }
 0x2a4   :  { %v8768_v7 = vpack.i.bf16 %v848_v1, %v10423_v20  ;;  %v1235_v20 = vld [vmem:[%s14870_s2 + $0xf8] sm:$0xff] }
 0x2a5   :  { %8759 = vrot.lane.b32.xlu1 %v8758_v61, %s9566_s16  ;;  %8749 = vrot.lane.b32.xlu0 %v8748_v63, %s9564_s1  ;;  %v10556_v26 = vpop.permute.xlu1 %8649 }
 0x2a6   :  { %8734 = vrot.lane.b32.xlu2 %v8733_v0, %s9563_s30  ;;  %v882_v5 = vpop.f32.mrf.mxu2  ;;  %1265 = vmatpush.msrb.mxu1 %v1235_v20 }
 0x2a7   :  { %v8773_v10 = vpack.i.bf16 %v882_v5, %v10439_v19  ;;  %v1217_v19 = vld [vmem:[%s14870_s2 + $0x68] sm:$0xff] }
 0x2a8   :  { %1266 = vmatpush.msrb.mxu1 %v1234_v2  ;;  %1238 = vmatpush.msra.mxu0 %v1217_v19  ;;  %v8647_v19 = vunpack.i.h.bf16 %v10522_v4 }
 0x2aa   :  { %v916_v3 = vpop.f32.mrf.mxu3  ;;  %1239 = vmatpush.msra.mxu0 %v1216_v23 }
 0x2ab   :  { %v8778_v58 = vpack.i.bf16 %v916_v3, %v10441_v21  ;;  %v1233_v21 = vld [vmem:[%s14870_s2 + $0xe8] sm:$0xff] }
 0x2ac   :  { %1267 = vmatpush.msrb.mxu1 %v1233_v21  ;;  %1240 = vmatpush.msra.mxu0 %v1215_v60  ;;  %v8646_v21 = vunpack.i.l.bf16 %v10522_v4 }
 0x2ad   :  { %8769 = vrot.lane.b32.xlu1 %v8768_v7, %s9564_s1  ;;  %8754 = vrot.lane.b32.xlu0 %v8753_v25, %s9560_s28 }
 0x2ae   :  { %8764 = vrot.lane.b32.xlu2 %v8763_v8, %s9565_s15  ;;  %1268 = vmatpush.msrb.mxu1 %v1232_v59 }
 0x2af   :  { %1241 = vmatpush.msra.mxu0 %v1214_v9 }
 0x2b0   :  { %1269 = vmatpush.msrb.mxu1 %v1231_v62 }
 0x2b1   :  { %1242 = vmatpush.msra.mxu0 %v1213_v24 }
 0x2b2   :  { %1270 = vmatpush.msrb.mxu1 %v1230_v22 }
 0x2b3   :  { %1243 = vmatpush.msra.mxu0 %v1212_v12 }
 0x2b4   :  { %1271 = vmatpush.msrb.mxu1 %v1229_v16 }
 0x2b5   :  { %8779 = vrot.lane.b32.xlu0 %v8778_v58, %s9565_s15  ;;  %1244 = vmatpush.msra.mxu0 %v1211_v11 }
 0x2b6   :  { %8774 = vrot.lane.b32.xlu2 %v8773_v10, %s9566_s16  ;;  %1272 = vmatpush.msrb.mxu1 %v1228_v27 }
 0x2b7   :  { %1245 = vmatpush.msra.mxu0 %v1210_v29 }
 0x2b8   :  { %1273 = vmatpush.msrb.mxu1 %v1227_v38 }
 0x2b9   :  { %1246 = vmatpush.msra.mxu0 %v1209_v35 }
 0x2ba   :  { %1274 = vmatpush.msrb.mxu1 %v1226_v45 }
 0x2bb   :  { %1247 = vmatpush.msra.mxu0 %v1208_v31 }
 0x2bc   :  { %1275 = vmatpush.msrb.mxu1 %v1225_v47 }
 0x2bd   :  { %1248 = vmatpush.msra.mxu0 %v1207_v41 }
 0x2be   :  { %1276 = vmatpush.msrb.mxu1 %v1224_v32 }
 0x2bf   :  { %1249 = vmatpush.msra.mxu0 %v1206_v54 }
 0x2c0   :  { %1277 = vmatpush.msrb.mxu1 %v1223_v44 }
 0x2c1   :  { %1250 = vmatpush.msra.mxu0 %v1205_v51  ;;  %v8652_v51 = vunpack.i.h.bf16 %v10556_v26 }
 0x2c2   :  { %1278 = vmatpush.msrb.mxu1 %v1222_v55 }
 0x2c3   :  { %1251 = vmatpush.msra.mxu0 %v1204_v57 }
 0x2c4   :  { %1279 = vmatpush.msrb.mxu1 %v1221_v52  ;;  %v8651_v52 = vunpack.i.l.bf16 %v10556_v26 }
 0x2c6   :  { %1280 = vmatpush.msrb.mxu1 %v1220_v50 }
 0x2d1   :  { %v10548_v42 = vpop.permute.xlu2 %8679 }
 0x2d2   :  { %v8682_v9 = vunpack.i.h.bf16 %v10548_v42  ;;  %v8681_v16 = vunpack.i.l.bf16 %v10548_v42 }
 0x2d9   :  { %v10582_v56 = vpop.permute.xlu2 %8689 }
 0x2da   :  { %v8692_v57 = vunpack.i.h.bf16 %v10582_v56  ;;  %v8691_v50 = vunpack.i.l.bf16 %v10582_v56 }
 0x2dc   :  { %v1178_v56 = vsel %vm186_vm1, %v10437_v14, %v8692_v57 }
 0x2dd   :  { %v8660_v37 = vpop.permute.xlu0 %8659 }
 0x2de   :  { %v8662_v0 = vunpack.i.h.bf16 %v8660_v37  ;;  %v8661_v36 = vunpack.i.l.bf16 %v8660_v37 }
 0x2e0   :  { %v1176_v8 = vsel %vm186_vm1, %v10425_v18, %v8662_v0  ;;  %v1143_v3 = vsel %vm186_vm1, %v10317_v49, %v8661_v36 }
 0x2e3   :  { %v8670_v53 = vpop.permute.xlu1 %8669 }
 0x2e4   :  { %v8672_v10 = vunpack.i.h.bf16 %v8670_v53  ;;  %v8671_v6 = vunpack.i.l.bf16 %v8670_v53 }
 0x2e5   :  { %v8665_v48 = vpop.permute.xlu0 %8664 }
 0x2e6   :  { %v8667_v39 = vunpack.i.h.bf16 %v8665_v48  ;;  %v8666_v1 = vunpack.i.l.bf16 %v8665_v48 }
 0x2e8   :  { %v8715_v46 = vpop.permute.xlu2 %8714  ;;  %v1148_v5 = vsel %vm1147_vm5, %v1143_v3, %v8666_v1  ;;  %v1180_v58 = vsel %vm1147_vm5, %v1176_v8, %v8667_v39 }
 0x2e9   :  { %v1152_v20 = vsel %vm69_vm0, %v1148_v5, %v8671_v6  ;;  %v1184_v17 = vsel %vm69_vm0, %v1180_v58, %v8672_v10  ;;  %v8717_v22 = vunpack.i.h.bf16 %v8715_v46  ;;  %v8716_v24 = vunpack.i.l.bf16 %v8715_v46 }
 0x2ea   :  { %v1157_v60 = vsel %vm1156_vm6, %v1152_v20, %v8646_v21  ;;  %v1188_v62 = vsel %vm1156_vm6, %v1184_v17, %v8647_v19 }
 0x2eb   :  { %v8675_v43 = vpop.permute.xlu1 %8674  ;;  %v1162_v29 = vsel %vm1161_vm7, %v1157_v60, %v8716_v24  ;;  %v1192_v45 = vsel %vm1161_vm7, %v1188_v62, %v8717_v22 }
 0x2ec   :  { %v8677_v18 = vunpack.i.h.bf16 %v8675_v43  ;;  %v8676_v23 = vunpack.i.l.bf16 %v8675_v43 }
 0x2ee   :  { %v8685_v33 = vpop.permute.xlu0 %8684  ;;  %v1177_v12 = vsel %vm186_vm1, %v10431_v15, %v8677_v18  ;;  %v1144_v4 = vsel %vm186_vm1, %v10344_v34, %v8676_v23  ;;  %v8657_v23 = vunpack.i.h.bf16 %v10520_v40 }
 0x2ef   :  { %v8687_v35 = vunpack.i.h.bf16 %v8685_v33  ;;  %v8686_v47 = vunpack.i.l.bf16 %v8685_v33  ;;  %v1149_v15 = vsel %vm1147_vm5, %v1144_v4, %v8681_v16  ;;  %v1181_v34 = vsel %vm1147_vm5, %v1177_v12, %v8682_v9 }
 0x2f0   :  { %v8720_v63 = vpop.permute.xlu2 %8719 }
 0x2f1   :  { %v8722_v49 = vunpack.i.h.bf16 %v8720_v63  ;;  %v8721_v59 = vunpack.i.l.bf16 %v8720_v63  ;;  %v1153_v44 = vsel %vm69_vm0, %v1149_v15, %v8686_v47  ;;  %v1185_v54 = vsel %vm69_vm0, %v1181_v34, %v8687_v35 }
 0x2f2   :  { %v1158_v39 = vsel %vm1156_vm6, %v1153_v44, %v8651_v52  ;;  %v1189_v1 = vsel %vm1156_vm6, %v1185_v54, %v8652_v51 }
 0x2f3   :  { %v1167_v42 = vsel %vm1166_vm8, %v1162_v29, %v8721_v59  ;;  %v1196_v48 = vsel %vm1166_vm8, %v1192_v45, %v8722_v49  ;;  %v8656_v49 = vunpack.i.l.bf16 %v10520_v40 }
 0x2f6   :  { %v10596_v61 = vpop.permute.xlu0 %8694  ;;  %v10598_v25 = vpop.permute.xlu1 %8699 }
 0x2f7   :  { %v8697_v33 = vunpack.i.h.bf16 %v10596_v61  ;;  %v8696_v46 = vunpack.i.l.bf16 %v10596_v61  ;;  %v1145_v61 = vsel %vm186_vm1, %v10371_v28, %v8691_v50  ;;  %v8702_v19 = vunpack.i.h.bf16 %v10598_v25 }
 0x2f8   :  { %v8730_v2 = vpop.permute.xlu2 %8729  ;;  %v8701_v21 = vunpack.i.l.bf16 %v10598_v25 }
 0x2f9   :  { %v8732_v55 = vunpack.i.h.bf16 %v8730_v2  ;;  %v8731_v53 = vunpack.i.l.bf16 %v8730_v2  ;;  %v1150_v6 = vsel %vm1147_vm5, %v1145_v61, %v8696_v46  ;;  %v1182_v20 = vsel %vm1147_vm5, %v1178_v56, %v8697_v33 }
 0x2fa   :  { %v1154_v28 = vsel %vm69_vm0, %v1150_v6, %v8701_v21  ;;  %v1186_v18 = vsel %vm69_vm0, %v1182_v20, %v8702_v19 }
 0x2fb   :  { %v1163_v26 = vsel %vm1161_vm7, %v1158_v39, %v8731_v53  ;;  %v1193_v5 = vsel %vm1161_vm7, %v1189_v1, %v8732_v55  ;;  %v1159_v12 = vsel %vm1156_vm6, %v1154_v28, %v8656_v49  ;;  %v1190_v4 = vsel %vm1156_vm6, %v1186_v18, %v8657_v23 }
 0x2fe   :  { %v10600_v7 = vpop.permute.xlu0 %8704  ;;  %v10620_v27 = vpop.permute.xlu1 %8709 }
 0x2ff   :  { %v8707_v62 = vunpack.i.h.bf16 %v10600_v7  ;;  %v8706_v9 = vunpack.i.l.bf16 %v10600_v7  ;;  %v8711_v15 = vunpack.i.l.bf16 %v10620_v27 }
 0x300   :  { %v10630_v41 = vpop.permute.xlu2 %8734 }
 0x301   :  { %v1179_v7 = vsel %vm186_vm1, %v10443_v13, %v8707_v62  ;;  %v1146_v35 = vsel %vm186_vm1, %v10386_v30, %v8706_v9  ;;  %v8737_v13 = vunpack.i.h.bf16 %v10630_v41  ;;  %v8736_v44 = vunpack.i.l.bf16 %v10630_v41 }
 0x302   :  { %v1151_v34 = vsel %vm1147_vm5, %v1146_v35, %v8711_v15 }
 0x303   :  { %v1155_v51 = vsel %vm69_vm0, %v1151_v34, %v8736_v44 }
 0x307   :  { %v8725_v37 = vpop.permute.xlu0 %8724 }
 0x308   :  { %v8727_v11 = vunpack.i.h.bf16 %v8725_v37  ;;  %v8726_v38 = vunpack.i.l.bf16 %v8725_v37  ;;  %v8765_v14 = vpop.permute.xlu2 %8764 }
 0x309   :  { %v8767_v37 = vunpack.i.h.bf16 %v8765_v14 }
 0x30a   :  { %v1172_v31 = vsel %vm1171_vm9, %v1167_v42, %v8726_v38  ;;  %v1200_v32 = vsel %vm1171_vm9, %v1196_v48, %v8727_v11  ;;  %v8766_v11 = vunpack.i.l.bf16 %v8765_v14  ;;  %v8712_v48 = vunpack.i.h.bf16 %v10620_v27 }
 0x30b   :  { %1252 = vmatmul.f32.vlgmr.msra.gmra.mxu0 %v1172_v31  ;;  %1281 = vmatmul.f32.vlgmr.msrb.gmra.mxu1 %v1200_v32 }
 0x30c   :  { %v1183_v31 = vsel %vm1147_vm5, %v1179_v7, %v8712_v48 }
 0x30d   :  { %v1187_v53 = vsel %vm69_vm0, %v1183_v31, %v8737_v13 }
 0x30f   :  { %v8745_v43 = vpop.permute.xlu1 %8744  ;;  %v8740_v63 = vpop.permute.xlu0 %8739 }
 0x310   :  { %v8742_v0 = vunpack.i.h.bf16 %v8740_v63  ;;  %v8741_v36 = vunpack.i.l.bf16 %v8740_v63  ;;  %v8747_v8 = vunpack.i.h.bf16 %v8745_v43  ;;  %v8746_v3 = vunpack.i.l.bf16 %v8745_v43  ;;  %v8775_v57 = vpop.permute.xlu2 %8774 }
 0x311   :  { %v8777_v63 = vunpack.i.h.bf16 %v8775_v57  ;;  %v8776_v41 = vunpack.i.l.bf16 %v8775_v57 }
 0x312   :  { %v1168_v58 = vsel %vm1166_vm8, %v1163_v26, %v8741_v36  ;;  %v1197_v10 = vsel %vm1166_vm8, %v1193_v5, %v8742_v0 }
 0x313   :  { %v1173_v17 = vsel %vm1171_vm9, %v1168_v58, %v8746_v3  ;;  %v1201_v2 = vsel %vm1171_vm9, %v1197_v10, %v8747_v8 }
 0x314   :  { %1255 = vmatmul.f32.gmra.mxu0 %v1173_v17  ;;  %1284 = vmatmul.f32.gmra.mxu1 %v1201_v2 }
 0x317   :  { %v8760_v59 = vpop.permute.xlu1 %8759  ;;  %v8750_v60 = vpop.permute.xlu0 %8749 }
 0x318   :  { %v8752_v22 = vunpack.i.h.bf16 %v8750_v60  ;;  %v8751_v24 = vunpack.i.l.bf16 %v8750_v60  ;;  %v8762_v25 = vunpack.i.h.bf16 %v8760_v59  ;;  %v8761_v16 = vunpack.i.l.bf16 %v8760_v59 }
 0x31a   :  { %v1164_v38 = vsel %vm1161_vm7, %v1159_v12, %v8751_v24  ;;  %v1194_v40 = vsel %vm1161_vm7, %v1190_v4, %v8752_v22 }
 0x31b   :  { %v1169_v29 = vsel %vm1166_vm8, %v1164_v38, %v8761_v16  ;;  %v1198_v45 = vsel %vm1166_vm8, %v1194_v40, %v8762_v25 }
 0x31c   :  { %v1174_v47 = vsel %vm1171_vm9, %v1169_v29, %v8766_v11  ;;  %v1202_v42 = vsel %vm1171_vm9, %v1198_v45, %v8767_v37 }
 0x31d   :  { %1258 = vmatmul.f32.gmra.mxu0 %v1174_v47  ;;  %1287 = vmatmul.f32.gmra.mxu1 %v1202_v42 }
 0x31f   :  { %v8755_v32 = vpop.permute.xlu0 %8754  ;;  %v8770_v55 = vpop.permute.xlu1 %8769 }
 0x320   :  { %v8757_v30 = vunpack.i.h.bf16 %v8755_v32  ;;  %v8756_v54 = vunpack.i.l.bf16 %v8755_v32  ;;  %v8772_v50 = vunpack.i.h.bf16 %v8770_v55  ;;  %v8771_v33 = vunpack.i.l.bf16 %v8770_v55 }
 0x322   :  { %v1160_v27 = vsel %vm1156_vm6, %v1155_v51, %v8756_v54  ;;  %v1191_v52 = vsel %vm1156_vm6, %v1187_v53, %v8757_v30 }
 0x323   :  { %v1165_v46 = vsel %vm1161_vm7, %v1160_v27, %v8771_v33  ;;  %v1195_v43 = vsel %vm1161_vm7, %v1191_v52, %v8772_v50 }
 0x324   :  { %v1170_v1 = vsel %vm1166_vm8, %v1165_v46, %v8776_v41  ;;  %v1199_v8 = vsel %vm1166_vm8, %v1195_v43, %v8777_v63  ;;  %v9325_v63 = vld [vmem:[%s14868_s7 + $0x2] ss:$0 sm:$0xff] }
 0x327   :  { %v8780_v0 = vpop.permute.xlu0 %8779 }
 0x328   :  { %v8782_v36 = vunpack.i.h.bf16 %v8780_v0  ;;  %v8781_v39 = vunpack.i.l.bf16 %v8780_v0 }
 0x32a   :  { %v1175_v3 = vsel %vm1171_vm9, %v1170_v1, %v8781_v39  ;;  %v1203_v26 = vsel %vm1171_vm9, %v1199_v8, %v8782_v36  ;;  %v9326_v8 = vld [vmem:[%s14868_s7 + $0x3] ss:$0 sm:$0xff] }
 0x32b   :  { %1261 = vmatmul.f32.gmra.mxu0 %v1175_v3  ;;  %1290 = vmatmul.f32.gmra.mxu1 %v1203_v26 }
 0x388   :  { %v1253_v5 = vpop.f32.mrf.mxu0  ;;  %v1282_v56 = vpop.f32.mrf.mxu1 }
 0x389   :  { %v1283_v17 = vadd.f32 %v1282_v56, %v1253_v5 }
 0x38b   :  { %v1298_v21 = vsel %vm186_vm1, %v1283_v17, 0.0 }
 0x391   :  { %v1256_v61 = vpop.f32.mrf.mxu0  ;;  %v1285_v58 = vpop.f32.mrf.mxu1 }
 0x392   :  { %v1286_v20 = vadd.f32 %v1285_v58, %v1256_v61 }
 0x394   :  { %v1299_v19 = vsel %vm186_vm1, %v1286_v20, 0.0 }
 0x395   :  { %v1300_v28 = vadd.f32 %v1299_v19, %v1298_v21 }
 0x39a   :  { %v1259_v10 = vpop.f32.mrf.mxu0  ;;  %v1288_v6 = vpop.f32.mrf.mxu1 }
 0x39b   :  { %v1289_v2 = vadd.f32 %v1288_v6, %v1259_v10 }
 0x39d   :  { %v1301_v14 = vsel %vm186_vm1, %v1289_v2, 0.0 }
 0x39e   :  { %v1302_v59 = vadd.f32 %v1301_v14, %v1300_v28 }
 0x3a8   :  { %v1262_v18 = vpop.f32.mrf.mxu0  ;;  %v1291_v23 = vpop.f32.mrf.mxu1 }
 0x3a9   :  { %v1292_v49 = vadd.f32 %v1291_v23, %v1262_v18  ;;  %v10727_v23 = vld [vmem:[%s14871_s11] sm:$0xff] }
 0x3ab   :  { %v1303_v60 = vsel %vm186_vm1, %v1292_v49, 0.0 }
 0x3ac   :  { %v1304_v62 = vadd.f32 %v1303_v60, %v1302_v59  ;;  %v10737_v59 = vld [vmem:[%s14871_s11 + $0x40] sm:$0xff]  ;;  %v10742_v60 = vld [vmem:[%s14871_s11 + $0x58] sm:$0xff] }
 0x3ae   :  { %v1305_v9 = vrot.slane %v1304_v62, 4 }
 0x3b0   :  { %v1306_v22 = vadd.f32 %v1305_v9, %v1304_v62  ;;  %v10755_v62 = vld [vmem:[%s14871_s11 + $0x8] sm:$0xff] }
 0x3b1   :  { %v10760_v9 = vld [vmem:[%s14871_s11 + $0x28] sm:$0xff] }
 0x3b2   :  { %v1307_v24 = vrot.slane %v1306_v22, 2 }
 0x3b4   :  { %v1308_v25 = vadd.f32 %v1307_v24, %v1306_v22  ;;  %v10765_v22 = vld [vmem:[%s14871_s11 + $0x48] sm:$0xff]  ;;  %v10770_v24 = vld [vmem:[%s14871_s11 + $0x60] sm:$0xff] }
 0x3b6   :  { %v1309_v16 = vrot.slane %v1308_v25, 1 }
 0x3b8   :  { %v1310_v12 = vadd.f32 %v1309_v16, %v1308_v25  ;;  %v10783_v25 = vld [vmem:[%s14871_s11 + $0x10] sm:$0xff] }
 0x3b9   :  { %v10788_v16 = vld [vmem:[%s14871_s11 + $0x30] sm:$0xff] }
 0x3ba   :  { %v1311_v4 = vmul.f32 0.03125, %v1310_v12  ;;  %v10793_v12 = vld [vmem:[%s14871_s11 + $0x50] sm:$0xff] }
 0x3bc   :  { %v1312_v37 = vsub.f32 %v1283_v17, %v1311_v4  ;;  %v1313_v11 = vsub.f32 %v1286_v20, %v1311_v4  ;;  %v1314_v38 = vsub.f32 %v1289_v2, %v1311_v4  ;;  %v1315_v40 = vsub.f32 %v1292_v49, %v1311_v4  ;;  %v10732_v49 = vld [vmem:[%s14871_s11 + $0x20] sm:$0xff]  ;;  %v10798_v4 = vld [vmem:[%s14871_s11 + $0x68] sm:$0xff] }
 0x3be   :  { %v1316_v29 = vmul.f32 %v1312_v37, %v1312_v37  ;;  %v1317_v45 = vmul.f32 %v1313_v11, %v1313_v11  ;;  %v1318_v7 = vmul.f32 %v1314_v38, %v1314_v38  ;;  %v1319_v35 = vmul.f32 %v1315_v40, %v1315_v40 }
 0x3c0   :  { %v1320_v47 = vsel %vm186_vm1, %v1316_v29, 0.0  ;;  %v1321_v42 = vsel %vm186_vm1, %v1317_v45, 0.0  ;;  %v1323_v15 = vsel %vm186_vm1, %v1318_v7, 0.0  ;;  %v1325_v31 = vsel %vm186_vm1, %v1319_v35, 0.0  ;;  %v10839_v29 = vld [vmem:[%s14871_s11 + $0x80] sm:$0xff]  ;;  %v10849_v7 = vld [vmem:[%s14871_s11 + $0x78] sm:$0xff] }
 0x3c1   :  { %v1322_v48 = vadd.f32 %v1321_v42, %v1320_v47  ;;  %v10844_v45 = vld [vmem:[%s14871_s11 + $0xa0] sm:$0xff]  ;;  %v10854_v35 = vld [vmem:[%s14871_s11 + $0xc8] sm:$0xff] }
 0x3c2   :  { %v10867_v47 = vld [vmem:[%s14871_s11 + $0x88] sm:$0xff] }
 0x3c3   :  { %v1324_v34 = vadd.f32 %v1323_v15, %v1322_v48  ;;  %v10872_v42 = vld [vmem:[%s14871_s11 + $0xa8] sm:$0xff]  ;;  %v10877_v48 = vld [vmem:[%s14871_s11 + $0xe0] sm:$0xff]  ;;  %v10882_v15 = vld [vmem:[%s14871_s11 + $0xd0] sm:$0xff] }
 0x3c5   :  { %v1326_v32 = vadd.f32 %v1325_v31, %v1324_v34  ;;  %v10895_v34 = vld [vmem:[%s14871_s11 + $0xb0] sm:$0xff] }
 0x3c6   :  { %v10900_v31 = vld [vmem:[%s14871_s11 + $0x90] sm:$0xff] }
 0x3c7   :  { %v1327_v13 = vrot.slane %v1326_v32, 4 }
 0x3c9   :  { %v1328_v44 = vadd.f32 %v1327_v13, %v1326_v32  ;;  %v10905_v32 = vld [vmem:[%s14871_s11 + $0xe8] sm:$0xff]  ;;  %v10910_v13 = vld [vmem:[%s14871_s11 + $0xd8] sm:$0xff] }
 0x3cb   :  { %v1329_v30 = vrot.slane %v1328_v44, 2 }
 0x3cd   :  { %v1330_v54 = vadd.f32 %v1329_v30, %v1328_v44  ;;  %v10923_v44 = vld [vmem:[%s14871_s11 + $0xb8] sm:$0xff] }
 0x3ce   :  { %v10928_v30 = vld [vmem:[%s14871_s11 + $0x98] sm:$0xff] }
 0x3cf   :  { %v1331_v55 = vrot.slane %v1330_v54, 1 }
 0x3d1   :  { %v1332_v53 = vadd.f32 %v1331_v55, %v1330_v54  ;;  %v10933_v54 = vld [vmem:[%s14871_s11 + $0xf0] sm:$0xff]  ;;  %v10944_v55 = vld [vmem:[%s14871_s11 + $0xf8] sm:$0xff] }
 0x3d3   :  { %v1333_v51 = vmul.f32 0.03125, %v1332_v53 }
 0x3d5   :  { %v1334_v27 = vadd.f32 1e-05, %v1333_v51 }
 0x3d7   :  { %9345 = vrsqrt.f32 %v1334_v27  ;;  %vm1341_vm11 = vweird.f32 %v1334_v27 }
 0x3dd   :  { %v9346_v52 = vpop.eup %9345 }
 0x3de   :  { %v1336_v57 = vmul.f32 %v9346_v52, %v1334_v27  ;;  %vm1342_vm10 = vweird.f32 %v9346_v52 }
 0x3df   :  { %vm1343_vm12 = vmor %vm1341_vm11, %vm1342_vm10 }
 0x3e0   :  { %v1337_v50 = vmul.f32 %v9346_v52, %v1336_v57 }
 0x3e2   :  { %v1338_v33 = vmul.f32 0.5, %v1337_v50 }
 0x3e4   :  { %v1339_v46 = vsub.f32 1.5, %v1338_v33 }
 0x3e6   :  { %v1340_v43 = vmul.f32 %v9346_v52, %v1339_v46 }
 0x3e8   :  { %v1344_v41 = vsel %vm1343_vm12, %v9346_v52, %v1340_v43 }
 0x3e9   :  { %v1345_v0 = vmul.f32 %v1344_v41, %v1312_v37  ;;  %v1346_v36 = vmul.f32 %v1344_v41, %v1313_v11  ;;  %v1347_v39 = vmul.f32 %v1344_v41, %v1314_v38  ;;  %v1348_v1 = vmul.f32 %v1344_v41, %v1315_v40  ;;  %v10811_v37 = vld [vmem:[%s14871_s11 + $0x18] sm:$0xff]  ;;  %v10821_v38 = vld [vmem:[%s14871_s11 + $0x70] sm:$0xff]  ;;  %v10826_v40 = vld [vmem:[%s14871_s11 + $0xc0] sm:$0xff] }
 0x3ea   :  { %v10816_v11 = vld [vmem:[%s14871_s11 + $0x38] sm:$0xff] }
 0x3eb   :  { %v1352_v3 = vmul.f32 %v9325_v63, %v1345_v0  ;;  %v1353_v26 = vmul.f32 %v9325_v63, %v1346_v36  ;;  %v1354_v5 = vmul.f32 %v9325_v63, %v1347_v39  ;;  %v1355_v56 = vmul.f32 %v9325_v63, %v1348_v1  ;;  %v10957_v36 = vld [vmem:[%s14871_s11 + $0x100] sm:$0xff] }
 0x3ed   :  { %v10704_v61 = vadd.f32 %v9326_v8, %v1353_v26  ;;  %v10706_v58 = vadd.f32 %v9326_v8, %v1354_v5  ;;  %v10708_v10 = vadd.f32 %v9326_v8, %v1355_v56  ;;  %v10710_v6 = vadd.f32 %v9326_v8, %v1352_v3  ;;  %v10967_v5 = vld [vmem:[%s14871_s11 + $0x108] sm:$0xff] }
 0x3ef   :  { %v14882_v20 = vmax.f32 %v10706_v58, 0.0  ;;  %v14881_v17 = vmax.f32 %v10708_v10, 0.0  ;;  %v14884_v2 = vmax.f32 %v10704_v61, 0.0  ;;  %v14883_v21 = vmax.f32 %v10710_v6, 0.0 }
 0x3f1   :  { %v1374_v19 = vmax.f32 %v14881_v17, 0.0  ;;  %v1373_v14 = vmax.f32 %v14882_v20, 0.0  ;;  %v1372_v28 = vmax.f32 %v14884_v2, 0.0  ;;  %v1371_v18 = vmax.f32 %v14883_v21, 0.0 }
 0x3f3   :  { %1403 = vmatpush.msrb.mxu2 %v1374_v19  ;;  %1449 = vmatpush.msrb.mxu3 %v1374_v19 }
 0x3f4   :  { %1495 = vmatpush.msrb.mxu0 %v1374_v19  ;;  %8621 = vmatpush.msra.mxu1 %v1374_v19 }
 0x3f5   :  { %1404 = vmatpush.msrb.mxu2 %v1373_v14  ;;  %1450 = vmatpush.msrb.mxu3 %v1373_v14 }
 0x3f6   :  { %1496 = vmatpush.msrb.mxu0 %v1373_v14  ;;  %8622 = vmatpush.msra.mxu1 %v1373_v14 }
 0x3f7   :  { %1405 = vmatpush.msrb.mxu2 %v1372_v28  ;;  %1451 = vmatpush.msrb.mxu3 %v1372_v28 }
 0x3f8   :  { %1497 = vmatpush.msrb.mxu0 %v1372_v28  ;;  %8623 = vmatpush.msra.mxu1 %v1372_v28 }
 0x3f9   :  { %1406 = vmatpush.msrb.mxu2 %v1371_v18  ;;  %1452 = vmatpush.msrb.mxu3 %v1371_v18 }
 0x3fa   :  { %1498 = vmatpush.msrb.mxu0 %v1371_v18  ;;  %8624 = vmatpush.msra.mxu1 %v1371_v18 }
 0x3fb   :  { %7877 = vmatmul.msk.f32.vlgmr.msrb.gmra.mxu2 %vm1147_vm5, %v10727_v23  ;;  %7885 = vmatmul.msk.f32.vlgmr.msrb.gmra.mxu3 %vm1147_vm5, %v10732_v49 }
 0x3fc   :  { %7893 = vmatmul.msk.f32.vlgmr.msrb.gmra.mxu0 %vm1147_vm5, %v10737_v59  ;;  %7896 = vmatmul.msk.f32.vlgmr.msra.gmra.mxu1 %vm1147_vm5, %v10742_v60 }
 0x3fd   :  { %1541 = vmatpush.msrb.mxu1 %v1374_v19  ;;  %1587 = vmatpush.msra.mxu2 %v1374_v19 }
 0x3fe   :  { %1633 = vmatpush.msra.mxu3 %v1374_v19  ;;  %1679 = vmatpush.msra.mxu0 %v1374_v19 }
 0x3ff   :  { %1542 = vmatpush.msrb.mxu1 %v1373_v14  ;;  %1588 = vmatpush.msra.mxu2 %v1373_v14 }
 0x400   :  { %1634 = vmatpush.msra.mxu3 %v1373_v14  ;;  %1680 = vmatpush.msra.mxu0 %v1373_v14 }
 0x401   :  { %1543 = vmatpush.msrb.mxu1 %v1372_v28  ;;  %1589 = vmatpush.msra.mxu2 %v1372_v28 }
 0x402   :  { %1635 = vmatpush.msra.mxu3 %v1372_v28  ;;  %1681 = vmatpush.msra.mxu0 %v1372_v28 }
 0x403   :  { %1544 = vmatpush.msrb.mxu1 %v1371_v18  ;;  %1590 = vmatpush.msra.mxu2 %v1371_v18 }
 0x404   :  { %1636 = vmatpush.msra.mxu3 %v1371_v18  ;;  %1682 = vmatpush.msra.mxu0 %v1371_v18 }
 0x405   :  { %1725 = vmatpush.msra.mxu1 %v1374_v19  ;;  %1771 = vmatpush.msrb.mxu2 %v1374_v19 }
 0x406   :  { %7878 = vmatmul.msk.f32.gmra.mxu2 %vm1147_vm5, %v10755_v62  ;;  %7886 = vmatmul.msk.f32.gmra.mxu3 %vm1147_vm5, %v10760_v9 }
 0x407   :  { %7894 = vmatmul.msk.f32.gmra.mxu0 %vm1147_vm5, %v10765_v22  ;;  %7901 = vmatmul.msk.f32.vlgmr.msrb.gmra.mxu1 %vm1147_vm5, %v10770_v24 }
 0x408   :  { %1726 = vmatpush.msra.mxu1 %v1373_v14  ;;  %1772 = vmatpush.msrb.mxu2 %v1373_v14  ;;  %v10976_v14 = vld [vmem:[%s14871_s11 + $0x110] sm:$0xff] }
 0x409   :  { %14889 = vst [vmem:[#allocation2_spill] sm:$0xff] %v10976_v14 }
 0x40a   :  { %1727 = vmatpush.msra.mxu1 %v1372_v28  ;;  %1773 = vmatpush.msrb.mxu2 %v1372_v28 }
 0x40c   :  { %1728 = vmatpush.msra.mxu1 %v1371_v18  ;;  %1774 = vmatpush.msrb.mxu2 %v1371_v18 }
 0x40e   :  { %7879 = vmatmul.msk.f32.gmra.mxu2 %vm1147_vm5, %v10783_v25  ;;  %7887 = vmatmul.msk.f32.gmra.mxu3 %vm1147_vm5, %v10788_v16 }
 0x40f   :  { %7895 = vmatmul.msk.f32.gmra.mxu0 %vm1147_vm5, %v10793_v12  ;;  %7902 = vmatmul.msk.f32.gmra.mxu1 %vm1147_vm5, %v10798_v4 }
 0x416   :  { %7880 = vmatmul.msk.f32.gmra.mxu2 %vm1147_vm5, %v10811_v37  ;;  %7888 = vmatmul.msk.f32.gmra.mxu3 %vm1147_vm5, %v10816_v11 }
 0x417   :  { %7903 = vmatmul.msk.f32.gmra.mxu1 %vm1147_vm5, %v10821_v38  ;;  %7925 = vmatmul.msk.f32.vlgmr.msra.gmra.mxu0 %vm1147_vm5, %v10826_v40 }
 0x41e   :  { %7909 = vmatmul.msk.f32.vlgmr.msra.gmra.mxu2 %vm1147_vm5, %v10839_v29  ;;  %7917 = vmatmul.msk.f32.vlgmr.msra.gmra.mxu3 %vm1147_vm5, %v10844_v45 }
 0x41f   :  { %7904 = vmatmul.msk.f32.gmra.mxu1 %vm1147_vm5, %v10849_v7  ;;  %7926 = vmatmul.msk.f32.gmra.mxu0 %vm1147_vm5, %v10854_v35 }
 0x426   :  { %7910 = vmatmul.msk.f32.gmra.mxu2 %vm1147_vm5, %v10867_v47  ;;  %7918 = vmatmul.msk.f32.gmra.mxu3 %vm1147_vm5, %v10872_v42 }
 0x427   :  { %7933 = vmatmul.msk.f32.vlgmr.msra.gmra.mxu1 %vm1147_vm5, %v10877_v48  ;;  %7927 = vmatmul.msk.f32.gmra.mxu0 %vm1147_vm5, %v10882_v15 }
 0x42e   :  { %7919 = vmatmul.msk.f32.gmra.mxu3 %vm1147_vm5, %v10895_v34  ;;  %7911 = vmatmul.msk.f32.gmra.mxu2 %vm1147_vm5, %v10900_v31 }
 0x42f   :  { %7934 = vmatmul.msk.f32.gmra.mxu1 %vm1147_vm5, %v10905_v32  ;;  %7928 = vmatmul.msk.f32.gmra.mxu0 %vm1147_vm5, %v10910_v13 }
 0x436   :  { %7920 = vmatmul.msk.f32.gmra.mxu3 %vm1147_vm5, %v10923_v44  ;;  %7912 = vmatmul.msk.f32.gmra.mxu2 %vm1147_vm5, %v10928_v30 }
 0x437   :  { %7935 = vmatmul.msk.f32.gmra.mxu1 %vm1147_vm5, %v10933_v54 }
 0x43e   :  { %7941 = vmatmul.msk.f32.vlgmr.msrb.gmra.mxu2 %vm1147_vm5, %v10957_v36 }
 0x43f   :  { %7936 = vmatmul.msk.f32.gmra.mxu1 %vm1147_vm5, %v10944_v55 }
 0x446   :  { %7942 = vmatmul.msk.f32.gmra.mxu2 %vm1147_vm5, %v10967_v5 }
 0x44e   :  { %7943 = vmatmul.msk.f32.gmra.mxu2 %vm1147_vm5, %v10976_v14 }
 0x479   :  { %v1500_v53 = vpop.f32.mrf.mxu0  ;;  %v1509_v51 = vpop.f32.mrf.mxu1 }
 0x47e   :  { %v10948_v27 = vpop.f32.mrf.mxu2  ;;  %v1454_v52 = vpop.f32.mrf.mxu3 }
 0x484   :  { %v1503_v57 = vpop.f32.mrf.mxu0  ;;  %v1546_v50 = vpop.f32.mrf.mxu1 }
 0x485   :  { %v8783_v33 = vpack.i.bf16 %v1503_v57, %v1500_v53 }
 0x487   :  { %8784 = vrot.lane.b32.xlu2 %v8783_v33, %s9562_s29 }
 0x489   :  { %v10951_v46 = vpop.f32.mrf.mxu2  ;;  %v1457_v43 = vpop.f32.mrf.mxu3 }
 0x48a   :  { %v8788_v63 = vpack.i.bf16 %v1457_v43, %v1454_v52 }
 0x48c   :  { %v1506_v41 = vpop.f32.mrf.mxu0  ;;  %v1549_v0 = vpop.f32.mrf.mxu1  ;;  %8789 = vrot.lane.b32.xlu1 %v8788_v63, %s9561_s10 }
 0x48d   :  { %v8793_v39 = vpack.i.bf16 %v1549_v0, %v1546_v50  ;;  %v10984_v50 = vld [vmem:[%s14871_s11 + $0x118] sm:$0xff]  ;;  %v8818_v33 = vpack.i.bf16 %v1509_v51, %v1506_v41 }
 0x48e   :  { %14890 = vst [vmem:[#allocation3_spill] sm:$0xff] %v10984_v50  ;;  %7944 = vmatmul.msk.f32.gmra.mxu2 %vm1147_vm5, %v10984_v50 }
 0x48f   :  { %8794 = vrot.lane.b32.xlu0 %v8793_v39, %s9563_s30 }
 0x491   :  { %v10962_v1 = vpop.f32.mrf.mxu2  ;;  %v1460_v8 = vpop.f32.mrf.mxu3 }
 0x494   :  { %v1552_v3 = vpop.f32.mrf.mxu1  ;;  %v1684_v26 = vpop.f32.mrf.mxu0 }
 0x499   :  { %v10971_v56 = vpop.f32.mrf.mxu2  ;;  %v1463_v19 = vpop.f32.mrf.mxu3 }
 0x49a   :  { %v8813_v20 = vpack.i.bf16 %v1463_v19, %v1460_v8  ;;  %v1940_v19 = vld [vmem:[%s14872_s3 + $0x60] sm:$0xff] }
 0x49c   :  { %v1555_v28 = vpop.f32.mrf.mxu1  ;;  %v1687_v18 = vpop.f32.mrf.mxu0 }
 0x49d   :  { %v8798_v53 = vpack.i.bf16 %v1687_v18, %v1684_v26 }
 0x49f   :  { %8799 = vrot.lane.b32.xlu0 %v8798_v53, %s9566_s16 }
 0x4a1   :  { %v1592_v52 = vpop.f32.mrf.mxu2  ;;  %v1638_v57 = vpop.f32.mrf.mxu3 }
 0x4a4   :  { %v1730_v43 = vpop.f32.mrf.mxu1 }
 0x4a7   :  { %8819 = vrot.lane.b32.xlu0 %v8818_v33, %s9562_s29  ;;  %v8828_v33 = vpack.i.bf16 %v1555_v28, %v1552_v3  ;;  %v1941_v3 = vld [vmem:[%s14872_s3 + $0x68] sm:$0xff]  ;;  %v1939_v28 = vld [vmem:[%s14872_s3 + $0x58] sm:$0xff] }
 0x4a9   :  { %v1595_v63 = vpop.f32.mrf.mxu2  ;;  %v1641_v0 = vpop.f32.mrf.mxu3 }
 0x4aa   :  { %v8803_v39 = vpack.i.bf16 %v1595_v63, %v1592_v52  ;;  %v8808_v26 = vpack.i.bf16 %v1641_v0, %v1638_v57  ;;  %v1690_v57 = vpop.f32.mrf.mxu0  ;;  %v1937_v0 = vld [vmem:[%s14872_s3 + $0x48] sm:$0xff] }
 0x4ac   :  { %8809 = vrot.lane.b32.xlu2 %v8808_v26, %s9564_s1  ;;  %8804 = vrot.lane.b32.xlu1 %v8803_v39, %s9560_s28  ;;  %v1733_v18 = vpop.f32.mrf.mxu1  ;;  %v1936_v39 = vld [vmem:[%s14872_s3 + $0x40] sm:$0xff]  ;;  %v1935_v26 = vld [vmem:[%s14872_s3 + $0x38] sm:$0xff] }
 0x4ad   :  { %v8823_v21 = vpack.i.bf16 %v1733_v18, %v1730_v43  ;;  %v1938_v43 = vld [vmem:[%s14872_s3 + $0x50] sm:$0xff] }
 0x4ae   :  { %v1934_v18 = vld [vmem:[%s14872_s3 + $0x30] sm:$0xff] }
 0x4b1   :  { %v1644_v53 = vpop.f32.mrf.mxu3  ;;  %v1598_v17 = vpop.f32.mrf.mxu2 }
 0x4b2   :  { %1860 = vrot.lane.b32.xlu0 %v1644_v53, %s9564_s1  ;;  %v1693_v8 = vpop.f32.mrf.mxu0  ;;  %v1933_v53 = vld [vmem:[%s14872_s3 + $0x28] sm:$0xff] }
 0x4b4   :  { %8814 = vrot.lane.b32.xlu2 %v8813_v20, %s9561_s10  ;;  %8824 = vrot.lane.b32.xlu1 %v8823_v21, %s9565_s15  ;;  %v1736_v63 = vpop.f32.mrf.mxu1  ;;  %v1942_v21 = vld [vmem:[%s14872_s3 + $0x70] sm:$0xff] }
 0x4b9   :  { %v1647_v51 = vpop.f32.mrf.mxu3  ;;  %v1601_v41 = vpop.f32.mrf.mxu2 }
 0x4ba   :  { %1862 = vrot.lane.b32.xlu0 %v1647_v51, %s9564_s1  ;;  %v8833_v52 = vpack.i.bf16 %v1601_v41, %v1598_v17  ;;  %v1943_v17 = vld [vmem:[%s14872_s3 + $0x78] sm:$0xff]  ;;  %v1932_v51 = vld [vmem:[%s14872_s3 + $0x20] sm:$0xff] }
 0x4bb   :  { %1958 = vmatpush.msrb.mxu3 %v1943_v17  ;;  %v1931_v41 = vld [vmem:[%s14872_s3 + $0x18] sm:$0xff] }
 0x4bc   :  { %8829 = vrot.lane.b32.xlu1 %v8828_v33, %s9563_s30  ;;  %8834 = vrot.lane.b32.xlu2 %v8833_v52, %s9560_s28  ;;  %v1739_v20 = vpop.f32.mrf.mxu1  ;;  %v1930_v33 = vld [vmem:[%s14872_s3 + $0x10] sm:$0xff]  ;;  %v1929_v52 = vld [vmem:[%s14872_s3 + $0x8] sm:$0xff] }
 0x4bd   :  { %1959 = vmatpush.msrb.mxu3 %v1942_v21 }
 0x4bf   :  { %1960 = vmatpush.msrb.mxu3 %v1941_v3 }
 0x4c1   :  { %1961 = vmatpush.msrb.mxu3 %v1940_v19 }
 0x4c3   :  { %1962 = vmatpush.msrb.mxu3 %v1939_v28 }
 0x4c4   :  { %1876 = vrot.lane.b32.xlu1 %v1690_v57, %s9566_s16  ;;  %1892 = vrot.lane.b32.xlu2 %v1736_v63, %s9565_s15  ;;  %v1928_v57 = vld [vmem:[%s14872_s3] sm:$0xff]  ;;  %v1945_v63 = vld [vmem:[%s14872_s3 + $0x88] sm:$0xff] }
 0x4c5   :  { %1963 = vmatpush.msrb.mxu3 %v1938_v43  ;;  %2001 = vmatpush.msrb.mxu0 %v1945_v63 }
 0x4c7   :  { %1964 = vmatpush.msrb.mxu3 %v1937_v0 }
 0x4c9   :  { %1965 = vmatpush.msrb.mxu3 %v1936_v39 }
 0x4cb   :  { %1966 = vmatpush.msrb.mxu3 %v1935_v26 }
 0x4cc   :  { %1878 = vrot.lane.b32.xlu1 %v1693_v8, %s9566_s16  ;;  %1894 = vrot.lane.b32.xlu2 %v1739_v20, %s9565_s15  ;;  %v1944_v8 = vld [vmem:[%s14872_s3 + $0x80] sm:$0xff]  ;;  %v1776_v20 = vpop.f32.mrf.mxu2 }
 0x4cd   :  { %1967 = vmatpush.msrb.mxu3 %v1934_v18  ;;  %2002 = vmatpush.msrb.mxu0 %v1944_v8 }
 0x4ce   :  { %7945 = vmatmul.msk.f32.vlgmr.msrb.gmra.mxu0 %vm186_vm1, %v1776_v20 }
 0x4cf   :  { %1968 = vmatpush.msrb.mxu3 %v1933_v53 }
 0x4d1   :  { %1969 = vmatpush.msrb.mxu3 %v1932_v51 }
 0x4d3   :  { %1970 = vmatpush.msrb.mxu3 %v1931_v41 }
 0x4d4   :  { %v1779_v28 = vpop.f32.mrf.mxu2 }
 0x4d5   :  { %1971 = vmatpush.msrb.mxu3 %v1930_v33 }
 0x4d6   :  { %7946 = vmatmul.msk.f32.gmra.mxu0 %vm186_vm1, %v1779_v28 }
 0x4d7   :  { %1972 = vmatpush.msrb.mxu3 %v1929_v52 }
 0x4d9   :  { %1973 = vmatpush.msrb.mxu3 %v1928_v57 }
 0x4dc   :  { %v1782_v52 = vpop.f32.mrf.mxu2 }
 0x4de   :  { %7947 = vmatmul.msk.f32.gmra.mxu0 %vm186_vm1, %v1782_v52 }
 0x4e1   :  { %v8785_v17 = vpop.permute.xlu2 %8784 }
 0x4e2   :  { %v8786_v39 = vunpack.i.l.bf16 %v8785_v17 }
 0x4fe   :  { %v8790_v21 = vpop.permute.xlu1 %8789 }
 0x4ff   :  { %v8791_v3 = vunpack.i.l.bf16 %v8790_v21  ;;  %v8792_v51 = vunpack.i.h.bf16 %v8790_v21 }
 0x501   :  { %v8795_v19 = vpop.permute.xlu0 %8794  ;;  %v1900_v0 = vsel %vm186_vm1, %v10948_v27, %v8791_v3  ;;  %v1901_v8 = vsel %vm186_vm1, %v10951_v46, %v8792_v51  ;;  %v8787_v3 = vunpack.i.h.bf16 %v8785_v17 }
 0x502   :  { %v8796_v26 = vunpack.i.l.bf16 %v8795_v19  ;;  %v1904_v18 = vsel %vm1147_vm5, %v1900_v0, %v8786_v39  ;;  %v8797_v28 = vunpack.i.h.bf16 %v8795_v19 }
 0x503   :  { %v1905_v21 = vsel %vm1147_vm5, %v1901_v8, %v8787_v3 }
 0x504   :  { %v1908_v57 = vsel %vm69_vm0, %v1904_v18, %v8796_v26 }
 0x506   :  { %v8810_v43 = vpop.permute.xlu2 %8809 }
 0x507   :  { %v8811_v20 = vunpack.i.l.bf16 %v8810_v43  ;;  %v8812_v19 = vunpack.i.h.bf16 %v8810_v43 }
 0x50e   :  { %v8815_v27 = vpop.permute.xlu2 %8814 }
 0x50f   :  { %v8816_v51 = vunpack.i.l.bf16 %v8815_v27 }
 0x511   :  { %v8800_v41 = vpop.permute.xlu0 %8799  ;;  %v1785_v18 = vpop.f32.mrf.mxu2 }
 0x512   :  { %v8801_v39 = vunpack.i.l.bf16 %v8800_v41  ;;  %7948 = vmatmul.msk.f32.gmra.mxu0 %vm186_vm1, %v1785_v18  ;;  %v8817_v18 = vunpack.i.h.bf16 %v8815_v27 }
 0x519   :  { %v8820_v52 = vpop.permute.xlu0 %8819 }
 0x51e   :  { %v8805_v53 = vpop.permute.xlu1 %8804 }
 0x51f   :  { %v8806_v33 = vunpack.i.l.bf16 %v8805_v53  ;;  %v8807_v2 = vunpack.i.h.bf16 %v8805_v53 }
 0x521   :  { %v1912_v63 = vsel %vm1156_vm6, %v1908_v57, %v8806_v33  ;;  %v1909_v33 = vsel %vm69_vm0, %v1905_v21, %v8797_v28  ;;  %v8835_v57 = vpop.permute.xlu2 %8834  ;;  %v1902_v28 = vsel %vm186_vm1, %v10962_v1, %v8816_v51  ;;  %v1903_v1 = vsel %vm186_vm1, %v10971_v56, %v8817_v18 }
 0x522   :  { %v1916_v0 = vsel %vm1161_vm7, %v1912_v63, %v8811_v20  ;;  %v1913_v17 = vsel %vm1156_vm6, %v1909_v33, %v8807_v2  ;;  %v8821_v63 = vunpack.i.l.bf16 %v8820_v52  ;;  %v8802_v20 = vunpack.i.h.bf16 %v8800_v41 }
 0x523   :  { %v1920_v26 = vsel %vm1166_vm8, %v1916_v0, %v8801_v39  ;;  %v1917_v8 = vsel %vm1161_vm7, %v1913_v17, %v8812_v19  ;;  %v8836_v39 = vunpack.i.l.bf16 %v8835_v57 }
 0x524   :  { %v1921_v21 = vsel %vm1166_vm8, %v1917_v8, %v8802_v20  ;;  %v1861_v2 = vpop.permute.xlu0 %1860 }
 0x526   :  { %v8825_v50 = vpop.permute.xlu1 %8824 }
 0x527   :  { %v8826_v14 = vunpack.i.l.bf16 %v8825_v50  ;;  %v8827_v53 = vunpack.i.h.bf16 %v8825_v50  ;;  %v8822_v50 = vunpack.i.h.bf16 %v8820_v52 }
 0x529   :  { %v1924_v46 = vsel %vm1171_vm9, %v1920_v26, %v8826_v14  ;;  %v1906_v14 = vsel %vm1147_vm5, %v1902_v28, %v8821_v63  ;;  %v1925_v26 = vsel %vm1171_vm9, %v1921_v21, %v8827_v53  ;;  %v1893_v33 = vpop.permute.xlu2 %1892  ;;  %v1907_v51 = vsel %vm1147_vm5, %v1903_v1, %v8822_v50 }
 0x52a   :  { %1974 = vmatmul.f32.vlgmr.msrb.gmra.mxu3 %v1924_v46  ;;  %v8837_v53 = vunpack.i.h.bf16 %v8835_v57 }
 0x52c   :  { %v1863_v52 = vpop.permute.xlu0 %1862 }
 0x52e   :  { %v8830_v3 = vpop.permute.xlu1 %8829 }
 0x52f   :  { %v8831_v0 = vunpack.i.l.bf16 %v8830_v3  ;;  %v8832_v46 = vunpack.i.h.bf16 %v8830_v3 }
 0x531   :  { %v1910_v43 = vsel %vm69_vm0, %v1906_v14, %v8831_v0  ;;  %v1911_v8 = vsel %vm69_vm0, %v1907_v51, %v8832_v46  ;;  %v1895_v3 = vpop.permute.xlu2 %1894 }
 0x532   :  { %1977 = vmatmul.f32.gmra.mxu3 %v1925_v26  ;;  %v1914_v41 = vsel %vm1156_vm6, %v1910_v43, %v8836_v39  ;;  %v1915_v20 = vsel %vm1156_vm6, %v1911_v8, %v8837_v53 }
 0x533   :  { %v1918_v19 = vsel %vm1161_vm7, %v1914_v41, %v1861_v2  ;;  %v1919_v28 = vsel %vm1161_vm7, %v1915_v20, %v1863_v52 }
 0x536   :  { %v1877_v17 = vpop.permute.xlu1 %1876 }
 0x537   :  { %v1922_v63 = vsel %vm1166_vm8, %v1918_v19, %v1877_v17 }
 0x538   :  { %v1926_v27 = vsel %vm1171_vm9, %v1922_v63, %v1893_v33 }
 0x53a   :  { %1980 = vmatmul.f32.gmra.mxu3 %v1926_v27 }
 0x53e   :  { %v1879_v56 = vpop.permute.xlu1 %1878 }
 0x53f   :  { %v1923_v0 = vsel %vm1166_vm8, %v1919_v28, %v1879_v56 }
 0x540   :  { %v1927_v14 = vsel %vm1171_vm9, %v1923_v0, %v1895_v3 }
 0x542   :  { %1983 = vmatmul.f32.gmra.mxu3 %v1927_v14 }
 0x54b   :  { %v2004_v21 = vpop.f32.mrf.mxu0 }
 0x553   :  { %v2007_v2 = vpop.f32.mrf.mxu0 }
 0x55b   :  { %v2010_v26 = vpop.f32.mrf.mxu0 }
 0x58f   :  { %v2013_v46 = vpop.f32.mrf.mxu0 }
 0x5ad   :  { %v1975_v39 = vpop.f32.mrf.mxu3 }
 0x5ae   :  { %v2005_v50 = vadd.f32 %v2004_v21, %v1975_v39 }
 0x5b0   :  { %v2016_v1 = vsel %vm186_vm1, %v2005_v50, 0.0 }
 0x5b5   :  { %v1978_v43 = vpop.f32.mrf.mxu3 }
 0x5b6   :  { %v2008_v57 = vadd.f32 %v2007_v2, %v1978_v43 }
 0x5b8   :  { %v2017_v33 = vsel %vm186_vm1, %v2008_v57, 0.0 }
 0x5b9   :  { %v2018_v19 = vadd.f32 %v2017_v33, %v2016_v1 }
 0x5bd   :  { %v1981_v18 = vpop.f32.mrf.mxu3 }
 0x5be   :  { %v2011_v41 = vadd.f32 %v2010_v26, %v1981_v18 }
 0x5c0   :  { %v2019_v17 = vsel %vm186_vm1, %v2011_v41, 0.0 }
 0x5c1   :  { %v2020_v8 = vadd.f32 %v2019_v17, %v2018_v19 }
 0x5c5   :  { %v1984_v51 = vpop.f32.mrf.mxu3 }
 0x5c6   :  { %v2014_v63 = vadd.f32 %v2013_v46, %v1984_v51 }
 0x5c8   :  { %v2021_v27 = vsel %vm186_vm1, %v2014_v63, 0.0 }
 0x5c9   :  { %v2022_v53 = vadd.f32 %v2021_v27, %v2020_v8 }
 0x5cb   :  { %v2023_v52 = vrot.slane %v2022_v53, 4 }
 0x5cd   :  { %v2024_v20 = vadd.f32 %v2023_v52, %v2022_v53 }
 0x5cf   :  { %v2025_v3 = vrot.slane %v2024_v20, 2 }
 0x5d1   :  { %v2026_v28 = vadd.f32 %v2025_v3, %v2024_v20  ;;  %v2085_v20 = vld [vmem:[%s14873_s4] sm:$0xff] }
 0x5d3   :  { %v2027_v56 = vrot.slane %v2026_v28, 1 }
 0x5d5   :  { %v2028_v0 = vadd.f32 %v2027_v56, %v2026_v28 }
 0x5d7   :  { %v2029_v14 = vmul.f32 0.03125, %v2028_v0 }
 0x5d9   :  { %v2030_v21 = vsub.f32 %v2005_v50, %v2029_v14  ;;  %v2031_v39 = vsub.f32 %v2008_v57, %v2029_v14  ;;  %v2032_v2 = vsub.f32 %v2011_v41, %v2029_v14  ;;  %v2033_v43 = vsub.f32 %v2014_v63, %v2029_v14  ;;  %v2086_v63 = vld [vmem:[%s14873_s4 + $0x8] sm:$0xff] }
 0x5da   :  { %2113 = vmatpush.msrb.mxu1 %v2086_v63 }
 0x5db   :  { %v2034_v26 = vmul.f32 %v2030_v21, %v2030_v21  ;;  %v2035_v18 = vmul.f32 %v2031_v39, %v2031_v39  ;;  %v2036_v33 = vmul.f32 %v2032_v2, %v2032_v2  ;;  %v2037_v1 = vmul.f32 %v2033_v43, %v2033_v43 }
 0x5dc   :  { %2114 = vmatpush.msrb.mxu1 %v2085_v20 }
 0x5dd   :  { %v2038_v46 = vsel %vm186_vm1, %v2034_v26, 0.0  ;;  %v2039_v17 = vsel %vm186_vm1, %v2035_v18, 0.0  ;;  %v2041_v51 = vsel %vm186_vm1, %v2036_v33, 0.0  ;;  %v2043_v27 = vsel %vm186_vm1, %v2037_v1, 0.0 }
 0x5de   :  { %v2040_v19 = vadd.f32 %v2039_v17, %v2038_v46  ;;  %v9327_v17 = vld [vmem:[%s14868_s7 + $0x4] ss:$0 sm:$0xff] }
 0x5e0   :  { %v2042_v8 = vadd.f32 %v2041_v51, %v2040_v19 }
 0x5e2   :  { %v2044_v53 = vadd.f32 %v2043_v27, %v2042_v8  ;;  %v9328_v8 = vld [vmem:[%s14868_s7 + $0x5] ss:$0 sm:$0xff] }
 0x5e4   :  { %v2045_v52 = vrot.slane %v2044_v53, 4 }
 0x5e6   :  { %v2046_v50 = vadd.f32 %v2045_v52, %v2044_v53 }
 0x5e8   :  { %v2047_v57 = vrot.slane %v2046_v50, 2 }
 0x5ea   :  { %v2048_v41 = vadd.f32 %v2047_v57, %v2046_v50 }
 0x5ec   :  { %v2049_v3 = vrot.slane %v2048_v41, 1 }
 0x5ee   :  { %v2050_v28 = vadd.f32 %v2049_v3, %v2048_v41 }
 0x5f0   :  { %v2051_v56 = vmul.f32 0.03125, %v2050_v28 }
 0x5f2   :  { %v2052_v0 = vadd.f32 1e-05, %v2051_v56 }
 0x5f4   :  { %9347 = vrsqrt.f32 %v2052_v0  ;;  %vm2059_vm14 = vweird.f32 %v2052_v0 }
 0x5fa   :  { %v9348_v14 = vpop.eup %9347 }
 0x5fb   :  { %v2054_v26 = vmul.f32 %v9348_v14, %v2052_v0  ;;  %vm2060_vm13 = vweird.f32 %v9348_v14 }
 0x5fc   :  { %vm2061_vm15 = vmor %vm2059_vm14, %vm2060_vm13 }
 0x5fd   :  { %v2055_v18 = vmul.f32 %v9348_v14, %v2054_v26 }
 0x5ff   :  { %v2056_v33 = vmul.f32 0.5, %v2055_v18 }
 0x601   :  { %v2057_v1 = vsub.f32 1.5, %v2056_v33 }
 0x603   :  { %v2058_v46 = vmul.f32 %v9348_v14, %v2057_v1  ;;  %v14891_v1 = vmax.f32 %v10704_v61, 0.0 }
 0x605   :  { %v2062_v19 = vsel %vm2061_vm15, %v9348_v14, %v2058_v46  ;;  %v14892_v46 = vmax.f32 %v10710_v6, 0.0 }
 0x606   :  { %v2063_v51 = vmul.f32 %v2062_v19, %v2030_v21  ;;  %v2064_v53 = vmul.f32 %v2062_v19, %v2031_v39  ;;  %v2065_v63 = vmul.f32 %v2062_v19, %v2032_v2  ;;  %v2066_v28 = vmul.f32 %v2062_v19, %v2033_v43 }
 0x607   :  { %v14893_v43 = vmax.f32 %v10706_v58, 0.0 }
 0x608   :  { %v2070_v27 = vmul.f32 %v9327_v17, %v2063_v51  ;;  %v2071_v57 = vmul.f32 %v9327_v17, %v2064_v53  ;;  %v2072_v3 = vmul.f32 %v9327_v17, %v2065_v63  ;;  %v2073_v21 = vmul.f32 %v9327_v17, %v2066_v28 }
 0x60a   :  { %v2077_v52 = vadd.f32 %v9328_v8, %v2070_v27  ;;  %v2078_v41 = vadd.f32 %v9328_v8, %v2071_v57  ;;  %v2079_v56 = vadd.f32 %v9328_v8, %v2072_v3  ;;  %v2080_v14 = vadd.f32 %v9328_v8, %v2073_v21 }
 0x60c   :  { %v2081_v50 = vmax.f32 %v2077_v52, 0.0  ;;  %v2082_v20 = vmax.f32 %v2078_v41, 0.0  ;;  %v2083_v0 = vmax.f32 %v2079_v56, 0.0  ;;  %v2084_v26 = vmax.f32 %v2080_v14, 0.0 }
 0x60e   :  { %7949 = vmatmul.msk.f32.vlgmr.msrb.gmra.mxu1 %vm186_vm1, %v2081_v50  ;;  %v14894_v50 = vmax.f32 %v10708_v10, 0.0 }
 0x616   :  { %7950 = vmatmul.msk.f32.gmra.mxu1 %vm186_vm1, %v2082_v20 }
 0x61e   :  { %7951 = vmatmul.msk.f32.gmra.mxu1 %vm186_vm1, %v2083_v0 }
 0x626   :  { %7952 = vmatmul.msk.f32.gmra.mxu1 %vm186_vm1, %v2084_v26 }
 0x68b   :  { %v2116_v39 = vpop.f32.mrf.mxu1 }
 0x68c   :  { %v2128_v51 = vadd.f32 %v2116_v39, %v14892_v46 }
 0x68e   :  { %v2136_v27 = vsel %vm186_vm1, %v2128_v51, 0.0 }
 0x693   :  { %v2119_v18 = vpop.f32.mrf.mxu1 }
 0x694   :  { %v2129_v2 = vadd.f32 %v2119_v18, %v14891_v1 }
 0x696   :  { %v2137_v17 = vsel %vm186_vm1, %v2129_v2, 0.0 }
 0x697   :  { %v2138_v53 = vadd.f32 %v2137_v17, %v2136_v27 }
 0x69b   :  { %v2122_v33 = vpop.f32.mrf.mxu1 }
 0x69c   :  { %v2130_v19 = vadd.f32 %v2122_v33, %v14893_v43 }
 0x69e   :  { %v2139_v8 = vsel %vm186_vm1, %v2130_v19, 0.0 }
 0x69f   :  { %v2140_v41 = vadd.f32 %v2139_v8, %v2138_v53 }
 0x6a3   :  { %v2125_v52 = vpop.f32.mrf.mxu1 }
 0x6a4   :  { %v2131_v57 = vadd.f32 %v2125_v52, %v14894_v50 }
 0x6a6   :  { %v2141_v61 = vsel %vm186_vm1, %v2131_v57, 0.0 }
 0x6a7   :  { %v2142_v63 = vadd.f32 %v2141_v61, %v2140_v41 }
 0x6a9   :  { %v2143_v6 = vrot.slane %v2142_v63, 4 }
 0x6ab   :  { %v2144_v20 = vadd.f32 %v2143_v6, %v2142_v63 }
 0x6ad   :  { %v2145_v3 = vrot.slane %v2144_v20, 2 }
 0x6af   :  { %v2146_v58 = vadd.f32 %v2145_v3, %v2144_v20 }
 0x6b1   :  { %v2147_v28 = vrot.slane %v2146_v58, 1 }
 0x6b3   :  { %v2148_v56 = vadd.f32 %v2147_v28, %v2146_v58 }
 0x6b5   :  { %v2149_v21 = vmul.f32 0.03125, %v2148_v56 }
 0x6b7   :  { %v2150_v0 = vsub.f32 %v2128_v51, %v2149_v21  ;;  %v2151_v14 = vsub.f32 %v2129_v2, %v2149_v21  ;;  %v2152_v26 = vsub.f32 %v2130_v19, %v2149_v21  ;;  %v2153_v39 = vsub.f32 %v2131_v57, %v2149_v21  ;;  %v9329_v21 = vld [vmem:[%s14868_s7 + $0x6] ss:$0 sm:$0xff] }
 0x6b9   :  { %v2154_v18 = vmul.f32 %v2150_v0, %v2150_v0  ;;  %v2155_v33 = vmul.f32 %v2151_v14, %v2151_v14  ;;  %v2156_v1 = vmul.f32 %v2152_v26, %v2152_v26  ;;  %v2157_v10 = vmul.f32 %v2153_v39, %v2153_v39 }
 0x6bb   :  { %v2158_v46 = vsel %vm186_vm1, %v2154_v18, 0.0  ;;  %v2159_v43 = vsel %vm186_vm1, %v2155_v33, 0.0  ;;  %v2161_v27 = vsel %vm186_vm1, %v2156_v1, 0.0  ;;  %v2163_v53 = vsel %vm186_vm1, %v2157_v10, 0.0 }
 0x6bc   :  { %v2160_v17 = vadd.f32 %v2159_v43, %v2158_v46  ;;  %v9330_v43 = vld [vmem:[%s14868_s7 + $0x7] ss:$0 sm:$0xff] }
 0x6be   :  { %v2162_v8 = vadd.f32 %v2161_v27, %v2160_v17 }
 0x6c0   :  { %v2164_v52 = vadd.f32 %v2163_v53, %v2162_v8 }
 0x6c2   :  { %v2165_v50 = vrot.slane %v2164_v52, 4 }
 0x6c4   :  { %v2166_v51 = vadd.f32 %v2165_v50, %v2164_v52 }
 0x6c6   :  { %v2167_v2 = vrot.slane %v2166_v51, 2 }
 0x6c8   :  { %v2168_v19 = vadd.f32 %v2167_v2, %v2166_v51 }
 0x6ca   :  { %v2169_v57 = vrot.slane %v2168_v19, 1 }
 0x6cc   :  { %v2170_v41 = vadd.f32 %v2169_v57, %v2168_v19 }
 0x6ce   :  { %v2171_v61 = vmul.f32 0.03125, %v2170_v41 }
 0x6d0   :  { %v2172_v63 = vadd.f32 1e-05, %v2171_v61 }
 0x6d2   :  { %9349 = vrsqrt.f32 %v2172_v63  ;;  %vm2179_vm3 = vweird.f32 %v2172_v63 }
 0x6d8   :  { %v9350_v6 = vpop.eup %9349 }
 0x6d9   :  { %v2174_v20 = vmul.f32 %v9350_v6, %v2172_v63  ;;  %vm2180_vm2 = vweird.f32 %v9350_v6 }
 0x6da   :  { %vm2181_vm4 = vmor %vm2179_vm3, %vm2180_vm2 }
 0x6db   :  { %v2175_v3 = vmul.f32 %v9350_v6, %v2174_v20 }
 0x6dd   :  { %v2176_v58 = vmul.f32 0.5, %v2175_v3 }
 0x6df   :  { %v2177_v28 = vsub.f32 1.5, %v2176_v58 }
 0x6e1   :  { %v2178_v56 = vmul.f32 %v9350_v6, %v2177_v28 }
 0x6e3   :  { %v2182_v18 = vsel %vm2181_vm4, %v9350_v6, %v2178_v56 }
 0x6e4   :  { %v2183_v33 = vmul.f32 %v2182_v18, %v2150_v0  ;;  %v2184_v1 = vmul.f32 %v2182_v18, %v2151_v14  ;;  %v2185_v10 = vmul.f32 %v2182_v18, %v2152_v26  ;;  %v2186_v46 = vmul.f32 %v2182_v18, %v2153_v39  ;;  %v8007_v18 = vld [vmem:[%s14872_s3 + $0x100] sm:$0xff] }
 0x6e6   :  { %v2191_v17 = vmul.f32 %v9329_v21, %v2184_v1  ;;  %v2192_v27 = vmul.f32 %v9329_v21, %v2185_v10  ;;  %v2193_v8 = vmul.f32 %v9329_v21, %v2186_v46  ;;  %v2190_v53 = vmul.f32 %v9329_v21, %v2183_v33  ;;  %v8008_v21 = vld [vmem:[%s14872_s3 + $0x108] sm:$0xff]  ;;  %v8006_v33 = vld [vmem:[%s14872_s3 + $0xf8] sm:$0xff]  ;;  %v8005_v1 = vld [vmem:[%s14872_s3 + $0xf0] sm:$0xff] }
 0x6e7   :  { %v8004_v10 = vld [vmem:[%s14872_s3 + $0xe8] sm:$0xff]  ;;  %v8003_v46 = vld [vmem:[%s14872_s3 + $0xe0] sm:$0xff] }
 0x6e8   :  { %v11137_v52 = vadd.f32 %v9330_v43, %v2192_v27  ;;  %v11139_v50 = vadd.f32 %v9330_v43, %v2193_v8  ;;  %v11141_v51 = vadd.f32 %v9330_v43, %v2191_v17  ;;  %v11144_v0 = vadd.f32 %v9330_v43, %v2190_v53  ;;  %v8002_v43 = vld [vmem:[%s14872_s3 + $0xd8] sm:$0xff]  ;;  %v8001_v17 = vld [vmem:[%s14872_s3 + $0xd0] sm:$0xff]  ;;  %v8000_v27 = vld [vmem:[%s14872_s3 + $0xc8] sm:$0xff] }
 0x6e9   :  { %v7999_v8 = vld [vmem:[%s14872_s3 + $0xc0] sm:$0xff]  ;;  %v7998_v53 = vld [vmem:[%s14872_s3 + $0xb8] sm:$0xff] }
 0x6ea   :  { %v2208_v2 = vmax.f32 %v11139_v50, 0.0  ;;  %v2207_v14 = vmax.f32 %v11137_v52, 0.0  ;;  %v2206_v26 = vmax.f32 %v11141_v51, 0.0  ;;  %v2205_v39 = vmax.f32 %v11144_v0, 0.0 }
 0x6ec   :  { %2221 = vmatpush.msra.mxu2 %v2208_v2  ;;  %2250 = vmatpush.msra.mxu3 %v2208_v2 }
 0x6ed   :  { %2279 = vmatpush.msra.mxu0 %v2208_v2  ;;  %2308 = vmatpush.msra.mxu1 %v2208_v2 }
 0x6ee   :  { %2222 = vmatpush.msra.mxu2 %v2207_v14  ;;  %2251 = vmatpush.msra.mxu3 %v2207_v14 }
 0x6ef   :  { %2280 = vmatpush.msra.mxu0 %v2207_v14  ;;  %2309 = vmatpush.msra.mxu1 %v2207_v14 }
 0x6f0   :  { %2223 = vmatpush.msra.mxu2 %v2206_v26  ;;  %2252 = vmatpush.msra.mxu3 %v2206_v26 }
 0x6f1   :  { %2281 = vmatpush.msra.mxu0 %v2206_v26  ;;  %2310 = vmatpush.msra.mxu1 %v2206_v26 }
 0x6f2   :  { %2224 = vmatpush.msra.mxu2 %v2205_v39  ;;  %2253 = vmatpush.msra.mxu3 %v2205_v39 }
 0x6f3   :  { %2282 = vmatpush.msra.mxu0 %v2205_v39  ;;  %2311 = vmatpush.msra.mxu1 %v2205_v39 }
 0x6f4   :  { %7957 = vmatmul.msk.f32.vlgmr.msra.gmra.mxu2 %vm1147_vm5, %v10727_v23  ;;  %7961 = vmatmul.msk.f32.vlgmr.msra.gmra.mxu3 %vm1147_vm5, %v10732_v49  ;;  %v14895_v23 = vld [vmem:[#allocation2_spill] sm:$0xff]  ;;  %v14896_v49 = vld [vmem:[#allocation3_spill] sm:$0xff] }
 0x6f5   :  { %7965 = vmatmul.msk.f32.vlgmr.msra.gmra.mxu0 %vm1147_vm5, %v10737_v59  ;;  %2337 = vmatpush.msrb.mxu2 %v2208_v2 }
 0x6f6   :  { %2366 = vmatpush.msrb.mxu3 %v2208_v2  ;;  %2395 = vmatpush.msrb.mxu0 %v2208_v2 }
 0x6f7   :  { %2424 = vmatpush.msrb.mxu1 %v2208_v2  ;;  %2338 = vmatpush.msrb.mxu2 %v2207_v14 }
 0x6f8   :  { %2367 = vmatpush.msrb.mxu3 %v2207_v14  ;;  %2396 = vmatpush.msrb.mxu0 %v2207_v14 }
 0x6f9   :  { %2425 = vmatpush.msrb.mxu1 %v2207_v14  ;;  %2339 = vmatpush.msrb.mxu2 %v2206_v26 }
 0x6fa   :  { %2368 = vmatpush.msrb.mxu3 %v2206_v26  ;;  %2397 = vmatpush.msrb.mxu0 %v2206_v26 }
 0x6fb   :  { %2426 = vmatpush.msrb.mxu1 %v2206_v26  ;;  %2340 = vmatpush.msrb.mxu2 %v2205_v39 }
 0x6fc   :  { %7969 = vmatmul.msk.f32.vlgmr.msra.gmra.mxu1 %vm1147_vm5, %v10770_v24  ;;  %2369 = vmatpush.msrb.mxu3 %v2205_v39 }
 0x6fd   :  { %2398 = vmatpush.msrb.mxu0 %v2205_v39  ;;  %2427 = vmatpush.msrb.mxu1 %v2205_v39 }
 0x6fe   :  { %2453 = vmatpush.msra.mxu2 %v2208_v2  ;;  %7962 = vmatmul.msk.f32.gmra.mxu3 %vm1147_vm5, %v10760_v9  ;;  %v7997_v2 = vld [vmem:[%s14872_s3 + $0xb0] sm:$0xff] }
 0x6ff   :  { %7958 = vmatmul.msk.f32.gmra.mxu2 %vm1147_vm5, %v10755_v62  ;;  %7966 = vmatmul.msk.f32.gmra.mxu0 %vm1147_vm5, %v10765_v22 }
 0x700   :  { %2454 = vmatpush.msra.mxu2 %v2207_v14  ;;  %2641 = vmatpush.msra.mxu3 %v8008_v21  ;;  %v7996_v14 = vld [vmem:[%s14872_s3 + $0xa8] sm:$0xff] }
 0x702   :  { %2455 = vmatpush.msra.mxu2 %v2206_v26  ;;  %2642 = vmatpush.msra.mxu3 %v8007_v18  ;;  %v7995_v26 = vld [vmem:[%s14872_s3 + $0xa0] sm:$0xff] }
 0x704   :  { %2456 = vmatpush.msra.mxu2 %v2205_v39  ;;  %7970 = vmatmul.msk.f32.gmra.mxu1 %vm1147_vm5, %v10798_v4  ;;  %v7994_v39 = vld [vmem:[%s14872_s3 + $0x98] sm:$0xff] }
 0x705   :  { %2643 = vmatpush.msra.mxu3 %v8006_v33 }
 0x706   :  { %7963 = vmatmul.msk.f32.gmra.mxu3 %vm1147_vm5, %v10788_v16 }
 0x707   :  { %7959 = vmatmul.msk.f32.gmra.mxu2 %vm1147_vm5, %v10783_v25  ;;  %7967 = vmatmul.msk.f32.gmra.mxu0 %vm1147_vm5, %v10793_v12 }
 0x708   :  { %2644 = vmatpush.msra.mxu3 %v8005_v1 }
 0x70a   :  { %2645 = vmatpush.msra.mxu3 %v8004_v10 }
 0x70c   :  { %7971 = vmatmul.msk.f32.gmra.mxu1 %vm1147_vm5, %v10821_v38  ;;  %2646 = vmatpush.msra.mxu3 %v8003_v46 }
 0x70e   :  { %7964 = vmatmul.msk.f32.gmra.mxu3 %vm1147_vm5, %v10816_v11 }
 0x70f   :  { %7960 = vmatmul.msk.f32.gmra.mxu2 %vm1147_vm5, %v10811_v37  ;;  %7968 = vmatmul.msk.f32.gmra.mxu0 %vm1147_vm5, %v10742_v60 }
 0x710   :  { %2647 = vmatpush.msra.mxu3 %v8002_v43 }
 0x712   :  { %2648 = vmatpush.msra.mxu3 %v8001_v17 }
 0x714   :  { %7972 = vmatmul.msk.f32.gmra.mxu1 %vm1147_vm5, %v10849_v7  ;;  %2649 = vmatpush.msra.mxu3 %v8000_v27 }
 0x716   :  { %7977 = vmatmul.msk.f32.vlgmr.msrb.gmra.mxu3 %vm1147_vm5, %v10844_v45 }
 0x717   :  { %7973 = vmatmul.msk.f32.vlgmr.msrb.gmra.mxu2 %vm1147_vm5, %v10839_v29  ;;  %7981 = vmatmul.msk.f32.vlgmr.msrb.gmra.mxu0 %vm1147_vm5, %v10826_v40 }
 0x718   :  { %2650 = vmatpush.msra.mxu3 %v7999_v8 }
 0x71a   :  { %2651 = vmatpush.msra.mxu3 %v7998_v53 }
 0x71c   :  { %7985 = vmatmul.msk.f32.vlgmr.msrb.gmra.mxu1 %vm1147_vm5, %v10877_v48  ;;  %2652 = vmatpush.msra.mxu3 %v7997_v2 }
 0x71e   :  { %7978 = vmatmul.msk.f32.gmra.mxu3 %vm1147_vm5, %v10872_v42 }
 0x71f   :  { %7974 = vmatmul.msk.f32.gmra.mxu2 %vm1147_vm5, %v10867_v47  ;;  %7982 = vmatmul.msk.f32.gmra.mxu0 %vm1147_vm5, %v10854_v35 }
 0x720   :  { %2653 = vmatpush.msra.mxu3 %v7996_v14 }
 0x722   :  { %2654 = vmatpush.msra.mxu3 %v7995_v26 }
 0x724   :  { %7986 = vmatmul.msk.f32.gmra.mxu1 %vm1147_vm5, %v10905_v32  ;;  %2655 = vmatpush.msra.mxu3 %v7994_v39 }
 0x726   :  { %7979 = vmatmul.msk.f32.gmra.mxu3 %vm1147_vm5, %v10895_v34 }
 0x727   :  { %7975 = vmatmul.msk.f32.gmra.mxu2 %vm1147_vm5, %v10900_v31  ;;  %7983 = vmatmul.msk.f32.gmra.mxu0 %vm1147_vm5, %v10882_v15 }
 0x72c   :  { %7987 = vmatmul.msk.f32.gmra.mxu1 %vm1147_vm5, %v10933_v54 }
 0x72e   :  { %7980 = vmatmul.msk.f32.gmra.mxu3 %vm1147_vm5, %v10923_v44 }
 0x72f   :  { %7976 = vmatmul.msk.f32.gmra.mxu2 %vm1147_vm5, %v10928_v30  ;;  %7984 = vmatmul.msk.f32.gmra.mxu0 %vm1147_vm5, %v10910_v13 }
 0x734   :  { %7988 = vmatmul.msk.f32.gmra.mxu1 %vm1147_vm5, %v10944_v55 }
 0x737   :  { %7989 = vmatmul.msk.f32.vlgmr.msra.gmra.mxu2 %vm1147_vm5, %v10957_v36 }
 0x73f   :  { %7990 = vmatmul.msk.f32.gmra.mxu2 %vm1147_vm5, %v10967_v5 }
 0x747   :  { %7991 = vmatmul.msk.f32.gmra.mxu2 %vm1147_vm5, %v14895_v23  ;;  %v7993_v23 = vld [vmem:[%s14872_s3 + $0x90] sm:$0xff] }
 0x748   :  { %2656 = vmatpush.msra.mxu3 %v7993_v23 }
 0x74f   :  { %7992 = vmatmul.msk.f32.gmra.mxu2 %vm1147_vm5, %v14896_v49  ;;  %v8010_v49 = vld [vmem:[%s14872_s3 + $0x118] sm:$0xff] }
 0x750   :  { %2684 = vmatpush.msra.mxu0 %v8010_v49 }
 0x772   :  { %v2284_v59 = vpop.f32.mrf.mxu0 }
 0x777   :  { %v2255_v60 = vpop.f32.mrf.mxu3  ;;  %v11221_v62 = vpop.f32.mrf.mxu2 }
 0x779   :  { %v2313_v9 = vpop.f32.mrf.mxu1 }
 0x77c   :  { %v2287_v22 = vpop.f32.mrf.mxu0 }
 0x77d   :  { %v8838_v24 = vpack.i.bf16 %v2287_v22, %v2284_v59  ;;  %v8009_v59 = vld [vmem:[%s14872_s3 + $0x110] sm:$0xff] }
 0x77e   :  { %2685 = vmatpush.msra.mxu0 %v8009_v59 }
 0x77f   :  { %8839 = vrot.lane.b32.xlu1 %v8838_v24, %s9562_s29 }
 0x781   :  { %v2258_v25 = vpop.f32.mrf.mxu3  ;;  %v2316_v16 = vpop.f32.mrf.mxu1 }
 0x782   :  { %v11224_v12 = vpop.f32.mrf.mxu2  ;;  %v8848_v4 = vpack.i.bf16 %v2258_v25, %v2255_v60  ;;  %v8843_v37 = vpack.i.bf16 %v2316_v16, %v2313_v9 }
 0x784   :  { %v2290_v11 = vpop.f32.mrf.mxu0  ;;  %8844 = vrot.lane.b32.xlu2 %v8843_v37, %s9563_s30  ;;  %8849 = vrot.lane.b32.xlu0 %v8848_v4, %s9561_s10 }
 0x789   :  { %v2261_v38 = vpop.f32.mrf.mxu3  ;;  %v2319_v29 = vpop.f32.mrf.mxu1 }
 0x78a   :  { %v11228_v40 = vpop.f32.mrf.mxu2 }
 0x78c   :  { %v2293_v45 = vpop.f32.mrf.mxu0 }
 0x78d   :  { %v8878_v55 = vpack.i.bf16 %v2293_v45, %v2290_v11 }
 0x791   :  { %v2264_v7 = vpop.f32.mrf.mxu3  ;;  %v2322_v47 = vpop.f32.mrf.mxu1 }
 0x792   :  { %v11230_v35 = vpop.f32.mrf.mxu2  ;;  %v8873_v5 = vpack.i.bf16 %v2264_v7, %v2261_v38  ;;  %v8883_v63 = vpack.i.bf16 %v2322_v47, %v2319_v29 }
 0x794   :  { %v2400_v42 = vpop.f32.mrf.mxu0 }
 0x799   :  { %v2371_v48 = vpop.f32.mrf.mxu3  ;;  %v2429_v32 = vpop.f32.mrf.mxu1 }
 0x79a   :  { %v2342_v15 = vpop.f32.mrf.mxu2 }
 0x79c   :  { %v2403_v34 = vpop.f32.mrf.mxu0 }
 0x79d   :  { %v8853_v31 = vpack.i.bf16 %v2403_v34, %v2400_v42 }
 0x79f   :  { %8854 = vrot.lane.b32.xlu2 %v8853_v31, %s9566_s16 }
 0x7a1   :  { %v2374_v13 = vpop.f32.mrf.mxu3  ;;  %v2432_v36 = vpop.f32.mrf.mxu1 }
 0x7a2   :  { %v2345_v44 = vpop.f32.mrf.mxu2  ;;  %v8868_v30 = vpack.i.bf16 %v2374_v13, %v2371_v48  ;;  %v8863_v41 = vpack.i.bf16 %v2432_v36, %v2429_v32 }
 0x7a3   :  { %v8858_v54 = vpack.i.bf16 %v2345_v44, %v2342_v15 }
 0x7a4   :  { %8869 = vrot.lane.b32.xlu1 %v8868_v30, %s9564_s1  ;;  %v2406_v3 = vpop.f32.mrf.mxu0 }
 0x7a5   :  { %8859 = vrot.lane.b32.xlu0 %v8858_v54, %s9560_s28 }
 0x7a7   :  { %8879 = vrot.lane.b32.xlu2 %v8878_v55, %s9562_s29 }
 0x7a9   :  { %v2377_v57 = vpop.f32.mrf.mxu3  ;;  %v2435_v58 = vpop.f32.mrf.mxu1 }
 0x7aa   :  { %v2348_v19 = vpop.f32.mrf.mxu2 }
 0x7ac   :  { %8874 = vrot.lane.b32.xlu1 %v8873_v5, %s9561_s10  ;;  %v2409_v28 = vpop.f32.mrf.mxu0 }
 0x7ad   :  { %8864 = vrot.lane.b32.xlu0 %v8863_v41, %s9565_s15 }
 0x7af   :  { %2542 = vrot.lane.b32.xlu2 %v2377_v57, %s9564_s1 }
 0x7b1   :  { %v2380_v20 = vpop.f32.mrf.mxu3  ;;  %v2438_v56 = vpop.f32.mrf.mxu1 }
 0x7b2   :  { %v2351_v61 = vpop.f32.mrf.mxu2 }
 0x7b3   :  { %v8888_v6 = vpack.i.bf16 %v2351_v61, %v2348_v19 }
 0x7b5   :  { %8884 = vrot.lane.b32.xlu0 %v8883_v63, %s9563_s30  ;;  %8889 = vrot.lane.b32.xlu1 %v8888_v6, %s9560_s28 }
 0x7b7   :  { %2544 = vrot.lane.b32.xlu2 %v2380_v20, %s9564_s1 }
 0x7ba   :  { %v2458_v60 = vpop.f32.mrf.mxu2 }
 0x7bb   :  { %8011 = vmatmul.msk.f32.vlgmr.msra.gmra.mxu0 %vm186_vm1, %v2458_v60 }
 0x7bd   :  { %2558 = vrot.lane.b32.xlu0 %v2406_v3, %s9566_s16  ;;  %2574 = vrot.lane.b32.xlu1 %v2435_v58, %s9565_s15 }
 0x7c2   :  { %v2461_v16 = vpop.f32.mrf.mxu2 }
 0x7c3   :  { %8012 = vmatmul.msk.f32.gmra.mxu0 %vm186_vm1, %v2461_v16 }
 0x7c5   :  { %2560 = vrot.lane.b32.xlu0 %v2409_v28, %s9566_s16  ;;  %2576 = vrot.lane.b32.xlu1 %v2438_v56, %s9565_s15 }
 0x7ca   :  { %v2464_v48 = vpop.f32.mrf.mxu2 }
 0x7cb   :  { %8013 = vmatmul.msk.f32.gmra.mxu0 %vm186_vm1, %v2464_v48 }
 0x7d2   :  { %v2467_v57 = vpop.f32.mrf.mxu2 }
 0x7d3   :  { %8014 = vmatmul.msk.f32.gmra.mxu0 %vm186_vm1, %v2467_v57 }
 0x7de   :  { %v8845_v24 = vpop.permute.xlu2 %8844 }
 0x7df   :  { %v8846_v45 = vunpack.i.l.bf16 %v8845_v24  ;;  %v8847_v5 = vunpack.i.h.bf16 %v8845_v24 }
 0x7f1   :  { %v8840_v22 = vpop.permute.xlu1 %8839 }
 0x7f2   :  { %v8841_v4 = vunpack.i.l.bf16 %v8840_v22  ;;  %v8842_v31 = vunpack.i.h.bf16 %v8840_v22 }
 0x7f6   :  { %v8850_v9 = vpop.permute.xlu0 %8849 }
 0x7f7   :  { %v8851_v25 = vunpack.i.l.bf16 %v8850_v9  ;;  %v8852_v7 = vunpack.i.h.bf16 %v8850_v9 }
 0x7f9   :  { %v2582_v37 = vsel %vm186_vm1, %v11221_v62, %v8851_v25  ;;  %v8855_v47 = vpop.permute.xlu2 %8854  ;;  %v2583_v62 = vsel %vm186_vm1, %v11224_v12, %v8852_v7 }
 0x7fa   :  { %v2586_v38 = vsel %vm1147_vm5, %v2582_v37, %v8841_v4  ;;  %v2587_v30 = vsel %vm1147_vm5, %v2583_v62, %v8842_v31  ;;  %v8856_v54 = vunpack.i.l.bf16 %v8855_v47  ;;  %v8857_v21 = vunpack.i.h.bf16 %v8855_v47 }
 0x7fb   :  { %v2590_v34 = vsel %vm69_vm0, %v2586_v38, %v8846_v45  ;;  %v2591_v6 = vsel %vm69_vm0, %v2587_v30, %v8847_v5 }
 0x801   :  { %v8880_v61 = vpop.permute.xlu2 %8879 }
 0x802   :  { %v8881_v18 = vunpack.i.l.bf16 %v8880_v61  ;;  %v8882_v39 = vunpack.i.h.bf16 %v8880_v61 }
 0x809   :  { %v2543_v8 = vpop.permute.xlu2 %2542 }
 0x811   :  { %v2545_v16 = vpop.permute.xlu2 %2544 }
 0x816   :  { %v8870_v11 = vpop.permute.xlu1 %8869 }
 0x817   :  { %v8860_v29 = vpop.permute.xlu0 %8859  ;;  %v8871_v15 = vunpack.i.l.bf16 %v8870_v11  ;;  %v8872_v63 = vunpack.i.h.bf16 %v8870_v11 }
 0x818   :  { %v8861_v42 = vunpack.i.l.bf16 %v8860_v29  ;;  %v8862_v55 = vunpack.i.h.bf16 %v8860_v29 }
 0x81a   :  { %v2594_v32 = vsel %vm1156_vm6, %v2590_v34, %v8861_v42  ;;  %v2595_v3 = vsel %vm1156_vm6, %v2591_v6, %v8862_v55 }
 0x81b   :  { %v2598_v44 = vsel %vm1161_vm7, %v2594_v32, %v8871_v15  ;;  %v2599_v56 = vsel %vm1161_vm7, %v2595_v3, %v8872_v63 }
 0x81c   :  { %v2602_v41 = vsel %vm1166_vm8, %v2598_v44, %v8856_v54  ;;  %v2603_v27 = vsel %vm1166_vm8, %v2599_v56, %v8857_v21 }
 0x81e   :  { %v8875_v13 = vpop.permute.xlu1 %8874 }
 0x81f   :  { %v8865_v36 = vpop.permute.xlu0 %8864  ;;  %v8876_v12 = vunpack.i.l.bf16 %v8875_v13  ;;  %v8877_v43 = vunpack.i.h.bf16 %v8875_v13 }
 0x820   :  { %v8866_v19 = vunpack.i.l.bf16 %v8865_v36  ;;  %v8867_v28 = vunpack.i.h.bf16 %v8865_v36 }
 0x821   :  { %v2584_v58 = vsel %vm186_vm1, %v11228_v40, %v8876_v12  ;;  %v2585_v14 = vsel %vm186_vm1, %v11230_v35, %v8877_v43 }
 0x822   :  { %v2606_v20 = vsel %vm1171_vm9, %v2602_v41, %v8866_v19  ;;  %v2588_v17 = vsel %vm1147_vm5, %v2584_v58, %v8881_v18  ;;  %v2607_v2 = vsel %vm1171_vm9, %v2603_v27, %v8867_v28  ;;  %v2589_v9 = vsel %vm1147_vm5, %v2585_v14, %v8882_v39 }
 0x823   :  { %2657 = vmatmul.f32.vlgmr.msra.gmra.mxu3 %v2606_v20 }
 0x827   :  { %v8885_v33 = vpop.permute.xlu0 %8884  ;;  %v8890_v1 = vpop.permute.xlu1 %8889 }
 0x828   :  { %v8886_v10 = vunpack.i.l.bf16 %v8885_v33  ;;  %v8891_v46 = vunpack.i.l.bf16 %v8890_v1  ;;  %v8887_v26 = vunpack.i.h.bf16 %v8885_v33  ;;  %v8892_v60 = vunpack.i.h.bf16 %v8890_v1 }
 0x82a   :  { %v2592_v53 = vsel %vm69_vm0, %v2588_v17, %v8886_v10  ;;  %v2593_v24 = vsel %vm69_vm0, %v2589_v9, %v8887_v26 }
 0x82b   :  { %2660 = vmatmul.f32.gmra.mxu3 %v2607_v2  ;;  %v2596_v40 = vsel %vm1156_vm6, %v2592_v53, %v8891_v46  ;;  %v2597_v4 = vsel %vm1156_vm6, %v2593_v24, %v8892_v60 }
 0x82c   :  { %v2600_v49 = vsel %vm1161_vm7, %v2596_v40, %v2543_v8  ;;  %v2601_v35 = vsel %vm1161_vm7, %v2597_v4, %v2545_v16 }
 0x82f   :  { %v2559_v23 = vpop.permute.xlu0 %2558  ;;  %v2575_v59 = vpop.permute.xlu1 %2574 }
 0x830   :  { %v2604_v22 = vsel %vm1166_vm8, %v2600_v49, %v2559_v23  ;;  %v8016_v23 = vld [vmem:[%s14873_s4 + $0x18] sm:$0xff]  ;;  %v8015_v49 = vld [vmem:[%s14873_s4 + $0x10] sm:$0xff] }
 0x831   :  { %v2608_v25 = vsel %vm1171_vm9, %v2604_v22, %v2575_v59  ;;  %2797 = vmatpush.msra.mxu1 %v8016_v23 }
 0x833   :  { %2663 = vmatmul.f32.gmra.mxu3 %v2608_v25  ;;  %2798 = vmatpush.msra.mxu1 %v8015_v49 }
 0x837   :  { %v2561_v37 = vpop.permute.xlu0 %2560  ;;  %v2577_v11 = vpop.permute.xlu1 %2576 }
 0x838   :  { %v2605_v38 = vsel %vm1166_vm8, %v2601_v35, %v2561_v37  ;;  %v2687_v45 = vpop.f32.mrf.mxu0 }
 0x839   :  { %v2609_v29 = vsel %vm1171_vm9, %v2605_v38, %v2577_v11  ;;  %v9331_v11 = vld [vmem:[%s14868_s7 + $0x8] ss:$0 sm:$0xff] }
 0x83b   :  { %2666 = vmatmul.f32.gmra.mxu3 %v2609_v29 }
 0x840   :  { %v2690_v47 = vpop.f32.mrf.mxu0 }
 0x848   :  { %v2693_v48 = vpop.f32.mrf.mxu0 }
 0x850   :  { %v2696_v13 = vpop.f32.mrf.mxu0 }
 0x8a6   :  { %v2658_v7 = vpop.f32.mrf.mxu3 }
 0x8a7   :  { %v2688_v31 = vadd.f32 %v2687_v45, %v2658_v7  ;;  %v9332_v45 = vld [vmem:[%s14868_s7 + $0x9] ss:$0 sm:$0xff] }
 0x8a9   :  { %v2699_v44 = vsel %vm186_vm1, %v2688_v31, 0.0 }
 0x8ae   :  { %v2661_v42 = vpop.f32.mrf.mxu3 }
 0x8af   :  { %v2691_v34 = vadd.f32 %v2690_v47, %v2661_v42 }
 0x8b1   :  { %v2700_v62 = vsel %vm186_vm1, %v2691_v34, 0.0 }
 0x8b2   :  { %v2701_v54 = vadd.f32 %v2700_v62, %v2699_v44 }
 0x8b6   :  { %v2664_v15 = vpop.f32.mrf.mxu3 }
 0x8b7   :  { %v2694_v32 = vadd.f32 %v2693_v48, %v2664_v15 }
 0x8b9   :  { %v2702_v30 = vsel %vm186_vm1, %v2694_v32, 0.0 }
 0x8ba   :  { %v2703_v5 = vadd.f32 %v2702_v30, %v2701_v54 }
 0x8be   :  { %v2667_v55 = vpop.f32.mrf.mxu3 }
 0x8bf   :  { %v2697_v36 = vadd.f32 %v2696_v13, %v2667_v55 }
 0x8c1   :  { %v2704_v19 = vsel %vm186_vm1, %v2697_v36, 0.0 }
 0x8c2   :  { %v2705_v57 = vadd.f32 %v2704_v19, %v2703_v5 }
 0x8c4   :  { %v2706_v41 = vrot.slane %v2705_v57, 4 }
 0x8c6   :  { %v2707_v61 = vadd.f32 %v2706_v41, %v2705_v57 }
 0x8c8   :  { %v2708_v63 = vrot.slane %v2707_v61, 2 }
 0x8ca   :  { %v2709_v6 = vadd.f32 %v2708_v63, %v2707_v61 }
 0x8cc   :  { %v2710_v12 = vrot.slane %v2709_v6, 1 }
 0x8ce   :  { %v2711_v20 = vadd.f32 %v2710_v12, %v2709_v6 }
 0x8d0   :  { %v2712_v3 = vmul.f32 0.03125, %v2711_v20 }
 0x8d2   :  { %v2713_v58 = vsub.f32 %v2688_v31, %v2712_v3  ;;  %v2714_v28 = vsub.f32 %v2691_v34, %v2712_v3  ;;  %v2715_v56 = vsub.f32 %v2694_v32, %v2712_v3  ;;  %v2716_v21 = vsub.f32 %v2697_v36, %v2712_v3 }
 0x8d4   :  { %v2717_v18 = vmul.f32 %v2713_v58, %v2713_v58  ;;  %v2718_v33 = vmul.f32 %v2714_v28, %v2714_v28  ;;  %v2719_v1 = vmul.f32 %v2715_v56, %v2715_v56  ;;  %v2720_v10 = vmul.f32 %v2716_v21, %v2716_v21 }
 0x8d6   :  { %v2721_v46 = vsel %vm186_vm1, %v2717_v18, 0.0  ;;  %v2722_v43 = vsel %vm186_vm1, %v2718_v33, 0.0  ;;  %v2724_v27 = vsel %vm186_vm1, %v2719_v1, 0.0  ;;  %v2726_v53 = vsel %vm186_vm1, %v2720_v10, 0.0 }
 0x8d7   :  { %v2723_v17 = vadd.f32 %v2722_v43, %v2721_v46 }
 0x8d9   :  { %v2725_v8 = vadd.f32 %v2724_v27, %v2723_v17 }
 0x8db   :  { %v2727_v2 = vadd.f32 %v2726_v53, %v2725_v8 }
 0x8dd   :  { %v2728_v40 = vrot.slane %v2727_v2, 4 }
 0x8df   :  { %v2729_v14 = vadd.f32 %v2728_v40, %v2727_v2 }
 0x8e1   :  { %v2730_v26 = vrot.slane %v2729_v14, 2 }
 0x8e3   :  { %v2731_v39 = vadd.f32 %v2730_v26, %v2729_v14 }
 0x8e5   :  { %v2732_v59 = vrot.slane %v2731_v39, 1 }
 0x8e7   :  { %v2733_v60 = vadd.f32 %v2732_v59, %v2731_v39 }
 0x8e9   :  { %v2734_v9 = vmul.f32 0.03125, %v2733_v60 }
 0x8eb   :  { %v2735_v22 = vadd.f32 1e-05, %v2734_v9 }
 0x8ed   :  { %9351 = vrsqrt.f32 %v2735_v22  ;;  %vm2742_vm11 = vweird.f32 %v2735_v22 }
 0x8f3   :  { %v9352_v24 = vpop.eup %9351 }
 0x8f4   :  { %v2737_v25 = vmul.f32 %v9352_v24, %v2735_v22  ;;  %vm2743_vm10 = vweird.f32 %v9352_v24 }
 0x8f5   :  { %vm2744_vm12 = vmor %vm2742_vm11, %vm2743_vm10 }
 0x8f6   :  { %v2738_v16 = vmul.f32 %v9352_v24, %v2737_v25 }
 0x8f8   :  { %v2739_v4 = vmul.f32 0.5, %v2738_v16 }
 0x8fa   :  { %v2740_v35 = vsub.f32 1.5, %v2739_v4 }
 0x8fc   :  { %v2741_v37 = vmul.f32 %v9352_v24, %v2740_v35 }
 0x8fe   :  { %v2745_v38 = vsel %vm2744_vm12, %v9352_v24, %v2741_v37 }
 0x8ff   :  { %v2746_v29 = vmul.f32 %v2745_v38, %v2713_v58  ;;  %v2747_v47 = vmul.f32 %v2745_v38, %v2714_v28  ;;  %v2748_v31 = vmul.f32 %v2745_v38, %v2715_v56  ;;  %v2749_v13 = vmul.f32 %v2745_v38, %v2716_v21 }
 0x901   :  { %v2753_v7 = vmul.f32 %v9331_v11, %v2746_v29  ;;  %v2754_v15 = vmul.f32 %v9331_v11, %v2747_v47  ;;  %v2755_v62 = vmul.f32 %v9331_v11, %v2748_v31  ;;  %v2756_v30 = vmul.f32 %v9331_v11, %v2749_v13 }
 0x903   :  { %v2760_v42 = vadd.f32 %v9332_v45, %v2753_v7  ;;  %v2761_v34 = vadd.f32 %v9332_v45, %v2754_v15  ;;  %v2762_v44 = vadd.f32 %v9332_v45, %v2755_v62  ;;  %v2763_v55 = vadd.f32 %v9332_v45, %v2756_v30  ;;  %v9334_v62 = vld [vmem:[%s14868_s7 + $0xb] ss:$0 sm:$0xff] }
 0x905   :  { %v2764_v48 = vmax.f32 %v2760_v42, 0.0  ;;  %v2765_v32 = vmax.f32 %v2761_v34, 0.0  ;;  %v2766_v54 = vmax.f32 %v2762_v44, 0.0  ;;  %v2767_v36 = vmax.f32 %v2763_v55, 0.0  ;;  %v9333_v42 = vld [vmem:[%s14868_s7 + $0xa] ss:$0 sm:$0xff] }
 0x907   :  { %8017 = vmatmul.msk.f32.vlgmr.msra.gmra.mxu1 %vm186_vm1, %v2764_v48 }
 0x90f   :  { %8018 = vmatmul.msk.f32.gmra.mxu1 %vm186_vm1, %v2765_v32 }
 0x917   :  { %8019 = vmatmul.msk.f32.gmra.mxu1 %vm186_vm1, %v2766_v54 }
 0x91f   :  { %8020 = vmatmul.msk.f32.gmra.mxu1 %vm186_vm1, %v2767_v36 }
 0x984   :  { %v2800_v5 = vpop.f32.mrf.mxu1 }
 0x985   :  { %v2812_v61 = vadd.f32 %v2800_v5, %v11144_v0 }
 0x987   :  { %v2820_v12 = vsel %vm186_vm1, %v2812_v61, 0.0 }
 0x98c   :  { %v2803_v19 = vpop.f32.mrf.mxu1 }
 0x98d   :  { %v2813_v41 = vadd.f32 %v2803_v19, %v11141_v51 }
 0x98f   :  { %v2821_v6 = vsel %vm186_vm1, %v2813_v41, 0.0 }
 0x990   :  { %v2822_v3 = vadd.f32 %v2821_v6, %v2820_v12  ;;  %v11393_v6 = vld [vmem:[%s14871_s11] sm:$0xff] }
 0x991   :  { %v11400_v12 = vld [vmem:[%s14871_s11 + $0x20] sm:$0xff] }
 0x994   :  { %v2806_v57 = vpop.f32.mrf.mxu1 }
 0x995   :  { %v2814_v63 = vadd.f32 %v2806_v57, %v11137_v52 }
 0x997   :  { %v2823_v20 = vsel %vm186_vm1, %v2814_v63, 0.0 }
 0x998   :  { %v2824_v56 = vadd.f32 %v2823_v20, %v2822_v3  ;;  %v11407_v20 = vld [vmem:[%s14871_s11 + $0x40] sm:$0xff] }
 0x999   :  { %v11414_v3 = vld [vmem:[%s14871_s11 + $0x60] sm:$0xff] }
 0x99c   :  { %v2809_v58 = vpop.f32.mrf.mxu1 }
 0x99d   :  { %v2815_v28 = vadd.f32 %v2809_v58, %v11139_v50  ;;  %v11421_v58 = vld [vmem:[%s14871_s11 + $0x28] sm:$0xff] }
 0x99f   :  { %v2825_v21 = vsel %vm186_vm1, %v2815_v28, 0.0 }
 0x9a0   :  { %v2826_v18 = vadd.f32 %v2825_v21, %v2824_v56  ;;  %v11435_v56 = vld [vmem:[%s14871_s11 + $0x48] sm:$0xff] }
 0x9a1   :  { %v11442_v21 = vld [vmem:[%s14871_s11 + $0x68] sm:$0xff] }
 0x9a2   :  { %v2827_v33 = vrot.slane %v2826_v18, 4 }
 0x9a4   :  { %v2828_v51 = vadd.f32 %v2827_v33, %v2826_v18  ;;  %v11449_v18 = vld [vmem:[%s14871_s11 + $0x30] sm:$0xff] }
 0x9a5   :  { %v11456_v33 = vld [vmem:[%s14871_s11 + $0x10] sm:$0xff] }
 0x9a6   :  { %v2829_v1 = vrot.slane %v2828_v51, 2 }
 0x9a8   :  { %v2830_v0 = vadd.f32 %v2829_v1, %v2828_v51  ;;  %v11463_v51 = vld [vmem:[%s14871_s11 + $0x50] sm:$0xff] }
 0x9a9   :  { %v11470_v1 = vld [vmem:[%s14871_s11 + $0x70] sm:$0xff] }
 0x9aa   :  { %v2831_v10 = vrot.slane %v2830_v0, 1 }
 0x9ac   :  { %v2832_v52 = vadd.f32 %v2831_v10, %v2830_v0  ;;  %v11477_v0 = vld [vmem:[%s14871_s11 + $0x38] sm:$0xff] }
 0x9ad   :  { %v11484_v10 = vld [vmem:[%s14871_s11 + $0x18] sm:$0xff] }
 0x9ae   :  { %v2833_v46 = vmul.f32 0.03125, %v2832_v52  ;;  %v11491_v52 = vld [vmem:[%s14871_s11 + $0x58] sm:$0xff] }
 0x9b0   :  { %v2834_v43 = vsub.f32 %v2812_v61, %v2833_v46  ;;  %v2835_v17 = vsub.f32 %v2813_v41, %v2833_v46  ;;  %v2836_v27 = vsub.f32 %v2814_v63, %v2833_v46  ;;  %v2837_v8 = vsub.f32 %v2815_v28, %v2833_v46  ;;  %v11428_v28 = vld [vmem:[%s14871_s11 + $0x8] sm:$0xff]  ;;  %v11498_v46 = vld [vmem:[%s14871_s11 + $0x78] sm:$0xff] }
 0x9b2   :  { %v2838_v53 = vmul.f32 %v2834_v43, %v2834_v43  ;;  %v2839_v2 = vmul.f32 %v2835_v17, %v2835_v17  ;;  %v2840_v40 = vmul.f32 %v2836_v27, %v2836_v27  ;;  %v2841_v14 = vmul.f32 %v2837_v8, %v2837_v8 }
 0x9b4   :  { %v2842_v50 = vsel %vm186_vm1, %v2838_v53, 0.0  ;;  %v2843_v26 = vsel %vm186_vm1, %v2839_v2, 0.0  ;;  %v2845_v23 = vsel %vm186_vm1, %v2840_v40, 0.0  ;;  %v2847_v59 = vsel %vm186_vm1, %v2841_v14, 0.0  ;;  %v11533_v53 = vld [vmem:[%s14871_s11 + $0xa8] sm:$0xff] }
 0x9b5   :  { %v2844_v39 = vadd.f32 %v2843_v26, %v2842_v50  ;;  %v11540_v2 = vld [vmem:[%s14871_s11 + $0x88] sm:$0xff]  ;;  %v11561_v50 = vld [vmem:[%s14871_s11 + $0xb0] sm:$0xff] }
 0x9b6   :  { %v11547_v40 = vld [vmem:[%s14871_s11 + $0xc8] sm:$0xff]  ;;  %v11568_v26 = vld [vmem:[%s14871_s11 + $0x90] sm:$0xff] }
 0x9b7   :  { %v2846_v49 = vadd.f32 %v2845_v23, %v2844_v39  ;;  %v11554_v14 = vld [vmem:[%s14871_s11 + $0xe8] sm:$0xff]  ;;  %v11575_v39 = vld [vmem:[%s14871_s11 + $0xd0] sm:$0xff] }
 0x9b8   :  { %v11582_v23 = vld [vmem:[%s14871_s11 + $0xf0] sm:$0xff] }
 0x9b9   :  { %v2848_v60 = vadd.f32 %v2847_v59, %v2846_v49  ;;  %v11589_v49 = vld [vmem:[%s14871_s11 + $0xb8] sm:$0xff] }
 0x9ba   :  { %v11596_v59 = vld [vmem:[%s14871_s11 + $0x98] sm:$0xff] }
 0x9bb   :  { %v2849_v9 = vrot.slane %v2848_v60, 4 }
 0x9bd   :  { %v2850_v22 = vadd.f32 %v2849_v9, %v2848_v60  ;;  %v11603_v60 = vld [vmem:[%s14871_s11 + $0xd8] sm:$0xff] }
 0x9be   :  { %v11610_v9 = vld [vmem:[%s14871_s11 + $0xf8] sm:$0xff] }
 0x9bf   :  { %v2851_v24 = vrot.slane %v2850_v22, 2 }
 0x9c1   :  { %v2852_v25 = vadd.f32 %v2851_v24, %v2850_v22  ;;  %v11617_v22 = vld [vmem:[%s14871_s11 + $0x100] sm:$0xff]  ;;  %v11624_v24 = vld [vmem:[%s14871_s11 + $0x108] sm:$0xff] }
 0x9c3   :  { %v2853_v16 = vrot.slane %v2852_v25, 1 }
 0x9c5   :  { %v2854_v4 = vadd.f32 %v2853_v16, %v2852_v25  ;;  %v11631_v25 = vld [vmem:[%s14871_s11 + $0x110] sm:$0xff]  ;;  %v11638_v16 = vld [vmem:[%s14871_s11 + $0x118] sm:$0xff] }
 0x9c6   :  { %14897 = vst [vmem:[#allocation2_spill] sm:$0xff] %v11631_v25 }
 0x9c7   :  { %v2855_v35 = vmul.f32 0.03125, %v2854_v4  ;;  %14898 = vst [vmem:[#allocation3_spill] sm:$0xff] %v11638_v16 }
 0x9c9   :  { %v2856_v37 = vadd.f32 1e-05, %v2855_v35 }
 0x9cb   :  { %9353 = vrsqrt.f32 %v2856_v37  ;;  %vm2863_vm14 = vweird.f32 %v2856_v37 }
 0x9d1   :  { %v9354_v11 = vpop.eup %9353 }
 0x9d2   :  { %v2858_v38 = vmul.f32 %v9354_v11, %v2856_v37  ;;  %vm2864_vm13 = vweird.f32 %v9354_v11 }
 0x9d3   :  { %vm2865_vm15 = vmor %vm2863_vm14, %vm2864_vm13 }
 0x9d4   :  { %v2859_v29 = vmul.f32 %v9354_v11, %v2858_v38 }
 0x9d6   :  { %v2860_v45 = vmul.f32 0.5, %v2859_v29 }
 0x9d8   :  { %v2861_v7 = vsub.f32 1.5, %v2860_v45 }
 0x9da   :  { %v2862_v47 = vmul.f32 %v9354_v11, %v2861_v7 }
 0x9dc   :  { %v2866_v48 = vsel %vm2865_vm15, %v9354_v11, %v2862_v47 }
 0x9dd   :  { %v2867_v15 = vmul.f32 %v2866_v48, %v2834_v43  ;;  %v2868_v34 = vmul.f32 %v2866_v48, %v2835_v17  ;;  %v2869_v31 = vmul.f32 %v2866_v48, %v2836_v27  ;;  %v2870_v32 = vmul.f32 %v2866_v48, %v2837_v8  ;;  %v11505_v43 = vld [vmem:[%s14871_s11 + $0xa0] sm:$0xff] }
 0x9de   :  { %v11512_v17 = vld [vmem:[%s14871_s11 + $0x80] sm:$0xff] }
 0x9df   :  { %v2875_v13 = vmul.f32 %v9333_v42, %v2868_v34  ;;  %v2876_v44 = vmul.f32 %v9333_v42, %v2869_v31  ;;  %v2877_v30 = vmul.f32 %v9333_v42, %v2870_v32  ;;  %v2874_v54 = vmul.f32 %v9333_v42, %v2867_v15  ;;  %v11519_v27 = vld [vmem:[%s14871_s11 + $0xc0] sm:$0xff] }
 0x9e0   :  { %v11526_v8 = vld [vmem:[%s14871_s11 + $0xe0] sm:$0xff] }
 0x9e1   :  { %v11378_v55 = vadd.f32 %v9334_v62, %v2876_v44  ;;  %v11380_v36 = vadd.f32 %v9334_v62, %v2877_v30  ;;  %v11382_v5 = vadd.f32 %v9334_v62, %v2875_v13  ;;  %v11385_v57 = vadd.f32 %v9334_v62, %v2874_v54 }
 0x9e3   :  { %v2889_v19 = vmax.f32 %v11380_v36, 0.0  ;;  %v2888_v41 = vmax.f32 %v11378_v55, 0.0  ;;  %v2887_v61 = vmax.f32 %v11382_v5, 0.0  ;;  %v2886_v63 = vmax.f32 %v11385_v57, 0.0 }
 0x9e5   :  { %2902 = vmatpush.msrb.mxu2 %v2889_v19  ;;  %2931 = vmatpush.msrb.mxu3 %v2889_v19 }
 0x9e6   :  { %2960 = vmatpush.msrb.mxu0 %v2889_v19  ;;  %2989 = vmatpush.msrb.mxu1 %v2889_v19 }
 0x9e7   :  { %2903 = vmatpush.msrb.mxu2 %v2888_v41  ;;  %2932 = vmatpush.msrb.mxu3 %v2888_v41 }
 0x9e8   :  { %2961 = vmatpush.msrb.mxu0 %v2888_v41  ;;  %2990 = vmatpush.msrb.mxu1 %v2888_v41 }
 0x9e9   :  { %2904 = vmatpush.msrb.mxu2 %v2887_v61  ;;  %2933 = vmatpush.msrb.mxu3 %v2887_v61 }
 0x9ea   :  { %2962 = vmatpush.msrb.mxu0 %v2887_v61  ;;  %2991 = vmatpush.msrb.mxu1 %v2887_v61 }
 0x9eb   :  { %2905 = vmatpush.msrb.mxu2 %v2886_v63  ;;  %2934 = vmatpush.msrb.mxu3 %v2886_v63 }
 0x9ec   :  { %2963 = vmatpush.msrb.mxu0 %v2886_v63  ;;  %2992 = vmatpush.msrb.mxu1 %v2886_v63 }
 0x9ed   :  { %8023 = vmatmul.msk.f32.vlgmr.msrb.gmra.mxu2 %vm1147_vm5, %v11393_v6  ;;  %8027 = vmatmul.msk.f32.vlgmr.msrb.gmra.mxu3 %vm1147_vm5, %v11400_v12 }
 0x9ee   :  { %8031 = vmatmul.msk.f32.vlgmr.msrb.gmra.mxu0 %vm1147_vm5, %v11407_v20  ;;  %3018 = vmatpush.msra.mxu2 %v2889_v19 }
 0x9ef   :  { %3047 = vmatpush.msra.mxu3 %v2889_v19  ;;  %3076 = vmatpush.msra.mxu0 %v2889_v19 }
 0x9f0   :  { %3105 = vmatpush.msra.mxu1 %v2889_v19  ;;  %3019 = vmatpush.msra.mxu2 %v2888_v41 }
 0x9f1   :  { %8035 = vmatmul.msk.f32.vlgmr.msrb.gmra.mxu1 %vm1147_vm5, %v11414_v3  ;;  %3048 = vmatpush.msra.mxu3 %v2888_v41 }
 0x9f2   :  { %3077 = vmatpush.msra.mxu0 %v2888_v41  ;;  %3106 = vmatpush.msra.mxu1 %v2888_v41 }
 0x9f3   :  { %3020 = vmatpush.msra.mxu2 %v2887_v61  ;;  %3049 = vmatpush.msra.mxu3 %v2887_v61 }
 0x9f4   :  { %3078 = vmatpush.msra.mxu0 %v2887_v61  ;;  %3107 = vmatpush.msra.mxu1 %v2887_v61 }
 0x9f5   :  { %3021 = vmatpush.msra.mxu2 %v2886_v63  ;;  %3050 = vmatpush.msra.mxu3 %v2886_v63 }
 0x9f6   :  { %3079 = vmatpush.msra.mxu0 %v2886_v63  ;;  %3108 = vmatpush.msra.mxu1 %v2886_v63 }
 0x9f7   :  { %3134 = vmatpush.msrb.mxu2 %v2889_v19  ;;  %8028 = vmatmul.msk.f32.gmra.mxu3 %vm1147_vm5, %v11421_v58 }
 0x9f8   :  { %8024 = vmatmul.msk.f32.gmra.mxu2 %vm1147_vm5, %v11428_v28  ;;  %8032 = vmatmul.msk.f32.gmra.mxu0 %vm1147_vm5, %v11435_v56 }
 0x9f9   :  { %8036 = vmatmul.msk.f32.gmra.mxu1 %vm1147_vm5, %v11442_v21  ;;  %3135 = vmatpush.msrb.mxu2 %v2888_v41 }
 0x9fb   :  { %3136 = vmatpush.msrb.mxu2 %v2887_v61 }
 0x9fd   :  { %3137 = vmatpush.msrb.mxu2 %v2886_v63 }
 0x9ff   :  { %8029 = vmatmul.msk.f32.gmra.mxu3 %vm1147_vm5, %v11449_v18 }
 0xa00   :  { %8025 = vmatmul.msk.f32.gmra.mxu2 %vm1147_vm5, %v11456_v33  ;;  %8033 = vmatmul.msk.f32.gmra.mxu0 %vm1147_vm5, %v11463_v51 }
 0xa01   :  { %8037 = vmatmul.msk.f32.gmra.mxu1 %vm1147_vm5, %v11470_v1 }
 0xa07   :  { %8030 = vmatmul.msk.f32.gmra.mxu3 %vm1147_vm5, %v11477_v0 }
 0xa08   :  { %8026 = vmatmul.msk.f32.gmra.mxu2 %vm1147_vm5, %v11484_v10  ;;  %8034 = vmatmul.msk.f32.gmra.mxu0 %vm1147_vm5, %v11491_v52 }
 0xa09   :  { %8038 = vmatmul.msk.f32.gmra.mxu1 %vm1147_vm5, %v11498_v46 }
 0xa0f   :  { %8043 = vmatmul.msk.f32.vlgmr.msra.gmra.mxu3 %vm1147_vm5, %v11505_v43 }
 0xa10   :  { %8039 = vmatmul.msk.f32.vlgmr.msra.gmra.mxu2 %vm1147_vm5, %v11512_v17  ;;  %8047 = vmatmul.msk.f32.vlgmr.msra.gmra.mxu0 %vm1147_vm5, %v11519_v27 }
 0xa11   :  { %8051 = vmatmul.msk.f32.vlgmr.msra.gmra.mxu1 %vm1147_vm5, %v11526_v8 }
 0xa17   :  { %8044 = vmatmul.msk.f32.gmra.mxu3 %vm1147_vm5, %v11533_v53 }
 0xa18   :  { %8040 = vmatmul.msk.f32.gmra.mxu2 %vm1147_vm5, %v11540_v2  ;;  %8048 = vmatmul.msk.f32.gmra.mxu0 %vm1147_vm5, %v11547_v40 }
 0xa19   :  { %8052 = vmatmul.msk.f32.gmra.mxu1 %vm1147_vm5, %v11554_v14 }
 0xa1f   :  { %8045 = vmatmul.msk.f32.gmra.mxu3 %vm1147_vm5, %v11561_v50 }
 0xa20   :  { %8041 = vmatmul.msk.f32.gmra.mxu2 %vm1147_vm5, %v11568_v26  ;;  %8049 = vmatmul.msk.f32.gmra.mxu0 %vm1147_vm5, %v11575_v39 }
 0xa21   :  { %8053 = vmatmul.msk.f32.gmra.mxu1 %vm1147_vm5, %v11582_v23 }
 0xa27   :  { %8046 = vmatmul.msk.f32.gmra.mxu3 %vm1147_vm5, %v11589_v49 }
 0xa28   :  { %8042 = vmatmul.msk.f32.gmra.mxu2 %vm1147_vm5, %v11596_v59  ;;  %8050 = vmatmul.msk.f32.gmra.mxu0 %vm1147_vm5, %v11603_v60 }
 0xa29   :  { %8054 = vmatmul.msk.f32.gmra.mxu1 %vm1147_vm5, %v11610_v9 }
 0xa30   :  { %8055 = vmatmul.msk.f32.vlgmr.msrb.gmra.mxu2 %vm1147_vm5, %v11617_v22 }
 0xa38   :  { %8056 = vmatmul.msk.f32.gmra.mxu2 %vm1147_vm5, %v11624_v24 }
 0xa40   :  { %8057 = vmatmul.msk.f32.gmra.mxu2 %vm1147_vm5, %v11631_v25 }
 0xa48   :  { %8058 = vmatmul.msk.f32.gmra.mxu2 %vm1147_vm5, %v11638_v16 }
 0xa6b   :  { %v2965_v4 = vpop.f32.mrf.mxu0 }
 0xa6e   :  { %v2994_v35 = vpop.f32.mrf.mxu1 }
 0xa70   :  { %v2936_v37 = vpop.f32.mrf.mxu3  ;;  %v11642_v11 = vpop.f32.mrf.mxu2 }
 0xa75   :  { %v2968_v38 = vpop.f32.mrf.mxu0 }
 0xa76   :  { %v8893_v29 = vpack.i.bf16 %v2968_v38, %v2965_v4  ;;  %v2997_v45 = vpop.f32.mrf.mxu1 }
 0xa77   :  { %v8898_v7 = vpack.i.bf16 %v2997_v45, %v2994_v35 }
 0xa78   :  { %8894 = vrot.lane.b32.xlu0 %v8893_v29, %s9562_s29 }
 0xa79   :  { %8899 = vrot.lane.b32.xlu1 %v8898_v7, %s9563_s30 }
 0xa7a   :  { %v2939_v47 = vpop.f32.mrf.mxu3 }
 0xa7b   :  { %v11646_v42 = vpop.f32.mrf.mxu2  ;;  %v8903_v48 = vpack.i.bf16 %v2939_v47, %v2936_v37 }
 0xa7d   :  { %v2971_v15 = vpop.f32.mrf.mxu0  ;;  %8904 = vrot.lane.b32.xlu2 %v8903_v48, %s9561_s10 }
 0xa7e   :  { %v3000_v34 = vpop.f32.mrf.mxu1 }
 0xa82   :  { %v2942_v31 = vpop.f32.mrf.mxu3 }
 0xa83   :  { %v11649_v32 = vpop.f32.mrf.mxu2 }
 0xa85   :  { %v2974_v62 = vpop.f32.mrf.mxu0 }
 0xa86   :  { %v3003_v30 = vpop.f32.mrf.mxu1  ;;  %v8933_v45 = vpack.i.bf16 %v2974_v62, %v2971_v15 }
 0xa8a   :  { %v2945_v13 = vpop.f32.mrf.mxu3 }
 0xa8b   :  { %v11651_v44 = vpop.f32.mrf.mxu2  ;;  %v8928_v48 = vpack.i.bf16 %v2945_v13, %v2942_v31 }
 0xa8d   :  { %v3081_v54 = vpop.f32.mrf.mxu0 }
 0xa8e   :  { %v3110_v63 = vpop.f32.mrf.mxu1 }
 0xa92   :  { %v3052_v19 = vpop.f32.mrf.mxu3 }
 0xa93   :  { %v3023_v41 = vpop.f32.mrf.mxu2 }
 0xa95   :  { %v3084_v61 = vpop.f32.mrf.mxu0 }
 0xa96   :  { %v8908_v4 = vpack.i.bf16 %v3084_v61, %v3081_v54  ;;  %v3113_v7 = vpop.f32.mrf.mxu1 }
 0xa97   :  { %v8918_v47 = vpack.i.bf16 %v3113_v7, %v3110_v63  ;;  %v8070_v63 = vld [vmem:[%s14872_s3 + $0x178] sm:$0xff]  ;;  %v8063_v7 = vld [vmem:[%s14872_s3 + $0x140] sm:$0xff] }
 0xa98   :  { %8909 = vrot.lane.b32.xlu1 %v8908_v4, %s9566_s16  ;;  %v8069_v4 = vld [vmem:[%s14872_s3 + $0x170] sm:$0xff] }
 0xa9a   :  { %v3055_v35 = vpop.f32.mrf.mxu3 }
 0xa9b   :  { %v3026_v37 = vpop.f32.mrf.mxu2  ;;  %v8923_v38 = vpack.i.bf16 %v3055_v35, %v3052_v19  ;;  %v8938_v19 = vpack.i.bf16 %v3003_v30, %v3000_v34  ;;  %v8072_v34 = vld [vmem:[%s14872_s3 + $0x188] sm:$0xff]  ;;  %v8071_v30 = vld [vmem:[%s14872_s3 + $0x180] sm:$0xff] }
 0xa9c   :  { %v8913_v29 = vpack.i.bf16 %v3026_v37, %v3023_v41  ;;  %v8068_v35 = vld [vmem:[%s14872_s3 + $0x168] sm:$0xff]  ;;  %v8067_v37 = vld [vmem:[%s14872_s3 + $0x160] sm:$0xff] }
 0xa9d   :  { %8924 = vrot.lane.b32.xlu0 %v8923_v38, %s9564_s1  ;;  %v3087_v31 = vpop.f32.mrf.mxu0  ;;  %v8066_v38 = vld [vmem:[%s14872_s3 + $0x158] sm:$0xff] }
 0xa9e   :  { %8914 = vrot.lane.b32.xlu2 %v8913_v29, %s9560_s28  ;;  %v3116_v15 = vpop.f32.mrf.mxu1  ;;  %v8065_v29 = vld [vmem:[%s14872_s3 + $0x150] sm:$0xff] }
 0xaa0   :  { %8934 = vrot.lane.b32.xlu1 %v8933_v45, %s9562_s29  ;;  %v8064_v45 = vld [vmem:[%s14872_s3 + $0x148] sm:$0xff] }
 0xaa2   :  { %v3058_v25 = vpop.f32.mrf.mxu3 }
 0xaa3   :  { %v3029_v16 = vpop.f32.mrf.mxu2 }
 0xaa5   :  { %8929 = vrot.lane.b32.xlu0 %v8928_v48, %s9561_s10  ;;  %v3090_v13 = vpop.f32.mrf.mxu0  ;;  %v8061_v48 = vld [vmem:[%s14872_s3 + $0x130] sm:$0xff] }
 0xaa6   :  { %8919 = vrot.lane.b32.xlu2 %v8918_v47, %s9565_s15  ;;  %v3119_v62 = vpop.f32.mrf.mxu1  ;;  %v8062_v47 = vld [vmem:[%s14872_s3 + $0x138] sm:$0xff] }
 0xaa8   :  { %3223 = vrot.lane.b32.xlu1 %v3058_v25, %s9564_s1  ;;  %v8074_v25 = vld [vmem:[%s14872_s3 + $0x198] sm:$0xff] }
 0xaa9   :  { %3325 = vmatpush.msrb.mxu3 %v8074_v25 }
 0xaaa   :  { %v3061_v61 = vpop.f32.mrf.mxu3 }
 0xaab   :  { %v3032_v54 = vpop.f32.mrf.mxu2 }
 0xaac   :  { %v8943_v41 = vpack.i.bf16 %v3032_v54, %v3029_v16  ;;  %v8073_v16 = vld [vmem:[%s14872_s3 + $0x190] sm:$0xff]  ;;  %v8060_v54 = vld [vmem:[%s14872_s3 + $0x128] sm:$0xff] }
 0xaad   :  { %3326 = vmatpush.msrb.mxu3 %v8073_v16 }
 0xaae   :  { %8939 = vrot.lane.b32.xlu2 %v8938_v19, %s9563_s30  ;;  %8944 = vrot.lane.b32.xlu0 %v8943_v41, %s9560_s28  ;;  %v8059_v19 = vld [vmem:[%s14872_s3 + $0x120] sm:$0xff]  ;;  %v8076_v41 = vld [vmem:[%s14872_s3 + $0x1a8] sm:$0xff] }
 0xaaf   :  { %3327 = vmatpush.msrb.mxu3 %v8072_v34  ;;  %3368 = vmatpush.msrb.mxu0 %v8076_v41 }
 0xab0   :  { %3225 = vrot.lane.b32.xlu1 %v3061_v61, %s9564_s1 }
 0xab1   :  { %3328 = vmatpush.msrb.mxu3 %v8071_v30 }
 0xab3   :  { %3329 = vmatpush.msrb.mxu3 %v8070_v63  ;;  %v3139_v61 = vpop.f32.mrf.mxu2 }
 0xab5   :  { %3330 = vmatpush.msrb.mxu3 %v8069_v4 }
 0xab6   :  { %3255 = vrot.lane.b32.xlu0 %v3116_v15, %s9565_s15  ;;  %3239 = vrot.lane.b32.xlu2 %v3087_v31, %s9566_s16  ;;  %v8075_v15 = vld [vmem:[%s14872_s3 + $0x1a0] sm:$0xff] }
 0xab7   :  { %3331 = vmatpush.msrb.mxu3 %v8068_v35  ;;  %3369 = vmatpush.msrb.mxu0 %v8075_v15 }
 0xab8   :  { %8077 = vmatmul.msk.f32.vlgmr.msrb.gmra.mxu0 %vm186_vm1, %v3139_v61 }
 0xab9   :  { %3332 = vmatpush.msrb.mxu3 %v8067_v37 }
 0xabb   :  { %3333 = vmatpush.msrb.mxu3 %v8066_v38 }
 0xabd   :  { %3334 = vmatpush.msrb.mxu3 %v8065_v29 }
 0xabe   :  { %3257 = vrot.lane.b32.xlu0 %v3119_v62, %s9565_s15  ;;  %3241 = vrot.lane.b32.xlu2 %v3090_v13, %s9566_s16  ;;  %v3142_v13 = vpop.f32.mrf.mxu2 }
 0xabf   :  { %3335 = vmatpush.msrb.mxu3 %v8064_v45 }
 0xac0   :  { %8078 = vmatmul.msk.f32.gmra.mxu0 %vm186_vm1, %v3142_v13 }
 0xac1   :  { %3336 = vmatpush.msrb.mxu3 %v8063_v7 }
 0xac3   :  { %3337 = vmatpush.msrb.mxu3 %v8062_v47 }
 0xac5   :  { %3338 = vmatpush.msrb.mxu3 %v8061_v48 }
 0xac6   :  { %v3145_v41 = vpop.f32.mrf.mxu2 }
 0xac7   :  { %3339 = vmatpush.msrb.mxu3 %v8060_v54 }
 0xac8   :  { %8079 = vmatmul.msk.f32.gmra.mxu0 %vm186_vm1, %v3145_v41 }
 0xac9   :  { %3340 = vmatpush.msrb.mxu3 %v8059_v19 }
 0xad7   :  { %v8905_v31 = vpop.permute.xlu2 %8904 }
 0xad8   :  { %v8906_v34 = vunpack.i.l.bf16 %v8905_v31  ;;  %v8907_v63 = vunpack.i.h.bf16 %v8905_v31 }
 0xada   :  { %v3263_v4 = vsel %vm186_vm1, %v11642_v11, %v8906_v34  ;;  %v3264_v47 = vsel %vm186_vm1, %v11646_v42, %v8907_v63 }
 0xaea   :  { %v8895_v25 = vpop.permute.xlu0 %8894 }
 0xaeb   :  { %v8900_v62 = vpop.permute.xlu1 %8899  ;;  %v8896_v30 = vunpack.i.l.bf16 %v8895_v25  ;;  %v8897_v38 = vunpack.i.h.bf16 %v8895_v25 }
 0xaec   :  { %v8901_v35 = vunpack.i.l.bf16 %v8900_v62  ;;  %v8902_v48 = vunpack.i.h.bf16 %v8900_v62 }
 0xaed   :  { %v3267_v29 = vsel %vm1147_vm5, %v3263_v4, %v8896_v30  ;;  %v3268_v61 = vsel %vm1147_vm5, %v3264_v47, %v8897_v38  ;;  %v3148_v47 = vpop.f32.mrf.mxu2 }
 0xaee   :  { %v3271_v54 = vsel %vm69_vm0, %v3267_v29, %v8901_v35  ;;  %v3272_v62 = vsel %vm69_vm0, %v3268_v61, %v8902_v48  ;;  %8080 = vmatmul.msk.f32.gmra.mxu0 %vm186_vm1, %v3148_v47 }
 0xaf8   :  { %v8915_v16 = vpop.permute.xlu2 %8914 }
 0xaf9   :  { %v8916_v45 = vunpack.i.l.bf16 %v8915_v16  ;;  %v8917_v15 = vunpack.i.h.bf16 %v8915_v16 }
 0xafb   :  { %v3275_v11 = vsel %vm1156_vm6, %v3271_v54, %v8916_v45  ;;  %v3276_v4 = vsel %vm1156_vm6, %v3272_v62, %v8917_v15 }
 0xb00   :  { %v8920_v31 = vpop.permute.xlu2 %8919 }
 0xb01   :  { %v8921_v25 = vunpack.i.l.bf16 %v8920_v31  ;;  %v8922_v54 = vunpack.i.h.bf16 %v8920_v31 }
 0xb0a   :  { %v8910_v37 = vpop.permute.xlu1 %8909 }
 0xb0b   :  { %v8911_v13 = vunpack.i.l.bf16 %v8910_v37  ;;  %v8912_v38 = vunpack.i.h.bf16 %v8910_v37 }
 0xb0f   :  { %v8925_v7 = vpop.permute.xlu0 %8924 }
 0xb10   :  { %v8926_v19 = vunpack.i.l.bf16 %v8925_v7  ;;  %v8927_v34 = vunpack.i.h.bf16 %v8925_v7 }
 0xb12   :  { %v3279_v30 = vsel %vm1161_vm7, %v3275_v11, %v8926_v19  ;;  %v8935_v16 = vpop.permute.xlu1 %8934  ;;  %v3280_v35 = vsel %vm1161_vm7, %v3276_v4, %v8927_v34  ;;  %v8940_v19 = vpop.permute.xlu2 %8939 }
 0xb13   :  { %v3283_v42 = vsel %vm1166_vm8, %v3279_v30, %v8911_v13  ;;  %v3284_v7 = vsel %vm1166_vm8, %v3280_v35, %v8912_v38  ;;  %v8936_v61 = vunpack.i.l.bf16 %v8935_v16  ;;  %v8941_v37 = vunpack.i.l.bf16 %v8940_v19 }
 0xb14   :  { %v3287_v63 = vsel %vm1171_vm9, %v3283_v42, %v8921_v25  ;;  %v3288_v41 = vsel %vm1171_vm9, %v3284_v7, %v8922_v54  ;;  %v8942_v38 = vunpack.i.h.bf16 %v8940_v19  ;;  %v8082_v19 = vld [vmem:[%s14873_s4 + $0x28] sm:$0xff] }
 0xb15   :  { %3341 = vmatmul.f32.vlgmr.msrb.gmra.mxu3 %v3287_v63  ;;  %3416 = vmatpush.msrb.mxu1 %v8082_v19 }
 0xb17   :  { %v8930_v29 = vpop.permute.xlu0 %8929 }
 0xb18   :  { %v8931_v45 = vunpack.i.l.bf16 %v8930_v29  ;;  %v8932_v15 = vunpack.i.h.bf16 %v8930_v29 }
 0xb1a   :  { %v3265_v48 = vsel %vm186_vm1, %v11649_v32, %v8931_v45  ;;  %v3224_v13 = vpop.permute.xlu1 %3223  ;;  %v3266_v31 = vsel %vm186_vm1, %v11651_v44, %v8932_v15  ;;  %v3240_v42 = vpop.permute.xlu2 %3239  ;;  %v8937_v32 = vunpack.i.h.bf16 %v8935_v16 }
 0xb1b   :  { %v3269_v11 = vsel %vm1147_vm5, %v3265_v48, %v8936_v61 }
 0xb1c   :  { %v3273_v30 = vsel %vm69_vm0, %v3269_v11, %v8941_v37  ;;  %v3270_v35 = vsel %vm1147_vm5, %v3266_v31, %v8937_v32  ;;  %v8081_v11 = vld [vmem:[%s14873_s4 + $0x20] sm:$0xff] }
 0xb1d   :  { %3344 = vmatmul.f32.gmra.mxu3 %v3288_v41  ;;  %v3274_v47 = vsel %vm69_vm0, %v3270_v35, %v8942_v38  ;;  %3417 = vmatpush.msrb.mxu1 %v8081_v11  ;;  %v9335_v37 = vld [vmem:[%s14874_s8] ss:$0 sm:$0xff] }
 0xb20   :  { %v8945_v25 = vpop.permute.xlu0 %8944 }
 0xb21   :  { %v8946_v34 = vunpack.i.l.bf16 %v8945_v25  ;;  %v8947_v4 = vunpack.i.h.bf16 %v8945_v25 }
 0xb22   :  { %v3226_v54 = vpop.permute.xlu1 %3225  ;;  %v3242_v16 = vpop.permute.xlu2 %3241 }
 0xb23   :  { %v3277_v62 = vsel %vm1156_vm6, %v3273_v30, %v8946_v34  ;;  %v3278_v44 = vsel %vm1156_vm6, %v3274_v47, %v8947_v4 }
 0xb24   :  { %v3281_v63 = vsel %vm1161_vm7, %v3277_v62, %v3224_v13  ;;  %v3282_v48 = vsel %vm1161_vm7, %v3278_v44, %v3226_v54 }
 0xb25   :  { %v3285_v45 = vsel %vm1166_vm8, %v3281_v63, %v3240_v42  ;;  %v3286_v41 = vsel %vm1166_vm8, %v3282_v48, %v3242_v16 }
 0xb28   :  { %v3256_v29 = vpop.permute.xlu0 %3255 }
 0xb29   :  { %v3289_v7 = vsel %vm1171_vm9, %v3285_v45, %v3256_v29 }
 0xb2a   :  { %3347 = vmatmul.f32.gmra.mxu3 %v3289_v7 }
 0xb30   :  { %v3258_v61 = vpop.permute.xlu0 %3257 }
 0xb31   :  { %v3290_v15 = vsel %vm1171_vm9, %v3286_v41, %v3258_v61 }
 0xb32   :  { %3350 = vmatmul.f32.gmra.mxu3 %v3290_v15 }
 0xb35   :  { %v3371_v13 = vpop.f32.mrf.mxu0 }
 0xb3d   :  { %v3374_v62 = vpop.f32.mrf.mxu0 }
 0xb45   :  { %v3377_v35 = vpop.f32.mrf.mxu0 }
 0xb6b   :  { %v3380_v54 = vpop.f32.mrf.mxu0 }
 0xb98   :  { %v3342_v25 = vpop.f32.mrf.mxu3 }
 0xb99   :  { %v3343_v34 = vadd.f32 %v9335_v37, %v3342_v25 }
 0xb9b   :  { %v3372_v30 = vadd.f32 %v3371_v13, %v3343_v34 }
 0xb9d   :  { %v3383_v31 = vmax.f32 %v3372_v30, 0.0 }
 0xb9f   :  { %8083 = vmatmul.msk.f32.vlgmr.msrb.gmra.mxu1 %vm186_vm1, %v3383_v31 }
 0xba0   :  { %v3345_v42 = vpop.f32.mrf.mxu3 }
 0xba1   :  { %v3346_v32 = vadd.f32 %v9335_v37, %v3345_v42 }
 0xba3   :  { %v3375_v63 = vadd.f32 %v3374_v62, %v3346_v32 }
 0xba5   :  { %v3384_v4 = vmax.f32 %v3375_v63, 0.0 }
 0xba7   :  { %8084 = vmatmul.msk.f32.gmra.mxu1 %vm186_vm1, %v3384_v4 }
 0xbad   :  { %v3348_v38 = vpop.f32.mrf.mxu3 }
 0xbae   :  { %v3349_v29 = vadd.f32 %v9335_v37, %v3348_v38 }
 0xbb0   :  { %v3378_v45 = vadd.f32 %v3377_v35, %v3349_v29 }
 0xbb2   :  { %v3385_v47 = vmax.f32 %v3378_v45, 0.0 }
 0xbb4   :  { %8085 = vmatmul.msk.f32.gmra.mxu1 %vm186_vm1, %v3385_v47 }
 0xbb5   :  { %v3351_v7 = vpop.f32.mrf.mxu3 }
 0xbb6   :  { %v3352_v44 = vadd.f32 %v9335_v37, %v3351_v7 }
 0xbb8   :  { %v3381_v48 = vadd.f32 %v3380_v54, %v3352_v44 }
 0xbba   :  { %v3386_v16 = vmax.f32 %v3381_v48, 0.0 }
 0xbbc   :  { %8086 = vmatmul.msk.f32.gmra.mxu1 %vm186_vm1, %v3386_v16 }
 0xc1c   :  { %v3419_v41 = vpop.f32.mrf.mxu1 }
 0xc1d   :  { %v3431_v11 = vadd.f32 %v3419_v41, %v11385_v57 }
 0xc1f   :  { %v3439_v34 = vsel %vm186_vm1, %v3431_v11, 0.0 }
 0xc24   :  { %v3422_v61 = vpop.f32.mrf.mxu1 }
 0xc25   :  { %v3432_v19 = vadd.f32 %v3422_v61, %v11382_v5 }
 0xc27   :  { %v3440_v25 = vsel %vm186_vm1, %v3432_v19, 0.0 }
 0xc28   :  { %v3441_v37 = vadd.f32 %v3440_v25, %v3439_v34 }
 0xc31   :  { %v3425_v15 = vpop.f32.mrf.mxu1 }
 0xc32   :  { %v3433_v13 = vadd.f32 %v3425_v15, %v11378_v55 }
 0xc34   :  { %v3442_v30 = vsel %vm186_vm1, %v3433_v13, 0.0 }
 0xc35   :  { %v3443_v62 = vadd.f32 %v3442_v30, %v3441_v37 }
 0xc39   :  { %v3428_v31 = vpop.f32.mrf.mxu1 }
 0xc3a   :  { %v3434_v42 = vadd.f32 %v3428_v31, %v11380_v36 }
 0xc3c   :  { %v3444_v32 = vsel %vm186_vm1, %v3434_v42, 0.0 }
 0xc3d   :  { %v3445_v63 = vadd.f32 %v3444_v32, %v3443_v62 }
 0xc3f   :  { %v3446_v4 = vrot.slane %v3445_v63, 4 }
 0xc41   :  { %v3447_v5 = vadd.f32 %v3446_v4, %v3445_v63 }
 0xc43   :  { %v3448_v35 = vrot.slane %v3447_v5, 2 }
 0xc45   :  { %v3449_v57 = vadd.f32 %v3448_v35, %v3447_v5 }
 0xc47   :  { %v3450_v38 = vrot.slane %v3449_v57, 1 }
 0xc49   :  { %v3451_v55 = vadd.f32 %v3450_v38, %v3449_v57 }
 0xc4b   :  { %v3452_v29 = vmul.f32 0.03125, %v3451_v55 }
 0xc4d   :  { %v3453_v45 = vsub.f32 %v3431_v11, %v3452_v29  ;;  %v3454_v47 = vsub.f32 %v3432_v19, %v3452_v29  ;;  %v3455_v7 = vsub.f32 %v3433_v13, %v3452_v29  ;;  %v3456_v54 = vsub.f32 %v3434_v42, %v3452_v29  ;;  %v9336_v29 = vld [vmem:[%s14868_s7 + $0xc] ss:$0 sm:$0xff] }
 0xc4f   :  { %v3457_v44 = vmul.f32 %v3453_v45, %v3453_v45  ;;  %v3458_v48 = vmul.f32 %v3454_v47, %v3454_v47  ;;  %v3459_v16 = vmul.f32 %v3455_v7, %v3455_v7  ;;  %v3460_v41 = vmul.f32 %v3456_v54, %v3456_v54 }
 0xc51   :  { %v3461_v36 = vsel %vm186_vm1, %v3457_v44, 0.0  ;;  %v3462_v61 = vsel %vm186_vm1, %v3458_v48, 0.0  ;;  %v3464_v25 = vsel %vm186_vm1, %v3459_v16, 0.0  ;;  %v3466_v30 = vsel %vm186_vm1, %v3460_v41, 0.0 }
 0xc52   :  { %v3463_v15 = vadd.f32 %v3462_v61, %v3461_v36  ;;  %v9337_v61 = vld [vmem:[%s14868_s7 + $0xd] ss:$0 sm:$0xff] }
 0xc54   :  { %v3465_v34 = vadd.f32 %v3464_v25, %v3463_v15 }
 0xc56   :  { %v3467_v37 = vadd.f32 %v3466_v30, %v3465_v34 }
 0xc58   :  { %v3468_v31 = vrot.slane %v3467_v37, 4 }
 0xc5a   :  { %v3469_v11 = vadd.f32 %v3468_v31, %v3467_v37 }
 0xc5c   :  { %v3470_v19 = vrot.slane %v3469_v11, 2 }
 0xc5e   :  { %v3471_v13 = vadd.f32 %v3470_v19, %v3469_v11 }
 0xc60   :  { %v3472_v42 = vrot.slane %v3471_v13, 1 }
 0xc62   :  { %v3473_v62 = vadd.f32 %v3472_v42, %v3471_v13 }
 0xc64   :  { %v3474_v32 = vmul.f32 0.03125, %v3473_v62 }
 0xc66   :  { %v3475_v63 = vadd.f32 1e-05, %v3474_v32 }
 0xc68   :  { %9355 = vrsqrt.f32 %v3475_v63  ;;  %vm3482_vm3 = vweird.f32 %v3475_v63 }
 0xc6e   :  { %v9356_v4 = vpop.eup %9355 }
 0xc6f   :  { %v3477_v5 = vmul.f32 %v9356_v4, %v3475_v63  ;;  %vm3483_vm2 = vweird.f32 %v9356_v4 }
 0xc70   :  { %vm3484_vm4 = vmor %vm3482_vm3, %vm3483_vm2 }
 0xc71   :  { %v3478_v35 = vmul.f32 %v9356_v4, %v3477_v5 }
 0xc73   :  { %v3479_v57 = vmul.f32 0.5, %v3478_v35 }
 0xc75   :  { %v3480_v38 = vsub.f32 1.5, %v3479_v57 }
 0xc77   :  { %v3481_v55 = vmul.f32 %v9356_v4, %v3480_v38 }
 0xc79   :  { %v3485_v44 = vsel %vm3484_vm4, %v9356_v4, %v3481_v55 }
 0xc7a   :  { %v3486_v48 = vmul.f32 %v3485_v44, %v3453_v45  ;;  %v3487_v16 = vmul.f32 %v3485_v44, %v3454_v47  ;;  %v3488_v41 = vmul.f32 %v3485_v44, %v3455_v7  ;;  %v3489_v36 = vmul.f32 %v3485_v44, %v3456_v54  ;;  %v8141_v44 = vld [vmem:[%s14872_s3 + $0x220] sm:$0xff] }
 0xc7c   :  { %v3494_v15 = vmul.f32 %v9336_v29, %v3487_v16  ;;  %v3495_v25 = vmul.f32 %v9336_v29, %v3488_v41  ;;  %v3496_v34 = vmul.f32 %v9336_v29, %v3489_v36  ;;  %v3493_v30 = vmul.f32 %v9336_v29, %v3486_v48  ;;  %v8142_v29 = vld [vmem:[%s14872_s3 + $0x228] sm:$0xff]  ;;  %v8140_v48 = vld [vmem:[%s14872_s3 + $0x218] sm:$0xff]  ;;  %v8139_v16 = vld [vmem:[%s14872_s3 + $0x210] sm:$0xff] }
 0xc7d   :  { %v8138_v41 = vld [vmem:[%s14872_s3 + $0x208] sm:$0xff]  ;;  %v8137_v36 = vld [vmem:[%s14872_s3 + $0x200] sm:$0xff] }
 0xc7e   :  { %v11788_v37 = vadd.f32 %v9337_v61, %v3495_v25  ;;  %v11790_v31 = vadd.f32 %v9337_v61, %v3496_v34  ;;  %v11792_v11 = vadd.f32 %v9337_v61, %v3494_v15  ;;  %v11795_v45 = vadd.f32 %v9337_v61, %v3493_v30  ;;  %v8136_v61 = vld [vmem:[%s14872_s3 + $0x1f8] sm:$0xff]  ;;  %v8135_v15 = vld [vmem:[%s14872_s3 + $0x1f0] sm:$0xff]  ;;  %v8134_v25 = vld [vmem:[%s14872_s3 + $0x1e8] sm:$0xff] }
 0xc7f   :  { %v8133_v34 = vld [vmem:[%s14872_s3 + $0x1e0] sm:$0xff]  ;;  %v8132_v30 = vld [vmem:[%s14872_s3 + $0x1d8] sm:$0xff] }
 0xc80   :  { %v3511_v19 = vmax.f32 %v11790_v31, 0.0  ;;  %v3510_v47 = vmax.f32 %v11788_v37, 0.0  ;;  %v3509_v7 = vmax.f32 %v11792_v11, 0.0  ;;  %v3508_v54 = vmax.f32 %v11795_v45, 0.0 }
 0xc82   :  { %3524 = vmatpush.msra.mxu2 %v3511_v19  ;;  %3553 = vmatpush.msra.mxu3 %v3511_v19 }
 0xc83   :  { %3582 = vmatpush.msra.mxu0 %v3511_v19  ;;  %3611 = vmatpush.msra.mxu1 %v3511_v19 }
 0xc84   :  { %3525 = vmatpush.msra.mxu2 %v3510_v47  ;;  %3554 = vmatpush.msra.mxu3 %v3510_v47 }
 0xc85   :  { %3583 = vmatpush.msra.mxu0 %v3510_v47  ;;  %3612 = vmatpush.msra.mxu1 %v3510_v47 }
 0xc86   :  { %3526 = vmatpush.msra.mxu2 %v3509_v7  ;;  %3555 = vmatpush.msra.mxu3 %v3509_v7 }
 0xc87   :  { %3584 = vmatpush.msra.mxu0 %v3509_v7  ;;  %3613 = vmatpush.msra.mxu1 %v3509_v7 }
 0xc88   :  { %3527 = vmatpush.msra.mxu2 %v3508_v54  ;;  %3556 = vmatpush.msra.mxu3 %v3508_v54 }
 0xc89   :  { %3585 = vmatpush.msra.mxu0 %v3508_v54  ;;  %3614 = vmatpush.msra.mxu1 %v3508_v54 }
 0xc8a   :  { %8091 = vmatmul.msk.f32.vlgmr.msra.gmra.mxu2 %vm1147_vm5, %v11393_v6  ;;  %8095 = vmatmul.msk.f32.vlgmr.msra.gmra.mxu3 %vm1147_vm5, %v11400_v12  ;;  %v14899_v6 = vld [vmem:[#allocation2_spill] sm:$0xff]  ;;  %v14900_v12 = vld [vmem:[#allocation3_spill] sm:$0xff] }
 0xc8b   :  { %8099 = vmatmul.msk.f32.vlgmr.msra.gmra.mxu0 %vm1147_vm5, %v11407_v20  ;;  %3640 = vmatpush.msrb.mxu2 %v3511_v19 }
 0xc8c   :  { %3669 = vmatpush.msrb.mxu3 %v3511_v19  ;;  %3698 = vmatpush.msrb.mxu0 %v3511_v19 }
 0xc8d   :  { %3727 = vmatpush.msrb.mxu1 %v3511_v19  ;;  %3641 = vmatpush.msrb.mxu2 %v3510_v47 }
 0xc8e   :  { %3670 = vmatpush.msrb.mxu3 %v3510_v47  ;;  %3699 = vmatpush.msrb.mxu0 %v3510_v47 }
 0xc8f   :  { %3728 = vmatpush.msrb.mxu1 %v3510_v47  ;;  %3642 = vmatpush.msrb.mxu2 %v3509_v7 }
 0xc90   :  { %3671 = vmatpush.msrb.mxu3 %v3509_v7  ;;  %3700 = vmatpush.msrb.mxu0 %v3509_v7 }
 0xc91   :  { %3729 = vmatpush.msrb.mxu1 %v3509_v7  ;;  %3643 = vmatpush.msrb.mxu2 %v3508_v54 }
 0xc92   :  { %8103 = vmatmul.msk.f32.vlgmr.msra.gmra.mxu1 %vm1147_vm5, %v11414_v3  ;;  %3672 = vmatpush.msrb.mxu3 %v3508_v54 }
 0xc93   :  { %3701 = vmatpush.msrb.mxu0 %v3508_v54  ;;  %3730 = vmatpush.msrb.mxu1 %v3508_v54 }
 0xc94   :  { %3756 = vmatpush.msra.mxu2 %v3511_v19  ;;  %8096 = vmatmul.msk.f32.gmra.mxu3 %vm1147_vm5, %v11421_v58  ;;  %v8131_v19 = vld [vmem:[%s14872_s3 + $0x1d0] sm:$0xff] }
 0xc95   :  { %8092 = vmatmul.msk.f32.gmra.mxu2 %vm1147_vm5, %v11428_v28  ;;  %8100 = vmatmul.msk.f32.gmra.mxu0 %vm1147_vm5, %v11435_v56 }
 0xc96   :  { %3757 = vmatpush.msra.mxu2 %v3510_v47  ;;  %3947 = vmatpush.msra.mxu3 %v8142_v29  ;;  %v8130_v47 = vld [vmem:[%s14872_s3 + $0x1c8] sm:$0xff] }
 0xc98   :  { %3758 = vmatpush.msra.mxu2 %v3509_v7  ;;  %3948 = vmatpush.msra.mxu3 %v8141_v44  ;;  %v8129_v7 = vld [vmem:[%s14872_s3 + $0x1c0] sm:$0xff] }
 0xc9a   :  { %3759 = vmatpush.msra.mxu2 %v3508_v54  ;;  %8104 = vmatmul.msk.f32.gmra.mxu1 %vm1147_vm5, %v11442_v21  ;;  %v8128_v54 = vld [vmem:[%s14872_s3 + $0x1b8] sm:$0xff] }
 0xc9b   :  { %3949 = vmatpush.msra.mxu3 %v8140_v48 }
 0xc9c   :  { %8097 = vmatmul.msk.f32.gmra.mxu3 %vm1147_vm5, %v11449_v18 }
 0xc9d   :  { %8093 = vmatmul.msk.f32.gmra.mxu2 %vm1147_vm5, %v11456_v33  ;;  %8101 = vmatmul.msk.f32.gmra.mxu0 %vm1147_vm5, %v11463_v51 }
 0xc9e   :  { %3950 = vmatpush.msra.mxu3 %v8139_v16 }
 0xca0   :  { %3951 = vmatpush.msra.mxu3 %v8138_v41 }
 0xca2   :  { %8105 = vmatmul.msk.f32.gmra.mxu1 %vm1147_vm5, %v11470_v1  ;;  %3952 = vmatpush.msra.mxu3 %v8137_v36 }
 0xca4   :  { %8098 = vmatmul.msk.f32.gmra.mxu3 %vm1147_vm5, %v11477_v0 }
 0xca5   :  { %8094 = vmatmul.msk.f32.gmra.mxu2 %vm1147_vm5, %v11484_v10  ;;  %8102 = vmatmul.msk.f32.gmra.mxu0 %vm1147_vm5, %v11491_v52 }
 0xca6   :  { %3953 = vmatpush.msra.mxu3 %v8136_v61 }
 0xca8   :  { %3954 = vmatpush.msra.mxu3 %v8135_v15 }
 0xcaa   :  { %8106 = vmatmul.msk.f32.gmra.mxu1 %vm1147_vm5, %v11498_v46  ;;  %3955 = vmatpush.msra.mxu3 %v8134_v25 }
 0xcac   :  { %8111 = vmatmul.msk.f32.vlgmr.msrb.gmra.mxu3 %vm1147_vm5, %v11505_v43 }
 0xcad   :  { %8107 = vmatmul.msk.f32.vlgmr.msrb.gmra.mxu2 %vm1147_vm5, %v11512_v17  ;;  %8115 = vmatmul.msk.f32.vlgmr.msrb.gmra.mxu0 %vm1147_vm5, %v11519_v27 }
 0xcae   :  { %3956 = vmatpush.msra.mxu3 %v8133_v34 }
 0xcb0   :  { %3957 = vmatpush.msra.mxu3 %v8132_v30 }
 0xcb2   :  { %8119 = vmatmul.msk.f32.vlgmr.msrb.gmra.mxu1 %vm1147_vm5, %v11526_v8  ;;  %3958 = vmatpush.msra.mxu3 %v8131_v19 }
 0xcb4   :  { %8112 = vmatmul.msk.f32.gmra.mxu3 %vm1147_vm5, %v11533_v53 }
 0xcb5   :  { %8108 = vmatmul.msk.f32.gmra.mxu2 %vm1147_vm5, %v11540_v2  ;;  %8116 = vmatmul.msk.f32.gmra.mxu0 %vm1147_vm5, %v11547_v40 }
 0xcb6   :  { %3959 = vmatpush.msra.mxu3 %v8130_v47 }
 0xcb8   :  { %3960 = vmatpush.msra.mxu3 %v8129_v7 }
 0xcba   :  { %8120 = vmatmul.msk.f32.gmra.mxu1 %vm1147_vm5, %v11554_v14  ;;  %3961 = vmatpush.msra.mxu3 %v8128_v54 }
 0xcbc   :  { %8113 = vmatmul.msk.f32.gmra.mxu3 %vm1147_vm5, %v11561_v50 }
 0xcbd   :  { %8109 = vmatmul.msk.f32.gmra.mxu2 %vm1147_vm5, %v11568_v26  ;;  %8117 = vmatmul.msk.f32.gmra.mxu0 %vm1147_vm5, %v11575_v39 }
 0xcc2   :  { %8121 = vmatmul.msk.f32.gmra.mxu1 %vm1147_vm5, %v11582_v23 }
 0xcc4   :  { %8114 = vmatmul.msk.f32.gmra.mxu3 %vm1147_vm5, %v11589_v49 }
 0xcc5   :  { %8110 = vmatmul.msk.f32.gmra.mxu2 %vm1147_vm5, %v11596_v59  ;;  %8118 = vmatmul.msk.f32.gmra.mxu0 %vm1147_vm5, %v11603_v60 }
 0xcca   :  { %8122 = vmatmul.msk.f32.gmra.mxu1 %vm1147_vm5, %v11610_v9 }
 0xccd   :  { %8123 = vmatmul.msk.f32.vlgmr.msra.gmra.mxu2 %vm1147_vm5, %v11617_v22 }
 0xcd5   :  { %8124 = vmatmul.msk.f32.gmra.mxu2 %vm1147_vm5, %v11624_v24 }
 0xcdd   :  { %8125 = vmatmul.msk.f32.gmra.mxu2 %vm1147_vm5, %v14899_v6  ;;  %v8127_v6 = vld [vmem:[%s14872_s3 + $0x1b0] sm:$0xff] }
 0xcde   :  { %3962 = vmatpush.msra.mxu3 %v8127_v6 }
 0xce5   :  { %8126 = vmatmul.msk.f32.gmra.mxu2 %vm1147_vm5, %v14900_v12  ;;  %v8144_v12 = vld [vmem:[%s14872_s3 + $0x238] sm:$0xff] }
 0xce6   :  { %3990 = vmatpush.msra.mxu0 %v8144_v12 }
 0xd08   :  { %v3587_v20 = vpop.f32.mrf.mxu0 }
 0xd0d   :  { %v3558_v3 = vpop.f32.mrf.mxu3  ;;  %v11872_v58 = vpop.f32.mrf.mxu2 }
 0xd0f   :  { %v3616_v28 = vpop.f32.mrf.mxu1 }
 0xd12   :  { %v3590_v56 = vpop.f32.mrf.mxu0 }
 0xd13   :  { %v8948_v21 = vpack.i.bf16 %v3590_v56, %v3587_v20  ;;  %v8143_v20 = vld [vmem:[%s14872_s3 + $0x230] sm:$0xff] }
 0xd14   :  { %3991 = vmatpush.msra.mxu0 %v8143_v20 }
 0xd15   :  { %8949 = vrot.lane.b32.xlu2 %v8948_v21, %s9562_s29 }
 0xd17   :  { %v3561_v18 = vpop.f32.mrf.mxu3  ;;  %v3619_v33 = vpop.f32.mrf.mxu1 }
 0xd18   :  { %v11875_v51 = vpop.f32.mrf.mxu2  ;;  %v8958_v1 = vpack.i.bf16 %v3561_v18, %v3558_v3  ;;  %v8953_v0 = vpack.i.bf16 %v3619_v33, %v3616_v28 }
 0xd1a   :  { %v3593_v10 = vpop.f32.mrf.mxu0  ;;  %8954 = vrot.lane.b32.xlu0 %v8953_v0, %s9563_s30  ;;  %8959 = vrot.lane.b32.xlu1 %v8958_v1, %s9561_s10 }
 0xd1f   :  { %v3564_v52 = vpop.f32.mrf.mxu3  ;;  %v3622_v43 = vpop.f32.mrf.mxu1 }
 0xd20   :  { %v11879_v46 = vpop.f32.mrf.mxu2 }
 0xd22   :  { %v3596_v17 = vpop.f32.mrf.mxu0 }
 0xd23   :  { %v8988_v9 = vpack.i.bf16 %v3596_v17, %v3593_v10 }
 0xd27   :  { %v3567_v27 = vpop.f32.mrf.mxu3  ;;  %v3625_v53 = vpop.f32.mrf.mxu1 }
 0xd28   :  { %v11881_v8 = vpop.f32.mrf.mxu2  ;;  %v8983_v24 = vpack.i.bf16 %v3567_v27, %v3564_v52  ;;  %v8993_v63 = vpack.i.bf16 %v3625_v53, %v3622_v43 }
 0xd2a   :  { %v3703_v2 = vpop.f32.mrf.mxu0 }
 0xd2f   :  { %v3674_v40 = vpop.f32.mrf.mxu3  ;;  %v3732_v39 = vpop.f32.mrf.mxu1 }
 0xd30   :  { %v3645_v14 = vpop.f32.mrf.mxu2 }
 0xd32   :  { %v3706_v50 = vpop.f32.mrf.mxu0 }
 0xd33   :  { %v8963_v26 = vpack.i.bf16 %v3706_v50, %v3703_v2 }
 0xd35   :  { %8964 = vrot.lane.b32.xlu0 %v8963_v26, %s9566_s16 }
 0xd37   :  { %v3677_v23 = vpop.f32.mrf.mxu3  ;;  %v3735_v22 = vpop.f32.mrf.mxu1 }
 0xd38   :  { %v3648_v49 = vpop.f32.mrf.mxu2  ;;  %v8978_v59 = vpack.i.bf16 %v3677_v23, %v3674_v40  ;;  %v8973_v62 = vpack.i.bf16 %v3735_v22, %v3732_v39 }
 0xd39   :  { %v8968_v60 = vpack.i.bf16 %v3648_v49, %v3645_v14 }
 0xd3a   :  { %8979 = vrot.lane.b32.xlu2 %v8978_v59, %s9564_s1  ;;  %v3709_v35 = vpop.f32.mrf.mxu0 }
 0xd3b   :  { %8969 = vrot.lane.b32.xlu1 %v8968_v60, %s9560_s28 }
 0xd3d   :  { %8989 = vrot.lane.b32.xlu0 %v8988_v9, %s9562_s29 }
 0xd3f   :  { %v3680_v13 = vpop.f32.mrf.mxu3  ;;  %v3738_v57 = vpop.f32.mrf.mxu1 }
 0xd40   :  { %v3651_v42 = vpop.f32.mrf.mxu2 }
 0xd42   :  { %8984 = vrot.lane.b32.xlu2 %v8983_v24, %s9561_s10  ;;  %v3712_v38 = vpop.f32.mrf.mxu0 }
 0xd43   :  { %8974 = vrot.lane.b32.xlu1 %v8973_v62, %s9565_s15 }
 0xd45   :  { %3845 = vrot.lane.b32.xlu0 %v3680_v13, %s9564_s1 }
 0xd47   :  { %v3683_v5 = vpop.f32.mrf.mxu3  ;;  %v3741_v55 = vpop.f32.mrf.mxu1 }
 0xd48   :  { %v3654_v32 = vpop.f32.mrf.mxu2 }
 0xd49   :  { %v8998_v4 = vpack.i.bf16 %v3654_v32, %v3651_v42 }
 0xd4b   :  { %8994 = vrot.lane.b32.xlu1 %v8993_v63, %s9563_s30  ;;  %8999 = vrot.lane.b32.xlu2 %v8998_v4, %s9560_s28 }
 0xd4d   :  { %3847 = vrot.lane.b32.xlu0 %v3683_v5, %s9564_s1 }
 0xd50   :  { %v3761_v28 = vpop.f32.mrf.mxu2 }
 0xd51   :  { %8145 = vmatmul.msk.f32.vlgmr.msra.gmra.mxu0 %vm186_vm1, %v3761_v28 }
 0xd53   :  { %3861 = vrot.lane.b32.xlu1 %v3709_v35, %s9566_s16  ;;  %3877 = vrot.lane.b32.xlu2 %v3738_v57, %s9565_s15 }
 0xd58   :  { %v3764_v1 = vpop.f32.mrf.mxu2 }
 0xd59   :  { %8146 = vmatmul.msk.f32.gmra.mxu0 %vm186_vm1, %v3764_v1 }
 0xd5b   :  { %3863 = vrot.lane.b32.xlu1 %v3712_v38, %s9566_s16  ;;  %3879 = vrot.lane.b32.xlu2 %v3741_v55, %s9565_s15 }
 0xd60   :  { %v3767_v14 = vpop.f32.mrf.mxu2 }
 0xd61   :  { %8147 = vmatmul.msk.f32.gmra.mxu0 %vm186_vm1, %v3767_v14 }
 0xd6f   :  { %v8950_v3 = vpop.permute.xlu2 %8949 }
 0xd70   :  { %v8951_v10 = vunpack.i.l.bf16 %v8950_v3  ;;  %v8952_v23 = vunpack.i.h.bf16 %v8950_v3 }
 0xd8c   :  { %v8960_v56 = vpop.permute.xlu1 %8959  ;;  %v8955_v21 = vpop.permute.xlu0 %8954 }
 0xd8d   :  { %v8961_v18 = vunpack.i.l.bf16 %v8960_v56  ;;  %v8956_v17 = vunpack.i.l.bf16 %v8955_v21  ;;  %v8962_v27 = vunpack.i.h.bf16 %v8960_v56  ;;  %v8957_v24 = vunpack.i.h.bf16 %v8955_v21 }
 0xd8f   :  { %v3885_v0 = vsel %vm186_vm1, %v11872_v58, %v8961_v18  ;;  %v3886_v26 = vsel %vm186_vm1, %v11875_v51, %v8962_v27  ;;  %v3770_v51 = vpop.f32.mrf.mxu2  ;;  %v8149_v27 = vld [vmem:[%s14873_s4 + $0x30] sm:$0xff] }
 0xd90   :  { %v3889_v52 = vsel %vm1147_vm5, %v3885_v0, %v8951_v10  ;;  %v3890_v59 = vsel %vm1147_vm5, %v3886_v26, %v8952_v23  ;;  %8148 = vmatmul.msk.f32.gmra.mxu0 %vm186_vm1, %v3770_v51 }
 0xd91   :  { %v3893_v40 = vsel %vm69_vm0, %v3889_v52, %v8956_v17  ;;  %v3894_v62 = vsel %vm69_vm0, %v3890_v59, %v8957_v24  ;;  %v8150_v17 = vld [vmem:[%s14873_s4 + $0x38] sm:$0xff] }
 0xd92   :  { %4041 = vmatpush.msra.mxu1 %v8150_v17  ;;  %v9551_v17 = vld [vmem:[%s14871_s11 + $0xb8] sm:$0xff] }
 0xd94   :  { %v8980_v33 = vpop.permute.xlu2 %8979  ;;  %4042 = vmatpush.msra.mxu1 %v8149_v27  ;;  %v9552_v27 = vld [vmem:[%s14871_s11 + $0x98] sm:$0xff] }
 0xd95   :  { %v8981_v39 = vunpack.i.l.bf16 %v8980_v33  ;;  %v8982_v5 = vunpack.i.h.bf16 %v8980_v33 }
 0xd9c   :  { %v8985_v58 = vpop.permute.xlu2 %8984 }
 0xd9d   :  { %v8986_v35 = vunpack.i.l.bf16 %v8985_v58  ;;  %v8987_v19 = vunpack.i.h.bf16 %v8985_v58 }
 0xd9f   :  { %v3887_v16 = vsel %vm186_vm1, %v11879_v46, %v8986_v35  ;;  %v3888_v46 = vsel %vm186_vm1, %v11881_v8, %v8987_v19  ;;  %v9531_v19 = vld [vmem:[%s14871_s11 + $0x30] sm:$0xff] }
 0xda5   :  { %v9000_v57 = vpop.permute.xlu2 %8999 }
 0xda6   :  { %v9001_v15 = vunpack.i.l.bf16 %v9000_v57  ;;  %v9002_v18 = vunpack.i.h.bf16 %v9000_v57  ;;  %v9339_v57 = vld [vmem:[%s14874_s8 + $0x2] ss:$0 sm:$0xff] }
 0xda7   :  { %v8965_v53 = vpop.permute.xlu0 %8964 }
 0xda8   :  { %v8966_v60 = vunpack.i.l.bf16 %v8965_v53  ;;  %v8967_v44 = vunpack.i.h.bf16 %v8965_v53 }
 0xdad   :  { %v8970_v43 = vpop.permute.xlu1 %8969  ;;  %v3878_v54 = vpop.permute.xlu2 %3877 }
 0xdae   :  { %v8971_v2 = vunpack.i.l.bf16 %v8970_v43  ;;  %v8972_v9 = vunpack.i.h.bf16 %v8970_v43 }
 0xdaf   :  { %v8990_v32 = vpop.permute.xlu0 %8989 }
 0xdb0   :  { %v3897_v50 = vsel %vm1156_vm6, %v3893_v40, %v8971_v2  ;;  %v3898_v4 = vsel %vm1156_vm6, %v3894_v62, %v8972_v9  ;;  %v8991_v38 = vunpack.i.l.bf16 %v8990_v32  ;;  %v8992_v47 = vunpack.i.h.bf16 %v8990_v32  ;;  %v9338_v2 = vld [vmem:[%s14874_s8 + $0x1] ss:$0 sm:$0xff] }
 0xdb1   :  { %v3901_v49 = vsel %vm1161_vm7, %v3897_v50, %v8981_v39  ;;  %v3902_v29 = vsel %vm1161_vm7, %v3898_v4, %v8982_v5 }
 0xdb2   :  { %v3905_v42 = vsel %vm1166_vm8, %v3901_v49, %v8966_v60  ;;  %v3891_v36 = vsel %vm1147_vm5, %v3887_v16, %v8991_v38  ;;  %v3906_v61 = vsel %vm1166_vm8, %v3902_v29, %v8967_v44  ;;  %v3892_v3 = vsel %vm1147_vm5, %v3888_v46, %v8992_v47  ;;  %v9532_v47 = vld [vmem:[%s14871_s11 + $0x10] sm:$0xff]  ;;  %v9536_v46 = vld [vmem:[%s14871_s11 + $0x18] sm:$0xff] }
 0xdb5   :  { %v8975_v22 = vpop.permute.xlu1 %8974  ;;  %v3880_v0 = vpop.permute.xlu2 %3879 }
 0xdb6   :  { %v8976_v13 = vunpack.i.l.bf16 %v8975_v22  ;;  %v8977_v55 = vunpack.i.h.bf16 %v8975_v22 }
 0xdb7   :  { %v3846_v25 = vpop.permute.xlu0 %3845 }
 0xdb8   :  { %v3909_v63 = vsel %vm1171_vm9, %v3905_v42, %v8976_v13  ;;  %v3910_v30 = vsel %vm1171_vm9, %v3906_v61, %v8977_v55 }
 0xdb9   :  { %3963 = vmatmul.f32.vlgmr.msra.gmra.mxu3 %v3909_v63 }
 0xdbd   :  { %v8995_v48 = vpop.permute.xlu1 %8994 }
 0xdbe   :  { %v8996_v41 = vunpack.i.l.bf16 %v8995_v48  ;;  %v8997_v6 = vunpack.i.h.bf16 %v8995_v48 }
 0xdbf   :  { %v3848_v33 = vpop.permute.xlu0 %3847 }
 0xdc0   :  { %v3895_v34 = vsel %vm69_vm0, %v3891_v36, %v8996_v41  ;;  %v3896_v56 = vsel %vm69_vm0, %v3892_v3, %v8997_v6  ;;  %v9535_v6 = vld [vmem:[%s14871_s11 + $0x38] sm:$0xff]  ;;  %v9539_v3 = vld [vmem:[%s14871_s11 + $0xa0] sm:$0xff] }
 0xdc1   :  { %3966 = vmatmul.f32.gmra.mxu3 %v3910_v30  ;;  %v3899_v7 = vsel %vm1156_vm6, %v3895_v34, %v9001_v15  ;;  %v3900_v1 = vsel %vm1156_vm6, %v3896_v56, %v9002_v18  ;;  %v9527_v15 = vld [vmem:[%s14871_s11 + $0x28] sm:$0xff]  ;;  %v9541_v56 = vld [vmem:[%s14871_s11 + $0xc0] sm:$0xff] }
 0xdc2   :  { %v3903_v20 = vsel %vm1161_vm7, %v3899_v7, %v3846_v25  ;;  %v3904_v10 = vsel %vm1161_vm7, %v3900_v1, %v3848_v33  ;;  %v9528_v25 = vld [vmem:[%s14871_s11 + $0x8] sm:$0xff]  ;;  %v9533_v7 = vld [vmem:[%s14871_s11 + $0x50] sm:$0xff] }
 0xdc3   :  { %v9529_v34 = vld [vmem:[%s14871_s11 + $0x48] sm:$0xff] }
 0xdc4   :  { %v9530_v30 = vld [vmem:[%s14871_s11 + $0x68] sm:$0xff] }
 0xdc5   :  { %v3862_v12 = vpop.permute.xlu1 %3861  ;;  %v9543_v18 = vld [vmem:[%s14871_s11 + $0xa8] sm:$0xff] }
 0xdc6   :  { %v3907_v28 = vsel %vm1166_vm8, %v3903_v20, %v3862_v12  ;;  %v9537_v12 = vld [vmem:[%s14871_s11 + $0x58] sm:$0xff]  ;;  %v9544_v33 = vld [vmem:[%s14871_s11 + $0x88] sm:$0xff] }
 0xdc7   :  { %v3911_v21 = vsel %vm1171_vm9, %v3907_v28, %v3878_v54  ;;  %v9534_v54 = vld [vmem:[%s14871_s11 + $0x70] sm:$0xff]  ;;  %v9538_v20 = vld [vmem:[%s14871_s11 + $0x78] sm:$0xff]  ;;  %v9540_v28 = vld [vmem:[%s14871_s11 + $0x80] sm:$0xff] }
 0xdc8   :  { %v9545_v1 = vld [vmem:[%s14871_s11 + $0xc8] sm:$0xff] }
 0xdc9   :  { %3969 = vmatmul.f32.gmra.mxu3 %v3911_v21  ;;  %v9542_v21 = vld [vmem:[%s14871_s11 + $0xe0] sm:$0xff] }
 0xdcd   :  { %v3864_v8 = vpop.permute.xlu1 %3863 }
 0xdce   :  { %v3908_v52 = vsel %vm1166_vm8, %v3904_v10, %v3864_v8  ;;  %v3993_v53 = vpop.f32.mrf.mxu0  ;;  %v9547_v10 = vld [vmem:[%s14871_s11 + $0xb0] sm:$0xff] }
 0xdcf   :  { %v3912_v43 = vsel %vm1171_vm9, %v3908_v52, %v3880_v0  ;;  %v9546_v0 = vld [vmem:[%s14871_s11 + $0xe8] sm:$0xff]  ;;  %v9548_v8 = vld [vmem:[%s14871_s11 + $0x90] sm:$0xff] }
 0xdd0   :  { %v9549_v52 = vld [vmem:[%s14871_s11 + $0xd0] sm:$0xff] }
 0xdd1   :  { %3972 = vmatmul.f32.gmra.mxu3 %v3912_v43  ;;  %v9550_v43 = vld [vmem:[%s14871_s11 + $0xf0] sm:$0xff] }
 0xdd6   :  { %v3996_v26 = vpop.f32.mrf.mxu0 }
 0xdde   :  { %v3999_v60 = vpop.f32.mrf.mxu0 }
 0xe0d   :  { %v4002_v62 = vpop.f32.mrf.mxu0 }
 0xe3c   :  { %v3964_v40 = vpop.f32.mrf.mxu3 }
 0xe3d   :  { %v3965_v14 = vadd.f32 %v9338_v2, %v3964_v40  ;;  %v9555_v40 = vld [vmem:[%s14871_s11 + $0x100] sm:$0xff] }
 0xe3f   :  { %v3994_v50 = vadd.f32 %v3993_v53, %v3965_v14  ;;  %v9553_v53 = vld [vmem:[%s14871_s11 + $0xd8] sm:$0xff]  ;;  %v9556_v14 = vld [vmem:[%s14871_s11 + $0x108] sm:$0xff] }
 0xe41   :  { %v4005_v39 = vmax.f32 %v3994_v50, 0.0  ;;  %v9557_v50 = vld [vmem:[%s14871_s11 + $0x110] sm:$0xff] }
 0xe43   :  { %8151 = vmatmul.msk.f32.vlgmr.msra.gmra.mxu1 %vm186_vm1, %v4005_v39 }
 0xe44   :  { %v3967_v58 = vpop.f32.mrf.mxu3 }
 0xe45   :  { %v3968_v23 = vadd.f32 %v9338_v2, %v3967_v58 }
 0xe47   :  { %v3997_v49 = vadd.f32 %v3996_v26, %v3968_v23  ;;  %v9558_v26 = vld [vmem:[%s14871_s11 + $0x118] sm:$0xff] }
 0xe49   :  { %v4006_v59 = vmax.f32 %v3997_v49, 0.0 }
 0xe4b   :  { %8152 = vmatmul.msk.f32.gmra.mxu1 %vm186_vm1, %v4006_v59 }
 0xe4c   :  { %v3970_v9 = vpop.f32.mrf.mxu3 }
 0xe4d   :  { %v3971_v22 = vadd.f32 %v9338_v2, %v3970_v9 }
 0xe4f   :  { %v4000_v24 = vadd.f32 %v3999_v60, %v3971_v22 }
 0xe51   :  { %v4007_v13 = vmax.f32 %v4000_v24, 0.0 }
 0xe53   :  { %8153 = vmatmul.msk.f32.gmra.mxu1 %vm186_vm1, %v4007_v13 }
 0xe54   :  { %v3973_v42 = vpop.f32.mrf.mxu3 }
 0xe55   :  { %v3974_v32 = vadd.f32 %v9338_v2, %v3973_v42  ;;  %v9554_v2 = vld [vmem:[%s14871_s11 + $0xf8] sm:$0xff] }
 0xe57   :  { %v4003_v63 = vadd.f32 %v4002_v62, %v3974_v32 }
 0xe59   :  { %v4008_v51 = vmax.f32 %v4003_v63, 0.0 }
 0xe5b   :  { %8154 = vmatmul.msk.f32.gmra.mxu1 %vm186_vm1, %v4008_v51 }
 0xec0   :  { %v4044_v4 = vpop.f32.mrf.mxu1 }
 0xec1   :  { %v4045_v16 = vadd.f32 %v9339_v57, %v4044_v4 }
 0xec3   :  { %v4056_v61 = vadd.f32 %v4045_v16, %v11795_v45  ;;  %v9526_v45 = vld [vmem:[%s14871_s11 + $0x60] sm:$0xff] }
 0xec8   :  { %v4047_v5 = vpop.f32.mrf.mxu1 }
 0xec9   :  { %v4048_v44 = vadd.f32 %v9339_v57, %v4047_v5 }
 0xecb   :  { %v4057_v36 = vadd.f32 %v4048_v44, %v11792_v11  ;;  %v9525_v11 = vld [vmem:[%s14871_s11 + $0x40] sm:$0xff] }
 0xed0   :  { %v4050_v35 = vpop.f32.mrf.mxu1 }
 0xed1   :  { %v4051_v55 = vadd.f32 %v9339_v57, %v4050_v35 }
 0xed3   :  { %v4058_v41 = vadd.f32 %v4051_v55, %v11788_v37  ;;  %v9523_v37 = vld [vmem:[%s14871_s11] sm:$0xff] }
 0xed8   :  { %v4053_v38 = vpop.f32.mrf.mxu1 }
 0xed9   :  { %v4054_v29 = vadd.f32 %v9339_v57, %v4053_v38 }
 0xedb   :  { %v4059_v48 = vadd.f32 %v4054_v29, %v11790_v31  ;;  %v9524_v31 = vld [vmem:[%s14871_s11 + $0x20] sm:$0xff] }
 0xedd   :  { %4072 = vmatpush.msrb.mxu2 %v4059_v48  ;;  %4101 = vmatpush.msrb.mxu3 %v4059_v48 }
 0xede   :  { %4130 = vmatpush.msrb.mxu0 %v4059_v48  ;;  %4159 = vmatpush.msrb.mxu1 %v4059_v48 }
 0xedf   :  { %4073 = vmatpush.msrb.mxu2 %v4058_v41  ;;  %4102 = vmatpush.msrb.mxu3 %v4058_v41 }
 0xee0   :  { %4131 = vmatpush.msrb.mxu0 %v4058_v41  ;;  %4160 = vmatpush.msrb.mxu1 %v4058_v41 }
 0xee1   :  { %4074 = vmatpush.msrb.mxu2 %v4057_v36  ;;  %4103 = vmatpush.msrb.mxu3 %v4057_v36 }
 0xee2   :  { %4132 = vmatpush.msrb.mxu0 %v4057_v36  ;;  %4161 = vmatpush.msrb.mxu1 %v4057_v36 }
 0xee3   :  { %4075 = vmatpush.msrb.mxu2 %v4056_v61  ;;  %4104 = vmatpush.msrb.mxu3 %v4056_v61 }
 0xee4   :  { %4133 = vmatpush.msrb.mxu0 %v4056_v61  ;;  %4162 = vmatpush.msrb.mxu1 %v4056_v61 }
 0xee5   :  { %8155 = vmatmul.msk.f32.vlgmr.msrb.gmra.mxu2 %vm1147_vm5, %v9523_v37  ;;  %8159 = vmatmul.msk.f32.vlgmr.msrb.gmra.mxu3 %vm1147_vm5, %v9524_v31 }
 0xee6   :  { %8163 = vmatmul.msk.f32.vlgmr.msrb.gmra.mxu0 %vm1147_vm5, %v9525_v11  ;;  %4188 = vmatpush.msra.mxu2 %v4059_v48 }
 0xee7   :  { %4217 = vmatpush.msra.mxu3 %v4059_v48  ;;  %4246 = vmatpush.msra.mxu0 %v4059_v48 }
 0xee8   :  { %4275 = vmatpush.msra.mxu1 %v4059_v48  ;;  %4189 = vmatpush.msra.mxu2 %v4058_v41 }
 0xee9   :  { %4218 = vmatpush.msra.mxu3 %v4058_v41  ;;  %4247 = vmatpush.msra.mxu0 %v4058_v41 }
 0xeea   :  { %4276 = vmatpush.msra.mxu1 %v4058_v41  ;;  %4190 = vmatpush.msra.mxu2 %v4057_v36 }
 0xeeb   :  { %4219 = vmatpush.msra.mxu3 %v4057_v36  ;;  %4248 = vmatpush.msra.mxu0 %v4057_v36 }
 0xeec   :  { %4277 = vmatpush.msra.mxu1 %v4057_v36  ;;  %4191 = vmatpush.msra.mxu2 %v4056_v61 }
 0xeed   :  { %8167 = vmatmul.msk.f32.vlgmr.msrb.gmra.mxu1 %vm1147_vm5, %v9526_v45  ;;  %4220 = vmatpush.msra.mxu3 %v4056_v61 }
 0xeee   :  { %4249 = vmatpush.msra.mxu0 %v4056_v61  ;;  %4278 = vmatpush.msra.mxu1 %v4056_v61 }
 0xeef   :  { %4304 = vmatpush.msrb.mxu2 %v4059_v48  ;;  %8160 = vmatmul.msk.f32.gmra.mxu3 %vm1147_vm5, %v9527_v15 }
 0xef0   :  { %8156 = vmatmul.msk.f32.gmra.mxu2 %vm1147_vm5, %v9528_v25  ;;  %8164 = vmatmul.msk.f32.gmra.mxu0 %vm1147_vm5, %v9529_v34 }
 0xef1   :  { %4305 = vmatpush.msrb.mxu2 %v4058_v41 }
 0xef3   :  { %4306 = vmatpush.msrb.mxu2 %v4057_v36 }
 0xef5   :  { %4307 = vmatpush.msrb.mxu2 %v4056_v61  ;;  %8168 = vmatmul.msk.f32.gmra.mxu1 %vm1147_vm5, %v9530_v30 }
 0xef7   :  { %8161 = vmatmul.msk.f32.gmra.mxu3 %vm1147_vm5, %v9531_v19 }
 0xef8   :  { %8157 = vmatmul.msk.f32.gmra.mxu2 %vm1147_vm5, %v9532_v47  ;;  %8165 = vmatmul.msk.f32.gmra.mxu0 %vm1147_vm5, %v9533_v7 }
 0xefd   :  { %8169 = vmatmul.msk.f32.gmra.mxu1 %vm1147_vm5, %v9534_v54 }
 0xeff   :  { %8162 = vmatmul.msk.f32.gmra.mxu3 %vm1147_vm5, %v9535_v6 }
 0xf00   :  { %8158 = vmatmul.msk.f32.gmra.mxu2 %vm1147_vm5, %v9536_v46  ;;  %8166 = vmatmul.msk.f32.gmra.mxu0 %vm1147_vm5, %v9537_v12  ;;  %v8228_v46 = vld [vmem:[%s14875_s5 + $0x118] sm:$0xff] }
 0xf05   :  { %8170 = vmatmul.msk.f32.gmra.mxu1 %vm1147_vm5, %v9538_v20  ;;  %v8227_v20 = vld [vmem:[%s14875_s5 + $0x110] sm:$0xff] }
 0xf07   :  { %8175 = vmatmul.msk.f32.vlgmr.msra.gmra.mxu3 %vm1147_vm5, %v9539_v3 }
 0xf08   :  { %8171 = vmatmul.msk.f32.vlgmr.msra.gmra.mxu2 %vm1147_vm5, %v9540_v28  ;;  %8179 = vmatmul.msk.f32.vlgmr.msra.gmra.mxu0 %vm1147_vm5, %v9541_v56 }
 0xf09   :  { %4644 = vmatpush.msra.mxu2 %v8228_v46  ;;  %v8296_v46 = vld [vmem:[%s14875_s5 + $0x198] sm:$0xff] }
 0xf0b   :  { %4645 = vmatpush.msra.mxu2 %v8227_v20  ;;  %v8295_v20 = vld [vmem:[%s14875_s5 + $0x190] sm:$0xff] }
 0xf0d   :  { %8183 = vmatmul.msk.f32.vlgmr.msra.gmra.mxu1 %vm1147_vm5, %v9542_v21 }
 0xf0f   :  { %8176 = vmatmul.msk.f32.gmra.mxu3 %vm1147_vm5, %v9543_v18 }
 0xf10   :  { %8172 = vmatmul.msk.f32.gmra.mxu2 %vm1147_vm5, %v9544_v33  ;;  %8180 = vmatmul.msk.f32.gmra.mxu0 %vm1147_vm5, %v9545_v1  ;;  %v8298_v33 = vld [vmem:[%s14875_s5 + $0x1a8] sm:$0xff]  ;;  %v8297_v1 = vld [vmem:[%s14875_s5 + $0x1a0] sm:$0xff] }
 0xf15   :  { %8184 = vmatmul.msk.f32.gmra.mxu1 %vm1147_vm5, %v9546_v0  ;;  %v4492_v0 = vld [vmem:[%s14875_s5 + $0x78] sm:$0xff] }
 0xf16   :  { %4507 = vmatpush.msrb.mxu3 %v4492_v0 }
 0xf17   :  { %8177 = vmatmul.msk.f32.gmra.mxu3 %vm1147_vm5, %v9547_v10  ;;  %v8226_v10 = vld [vmem:[%s14875_s5 + $0x108] sm:$0xff] }
 0xf18   :  { %8173 = vmatmul.msk.f32.gmra.mxu2 %vm1147_vm5, %v9548_v8  ;;  %8181 = vmatmul.msk.f32.gmra.mxu0 %vm1147_vm5, %v9549_v52  ;;  %v8350_v8 = vld [vmem:[%s14875_s5 + $0x228] sm:$0xff]  ;;  %v4491_v52 = vld [vmem:[%s14875_s5 + $0x70] sm:$0xff] }
 0xf19   :  { %4601 = vmatpush.msrb.mxu1 %v8226_v10  ;;  %4508 = vmatpush.msrb.mxu3 %v4491_v52 }
 0xf1d   :  { %8185 = vmatmul.msk.f32.gmra.mxu1 %vm1147_vm5, %v9550_v43  ;;  %v8225_v43 = vld [vmem:[%s14875_s5 + $0x100] sm:$0xff] }
 0xf1e   :  { %4602 = vmatpush.msrb.mxu1 %v8225_v43  ;;  %v8290_v43 = vld [vmem:[%s14875_s5 + $0x168] sm:$0xff] }
 0xf1f   :  { %8178 = vmatmul.msk.f32.gmra.mxu3 %vm1147_vm5, %v9551_v17  ;;  %v8349_v17 = vld [vmem:[%s14875_s5 + $0x220] sm:$0xff] }
 0xf20   :  { %8174 = vmatmul.msk.f32.gmra.mxu2 %vm1147_vm5, %v9552_v27  ;;  %8182 = vmatmul.msk.f32.gmra.mxu0 %vm1147_vm5, %v9553_v53  ;;  %v4490_v27 = vld [vmem:[%s14875_s5 + $0x68] sm:$0xff]  ;;  %v8224_v53 = vld [vmem:[%s14875_s5 + $0xf8] sm:$0xff] }
 0xf21   :  { %4509 = vmatpush.msrb.mxu3 %v4490_v27  ;;  %4603 = vmatpush.msrb.mxu1 %v8224_v53 }
 0xf25   :  { %8186 = vmatmul.msk.f32.gmra.mxu1 %vm1147_vm5, %v9554_v2  ;;  %v8348_v2 = vld [vmem:[%s14875_s5 + $0x218] sm:$0xff] }
 0xf28   :  { %8187 = vmatmul.msk.f32.vlgmr.msrb.gmra.mxu2 %vm1147_vm5, %v9555_v40  ;;  %v4489_v40 = vld [vmem:[%s14875_s5 + $0x60] sm:$0xff] }
 0xf29   :  { %4964 = vmatpush.msrb.mxu2 %v8298_v33  ;;  %4510 = vmatpush.msrb.mxu3 %v4489_v40  ;;  %v8292_v33 = vld [vmem:[%s14875_s5 + $0x178] sm:$0xff]  ;;  %v8287_v40 = vld [vmem:[%s14875_s5 + $0x150] sm:$0xff] }
 0xf2b   :  { %4965 = vmatpush.msrb.mxu2 %v8297_v1  ;;  %v8291_v1 = vld [vmem:[%s14875_s5 + $0x170] sm:$0xff] }
 0xf30   :  { %8188 = vmatmul.msk.f32.gmra.mxu2 %vm1147_vm5, %v9556_v14  ;;  %v8223_v14 = vld [vmem:[%s14875_s5 + $0xf0] sm:$0xff] }
 0xf31   :  { %4604 = vmatpush.msrb.mxu1 %v8223_v14 }
 0xf38   :  { %8189 = vmatmul.msk.f32.gmra.mxu2 %vm1147_vm5, %v9557_v50  ;;  %v8347_v50 = vld [vmem:[%s14875_s5 + $0x210] sm:$0xff] }
 0xf40   :  { %8190 = vmatmul.msk.f32.gmra.mxu2 %vm1147_vm5, %v9558_v26  ;;  %v4488_v26 = vld [vmem:[%s14875_s5 + $0x58] sm:$0xff] }
 0xf41   :  { %4511 = vmatpush.msrb.mxu3 %v4488_v26 }
 0xf63   :  { %v4135_v39 = vpop.f32.mrf.mxu0 }
 0xf68   :  { %v4106_v58 = vpop.f32.mrf.mxu3  ;;  %v12151_v23 = vpop.f32.mrf.mxu2 }
 0xf6a   :  { %v4164_v49 = vpop.f32.mrf.mxu1 }
 0xf6d   :  { %v4138_v59 = vpop.f32.mrf.mxu0 }
 0xf6e   :  { %v9003_v60 = vpack.i.bf16 %v4138_v59, %v4135_v39  ;;  %v8222_v39 = vld [vmem:[%s14875_s5 + $0xe8] sm:$0xff]  ;;  %v8221_v59 = vld [vmem:[%s14875_s5 + $0xe0] sm:$0xff] }
 0xf6f   :  { %4605 = vmatpush.msrb.mxu1 %v8222_v39 }
 0xf70   :  { %9004 = vrot.lane.b32.xlu1 %v9003_v60, %s9562_s29  ;;  %v8345_v60 = vld [vmem:[%s14875_s5 + $0x200] sm:$0xff] }
 0xf71   :  { %4606 = vmatpush.msrb.mxu1 %v8221_v59  ;;  %v8286_v59 = vld [vmem:[%s14875_s5 + $0x148] sm:$0xff] }
 0xf72   :  { %v4109_v9 = vpop.f32.mrf.mxu3  ;;  %v4167_v22 = vpop.f32.mrf.mxu1 }
 0xf73   :  { %v12154_v24 = vpop.f32.mrf.mxu2  ;;  %v9013_v13 = vpack.i.bf16 %v4109_v9, %v4106_v58  ;;  %v9008_v42 = vpack.i.bf16 %v4167_v22, %v4164_v49  ;;  %v8346_v58 = vld [vmem:[%s14875_s5 + $0x208] sm:$0xff]  ;;  %v4487_v49 = vld [vmem:[%s14875_s5 + $0x50] sm:$0xff]  ;;  %v8220_v22 = vld [vmem:[%s14875_s5 + $0xd8] sm:$0xff] }
 0xf74   :  { %v4486_v9 = vld [vmem:[%s14875_s5 + $0x48] sm:$0xff]  ;;  %4512 = vmatpush.msrb.mxu3 %v4487_v49  ;;  %4607 = vmatpush.msrb.mxu1 %v8220_v22 }
 0xf75   :  { %v4141_v62 = vpop.f32.mrf.mxu0  ;;  %9009 = vrot.lane.b32.xlu2 %v9008_v42, %s9563_s30  ;;  %9014 = vrot.lane.b32.xlu0 %v9013_v13, %s9561_s10  ;;  %v8344_v13 = vld [vmem:[%s14875_s5 + $0x1f8] sm:$0xff]  ;;  %v4485_v42 = vld [vmem:[%s14875_s5 + $0x40] sm:$0xff] }
 0xf76   :  { %4513 = vmatpush.msrb.mxu3 %v4486_v9 }
 0xf78   :  { %4514 = vmatpush.msrb.mxu3 %v4485_v42 }
 0xf7a   :  { %v4112_v32 = vpop.f32.mrf.mxu3  ;;  %v4170_v51 = vpop.f32.mrf.mxu1 }
 0xf7b   :  { %v12158_v63 = vpop.f32.mrf.mxu2 }
 0xf7d   :  { %v4144_v4 = vpop.f32.mrf.mxu0 }
 0xf7e   :  { %v9043_v31 = vpack.i.bf16 %v4144_v4, %v4141_v62  ;;  %v8219_v62 = vld [vmem:[%s14875_s5 + $0xd0] sm:$0xff]  ;;  %v8218_v4 = vld [vmem:[%s14875_s5 + $0xc8] sm:$0xff] }
 0xf7f   :  { %4608 = vmatpush.msrb.mxu1 %v8219_v62 }
 0xf81   :  { %4609 = vmatpush.msrb.mxu1 %v8218_v4  ;;  %v8352_v4 = vld [vmem:[%s14875_s5 + $0x238] sm:$0xff] }
 0xf82   :  { %v4115_v5 = vpop.f32.mrf.mxu3  ;;  %v4173_v57 = vpop.f32.mrf.mxu1 }
 0xf83   :  { %v12160_v35 = vpop.f32.mrf.mxu2  ;;  %v9038_v45 = vpack.i.bf16 %v4115_v5, %v4112_v32  ;;  %v9048_v19 = vpack.i.bf16 %v4173_v57, %v4170_v51  ;;  %v8343_v32 = vld [vmem:[%s14875_s5 + $0x1f0] sm:$0xff]  ;;  %v4484_v51 = vld [vmem:[%s14875_s5 + $0x38] sm:$0xff]  ;;  %v8342_v5 = vld [vmem:[%s14875_s5 + $0x1e8] sm:$0xff] }
 0xf84   :  { %v4483_v57 = vld [vmem:[%s14875_s5 + $0x30] sm:$0xff]  ;;  %4515 = vmatpush.msrb.mxu3 %v4484_v51 }
 0xf85   :  { %v4251_v38 = vpop.f32.mrf.mxu0  ;;  %v8283_v51 = vld [vmem:[%s14875_s5 + $0x130] sm:$0xff] }
 0xf86   :  { %4516 = vmatpush.msrb.mxu3 %v4483_v57 }
 0xf8a   :  { %v4222_v55 = vpop.f32.mrf.mxu3  ;;  %v4280_v16 = vpop.f32.mrf.mxu1 }
 0xf8b   :  { %v4193_v29 = vpop.f32.mrf.mxu2 }
 0xf8d   :  { %v4254_v44 = vpop.f32.mrf.mxu0 }
 0xf8e   :  { %v9018_v48 = vpack.i.bf16 %v4254_v44, %v4251_v38  ;;  %v8217_v38 = vld [vmem:[%s14875_s5 + $0xc0] sm:$0xff]  ;;  %v8216_v44 = vld [vmem:[%s14875_s5 + $0xb8] sm:$0xff] }
 0xf8f   :  { %4610 = vmatpush.msrb.mxu1 %v8217_v38  ;;  %v8282_v38 = vld [vmem:[%s14875_s5 + $0x128] sm:$0xff] }
 0xf90   :  { %9019 = vrot.lane.b32.xlu2 %v9018_v48, %s9566_s16  ;;  %v8340_v48 = vld [vmem:[%s14875_s5 + $0x1d8] sm:$0xff] }
 0xf91   :  { %4611 = vmatpush.msrb.mxu1 %v8216_v44 }
 0xf92   :  { %v4225_v41 = vpop.f32.mrf.mxu3  ;;  %v4283_v11 = vpop.f32.mrf.mxu1 }
 0xf93   :  { %v4196_v36 = vpop.f32.mrf.mxu2  ;;  %v9033_v61 = vpack.i.bf16 %v4225_v41, %v4222_v55  ;;  %v9028_v34 = vpack.i.bf16 %v4283_v11, %v4280_v16  ;;  %v8341_v55 = vld [vmem:[%s14875_s5 + $0x1e0] sm:$0xff]  ;;  %v4494_v41 = vld [vmem:[%s14875_s5 + $0x88] sm:$0xff] }
 0xf94   :  { %v9023_v37 = vpack.i.bf16 %v4196_v36, %v4193_v29  ;;  %v4482_v29 = vld [vmem:[%s14875_s5 + $0x28] sm:$0xff]  ;;  %v4481_v16 = vld [vmem:[%s14875_s5 + $0x20] sm:$0xff]  ;;  %v8215_v36 = vld [vmem:[%s14875_s5 + $0xb0] sm:$0xff]  ;;  %4550 = vmatpush.msrb.mxu0 %v4494_v41 }
 0xf95   :  { %9034 = vrot.lane.b32.xlu1 %v9033_v61, %s9564_s1  ;;  %v4257_v54 = vpop.f32.mrf.mxu0  ;;  %4517 = vmatpush.msrb.mxu3 %v4482_v29  ;;  %v8339_v61 = vld [vmem:[%s14875_s5 + $0x1d0] sm:$0xff]  ;;  %v8214_v11 = vld [vmem:[%s14875_s5 + $0xa8] sm:$0xff] }
 0xf96   :  { %9024 = vrot.lane.b32.xlu0 %v9023_v37, %s9560_s28  ;;  %4612 = vmatpush.msrb.mxu1 %v8215_v36  ;;  %v4480_v37 = vld [vmem:[%s14875_s5 + $0x18] sm:$0xff] }
 0xf97   :  { %4518 = vmatpush.msrb.mxu3 %v4481_v16 }
 0xf98   :  { %9044 = vrot.lane.b32.xlu2 %v9043_v31, %s9562_s29  ;;  %v4493_v31 = vld [vmem:[%s14875_s5 + $0x80] sm:$0xff]  ;;  %4613 = vmatpush.msrb.mxu1 %v8214_v11 }
 0xf99   :  { %4519 = vmatpush.msrb.mxu3 %v4480_v37  ;;  %4551 = vmatpush.msrb.mxu0 %v4493_v31 }
 0xf9a   :  { %v4228_v25 = vpop.f32.mrf.mxu3  ;;  %v4286_v6 = vpop.f32.mrf.mxu1 }
 0xf9b   :  { %v4199_v15 = vpop.f32.mrf.mxu2 }
 0xf9d   :  { %9039 = vrot.lane.b32.xlu1 %v9038_v45, %s9561_s10  ;;  %v4260_v3 = vpop.f32.mrf.mxu0  ;;  %v8338_v45 = vld [vmem:[%s14875_s5 + $0x1c8] sm:$0xff] }
 0xf9e   :  { %9029 = vrot.lane.b32.xlu0 %v9028_v34, %s9565_s15  ;;  %v8337_v34 = vld [vmem:[%s14875_s5 + $0x1c0] sm:$0xff] }
 0xfa0   :  { %4393 = vrot.lane.b32.xlu2 %v4228_v25, %s9564_s1  ;;  %v8213_v25 = vld [vmem:[%s14875_s5 + $0xa0] sm:$0xff] }
 0xfa1   :  { %4614 = vmatpush.msrb.mxu1 %v8213_v25 }
 0xfa2   :  { %v4231_v7 = vpop.f32.mrf.mxu3  ;;  %v4289_v28 = vpop.f32.mrf.mxu1 }
 0xfa3   :  { %v4202_v30 = vpop.f32.mrf.mxu2 }
 0xfa4   :  { %v9053_v47 = vpack.i.bf16 %v4202_v30, %v4199_v15  ;;  %v4479_v15 = vld [vmem:[%s14875_s5 + $0x10] sm:$0xff]  ;;  %v4478_v30 = vld [vmem:[%s14875_s5 + $0x8] sm:$0xff] }
 0xfa5   :  { %4520 = vmatpush.msrb.mxu3 %v4479_v15 }
 0xfa6   :  { %9049 = vrot.lane.b32.xlu0 %v9048_v19, %s9563_s30  ;;  %9054 = vrot.lane.b32.xlu1 %v9053_v47, %s9560_s28  ;;  %v8212_v19 = vld [vmem:[%s14875_s5 + $0x98] sm:$0xff] }
 0xfa7   :  { %v8336_v47 = vld [vmem:[%s14875_s5 + $0x1b8] sm:$0xff]  ;;  %4521 = vmatpush.msrb.mxu3 %v4478_v30  ;;  %4615 = vmatpush.msrb.mxu1 %v8212_v19 }
 0xfa8   :  { %4395 = vrot.lane.b32.xlu2 %v4231_v7, %s9564_s1  ;;  %v4477_v7 = vld [vmem:[%s14875_s5] sm:$0xff] }
 0xfa9   :  { %4522 = vmatpush.msrb.mxu3 %v4477_v7 }
 0xfab   :  { %v12177_v12 = vpop.f32.mrf.mxu2 }
 0xfac   :  { %8229 = vmatmul.msk.f32.vlgmr.msra.gmra.mxu2 %vm186_vm1, %v12177_v12  ;;  %8191 = vmatmul.msk.f32.vlgmr.msrb.gmra.mxu0 %vm186_vm1, %v12177_v12 }
 0xfad   :  { %5144 = vmatpush.msra.mxu2 %v8350_v8 }
 0xfae   :  { %4409 = vrot.lane.b32.xlu0 %v4257_v54, %s9566_s16  ;;  %4425 = vrot.lane.b32.xlu1 %v4286_v6, %s9565_s15  ;;  %v8211_v54 = vld [vmem:[%s14875_s5 + $0x90] sm:$0xff] }
 0xfaf   :  { %5145 = vmatpush.msra.mxu2 %v8349_v17  ;;  %v8335_v6 = vld [vmem:[%s14875_s5 + $0x1b0] sm:$0xff]  ;;  %4616 = vmatpush.msrb.mxu1 %v8211_v54  ;;  %v8289_v17 = vld [vmem:[%s14875_s5 + $0x160] sm:$0xff] }
 0xfb1   :  { %5146 = vmatpush.msra.mxu2 %v8348_v2  ;;  %4921 = vmatpush.msra.mxu1 %v8296_v46  ;;  %v8288_v2 = vld [vmem:[%s14875_s5 + $0x158] sm:$0xff] }
 0xfb3   :  { %v12186_v56 = vpop.f32.mrf.mxu2  ;;  %5147 = vmatpush.msra.mxu2 %v8347_v50  ;;  %4922 = vmatpush.msra.mxu1 %v8295_v20 }
 0xfb4   :  { %8230 = vmatmul.msk.f32.gmra.mxu2 %vm186_vm1, %v12186_v56  ;;  %8192 = vmatmul.msk.f32.gmra.mxu0 %vm186_vm1, %v12186_v56 }
 0xfb5   :  { %5148 = vmatpush.msra.mxu2 %v8346_v58 }
 0xfb6   :  { %4411 = vrot.lane.b32.xlu0 %v4260_v3, %s9566_s16  ;;  %4427 = vrot.lane.b32.xlu1 %v4289_v28, %s9565_s15  ;;  %v8294_v3 = vld [vmem:[%s14875_s5 + $0x188] sm:$0xff]  ;;  %v8293_v28 = vld [vmem:[%s14875_s5 + $0x180] sm:$0xff] }
 0xfb7   :  { %5149 = vmatpush.msra.mxu2 %v8345_v60  ;;  %4923 = vmatpush.msra.mxu1 %v8294_v3  ;;  %v8285_v60 = vld [vmem:[%s14875_s5 + $0x140] sm:$0xff] }
 0xfb9   :  { %5150 = vmatpush.msra.mxu2 %v8344_v13  ;;  %4924 = vmatpush.msra.mxu1 %v8293_v28 }
 0xfbb   :  { %v12190_v21 = vpop.f32.mrf.mxu2  ;;  %5151 = vmatpush.msra.mxu2 %v8343_v32  ;;  %4925 = vmatpush.msra.mxu1 %v8292_v33  ;;  %v8284_v32 = vld [vmem:[%s14875_s5 + $0x138] sm:$0xff] }
 0xfbc   :  { %8231 = vmatmul.msk.f32.gmra.mxu2 %vm186_vm1, %v12190_v21  ;;  %8193 = vmatmul.msk.f32.gmra.mxu0 %vm186_vm1, %v12190_v21 }
 0xfbd   :  { %5152 = vmatpush.msra.mxu2 %v8342_v5  ;;  %4926 = vmatpush.msra.mxu1 %v8291_v1  ;;  %v8351_v5 = vld [vmem:[%s14875_s5 + $0x230] sm:$0xff] }
 0xfbf   :  { %5153 = vmatpush.msra.mxu2 %v8341_v55  ;;  %4927 = vmatpush.msra.mxu1 %v8290_v43 }
 0xfc1   :  { %5154 = vmatpush.msra.mxu2 %v8340_v48  ;;  %4928 = vmatpush.msra.mxu1 %v8289_v17 }
 0xfc3   :  { %v12194_v18 = vpop.f32.mrf.mxu2  ;;  %5155 = vmatpush.msra.mxu2 %v8339_v61  ;;  %4929 = vmatpush.msra.mxu1 %v8288_v2  ;;  %v8281_v61 = vld [vmem:[%s14875_s5 + $0x120] sm:$0xff] }
 0xfc4   :  { %8232 = vmatmul.msk.f32.gmra.mxu2 %vm186_vm1, %v12194_v18  ;;  %8194 = vmatmul.msk.f32.gmra.mxu0 %vm186_vm1, %v12194_v18 }
 0xfc5   :  { %5156 = vmatpush.msra.mxu2 %v8338_v45  ;;  %4930 = vmatpush.msra.mxu1 %v8287_v40 }
 0xfc7   :  { %5157 = vmatpush.msra.mxu2 %v8337_v34  ;;  %4931 = vmatpush.msra.mxu1 %v8286_v59 }
 0xfc9   :  { %5158 = vmatpush.msra.mxu2 %v8336_v47  ;;  %4932 = vmatpush.msra.mxu1 %v8285_v60 }
 0xfcb   :  { %5159 = vmatpush.msra.mxu2 %v8335_v6  ;;  %4933 = vmatpush.msra.mxu1 %v8284_v32 }
 0xfcc   :  { %8299 = vmatmul.msk.f32.vlgmr.msrb.gmra.mxu2 %vm186_vm1, %v12177_v12 }
 0xfcd   :  { %5187 = vmatpush.msrb.mxu2 %v8352_v4  ;;  %4934 = vmatpush.msra.mxu1 %v8283_v51 }
 0xfcf   :  { %v9010_v8 = vpop.permute.xlu2 %9009  ;;  %5188 = vmatpush.msrb.mxu2 %v8351_v5  ;;  %4935 = vmatpush.msra.mxu1 %v8282_v38 }
 0xfd0   :  { %v9011_v39 = vunpack.i.l.bf16 %v9010_v8  ;;  %v9012_v16 = vunpack.i.h.bf16 %v9010_v8 }
 0xfd1   :  { %4936 = vmatpush.msra.mxu1 %v8281_v61 }
 0xfd4   :  { %8300 = vmatmul.msk.f32.gmra.mxu2 %vm186_vm1, %v12186_v56 }
 0xfdc   :  { %8301 = vmatmul.msk.f32.gmra.mxu2 %vm186_vm1, %v12190_v21 }
 0xfe2   :  { %v9005_v10 = vpop.permute.xlu1 %9004 }
 0xfe3   :  { %v9006_v27 = vunpack.i.l.bf16 %v9005_v10  ;;  %v9007_v13 = vunpack.i.h.bf16 %v9005_v10 }
 0xfe4   :  { %8302 = vmatmul.msk.f32.gmra.mxu2 %vm186_vm1, %v12194_v18 }
 0xfe7   :  { %v9015_v0 = vpop.permute.xlu0 %9014 }
 0xfe8   :  { %v9016_v52 = vunpack.i.l.bf16 %v9015_v0  ;;  %v9017_v58 = vunpack.i.h.bf16 %v9015_v0 }
 0xfea   :  { %v4433_v53 = vsel %vm186_vm1, %v12151_v23, %v9016_v52  ;;  %v9020_v23 = vpop.permute.xlu2 %9019  ;;  %v4434_v62 = vsel %vm186_vm1, %v12154_v24, %v9017_v58 }
 0xfeb   :  { %v4437_v50 = vsel %vm1147_vm5, %v4433_v53, %v9006_v27  ;;  %v4438_v55 = vsel %vm1147_vm5, %v4434_v62, %v9007_v13  ;;  %v9021_v29 = vunpack.i.l.bf16 %v9020_v23  ;;  %v9022_v47 = vunpack.i.h.bf16 %v9020_v23 }
 0xfec   :  { %v4441_v22 = vsel %vm69_vm0, %v4437_v50, %v9011_v39  ;;  %v4442_v11 = vsel %vm69_vm0, %v4438_v55, %v9012_v16 }
 0xff2   :  { %v9045_v37 = vpop.permute.xlu2 %9044 }
 0xff3   :  { %v9046_v7 = vunpack.i.l.bf16 %v9045_v37  ;;  %v9047_v43 = vunpack.i.h.bf16 %v9045_v37 }
 0xffa   :  { %v4394_v1 = vpop.permute.xlu2 %4393 }
0x1002   :  { %v4396_v39 = vpop.permute.xlu2 %4395 }
0x1007   :  { %v9035_v14 = vpop.permute.xlu1 %9034 }
0x1008   :  { %v9025_v26 = vpop.permute.xlu0 %9024  ;;  %v9036_v9 = vunpack.i.l.bf16 %v9035_v14  ;;  %v9037_v31 = vunpack.i.h.bf16 %v9035_v14 }
0x1009   :  { %v9026_v49 = vunpack.i.l.bf16 %v9025_v26  ;;  %v9027_v44 = vunpack.i.h.bf16 %v9025_v26 }
0x100b   :  { %v4445_v42 = vsel %vm1156_vm6, %v4441_v22, %v9026_v49  ;;  %v4446_v25 = vsel %vm1156_vm6, %v4442_v11, %v9027_v44 }
0x100c   :  { %v4449_v57 = vsel %vm1161_vm7, %v4445_v42, %v9036_v9  ;;  %v4450_v19 = vsel %vm1161_vm7, %v4446_v25, %v9037_v31  ;;  %v8195_v25 = vld [vmem:[%s14876_s13 + $0x80] sm:$0xff] }
0x100d   :  { %v4453_v36 = vsel %vm1166_vm8, %v4449_v57, %v9021_v29  ;;  %v4454_v33 = vsel %vm1166_vm8, %v4450_v19, %v9022_v47 }
0x100f   :  { %v9040_v24 = vpop.permute.xlu1 %9039 }
0x1010   :  { %v9030_v48 = vpop.permute.xlu0 %9029  ;;  %v9041_v45 = vunpack.i.l.bf16 %v9040_v24  ;;  %v9042_v3 = vunpack.i.h.bf16 %v9040_v24 }
0x1011   :  { %v9031_v41 = vunpack.i.l.bf16 %v9030_v48  ;;  %v9032_v30 = vunpack.i.h.bf16 %v9030_v48 }
0x1012   :  { %v4435_v34 = vsel %vm186_vm1, %v12158_v63, %v9041_v45  ;;  %v4436_v8 = vsel %vm186_vm1, %v12160_v35, %v9042_v3 }
0x1013   :  { %v4457_v15 = vsel %vm1171_vm9, %v4453_v36, %v9031_v41  ;;  %v4439_v28 = vsel %vm1147_vm5, %v4435_v34, %v9046_v7  ;;  %v4458_v10 = vsel %vm1171_vm9, %v4454_v33, %v9032_v30  ;;  %v4440_v40 = vsel %vm1147_vm5, %v4436_v8, %v9047_v43  ;;  %v8198_v33 = vld [vmem:[%s14876_s13 + $0x98] sm:$0xff] }
0x1014   :  { %4523 = vmatmul.f32.vlgmr.msrb.gmra.mxu3 %v4457_v15  ;;  %4617 = vmatmul.f32.vlgmr.msrb.gmra.mxu1 %v4457_v15 }
0x1015   :  { %5160 = vmatmul.f32.vlgmr.msra.gmra.mxu2 %v4457_v15 }
0x1018   :  { %v9050_v54 = vpop.permute.xlu0 %9049  ;;  %v9055_v6 = vpop.permute.xlu1 %9054 }
0x1019   :  { %v9051_v46 = vunpack.i.l.bf16 %v9050_v54  ;;  %v9056_v20 = vunpack.i.l.bf16 %v9055_v6  ;;  %v9052_v52 = vunpack.i.h.bf16 %v9050_v54  ;;  %v9057_v2 = vunpack.i.h.bf16 %v9055_v6  ;;  %v8196_v54 = vld [vmem:[%s14876_s13 + $0x88] sm:$0xff] }
0x101b   :  { %v4443_v0 = vsel %vm69_vm0, %v4439_v28, %v9051_v46  ;;  %v4444_v50 = vsel %vm69_vm0, %v4440_v40, %v9052_v52 }
0x101c   :  { %4526 = vmatmul.f32.gmra.mxu3 %v4458_v10  ;;  %4620 = vmatmul.f32.gmra.mxu1 %v4458_v10  ;;  %v4447_v63 = vsel %vm1156_vm6, %v4443_v0, %v9056_v20  ;;  %v4448_v35 = vsel %vm1156_vm6, %v4444_v50, %v9057_v2  ;;  %v8197_v20 = vld [vmem:[%s14876_s13 + $0x90] sm:$0xff]  ;;  %v8266_v50 = vld [vmem:[%s14876_s13 + $0x108] sm:$0xff] }
0x101d   :  { %5163 = vmatmul.f32.gmra.mxu2 %v4458_v10  ;;  %v4451_v27 = vsel %vm1161_vm7, %v4447_v63, %v4394_v1  ;;  %v4452_v58 = vsel %vm1161_vm7, %v4448_v35, %v4396_v39  ;;  %v8324_v39 = vld [vmem:[%s14876_s13 + $0x1a8] sm:$0xff] }
0x101e   :  { %v4462_v35 = vld [vmem:[%s14876_s13 + $0x8] sm:$0xff] }
0x1020   :  { %v4410_v17 = vpop.permute.xlu0 %4409  ;;  %v4426_v53 = vpop.permute.xlu1 %4425 }
0x1021   :  { %v4455_v14 = vsel %vm1166_vm8, %v4451_v27, %v4410_v17  ;;  %v8199_v17 = vld [vmem:[%s14876_s13 + $0xa0] sm:$0xff] }
0x1022   :  { %v4459_v26 = vsel %vm1171_vm9, %v4455_v14, %v4426_v53  ;;  %v8265_v27 = vld [vmem:[%s14876_s13 + $0x100] sm:$0xff] }
0x1023   :  { %v4461_v14 = vld [vmem:[%s14876_s13] sm:$0xff] }
0x1024   :  { %4529 = vmatmul.f32.gmra.mxu3 %v4459_v26  ;;  %4623 = vmatmul.f32.gmra.mxu1 %v4459_v26 }
0x1025   :  { %5166 = vmatmul.f32.gmra.mxu2 %v4459_v26 }
0x1028   :  { %v4412_v23 = vpop.permute.xlu0 %4411  ;;  %v4428_v49 = vpop.permute.xlu1 %4427 }
0x1029   :  { %v4456_v59 = vsel %vm1166_vm8, %v4452_v58, %v4412_v23  ;;  %v4553_v4 = vpop.f32.mrf.mxu0  ;;  %v8267_v58 = vld [vmem:[%s14876_s13 + $0x110] sm:$0xff] }
0x102a   :  { %v4460_v60 = vsel %vm1171_vm9, %v4456_v59, %v4428_v49  ;;  %v8201_v23 = vld [vmem:[%s14876_s13 + $0xb0] sm:$0xff] }
0x102b   :  { %v8325_v49 = vld [vmem:[%s14876_s13 + $0x1b0] sm:$0xff] }
0x102c   :  { %4532 = vmatmul.f32.gmra.mxu3 %v4460_v60  ;;  %4626 = vmatmul.f32.gmra.mxu1 %v4460_v60  ;;  %v4463_v59 = vld [vmem:[%s14876_s13 + $0x10] sm:$0xff] }
0x102d   :  { %5169 = vmatmul.f32.gmra.mxu2 %v4460_v60 }
0x102f   :  { %v4647_v9 = vpop.f32.mrf.mxu2 }
0x1031   :  { %v4556_v38 = vpop.f32.mrf.mxu0 }
0x1034   :  { %4937 = vmatmul.f32.vlgmr.msra.gmra.mxu1 %v4457_v15 }
0x1035   :  { %8353 = vmatmul.msk.f32.vlgmr.msrb.gmra.mxu2 %vm186_vm1, %v12177_v12 }
0x1037   :  { %v4650_v22 = vpop.f32.mrf.mxu2 }
0x1039   :  { %v4559_v44 = vpop.f32.mrf.mxu0 }
0x103c   :  { %4940 = vmatmul.f32.gmra.mxu1 %v4458_v10 }
0x103d   :  { %8354 = vmatmul.msk.f32.gmra.mxu2 %vm186_vm1, %v12186_v56 }
0x103f   :  { %v4653_v13 = vpop.f32.mrf.mxu2 }
0x1041   :  { %v4562_v37 = vpop.f32.mrf.mxu0 }
0x1044   :  { %4943 = vmatmul.f32.gmra.mxu1 %v4459_v26  ;;  %v8200_v26 = vld [vmem:[%s14876_s13 + $0xa8] sm:$0xff] }
0x1045   :  { %8355 = vmatmul.msk.f32.gmra.mxu2 %vm186_vm1, %v12190_v21 }
0x1047   :  { %v4656_v42 = vpop.f32.mrf.mxu2 }
0x104c   :  { %4946 = vmatmul.f32.gmra.mxu1 %v4460_v60  ;;  %v8268_v60 = vld [vmem:[%s14876_s13 + $0x118] sm:$0xff] }
0x104d   :  { %8356 = vmatmul.msk.f32.gmra.mxu2 %vm186_vm1, %v12194_v18 }
0x104f   :  { %v4967_v62 = vpop.f32.mrf.mxu2 }
0x1057   :  { %v4970_v32 = vpop.f32.mrf.mxu2 }
0x105f   :  { %v4973_v51 = vpop.f32.mrf.mxu2 }
0x1067   :  { %v4976_v12 = vpop.f32.mrf.mxu2 }
0x1091   :  { %v4618_v5 = vpop.f32.mrf.mxu1 }
0x1092   :  { %v4648_v11 = vadd.f32 %v4647_v9, %v4618_v5  ;;  %v8202_v9 = vld [vmem:[%s14876_s13 + $0xb8] sm:$0xff]  ;;  %v8328_v5 = vld [vmem:[%s14876_s13 + $0x1c8] sm:$0xff] }
0x1097   :  { %v4524_v57 = vpop.f32.mrf.mxu3 }
0x1098   :  { %v12464_v56 = vpop.f32.mrf.mxu2  ;;  %v4554_v47 = vadd.f32 %v4553_v4, %v4524_v57  ;;  %v8204_v4 = vld [vmem:[%s14876_s13 + $0xc8] sm:$0xff] }
0x1099   :  { %v4621_v24 = vpop.f32.mrf.mxu1  ;;  %v4466_v57 = vld [vmem:[%s14876_s13 + $0x28] sm:$0xff] }
0x109a   :  { %v4651_v61 = vadd.f32 %v4650_v22, %v4621_v24  ;;  %v8326_v22 = vld [vmem:[%s14876_s13 + $0x1b8] sm:$0xff]  ;;  %v8205_v24 = vld [vmem:[%s14876_s13 + $0xd0] sm:$0xff] }
0x109f   :  { %v4527_v21 = vpop.f32.mrf.mxu3 }
0x10a0   :  { %v5164_v55 = vpop.f32.mrf.mxu2  ;;  %v4557_v19 = vadd.f32 %v4556_v38, %v4527_v21  ;;  %v8329_v38 = vld [vmem:[%s14876_s13 + $0x1d0] sm:$0xff] }
0x10a1   :  { %v4624_v29 = vpop.f32.mrf.mxu1  ;;  %v4467_v21 = vld [vmem:[%s14876_s13 + $0x30] sm:$0xff] }
0x10a2   :  { %v4654_v36 = vadd.f32 %v4653_v13, %v4624_v29  ;;  %v4464_v13 = vld [vmem:[%s14876_s13 + $0x18] sm:$0xff] }
0x10a3   :  { %v8206_v29 = vld [vmem:[%s14876_s13 + $0xd8] sm:$0xff] }
0x10a7   :  { %v4530_v48 = vpop.f32.mrf.mxu3 }
0x10a8   :  { %v5167_v18 = vpop.f32.mrf.mxu2  ;;  %v4560_v30 = vadd.f32 %v4559_v44, %v4530_v48  ;;  %v8330_v44 = vld [vmem:[%s14876_s13 + $0x1d8] sm:$0xff] }
0x10a9   :  { %v4627_v16 = vpop.f32.mrf.mxu1  ;;  %v4468_v48 = vld [vmem:[%s14876_s13 + $0x38] sm:$0xff] }
0x10aa   :  { %v4657_v41 = vadd.f32 %v4656_v42, %v4627_v16  ;;  %v8269_v42 = vld [vmem:[%s14876_s13 + $0x120] sm:$0xff] }
0x10ab   :  { %v8207_v16 = vld [vmem:[%s14876_s13 + $0xe0] sm:$0xff] }
0x10ac   :  { %4719 = vmatpush.msra.mxu0 %v4657_v41  ;;  %8625 = vmatpush.msra.mxu3 %v4657_v41  ;;  %v8331_v41 = vld [vmem:[%s14876_s13 + $0x1e0] sm:$0xff] }
0x10ae   :  { %4720 = vmatpush.msra.mxu0 %v4654_v36  ;;  %8626 = vmatpush.msra.mxu3 %v4654_v36  ;;  %v4469_v36 = vld [vmem:[%s14876_s13 + $0x40] sm:$0xff] }
0x10af   :  { %v4533_v31 = vpop.f32.mrf.mxu3 }
0x10b0   :  { %v4563_v45 = vadd.f32 %v4562_v37, %v4533_v31  ;;  %v5170_v15 = vpop.f32.mrf.mxu2  ;;  %4721 = vmatpush.msra.mxu0 %v4651_v61  ;;  %8627 = vmatpush.msra.mxu3 %v4651_v61  ;;  %v8274_v61 = vld [vmem:[%s14876_s13 + $0x148] sm:$0xff] }
0x10b1   :  { %v4938_v34 = vpop.f32.mrf.mxu1  ;;  %v8208_v37 = vld [vmem:[%s14876_s13 + $0xe8] sm:$0xff] }
0x10b2   :  { %4722 = vmatpush.msra.mxu0 %v4648_v11  ;;  %8628 = vmatpush.msra.mxu3 %v4648_v11  ;;  %v4968_v8 = vadd.f32 %v4967_v62, %v4938_v34  ;;  %v8203_v62 = vld [vmem:[%s14876_s13 + $0xc0] sm:$0xff]  ;;  %v8332_v31 = vld [vmem:[%s14876_s13 + $0x1e8] sm:$0xff]  ;;  %v4471_v34 = vld [vmem:[%s14876_s13 + $0x50] sm:$0xff] }
0x10b3   :  { %8233 = vmatmul.msk.f32.vlgmr.msra.gmra.mxu0 %vm1147_vm5, %v8195_v25  ;;  %8238 = vmatmul.msk.f32.vlgmr.msra.gmra.mxu3 %vm1147_vm5, %v8200_v26  ;;  %v4470_v11 = vld [vmem:[%s14876_s13 + $0x48] sm:$0xff]  ;;  %v8333_v25 = vld [vmem:[%s14876_s13 + $0x1f0] sm:$0xff]  ;;  %v8322_v26 = vld [vmem:[%s14876_s13 + $0x198] sm:$0xff] }
0x10b4   :  { %4832 = vmatpush.msrb.mxu0 %v4563_v45  ;;  %v8275_v45 = vld [vmem:[%s14876_s13 + $0x150] sm:$0xff] }
0x10b6   :  { %4833 = vmatpush.msrb.mxu0 %v4560_v30  ;;  %v8276_v30 = vld [vmem:[%s14876_s13 + $0x158] sm:$0xff] }
0x10b8   :  { %4834 = vmatpush.msrb.mxu0 %v4557_v19  ;;  %v5190_v7 = vpop.f32.mrf.mxu2  ;;  %v8210_v19 = vld [vmem:[%s14876_s13 + $0xf8] sm:$0xff] }
0x10b9   :  { %v4941_v6 = vpop.f32.mrf.mxu1  ;;  %v5191_v40 = vadd.f32 %v5190_v7, %v12464_v56  ;;  %v8271_v56 = vld [vmem:[%s14876_s13 + $0x130] sm:$0xff]  ;;  %v4472_v7 = vld [vmem:[%s14876_s13 + $0x58] sm:$0xff] }
0x10ba   :  { %4835 = vmatpush.msrb.mxu0 %v4554_v47  ;;  %v4971_v63 = vadd.f32 %v4970_v32, %v4941_v6  ;;  %v8327_v32 = vld [vmem:[%s14876_s13 + $0x1c0] sm:$0xff]  ;;  %v8334_v6 = vld [vmem:[%s14876_s13 + $0x1f8] sm:$0xff] }
0x10bb   :  { %8234 = vmatmul.msk.f32.gmra.mxu0 %vm1147_vm5, %v8196_v54  ;;  %8239 = vmatmul.msk.f32.gmra.mxu3 %vm1147_vm5, %v8201_v23  ;;  %v8277_v54 = vld [vmem:[%s14876_s13 + $0x160] sm:$0xff] }
0x10c0   :  { %v5193_v46 = vpop.f32.mrf.mxu2 }
0x10c1   :  { %v4944_v3 = vpop.f32.mrf.mxu1  ;;  %v5194_v2 = vadd.f32 %v5193_v46, %v5164_v55  ;;  %v8272_v55 = vld [vmem:[%s14876_s13 + $0x138] sm:$0xff] }
0x10c2   :  { %v4974_v10 = vadd.f32 %v4973_v51, %v4944_v3  ;;  %v4465_v51 = vld [vmem:[%s14876_s13 + $0x20] sm:$0xff]  ;;  %v8278_v3 = vld [vmem:[%s14876_s13 + $0x168] sm:$0xff] }
0x10c3   :  { %8235 = vmatmul.msk.f32.gmra.mxu0 %vm1147_vm5, %v8197_v20  ;;  %8240 = vmatmul.msk.f32.gmra.mxu3 %vm1147_vm5, %v8202_v9  ;;  %v4473_v20 = vld [vmem:[%s14876_s13 + $0x60] sm:$0xff] }
0x10c8   :  { %v5196_v28 = vpop.f32.mrf.mxu2 }
0x10c9   :  { %v4947_v1 = vpop.f32.mrf.mxu1  ;;  %v5197_v53 = vadd.f32 %v5196_v28, %v5167_v18  ;;  %v8273_v18 = vld [vmem:[%s14876_s13 + $0x140] sm:$0xff] }
0x10ca   :  { %v4977_v0 = vadd.f32 %v4976_v12, %v4947_v1  ;;  %v8270_v12 = vld [vmem:[%s14876_s13 + $0x128] sm:$0xff]  ;;  %v8279_v1 = vld [vmem:[%s14876_s13 + $0x170] sm:$0xff] }
0x10cb   :  { %8236 = vmatmul.msk.f32.gmra.mxu0 %vm1147_vm5, %v8198_v33  ;;  %8241 = vmatmul.msk.f32.gmra.mxu3 %vm1147_vm5, %v8203_v62  ;;  %v4474_v33 = vld [vmem:[%s14876_s13 + $0x68] sm:$0xff] }
0x10cc   :  { %5039 = vmatpush.msrb.mxu1 %v4977_v0 }
0x10ce   :  { %5040 = vmatpush.msrb.mxu1 %v4974_v10  ;;  %v4475_v10 = vld [vmem:[%s14876_s13 + $0x70] sm:$0xff] }
0x10d0   :  { %v5199_v52 = vpop.f32.mrf.mxu2  ;;  %5041 = vmatpush.msrb.mxu1 %v4971_v63  ;;  %v8280_v63 = vld [vmem:[%s14876_s13 + $0x178] sm:$0xff] }
0x10d1   :  { %v5200_v43 = vadd.f32 %v5199_v52, %v5170_v15  ;;  %v8209_v15 = vld [vmem:[%s14876_s13 + $0xf0] sm:$0xff]  ;;  %v4476_v52 = vld [vmem:[%s14876_s13 + $0x78] sm:$0xff] }
0x10d2   :  { %5042 = vmatpush.msrb.mxu1 %v4968_v8 }
0x10d3   :  { %5262 = vmatpush.msra.mxu0 %v5200_v43  ;;  %8629 = vmatpush.msra.mxu2 %v5200_v43 }
0x10d4   :  { %8237 = vmatmul.msk.f32.gmra.mxu0 %vm1147_vm5, %v8199_v17  ;;  %8303 = vmatmul.msk.f32.vlgmr.msrb.gmra.mxu1 %vm1147_vm5, %v8265_v27  ;;  %v8319_v17 = vld [vmem:[%s14876_s13 + $0x180] sm:$0xff] }
0x10d5   :  { %5263 = vmatpush.msra.mxu0 %v5197_v53  ;;  %8630 = vmatpush.msra.mxu2 %v5197_v53  ;;  %v8320_v53 = vld [vmem:[%s14876_s13 + $0x188] sm:$0xff] }
0x10d6   :  { %8242 = vmatmul.msk.f32.gmra.mxu3 %vm1147_vm5, %v8204_v4 }
0x10d7   :  { %5264 = vmatpush.msra.mxu0 %v5194_v2  ;;  %8631 = vmatpush.msra.mxu2 %v5194_v2 }
0x10d9   :  { %5265 = vmatpush.msra.mxu0 %v5191_v40  ;;  %8632 = vmatpush.msra.mxu2 %v5191_v40  ;;  %v8321_v40 = vld [vmem:[%s14876_s13 + $0x190] sm:$0xff] }
0x10da   :  { %8362 = vmatmul.msk.f32.vlgmr.msra.gmra.mxu2 %vm1147_vm5, %v8324_v39 }
0x10dc   :  { %8249 = vmatmul.msk.f32.vlgmr.msrb.gmra.mxu0 %vm1147_vm5, %v4461_v14  ;;  %8304 = vmatmul.msk.f32.gmra.mxu1 %vm1147_vm5, %v8266_v50 }
0x10de   :  { %8243 = vmatmul.msk.f32.gmra.mxu3 %vm1147_vm5, %v8205_v24 }
0x10e2   :  { %8363 = vmatmul.msk.f32.gmra.mxu2 %vm1147_vm5, %v8325_v49 }
0x10e4   :  { %8250 = vmatmul.msk.f32.gmra.mxu0 %vm1147_vm5, %v4462_v35  ;;  %8305 = vmatmul.msk.f32.gmra.mxu1 %vm1147_vm5, %v8267_v58  ;;  %v8323_v35 = vld [vmem:[%s14876_s13 + $0x1a0] sm:$0xff] }
0x10e6   :  { %8244 = vmatmul.msk.f32.gmra.mxu3 %vm1147_vm5, %v8206_v29 }
0x10ea   :  { %8364 = vmatmul.msk.f32.gmra.mxu2 %vm1147_vm5, %v8326_v22 }
0x10ec   :  { %8251 = vmatmul.msk.f32.gmra.mxu0 %vm1147_vm5, %v4463_v59  ;;  %8306 = vmatmul.msk.f32.gmra.mxu1 %vm1147_vm5, %v8268_v60 }
0x10ee   :  { %8245 = vmatmul.msk.f32.gmra.mxu3 %vm1147_vm5, %v8207_v16 }
0x10f2   :  { %8365 = vmatmul.msk.f32.gmra.mxu2 %vm1147_vm5, %v8327_v32 }
0x10f4   :  { %8252 = vmatmul.msk.f32.gmra.mxu0 %vm1147_vm5, %v4464_v13  ;;  %8307 = vmatmul.msk.f32.gmra.mxu1 %vm1147_vm5, %v8269_v42 }
0x10f6   :  { %8246 = vmatmul.msk.f32.gmra.mxu3 %vm1147_vm5, %v8208_v37 }
0x10fa   :  { %8366 = vmatmul.msk.f32.gmra.mxu2 %vm1147_vm5, %v8328_v5 }
0x10fc   :  { %8253 = vmatmul.msk.f32.gmra.mxu0 %vm1147_vm5, %v4465_v51  ;;  %8308 = vmatmul.msk.f32.gmra.mxu1 %vm1147_vm5, %v8270_v12 }
0x10fe   :  { %8247 = vmatmul.msk.f32.gmra.mxu3 %vm1147_vm5, %v8209_v15 }
0x1102   :  { %8367 = vmatmul.msk.f32.gmra.mxu2 %vm1147_vm5, %v8329_v38 }
0x1104   :  { %8254 = vmatmul.msk.f32.gmra.mxu0 %vm1147_vm5, %v4466_v57  ;;  %8309 = vmatmul.msk.f32.gmra.mxu1 %vm1147_vm5, %v8271_v56 }
0x1106   :  { %8248 = vmatmul.msk.f32.gmra.mxu3 %vm1147_vm5, %v8210_v19 }
0x110a   :  { %8368 = vmatmul.msk.f32.gmra.mxu2 %vm1147_vm5, %v8330_v44 }
0x110c   :  { %8255 = vmatmul.msk.f32.gmra.mxu0 %vm1147_vm5, %v4467_v21  ;;  %8310 = vmatmul.msk.f32.gmra.mxu1 %vm1147_vm5, %v8272_v55 }
0x1112   :  { %8369 = vmatmul.msk.f32.gmra.mxu2 %vm1147_vm5, %v8331_v41 }
0x1114   :  { %8256 = vmatmul.msk.f32.gmra.mxu0 %vm1147_vm5, %v4468_v48  ;;  %8311 = vmatmul.msk.f32.gmra.mxu1 %vm1147_vm5, %v8273_v18 }
0x111a   :  { %8370 = vmatmul.msk.f32.gmra.mxu2 %vm1147_vm5, %v8332_v31 }
0x111c   :  { %8257 = vmatmul.msk.f32.gmra.mxu0 %vm1147_vm5, %v4469_v36  ;;  %8312 = vmatmul.msk.f32.gmra.mxu1 %vm1147_vm5, %v8274_v61 }
0x1122   :  { %8371 = vmatmul.msk.f32.gmra.mxu2 %vm1147_vm5, %v8333_v25 }
0x1124   :  { %8258 = vmatmul.msk.f32.gmra.mxu0 %vm1147_vm5, %v4470_v11  ;;  %8313 = vmatmul.msk.f32.gmra.mxu1 %vm1147_vm5, %v8275_v45 }
0x112a   :  { %8372 = vmatmul.msk.f32.gmra.mxu2 %vm1147_vm5, %v8334_v6 }
0x112c   :  { %8259 = vmatmul.msk.f32.gmra.mxu0 %vm1147_vm5, %v4471_v34  ;;  %8314 = vmatmul.msk.f32.gmra.mxu1 %vm1147_vm5, %v8276_v30 }
0x1130   :  { %v12663_v47 = vpop.f32.mrf.mxu0 }
0x1134   :  { %8260 = vmatmul.msk.f32.gmra.mxu0 %vm1147_vm5, %v4472_v7  ;;  %8315 = vmatmul.msk.f32.gmra.mxu1 %vm1147_vm5, %v8277_v54 }
0x1136   :  { %v4739_v42 = vpop.f32.mrf.mxu3 }
0x1138   :  { %v12677_v46 = vpop.f32.mrf.mxu0 }
0x113c   :  { %8261 = vmatmul.msk.f32.gmra.mxu0 %vm1147_vm5, %v4473_v20  ;;  %8316 = vmatmul.msk.f32.gmra.mxu1 %vm1147_vm5, %v8278_v3 }
0x113e   :  { %v4742_v12 = vpop.f32.mrf.mxu3 }
0x1140   :  { %v12687_v28 = vpop.f32.mrf.mxu0 }
0x1144   :  { %8262 = vmatmul.msk.f32.gmra.mxu0 %vm1147_vm5, %v4474_v33  ;;  %8317 = vmatmul.msk.f32.gmra.mxu1 %vm1147_vm5, %v8279_v1 }
0x1146   :  { %v4745_v24 = vpop.f32.mrf.mxu3 }
0x1148   :  { %v12697_v0 = vpop.f32.mrf.mxu0 }
0x114c   :  { %8263 = vmatmul.msk.f32.gmra.mxu0 %vm1147_vm5, %v4475_v10  ;;  %8318 = vmatmul.msk.f32.gmra.mxu1 %vm1147_vm5, %v8280_v63 }
0x114e   :  { %v4748_v29 = vpop.f32.mrf.mxu3 }
0x1151   :  { %v12707_v8 = vpop.f32.mrf.mxu0  ;;  %v5044_v14 = vpop.f32.mrf.mxu1 }
0x1154   :  { %8264 = vmatmul.msk.f32.gmra.mxu0 %vm1147_vm5, %v4476_v52 }
0x1159   :  { %v4837_v43 = vpop.f32.mrf.mxu0  ;;  %v5047_v58 = vpop.f32.mrf.mxu1 }
0x115a   :  { %v4751_v16 = vpop.f32.mrf.mxu3  ;;  %v4838_v25 = vadd.f32 %v4837_v43, %v12663_v47 }
0x115c   :  { %8357 = vmatmul.msk.f32.vlgmr.msra.gmra.mxu0 %vm1147_vm5, %v8319_v17  ;;  %v5092_v19 = vadd.f32 %v5044_v14, %v4838_v25 }
0x115d   :  { %v12737_v51 = vpop.f32.mrf.mxu2 }
0x1161   :  { %v4840_v27 = vpop.f32.mrf.mxu0  ;;  %v5050_v49 = vpop.f32.mrf.mxu1 }
0x1162   :  { %v4754_v37 = vpop.f32.mrf.mxu3  ;;  %v4841_v30 = vadd.f32 %v4840_v27, %v12677_v46 }
0x1164   :  { %8358 = vmatmul.msk.f32.gmra.mxu0 %vm1147_vm5, %v8320_v53  ;;  %v5093_v54 = vadd.f32 %v5047_v58, %v4841_v30 }
0x1165   :  { %v12741_v57 = vpop.f32.mrf.mxu2 }
0x1169   :  { %v4843_v2 = vpop.f32.mrf.mxu0  ;;  %v5053_v60 = vpop.f32.mrf.mxu1 }
0x116a   :  { %v4757_v34 = vpop.f32.mrf.mxu3  ;;  %v4844_v43 = vadd.f32 %v4843_v2, %v12687_v28 }
0x116c   :  { %8359 = vmatmul.msk.f32.gmra.mxu0 %vm1147_vm5, %v8321_v40  ;;  %v5094_v40 = vadd.f32 %v5050_v49, %v4844_v43 }
0x116d   :  { %v12747_v55 = vpop.f32.mrf.mxu2 }
0x1171   :  { %v4846_v50 = vpop.f32.mrf.mxu0  ;;  %v5056_v22 = vpop.f32.mrf.mxu1 }
0x1172   :  { %v4760_v47 = vpop.f32.mrf.mxu3  ;;  %v4847_v27 = vadd.f32 %v4846_v50, %v12697_v0 }
0x1174   :  { %8360 = vmatmul.msk.f32.gmra.mxu0 %vm1147_vm5, %v8322_v26  ;;  %v5095_v26 = vadd.f32 %v5053_v60, %v4847_v27 }
0x1175   :  { %v12751_v18 = vpop.f32.mrf.mxu2 }
0x1179   :  { %v12729_v39 = vpop.f32.mrf.mxu0  ;;  %v5059_v32 = vpop.f32.mrf.mxu1 }
0x117a   :  { %v4763_v53 = vpop.f32.mrf.mxu3  ;;  %v4850_v25 = vadd.f32 %v12729_v39, %v12707_v8 }
0x117c   :  { %8361 = vmatmul.msk.f32.gmra.mxu0 %vm1147_vm5, %v8323_v35  ;;  %v5096_v50 = vadd.f32 %v5056_v22, %v4850_v25 }
0x117d   :  { %v12755_v61 = vpop.f32.mrf.mxu2 }
0x1181   :  { %v4852_v23 = vpop.f32.mrf.mxu0  ;;  %v5062_v5 = vpop.f32.mrf.mxu1 }
0x1182   :  { %v4853_v35 = vadd.f32 %v4852_v23, %v4739_v42  ;;  %v4766_v60 = vpop.f32.mrf.mxu3 }
0x1185   :  { %v12759_v45 = vpop.f32.mrf.mxu2 }
0x1189   :  { %v4855_v59 = vpop.f32.mrf.mxu0  ;;  %v5065_v38 = vpop.f32.mrf.mxu1 }
0x118a   :  { %v4856_v30 = vadd.f32 %v4855_v59, %v4742_v12 }
0x118c   :  { %v5098_v49 = vadd.f32 %v5062_v5, %v4856_v30 }
0x118d   :  { %v12767_v33 = vpop.f32.mrf.mxu2 }
0x118e   :  { %v12794_v12 = vadd.f32 %v12741_v57, %v5098_v49 }
0x1190   :  { %v5346_v57 = vsel %vm186_vm1, %v12794_v12, 0.0 }
0x1191   :  { %v4858_v9 = vpop.f32.mrf.mxu0  ;;  %v5068_v44 = vpop.f32.mrf.mxu1 }
0x1192   :  { %v4859_v28 = vadd.f32 %v4858_v9, %v4745_v24 }
0x1194   :  { %v5099_v39 = vadd.f32 %v5065_v38, %v4859_v28 }
0x1195   :  { %v12774_v17 = vpop.f32.mrf.mxu2 }
0x1196   :  { %v12802_v38 = vadd.f32 %v12747_v55, %v5099_v39 }
0x1198   :  { %v5348_v43 = vsel %vm186_vm1, %v12802_v38, 0.0 }
0x1199   :  { %v4861_v13 = vpop.f32.mrf.mxu0  ;;  %v5071_v36 = vpop.f32.mrf.mxu1 }
0x119d   :  { %v5306_v0 = vpop.f32.mrf.mxu2 }
0x11a1   :  { %v12735_v62 = vpop.f32.mrf.mxu0  ;;  %v5074_v11 = vpop.f32.mrf.mxu1 }
0x11a2   :  { %v4865_v59 = vadd.f32 %v12735_v62, %v4751_v16 }
0x11a4   :  { %v5101_v62 = vadd.f32 %v5071_v36, %v4865_v59 }
0x11a6   :  { %v12814_v55 = vadd.f32 %v12755_v61, %v5101_v62 }
0x11a9   :  { %v12739_v4 = vpop.f32.mrf.mxu0  ;;  %v5077_v7 = vpop.f32.mrf.mxu1 }
0x11b1   :  { %v12743_v56 = vpop.f32.mrf.mxu0  ;;  %v5080_v52 = vpop.f32.mrf.mxu1 }
0x11b2   :  { %v4871_v16 = vadd.f32 %v12743_v56, %v4757_v34  ;;  %v4769_v34 = vpop.f32.mrf.mxu3 }
0x11b4   :  { %v5103_v36 = vadd.f32 %v5077_v7, %v4871_v16 }
0x11b6   :  { %v12826_v61 = vadd.f32 %v12767_v33, %v5103_v36 }
0x11b9   :  { %v12745_v21 = vpop.f32.mrf.mxu0 }
0x11c1   :  { %v12749_v48 = vpop.f32.mrf.mxu0 }
0x11c2   :  { %v4877_v56 = vadd.f32 %v12749_v48, %v4763_v53 }
0x11c9   :  { %v12753_v41 = vpop.f32.mrf.mxu0 }
0x11d1   :  { %v12757_v31 = vpop.f32.mrf.mxu0 }
0x11d2   :  { %v4883_v48 = vadd.f32 %v12757_v31, %v4769_v34 }
0x11d9   :  { %v5267_v15 = vpop.f32.mrf.mxu0 }
0x11da   :  { %v12763_v6 = vadd.f32 %v5267_v15, %v5092_v19  ;;  %v5083_v15 = vpop.f32.mrf.mxu1 }
0x11db   :  { %v5105_v7 = vadd.f32 %v5083_v15, %v4877_v56 }
0x11dc   :  { %v5335_v1 = vsel %vm186_vm1, %v12763_v6, 0.0 }
0x11dd   :  { %v5328_v30 = vadd.f32 %v5306_v0, %v5105_v7 }
0x11e1   :  { %v5270_v20 = vpop.f32.mrf.mxu0 }
0x11e2   :  { %v12765_v3 = vadd.f32 %v5270_v20, %v5093_v54  ;;  %v5097_v54 = vadd.f32 %v5059_v32, %v4853_v35  ;;  %v4862_v20 = vadd.f32 %v4861_v13, %v4748_v29  ;;  %v4868_v13 = vadd.f32 %v12739_v4, %v4754_v37  ;;  %v5086_v24 = vpop.f32.mrf.mxu1 }
0x11e3   :  { %v4874_v37 = vadd.f32 %v12745_v21, %v4760_v47  ;;  %v4880_v47 = vadd.f32 %v12753_v41, %v4766_v60  ;;  %v5356_v41 = vsel %vm186_vm1, %v12826_v61, 0.0 }
0x11e4   :  { %v5336_v10 = vsel %vm186_vm1, %v12765_v3, 0.0  ;;  %v12788_v8 = vadd.f32 %v12737_v51, %v5097_v54  ;;  %v5100_v22 = vadd.f32 %v5068_v44, %v4862_v20  ;;  %v5102_v44 = vadd.f32 %v5074_v11, %v4868_v13 }
0x11e5   :  { %v5337_v63 = vadd.f32 %v5336_v10, %v5335_v1  ;;  %v5104_v21 = vadd.f32 %v5080_v52, %v4874_v37  ;;  %v5106_v52 = vadd.f32 %v5086_v24, %v4880_v47 }
0x11e6   :  { %v5344_v51 = vsel %vm186_vm1, %v12788_v8, 0.0  ;;  %v12808_v4 = vadd.f32 %v12751_v18, %v5100_v22  ;;  %v12820_v11 = vadd.f32 %v12759_v45, %v5102_v44 }
0x11e7   :  { %v5327_v45 = vadd.f32 %v12774_v17, %v5104_v21 }
0x11e8   :  { %v5350_v18 = vsel %vm186_vm1, %v12808_v4, 0.0  ;;  %v5354_v35 = vsel %vm186_vm1, %v12820_v11, 0.0 }
0x11e9   :  { %v5273_v46 = vpop.f32.mrf.mxu0  ;;  %v5358_v15 = vsel %vm186_vm1, %v5327_v45, 0.0 }
0x11ea   :  { %v12777_v58 = vadd.f32 %v5273_v46, %v5094_v40  ;;  %v5089_v53 = vpop.f32.mrf.mxu1 }
0x11eb   :  { %v5107_v54 = vadd.f32 %v5089_v53, %v4883_v48 }
0x11ec   :  { %v5338_v2 = vsel %vm186_vm1, %v12777_v58, 0.0 }
0x11ed   :  { %v5339_v42 = vadd.f32 %v5338_v2, %v5337_v63  ;;  %v5309_v63 = vpop.f32.mrf.mxu2 }
0x11ee   :  { %v5329_v2 = vadd.f32 %v5309_v63, %v5106_v52 }
0x11f1   :  { %v5276_v14 = vpop.f32.mrf.mxu0 }
0x11f2   :  { %v12781_v19 = vadd.f32 %v5276_v14, %v5095_v26  ;;  %v5352_v14 = vsel %vm186_vm1, %v12814_v55, 0.0 }
0x11f4   :  { %v5340_v23 = vsel %vm186_vm1, %v12781_v19, 0.0 }
0x11f5   :  { %v5341_v32 = vadd.f32 %v5340_v23, %v5339_v42  ;;  %v5312_v28 = vpop.f32.mrf.mxu2  ;;  %v5362_v23 = vsel %vm186_vm1, %v5329_v2, 0.0 }
0x11f6   :  { %v5330_v49 = vadd.f32 %v5312_v28, %v5107_v54 }
0x11f8   :  { %v5364_v60 = vsel %vm186_vm1, %v5330_v49, 0.0 }
0x11f9   :  { %v5279_v1 = vpop.f32.mrf.mxu0 }
0x11fa   :  { %v12791_v9 = vadd.f32 %v5279_v1, %v5096_v50  ;;  %v5360_v50 = vsel %vm186_vm1, %v5328_v30, 0.0 }
0x11fc   :  { %v5342_v5 = vsel %vm186_vm1, %v12791_v9, 0.0 }
0x11fd   :  { %v5343_v29 = vadd.f32 %v5342_v5, %v5341_v32 }
0x11ff   :  { %v5345_v10 = vadd.f32 %v5344_v51, %v5343_v29 }
0x1201   :  { %v5347_v46 = vadd.f32 %v5346_v57, %v5345_v10 }
0x1203   :  { %v5349_v27 = vadd.f32 %v5348_v43, %v5347_v46 }
0x1205   :  { %v5351_v40 = vadd.f32 %v5350_v18, %v5349_v27 }
0x1207   :  { %v5353_v26 = vadd.f32 %v5352_v14, %v5351_v40 }
0x1209   :  { %v5355_v25 = vadd.f32 %v5354_v35, %v5353_v26 }
0x120b   :  { %v5357_v33 = vadd.f32 %v5356_v41, %v5355_v25 }
0x120d   :  { %v5359_v31 = vadd.f32 %v5358_v15, %v5357_v33 }
0x120f   :  { %v5361_v20 = vadd.f32 %v5360_v50, %v5359_v31 }
0x1211   :  { %v5363_v17 = vadd.f32 %v5362_v23, %v5361_v20 }
0x1213   :  { %v5365_v42 = vadd.f32 %v5364_v60, %v5363_v17 }
0x1215   :  { %v5366_v1 = vrot.slane %v5365_v42, 4 }
0x1217   :  { %v5367_v39 = vadd.f32 %v5366_v1, %v5365_v42 }
0x1219   :  { %v5368_v0 = vrot.slane %v5367_v39, 2 }
0x121b   :  { %v5369_v59 = vadd.f32 %v5368_v0, %v5367_v39 }
0x121d   :  { %v5370_v32 = vrot.slane %v5369_v59, 1 }
0x121f   :  { %v5371_v22 = vadd.f32 %v5370_v32, %v5369_v59 }
0x1221   :  { %v5372_v13 = vmul.f32 0.0078125, %v5371_v22 }
0x1223   :  { %v12839_v5 = vsub.f32 %v12763_v6, %v5372_v13  ;;  %v12842_v24 = vsub.f32 %v12765_v3, %v5372_v13  ;;  %v12845_v29 = vsub.f32 %v12777_v58, %v5372_v13  ;;  %v12848_v51 = vsub.f32 %v12781_v19, %v5372_v13 }
0x1224   :  { %v12855_v10 = vsub.f32 %v12791_v9, %v5372_v13  ;;  %v12860_v3 = vsub.f32 %v12788_v8, %v5372_v13  ;;  %v12867_v37 = vsub.f32 %v12794_v12, %v5372_v13  ;;  %v12873_v8 = vsub.f32 %v12802_v38, %v5372_v13 }
0x1225   :  { %v5389_v62 = vmul.f32 %v12839_v5, %v12839_v5  ;;  %v5390_v16 = vmul.f32 %v12842_v24, %v12842_v24  ;;  %v5391_v6 = vmul.f32 %v12845_v29, %v12845_v29  ;;  %v5392_v58 = vmul.f32 %v12848_v51, %v12848_v51 }
0x1226   :  { %v5393_v9 = vmul.f32 %v12855_v10, %v12855_v10  ;;  %v5394_v43 = vmul.f32 %v12860_v3, %v12860_v3  ;;  %v12879_v34 = vsub.f32 %v12808_v4, %v5372_v13  ;;  %v5395_v12 = vmul.f32 %v12867_v37, %v12867_v37 }
0x1227   :  { %v5405_v19 = vsel %vm186_vm1, %v5389_v62, 0.0  ;;  %v5406_v57 = vsel %vm186_vm1, %v5390_v16, 0.0  ;;  %v5408_v63 = vsel %vm186_vm1, %v5391_v6, 0.0  ;;  %v5410_v36 = vsel %vm186_vm1, %v5392_v58, 0.0 }
0x1228   :  { %v5407_v44 = vadd.f32 %v5406_v57, %v5405_v19  ;;  %v5412_v27 = vsel %vm186_vm1, %v5393_v9, 0.0  ;;  %v5382_v21 = vsub.f32 %v12814_v55, %v5372_v13  ;;  %v5396_v38 = vmul.f32 %v12873_v8, %v12873_v8 }
0x1229   :  { %v5414_v47 = vsel %vm186_vm1, %v5394_v43, 0.0  ;;  %v12889_v14 = vsub.f32 %v12820_v11, %v5372_v13  ;;  %v5397_v4 = vmul.f32 %v12879_v34, %v12879_v34  ;;  %v5416_v7 = vsel %vm186_vm1, %v5395_v12, 0.0 }
0x122a   :  { %v5409_v46 = vadd.f32 %v5408_v63, %v5407_v44  ;;  %v5384_v53 = vsub.f32 %v12826_v61, %v5372_v13  ;;  %v5398_v26 = vmul.f32 %v5382_v21, %v5382_v21  ;;  %v5418_v55 = vsel %vm186_vm1, %v5396_v38, 0.0 }
0x122b   :  { %v5385_v52 = vsub.f32 %v5327_v45, %v5372_v13  ;;  %v5399_v25 = vmul.f32 %v12889_v14, %v12889_v14  ;;  %v5420_v41 = vsel %vm186_vm1, %v5397_v4, 0.0  ;;  %v5386_v54 = vsub.f32 %v5328_v30, %v5372_v13 }
0x122c   :  { %v5411_v56 = vadd.f32 %v5410_v36, %v5409_v46  ;;  %v5400_v28 = vmul.f32 %v5384_v53, %v5384_v53  ;;  %v5422_v33 = vsel %vm186_vm1, %v5398_v26, 0.0  ;;  %v5387_v31 = vsub.f32 %v5329_v2, %v5372_v13 }
0x122d   :  { %v5401_v50 = vmul.f32 %v5385_v52, %v5385_v52  ;;  %v5424_v61 = vsel %vm186_vm1, %v5399_v25, 0.0  ;;  %v5388_v23 = vsub.f32 %v5330_v49, %v5372_v13  ;;  %v5402_v17 = vmul.f32 %v5386_v54, %v5386_v54 }
0x122e   :  { %v5413_v18 = vadd.f32 %v5412_v27, %v5411_v56  ;;  %v5426_v45 = vsel %vm186_vm1, %v5400_v28, 0.0  ;;  %v5403_v42 = vmul.f32 %v5387_v31, %v5387_v31 }
0x122f   :  { %v5428_v1 = vsel %vm186_vm1, %v5401_v50, 0.0  ;;  %v5404_v0 = vmul.f32 %v5388_v23, %v5388_v23  ;;  %v5430_v30 = vsel %vm186_vm1, %v5402_v17, 0.0 }
0x1230   :  { %v5415_v40 = vadd.f32 %v5414_v47, %v5413_v18  ;;  %v5432_v32 = vsel %vm186_vm1, %v5403_v42, 0.0  ;;  %v12914_v47 = vld [vmem:[%s14868_s7 + $0xe] ss:$0 sm:$0xff] }
0x1231   :  { %v5434_v22 = vsel %vm186_vm1, %v5404_v0, 0.0 }
0x1232   :  { %v5417_v48 = vadd.f32 %v5416_v7, %v5415_v40 }
0x1234   :  { %v5419_v35 = vadd.f32 %v5418_v55, %v5417_v48 }
0x1236   :  { %v5421_v11 = vadd.f32 %v5420_v41, %v5419_v35 }
0x1238   :  { %v5423_v15 = vadd.f32 %v5422_v33, %v5421_v11 }
0x123a   :  { %v5425_v20 = vadd.f32 %v5424_v61, %v5423_v15 }
0x123c   :  { %v5427_v60 = vadd.f32 %v5426_v45, %v5425_v20 }
0x123e   :  { %v5429_v39 = vadd.f32 %v5428_v1, %v5427_v60 }
0x1240   :  { %v5431_v59 = vadd.f32 %v5430_v30, %v5429_v39 }
0x1242   :  { %v5433_v2 = vadd.f32 %v5432_v32, %v5431_v59 }
0x1244   :  { %v5435_v62 = vadd.f32 %v5434_v22, %v5433_v2 }
0x1246   :  { %v5436_v16 = vrot.slane %v5435_v62, 4 }
0x1248   :  { %v5437_v49 = vadd.f32 %v5436_v16, %v5435_v62 }
0x124a   :  { %v5438_v13 = vrot.slane %v5437_v49, 2 }
0x124c   :  { %v5439_v6 = vadd.f32 %v5438_v13, %v5437_v49 }
0x124e   :  { %v5440_v58 = vrot.slane %v5439_v6, 1 }
0x1250   :  { %v5441_v19 = vadd.f32 %v5440_v58, %v5439_v6 }
0x1252   :  { %v5442_v57 = vmul.f32 0.0078125, %v5441_v19 }
0x1254   :  { %v5443_v44 = vadd.f32 1e-05, %v5442_v57 }
0x1256   :  { %9357 = vrsqrt.f32 %v5443_v44  ;;  %vm5450_vm11 = vweird.f32 %v5443_v44 }
0x125c   :  { %v9358_v9 = vpop.eup %9357 }
0x125d   :  { %v5445_v63 = vmul.f32 %v9358_v9, %v5443_v44  ;;  %vm5451_vm10 = vweird.f32 %v9358_v9 }
0x125e   :  { %vm5452_vm12 = vmor %vm5450_vm11, %vm5451_vm10 }
0x125f   :  { %v5446_v46 = vmul.f32 %v9358_v9, %v5445_v63 }
0x1261   :  { %v5447_v43 = vmul.f32 0.5, %v5446_v46 }
0x1263   :  { %v5448_v36 = vsub.f32 1.5, %v5447_v43 }
0x1265   :  { %v5449_v56 = vmul.f32 %v9358_v9, %v5448_v36 }
0x1267   :  { %v12906_v12 = vsel %vm5452_vm12, %v9358_v9, %v5449_v56 }
0x1268   :  { %v5463_v27 = vmul.f32 %v12906_v12, %v5382_v21  ;;  %v5468_v18 = vmul.f32 %v12906_v12, %v5387_v31  ;;  %v5469_v38 = vmul.f32 %v12906_v12, %v5388_v23  ;;  %v5467_v40 = vmul.f32 %v12906_v12, %v5386_v54  ;;  %v12923_v21 = vld [vmem:[%s14868_s7 + $0xf] ss:$0 sm:$0xff] }
0x1269   :  { %v5466_v4 = vmul.f32 %v12906_v12, %v5385_v52  ;;  %v5465_v26 = vmul.f32 %v12906_v12, %v5384_v53  ;;  %v5464_v35 = vmul.f32 %v12906_v12, %v12889_v14  ;;  %v5462_v53 = vmul.f32 %v12906_v12, %v12879_v34 }
0x126a   :  { %v5487_v7 = vmul.f32 %v12914_v47, %v5468_v18  ;;  %v5488_v48 = vmul.f32 %v12914_v47, %v5469_v38  ;;  %v5486_v55 = vmul.f32 %v12914_v47, %v5467_v40  ;;  %v5461_v31 = vmul.f32 %v12906_v12, %v12873_v8  ;;  %v5524_v38 = vld [vmem:[%s14877_s12] sm:$0xff] }
0x126b   :  { %v5485_v25 = vmul.f32 %v12914_v47, %v5466_v4  ;;  %v5484_v11 = vmul.f32 %v12914_v47, %v5465_v26  ;;  %v5483_v33 = vmul.f32 %v12914_v47, %v5464_v35  ;;  %v5482_v50 = vmul.f32 %v12914_v47, %v5463_v27  ;;  %v8391_v40 = vld [vmem:[%s14877_s12 + $0x100] sm:$0xff]  ;;  %v8408_v26 = vld [vmem:[%s14877_s12 + $0x188] sm:$0xff]  ;;  %v8377_v35 = vld [vmem:[%s14877_s12 + $0x90] sm:$0xff] }
0x126c   :  { %v5506_v52 = vadd.f32 %v12923_v21, %v5487_v7  ;;  %v5507_v41 = vadd.f32 %v12923_v21, %v5488_v48  ;;  %v5505_v54 = vadd.f32 %v12923_v21, %v5486_v55  ;;  %v5460_v20 = vmul.f32 %v12906_v12, %v12867_v37  ;;  %v8407_v4 = vld [vmem:[%s14877_s12 + $0x180] sm:$0xff]  ;;  %v5525_v7 = vld [vmem:[%s14877_s12 + $0x8] sm:$0xff]  ;;  %v5526_v55 = vld [vmem:[%s14877_s12 + $0x10] sm:$0xff] }
0x126d   :  { %v5504_v15 = vadd.f32 %v12923_v21, %v5485_v25  ;;  %v5503_v34 = vadd.f32 %v12923_v21, %v5484_v11  ;;  %v5481_v23 = vmul.f32 %v12914_v47, %v5462_v53  ;;  %v5502_v8 = vadd.f32 %v12923_v21, %v5483_v33  ;;  %v8376_v48 = vld [vmem:[%s14877_s12 + $0x88] sm:$0xff]  ;;  %v8409_v25 = vld [vmem:[%s14877_s12 + $0x190] sm:$0xff]  ;;  %v8378_v11 = vld [vmem:[%s14877_s12 + $0x98] sm:$0xff] }
0x126e   :  { %v12934_v28 = vmax.f32 %v5507_v41, 0.0  ;;  %v12942_v14 = vmax.f32 %v5506_v52, 0.0  ;;  %v12950_v61 = vmax.f32 %v5505_v54, 0.0  ;;  %v5459_v45 = vmul.f32 %v12906_v12, %v12860_v3  ;;  %v8393_v52 = vld [vmem:[%s14877_s12 + $0x110] sm:$0xff]  ;;  %v5527_v41 = vld [vmem:[%s14877_s12 + $0x18] sm:$0xff]  ;;  %v8379_v33 = vld [vmem:[%s14877_s12 + $0xa0] sm:$0xff] }
0x126f   :  { %v12960_v17 = vmax.f32 %v5504_v15, 0.0  ;;  %v5480_v60 = vmul.f32 %v12914_v47, %v5461_v31  ;;  %v5501_v37 = vadd.f32 %v12923_v21, %v5482_v50  ;;  %v12970_v42 = vmax.f32 %v5503_v34, 0.0  ;;  %v8410_v54 = vld [vmem:[%s14877_s12 + $0x198] sm:$0xff]  ;;  %v5528_v15 = vld [vmem:[%s14877_s12 + $0x20] sm:$0xff]  ;;  %v8380_v34 = vld [vmem:[%s14877_s12 + $0xa8] sm:$0xff] }
0x1270   :  { %5540 = vmatpush.msrb.mxu3 %v12934_v28  ;;  %5622 = vmatpush.msrb.mxu0 %v12934_v28  ;;  %v5458_v1 = vmul.f32 %v12906_v12, %v12855_v10  ;;  %v5479_v39 = vmul.f32 %v12914_v47, %v5460_v20  ;;  %v5500_v3 = vadd.f32 %v12923_v21, %v5481_v23  ;;  %v12980_v0 = vmax.f32 %v5502_v8, 0.0  ;;  %v8394_v53 = vld [vmem:[%s14877_s12 + $0x118] sm:$0xff]  ;;  %v8411_v31 = vld [vmem:[%s14877_s12 + $0x1a0] sm:$0xff]  ;;  %v5529_v20 = vld [vmem:[%s14877_s12 + $0x28] sm:$0xff] }
0x1271   :  { %5704 = vmatpush.msra.mxu1 %v12934_v28  ;;  %5786 = vmatpush.msrb.mxu2 %v12934_v28  ;;  %v5457_v30 = vmul.f32 %v12906_v12, %v12848_v51  ;;  %v5478_v59 = vmul.f32 %v12914_v47, %v5459_v45  ;;  %v5499_v10 = vadd.f32 %v12923_v21, %v5480_v60  ;;  %v12990_v32 = vmax.f32 %v5501_v37, 0.0  ;;  %v8395_v50 = vld [vmem:[%s14877_s12 + $0x120] sm:$0xff]  ;;  %v5530_v23 = vld [vmem:[%s14877_s12 + $0x30] sm:$0xff]  ;;  %v8382_v45 = vld [vmem:[%s14877_s12 + $0xb8] sm:$0xff] }
0x1272   :  { %5541 = vmatpush.msrb.mxu3 %v12942_v14  ;;  %5623 = vmatpush.msrb.mxu0 %v12942_v14  ;;  %v5456_v2 = vmul.f32 %v12906_v12, %v12845_v29  ;;  %v5477_v22 = vmul.f32 %v12914_v47, %v5458_v1  ;;  %v5498_v51 = vadd.f32 %v12923_v21, %v5479_v39  ;;  %v13000_v62 = vmax.f32 %v5500_v3, 0.0  ;;  %v8413_v8 = vld [vmem:[%s14877_s12 + $0x1b0] sm:$0xff]  ;;  %v5531_v60 = vld [vmem:[%s14877_s12 + $0x38] sm:$0xff]  ;;  %v8383_v1 = vld [vmem:[%s14877_s12 + $0xc0] sm:$0xff] }
0x1273   :  { %5705 = vmatpush.msra.mxu1 %v12942_v14  ;;  %5787 = vmatpush.msrb.mxu2 %v12942_v14  ;;  %v5455_v16 = vmul.f32 %v12906_v12, %v12842_v24  ;;  %v5476_v49 = vmul.f32 %v12914_v47, %v5457_v30  ;;  %v5497_v29 = vadd.f32 %v12923_v21, %v5478_v59  ;;  %v13010_v13 = vmax.f32 %v5499_v10, 0.0  ;;  %v8414_v37 = vld [vmem:[%s14877_s12 + $0x1b8] sm:$0xff]  ;;  %v5532_v39 = vld [vmem:[%s14877_s12 + $0x40] sm:$0xff]  ;;  %v8384_v30 = vld [vmem:[%s14877_s12 + $0xc8] sm:$0xff] }
0x1274   :  { %5542 = vmatpush.msrb.mxu3 %v12950_v61  ;;  %5624 = vmatpush.msrb.mxu0 %v12950_v61  ;;  %v5454_v6 = vmul.f32 %v12906_v12, %v12839_v5  ;;  %v5475_v58 = vmul.f32 %v12914_v47, %v5456_v2  ;;  %v5496_v24 = vadd.f32 %v12923_v21, %v5477_v22  ;;  %v13020_v19 = vmax.f32 %v5498_v51, 0.0  ;;  %v8415_v3 = vld [vmem:[%s14877_s12 + $0x1c0] sm:$0xff]  ;;  %v5533_v59 = vld [vmem:[%s14877_s12 + $0x48] sm:$0xff]  ;;  %v8385_v2 = vld [vmem:[%s14877_s12 + $0xd0] sm:$0xff] }
0x1275   :  { %5706 = vmatpush.msra.mxu1 %v12950_v61  ;;  %5788 = vmatpush.msrb.mxu2 %v12950_v61  ;;  %v5474_v57 = vmul.f32 %v12914_v47, %v5455_v16  ;;  %v5495_v44 = vadd.f32 %v12923_v21, %v5476_v49  ;;  %v13028_v9 = vmax.f32 %v5497_v29, 0.0  ;;  %v8416_v10 = vld [vmem:[%s14877_s12 + $0x1c8] sm:$0xff]  ;;  %v5534_v22 = vld [vmem:[%s14877_s12 + $0x50] sm:$0xff]  ;;  %v8386_v16 = vld [vmem:[%s14877_s12 + $0xd8] sm:$0xff] }
0x1276   :  { %5543 = vmatpush.msrb.mxu3 %v12960_v17  ;;  %5625 = vmatpush.msrb.mxu0 %v12960_v17  ;;  %v5473_v5 = vmul.f32 %v12914_v47, %v5454_v6  ;;  %v5494_v63 = vadd.f32 %v12923_v21, %v5475_v58  ;;  %v13036_v46 = vmax.f32 %v5496_v24, 0.0  ;;  %v8375_v47 = vld [vmem:[%s14877_s12 + $0x80] sm:$0xff]  ;;  %v8417_v51 = vld [vmem:[%s14877_s12 + $0x1d0] sm:$0xff]  ;;  %v5535_v49 = vld [vmem:[%s14877_s12 + $0x58] sm:$0xff] }
0x1277   :  { %5707 = vmatpush.msra.mxu1 %v12960_v17  ;;  %5789 = vmatpush.msrb.mxu2 %v12960_v17  ;;  %v5493_v43 = vadd.f32 %v12923_v21, %v5474_v57  ;;  %v13043_v36 = vmax.f32 %v5495_v44, 0.0  ;;  %v8418_v29 = vld [vmem:[%s14877_s12 + $0x1d8] sm:$0xff]  ;;  %v8387_v6 = vld [vmem:[%s14877_s12 + $0xe0] sm:$0xff]  ;;  %v8388_v57 = vld [vmem:[%s14877_s12 + $0xe8] sm:$0xff] }
0x1278   :  { %5544 = vmatpush.msrb.mxu3 %v12970_v42  ;;  %5626 = vmatpush.msrb.mxu0 %v12970_v42  ;;  %v5492_v56 = vadd.f32 %v12923_v21, %v5473_v5  ;;  %v13050_v12 = vmax.f32 %v5494_v63, 0.0  ;;  %v8392_v21 = vld [vmem:[%s14877_s12 + $0x108] sm:$0xff]  ;;  %v5536_v58 = vld [vmem:[%s14877_s12 + $0x60] sm:$0xff]  ;;  %v8389_v63 = vld [vmem:[%s14877_s12 + $0xf0] sm:$0xff] }
0x1279   :  { %5708 = vmatpush.msra.mxu1 %v12970_v42  ;;  %5790 = vmatpush.msrb.mxu2 %v12970_v42  ;;  %v13056_v27 = vmax.f32 %v5493_v43, 0.0  ;;  %v8419_v24 = vld [vmem:[%s14877_s12 + $0x1e0] sm:$0xff]  ;;  %v5537_v44 = vld [vmem:[%s14877_s12 + $0x68] sm:$0xff]  ;;  %v8421_v43 = vld [vmem:[%s14877_s12 + $0x1f0] sm:$0xff] }
0x127a   :  { %5545 = vmatpush.msrb.mxu3 %v12980_v0  ;;  %5627 = vmatpush.msrb.mxu0 %v12980_v0  ;;  %v13062_v18 = vmax.f32 %v5492_v56, 0.0  ;;  %v8404_v5 = vld [vmem:[%s14877_s12 + $0x168] sm:$0xff]  ;;  %v8390_v56 = vld [vmem:[%s14877_s12 + $0xf8] sm:$0xff] }
0x127b   :  { %5709 = vmatpush.msra.mxu1 %v12980_v0  ;;  %5791 = vmatpush.msrb.mxu2 %v12980_v0 }
0x127c   :  { %5546 = vmatpush.msrb.mxu3 %v12990_v32  ;;  %5628 = vmatpush.msrb.mxu0 %v12990_v32 }
0x127d   :  { %5710 = vmatpush.msra.mxu1 %v12990_v32  ;;  %5792 = vmatpush.msrb.mxu2 %v12990_v32 }
0x127e   :  { %5547 = vmatpush.msrb.mxu3 %v13000_v62  ;;  %5629 = vmatpush.msrb.mxu0 %v13000_v62 }
0x127f   :  { %5711 = vmatpush.msra.mxu1 %v13000_v62  ;;  %5793 = vmatpush.msrb.mxu2 %v13000_v62 }
0x1280   :  { %5548 = vmatpush.msrb.mxu3 %v13010_v13  ;;  %5630 = vmatpush.msrb.mxu0 %v13010_v13 }
0x1281   :  { %5712 = vmatpush.msra.mxu1 %v13010_v13  ;;  %5794 = vmatpush.msrb.mxu2 %v13010_v13 }
0x1282   :  { %5549 = vmatpush.msrb.mxu3 %v13020_v19  ;;  %5631 = vmatpush.msrb.mxu0 %v13020_v19 }
0x1283   :  { %5713 = vmatpush.msra.mxu1 %v13020_v19  ;;  %5795 = vmatpush.msrb.mxu2 %v13020_v19 }
0x1284   :  { %5550 = vmatpush.msrb.mxu3 %v13028_v9  ;;  %5632 = vmatpush.msrb.mxu0 %v13028_v9 }
0x1285   :  { %5714 = vmatpush.msra.mxu1 %v13028_v9  ;;  %5796 = vmatpush.msrb.mxu2 %v13028_v9 }
0x1286   :  { %5551 = vmatpush.msrb.mxu3 %v13036_v46  ;;  %5633 = vmatpush.msrb.mxu0 %v13036_v46 }
0x1287   :  { %5715 = vmatpush.msra.mxu1 %v13036_v46  ;;  %5797 = vmatpush.msrb.mxu2 %v13036_v46 }
0x1288   :  { %5552 = vmatpush.msrb.mxu3 %v13043_v36  ;;  %5634 = vmatpush.msrb.mxu0 %v13043_v36 }
0x1289   :  { %5716 = vmatpush.msra.mxu1 %v13043_v36  ;;  %5798 = vmatpush.msrb.mxu2 %v13043_v36 }
0x128a   :  { %5553 = vmatpush.msrb.mxu3 %v13050_v12  ;;  %5635 = vmatpush.msrb.mxu0 %v13050_v12 }
0x128b   :  { %5717 = vmatpush.msra.mxu1 %v13050_v12  ;;  %5799 = vmatpush.msrb.mxu2 %v13050_v12 }
0x128c   :  { %5554 = vmatpush.msrb.mxu3 %v13056_v27  ;;  %5636 = vmatpush.msrb.mxu0 %v13056_v27 }
0x128d   :  { %5718 = vmatpush.msra.mxu1 %v13056_v27  ;;  %5800 = vmatpush.msrb.mxu2 %v13056_v27 }
0x128e   :  { %5555 = vmatpush.msrb.mxu3 %v13062_v18  ;;  %5637 = vmatpush.msrb.mxu0 %v13062_v18 }
0x128f   :  { %5719 = vmatpush.msra.mxu1 %v13062_v18  ;;  %5801 = vmatpush.msrb.mxu2 %v13062_v18 }
0x1290   :  { %5556 = vmatmul.f32.vlgmr.msrb.gmra.mxu3 %v5524_v38  ;;  %5638 = vmatmul.f32.vlgmr.msrb.gmra.mxu0 %v8375_v47  ;;  %v8422_v38 = vld [vmem:[%s14877_s12 + $0x1f8] sm:$0xff] }
0x1291   :  { %5720 = vmatmul.f32.vlgmr.msra.gmra.mxu1 %v8391_v40  ;;  %5802 = vmatmul.f32.vlgmr.msrb.gmra.mxu2 %v8407_v4  ;;  %v8406_v47 = vld [vmem:[%s14877_s12 + $0x178] sm:$0xff] }
0x1292   :  { %5868 = vmatpush.msra.mxu3 %v12934_v28  ;;  %5950 = vmatpush.msra.mxu0 %v12934_v28 }
0x1293   :  { %6032 = vmatpush.msrb.mxu1 %v12934_v28  ;;  %6114 = vmatpush.msra.mxu2 %v12934_v28 }
0x1294   :  { %5869 = vmatpush.msra.mxu3 %v12942_v14  ;;  %5951 = vmatpush.msra.mxu0 %v12942_v14 }
0x1295   :  { %6033 = vmatpush.msrb.mxu1 %v12942_v14  ;;  %6115 = vmatpush.msra.mxu2 %v12942_v14 }
0x1296   :  { %5870 = vmatpush.msra.mxu3 %v12950_v61  ;;  %5952 = vmatpush.msra.mxu0 %v12950_v61 }
0x1297   :  { %6034 = vmatpush.msrb.mxu1 %v12950_v61  ;;  %6116 = vmatpush.msra.mxu2 %v12950_v61 }
0x1298   :  { %5871 = vmatpush.msra.mxu3 %v12960_v17  ;;  %5953 = vmatpush.msra.mxu0 %v12960_v17 }
0x1299   :  { %6035 = vmatpush.msrb.mxu1 %v12960_v17  ;;  %6117 = vmatpush.msra.mxu2 %v12960_v17 }
0x129a   :  { %5559 = vmatmul.f32.gmra.mxu3 %v5525_v7  ;;  %5641 = vmatmul.f32.gmra.mxu0 %v8376_v48  ;;  %v8439_v7 = vld [vmem:[%s14877_s12 + $0x280] sm:$0xff] }
0x129b   :  { %5723 = vmatmul.f32.gmra.mxu1 %v8392_v21  ;;  %5805 = vmatmul.f32.gmra.mxu2 %v8408_v26  ;;  %v8423_v48 = vld [vmem:[%s14877_s12 + $0x200] sm:$0xff] }
0x129c   :  { %5872 = vmatpush.msra.mxu3 %v12970_v42  ;;  %5954 = vmatpush.msra.mxu0 %v12970_v42  ;;  %v8471_v21 = vld [vmem:[%s14877_s12 + $0x380] sm:$0xff] }
0x129d   :  { %6036 = vmatpush.msrb.mxu1 %v12970_v42  ;;  %6118 = vmatpush.msra.mxu2 %v12970_v42  ;;  %v8455_v26 = vld [vmem:[%s14877_s12 + $0x300] sm:$0xff] }
0x129e   :  { %5873 = vmatpush.msra.mxu3 %v12980_v0  ;;  %5955 = vmatpush.msra.mxu0 %v12980_v0 }
0x129f   :  { %6037 = vmatpush.msrb.mxu1 %v12980_v0  ;;  %6119 = vmatpush.msra.mxu2 %v12980_v0 }
0x12a0   :  { %5874 = vmatpush.msra.mxu3 %v12990_v32  ;;  %5956 = vmatpush.msra.mxu0 %v12990_v32 }
0x12a1   :  { %6038 = vmatpush.msrb.mxu1 %v12990_v32  ;;  %6120 = vmatpush.msra.mxu2 %v12990_v32 }
0x12a2   :  { %5875 = vmatpush.msra.mxu3 %v13000_v62  ;;  %5957 = vmatpush.msra.mxu0 %v13000_v62 }
0x12a3   :  { %6039 = vmatpush.msrb.mxu1 %v13000_v62  ;;  %6121 = vmatpush.msra.mxu2 %v13000_v62 }
0x12a4   :  { %5562 = vmatmul.f32.gmra.mxu3 %v5526_v55  ;;  %5644 = vmatmul.f32.gmra.mxu0 %v8377_v35 }
0x12a5   :  { %5808 = vmatmul.f32.gmra.mxu2 %v8409_v25  ;;  %5876 = vmatpush.msra.mxu3 %v13010_v13 }
0x12a6   :  { %5958 = vmatpush.msra.mxu0 %v13010_v13  ;;  %6040 = vmatpush.msrb.mxu1 %v13010_v13 }
0x12a7   :  { %6122 = vmatpush.msra.mxu2 %v13010_v13  ;;  %5726 = vmatmul.f32.gmra.mxu1 %v8393_v52 }
0x12a8   :  { %5877 = vmatpush.msra.mxu3 %v13020_v19  ;;  %5959 = vmatpush.msra.mxu0 %v13020_v19 }
0x12a9   :  { %6041 = vmatpush.msrb.mxu1 %v13020_v19  ;;  %6123 = vmatpush.msra.mxu2 %v13020_v19 }
0x12aa   :  { %5878 = vmatpush.msra.mxu3 %v13028_v9  ;;  %5960 = vmatpush.msra.mxu0 %v13028_v9 }
0x12ab   :  { %6042 = vmatpush.msrb.mxu1 %v13028_v9  ;;  %6124 = vmatpush.msra.mxu2 %v13028_v9 }
0x12ac   :  { %5879 = vmatpush.msra.mxu3 %v13036_v46  ;;  %5961 = vmatpush.msra.mxu0 %v13036_v46 }
0x12ad   :  { %6043 = vmatpush.msrb.mxu1 %v13036_v46  ;;  %6125 = vmatpush.msra.mxu2 %v13036_v46 }
0x12ae   :  { %5565 = vmatmul.f32.gmra.mxu3 %v5527_v41  ;;  %5647 = vmatmul.f32.gmra.mxu0 %v8378_v11  ;;  %v8440_v41 = vld [vmem:[%s14877_s12 + $0x288] sm:$0xff] }
0x12af   :  { %5811 = vmatmul.f32.gmra.mxu2 %v8410_v54  ;;  %5880 = vmatpush.msra.mxu3 %v13043_v36  ;;  %v8424_v11 = vld [vmem:[%s14877_s12 + $0x208] sm:$0xff] }
0x12b0   :  { %5962 = vmatpush.msra.mxu0 %v13043_v36  ;;  %6044 = vmatpush.msrb.mxu1 %v13043_v36 }
0x12b1   :  { %6126 = vmatpush.msra.mxu2 %v13043_v36  ;;  %5729 = vmatmul.f32.gmra.mxu1 %v8394_v53 }
0x12b2   :  { %5881 = vmatpush.msra.mxu3 %v13050_v12  ;;  %5963 = vmatpush.msra.mxu0 %v13050_v12 }
0x12b3   :  { %6045 = vmatpush.msrb.mxu1 %v13050_v12  ;;  %6127 = vmatpush.msra.mxu2 %v13050_v12 }
0x12b4   :  { %5882 = vmatpush.msra.mxu3 %v13056_v27  ;;  %5964 = vmatpush.msra.mxu0 %v13056_v27 }
0x12b5   :  { %6046 = vmatpush.msrb.mxu1 %v13056_v27  ;;  %6128 = vmatpush.msra.mxu2 %v13056_v27 }
0x12b6   :  { %5883 = vmatpush.msra.mxu3 %v13062_v18  ;;  %5965 = vmatpush.msra.mxu0 %v13062_v18 }
0x12b7   :  { %6047 = vmatpush.msrb.mxu1 %v13062_v18  ;;  %6129 = vmatpush.msra.mxu2 %v13062_v18 }
0x12b8   :  { %6196 = vmatpush.msrb.mxu3 %v12934_v28  ;;  %5650 = vmatmul.f32.gmra.mxu0 %v8379_v33  ;;  %v8412_v28 = vld [vmem:[%s14877_s12 + $0x1a8] sm:$0xff] }
0x12b9   :  { %5568 = vmatmul.f32.gmra.mxu3 %v5528_v15  ;;  %5814 = vmatmul.f32.gmra.mxu2 %v8411_v31  ;;  %v8456_v33 = vld [vmem:[%s14877_s12 + $0x308] sm:$0xff] }
0x12ba   :  { %5732 = vmatmul.f32.gmra.mxu1 %v8395_v50  ;;  %6197 = vmatpush.msrb.mxu3 %v12942_v14  ;;  %v8396_v14 = vld [vmem:[%s14877_s12 + $0x128] sm:$0xff] }
0x12bb   :  { %v8472_v31 = vld [vmem:[%s14877_s12 + $0x388] sm:$0xff] }
0x12bc   :  { %6198 = vmatpush.msrb.mxu3 %v12950_v61  ;;  %v8381_v61 = vld [vmem:[%s14877_s12 + $0xb0] sm:$0xff] }
0x12be   :  { %6199 = vmatpush.msrb.mxu3 %v12960_v17  ;;  %v8397_v17 = vld [vmem:[%s14877_s12 + $0x130] sm:$0xff] }
0x12c0   :  { %6200 = vmatpush.msrb.mxu3 %v12970_v42  ;;  %5653 = vmatmul.f32.gmra.mxu0 %v8380_v34  ;;  %v8398_v42 = vld [vmem:[%s14877_s12 + $0x138] sm:$0xff] }
0x12c1   :  { %5571 = vmatmul.f32.gmra.mxu3 %v5529_v20  ;;  %5817 = vmatmul.f32.gmra.mxu2 %v8412_v28  ;;  %v8441_v20 = vld [vmem:[%s14877_s12 + $0x290] sm:$0xff] }
0x12c2   :  { %5735 = vmatmul.f32.gmra.mxu1 %v8396_v14  ;;  %6201 = vmatpush.msrb.mxu3 %v12980_v0  ;;  %v8399_v0 = vld [vmem:[%s14877_s12 + $0x140] sm:$0xff]  ;;  %v8425_v28 = vld [vmem:[%s14877_s12 + $0x210] sm:$0xff] }
0x12c3   :  { %v8457_v14 = vld [vmem:[%s14877_s12 + $0x310] sm:$0xff] }
0x12c4   :  { %6202 = vmatpush.msrb.mxu3 %v12990_v32  ;;  %v8400_v32 = vld [vmem:[%s14877_s12 + $0x148] sm:$0xff] }
0x12c6   :  { %6203 = vmatpush.msrb.mxu3 %v13000_v62  ;;  %v8401_v62 = vld [vmem:[%s14877_s12 + $0x150] sm:$0xff] }
0x12c8   :  { %6204 = vmatpush.msrb.mxu3 %v13010_v13  ;;  %5656 = vmatmul.f32.gmra.mxu0 %v8381_v61  ;;  %v8402_v13 = vld [vmem:[%s14877_s12 + $0x158] sm:$0xff]  ;;  %v8473_v61 = vld [vmem:[%s14877_s12 + $0x390] sm:$0xff] }
0x12c9   :  { %5574 = vmatmul.f32.gmra.mxu3 %v5530_v23  ;;  %5820 = vmatmul.f32.gmra.mxu2 %v8413_v8 }
0x12ca   :  { %5738 = vmatmul.f32.gmra.mxu1 %v8397_v17  ;;  %6205 = vmatpush.msrb.mxu3 %v13020_v19  ;;  %v8403_v19 = vld [vmem:[%s14877_s12 + $0x160] sm:$0xff] }
0x12cc   :  { %6206 = vmatpush.msrb.mxu3 %v13028_v9  ;;  %v8420_v9 = vld [vmem:[%s14877_s12 + $0x1e8] sm:$0xff] }
0x12ce   :  { %6207 = vmatpush.msrb.mxu3 %v13036_v46  ;;  %v5538_v46 = vld [vmem:[%s14877_s12 + $0x70] sm:$0xff] }
0x12d0   :  { %6208 = vmatpush.msrb.mxu3 %v13043_v36  ;;  %5659 = vmatmul.f32.gmra.mxu0 %v8382_v45  ;;  %v8405_v36 = vld [vmem:[%s14877_s12 + $0x170] sm:$0xff] }
0x12d1   :  { %5577 = vmatmul.f32.gmra.mxu3 %v5531_v60  ;;  %5823 = vmatmul.f32.gmra.mxu2 %v8414_v37  ;;  %v8442_v60 = vld [vmem:[%s14877_s12 + $0x298] sm:$0xff] }
0x12d2   :  { %5741 = vmatmul.f32.gmra.mxu1 %v8398_v42  ;;  %6209 = vmatpush.msrb.mxu3 %v13050_v12  ;;  %v8426_v42 = vld [vmem:[%s14877_s12 + $0x218] sm:$0xff] }
0x12d4   :  { %6210 = vmatpush.msrb.mxu3 %v13056_v27  ;;  %v5539_v27 = vld [vmem:[%s14877_s12 + $0x78] sm:$0xff] }
0x12d6   :  { %6211 = vmatpush.msrb.mxu3 %v13062_v18 }
0x12d8   :  { %5662 = vmatmul.f32.gmra.mxu0 %v8383_v1 }
0x12d9   :  { %5580 = vmatmul.f32.gmra.mxu3 %v5532_v39  ;;  %5826 = vmatmul.f32.gmra.mxu2 %v8415_v3  ;;  %v8458_v39 = vld [vmem:[%s14877_s12 + $0x318] sm:$0xff] }
0x12da   :  { %5744 = vmatmul.f32.gmra.mxu1 %v8399_v0  ;;  %v8474_v3 = vld [vmem:[%s14877_s12 + $0x398] sm:$0xff] }
0x12e0   :  { %5665 = vmatmul.f32.gmra.mxu0 %v8384_v30 }
0x12e1   :  { %5583 = vmatmul.f32.gmra.mxu3 %v5533_v59  ;;  %5829 = vmatmul.f32.gmra.mxu2 %v8416_v10 }
0x12e2   :  { %5747 = vmatmul.f32.gmra.mxu1 %v8400_v32  ;;  %v8443_v32 = vld [vmem:[%s14877_s12 + $0x2a0] sm:$0xff] }
0x12e8   :  { %5668 = vmatmul.f32.gmra.mxu0 %v8385_v2  ;;  %v8427_v2 = vld [vmem:[%s14877_s12 + $0x220] sm:$0xff] }
0x12e9   :  { %5586 = vmatmul.f32.gmra.mxu3 %v5534_v22  ;;  %5832 = vmatmul.f32.gmra.mxu2 %v8417_v51  ;;  %v8459_v51 = vld [vmem:[%s14877_s12 + $0x320] sm:$0xff] }
0x12ea   :  { %5750 = vmatmul.f32.gmra.mxu1 %v8401_v62  ;;  %v8475_v62 = vld [vmem:[%s14877_s12 + $0x3a0] sm:$0xff] }
0x12f0   :  { %5671 = vmatmul.f32.gmra.mxu0 %v8386_v16 }
0x12f1   :  { %5589 = vmatmul.f32.gmra.mxu3 %v5535_v49  ;;  %5835 = vmatmul.f32.gmra.mxu2 %v8418_v29 }
0x12f2   :  { %5753 = vmatmul.f32.gmra.mxu1 %v8402_v13  ;;  %v8444_v13 = vld [vmem:[%s14877_s12 + $0x2a8] sm:$0xff] }
0x12f8   :  { %5674 = vmatmul.f32.gmra.mxu0 %v8387_v6 }
0x12f9   :  { %5592 = vmatmul.f32.gmra.mxu3 %v5536_v58  ;;  %5838 = vmatmul.f32.gmra.mxu2 %v8419_v24  ;;  %v8428_v58 = vld [vmem:[%s14877_s12 + $0x228] sm:$0xff] }
0x12fa   :  { %5756 = vmatmul.f32.gmra.mxu1 %v8403_v19  ;;  %v8460_v19 = vld [vmem:[%s14877_s12 + $0x328] sm:$0xff] }
0x1300   :  { %5677 = vmatmul.f32.gmra.mxu0 %v8388_v57  ;;  %v8476_v57 = vld [vmem:[%s14877_s12 + $0x3a8] sm:$0xff] }
0x1301   :  { %5595 = vmatmul.f32.gmra.mxu3 %v5537_v44  ;;  %5841 = vmatmul.f32.gmra.mxu2 %v8420_v9 }
0x1302   :  { %5759 = vmatmul.f32.gmra.mxu1 %v8404_v5 }
0x1308   :  { %5680 = vmatmul.f32.gmra.mxu0 %v8389_v63 }
0x1309   :  { %5598 = vmatmul.f32.gmra.mxu3 %v5538_v46  ;;  %5844 = vmatmul.f32.gmra.mxu2 %v8421_v43  ;;  %v8445_v43 = vld [vmem:[%s14877_s12 + $0x2b0] sm:$0xff] }
0x130a   :  { %5762 = vmatmul.f32.gmra.mxu1 %v8405_v36  ;;  %v8429_v36 = vld [vmem:[%s14877_s12 + $0x230] sm:$0xff] }
0x130d   :  { %v5639_v12 = vpop.f32.mrf.mxu0 }
0x130e   :  { %v5721_v18 = vpop.f32.mrf.mxu1 }
0x1310   :  { %5683 = vmatmul.f32.gmra.mxu0 %v8390_v56 }
0x1311   :  { %5601 = vmatmul.f32.gmra.mxu3 %v5539_v27  ;;  %5847 = vmatmul.f32.gmra.mxu2 %v8422_v38  ;;  %v8477_v27 = vld [vmem:[%s14877_s12 + $0x3b0] sm:$0xff] }
0x1312   :  { %5765 = vmatmul.f32.gmra.mxu1 %v8406_v47 }
0x1313   :  { %v13344_v40 = vpop.f32.mrf.mxu3 }
0x1314   :  { %v5803_v4 = vpop.f32.mrf.mxu2 }
0x1317   :  { %v5642_v55 = vpop.f32.mrf.mxu0 }
0x1318   :  { %5966 = vmatmul.f32.vlgmr.msra.gmra.mxu0 %v8439_v7  ;;  %v9058_v35 = vpack.i.bf16 %v5642_v55, %v5639_v12  ;;  %v5724_v25 = vpop.f32.mrf.mxu1  ;;  %v8461_v12 = vld [vmem:[%s14877_s12 + $0x330] sm:$0xff]  ;;  %v8430_v7 = vld [vmem:[%s14877_s12 + $0x238] sm:$0xff] }
0x1319   :  { %5884 = vmatmul.f32.vlgmr.msra.gmra.mxu3 %v8423_v48  ;;  %v9063_v52 = vpack.i.bf16 %v5724_v25, %v5721_v18  ;;  %6130 = vmatmul.f32.vlgmr.msra.gmra.mxu2 %v8471_v21  ;;  %v8462_v21 = vld [vmem:[%s14877_s12 + $0x338] sm:$0xff] }
0x131a   :  { %6048 = vmatmul.f32.vlgmr.msrb.gmra.mxu1 %v8455_v26  ;;  %9059 = vrot.lane.b32.xlu2 %v9058_v35, %s9561_s10  ;;  %v8478_v26 = vld [vmem:[%s14877_s12 + $0x3b8] sm:$0xff] }
0x131b   :  { %9064 = vrot.lane.b32.xlu0 %v9063_v52, %s9562_s29 }
0x131d   :  { %v13366_v54 = vpop.f32.mrf.mxu3 }
0x131e   :  { %v5806_v53 = vpop.f32.mrf.mxu2 }
0x131f   :  { %v9068_v15 = vpack.i.bf16 %v5806_v53, %v5803_v4  ;;  %v8446_v4 = vld [vmem:[%s14877_s12 + $0x2b8] sm:$0xff] }
0x1320   :  { %5969 = vmatmul.f32.gmra.mxu0 %v8440_v41  ;;  %v8447_v41 = vld [vmem:[%s14877_s12 + $0x2c0] sm:$0xff] }
0x1321   :  { %5887 = vmatmul.f32.gmra.mxu3 %v8424_v11  ;;  %v5645_v50 = vpop.f32.mrf.mxu0  ;;  %9069 = vrot.lane.b32.xlu1 %v9068_v15, %s9563_s30  ;;  %v8431_v11 = vld [vmem:[%s14877_s12 + $0x240] sm:$0xff] }
0x1322   :  { %6051 = vmatmul.f32.gmra.mxu1 %v8456_v33  ;;  %6133 = vmatmul.f32.gmra.mxu2 %v8472_v31  ;;  %v8463_v33 = vld [vmem:[%s14877_s12 + $0x340] sm:$0xff] }
0x1323   :  { %v8479_v15 = vld [vmem:[%s14877_s12 + $0x3c0] sm:$0xff] }
0x1324   :  { %v5727_v34 = vpop.f32.mrf.mxu1 }
0x1327   :  { %v13387_v23 = vpop.f32.mrf.mxu3 }
0x1328   :  { %v5809_v8 = vpop.f32.mrf.mxu2  ;;  %5972 = vmatmul.f32.gmra.mxu0 %v8441_v20  ;;  %v8448_v20 = vld [vmem:[%s14877_s12 + $0x2c8] sm:$0xff] }
0x1329   :  { %5890 = vmatmul.f32.gmra.mxu3 %v8425_v28  ;;  %v8432_v28 = vld [vmem:[%s14877_s12 + $0x248] sm:$0xff] }
0x132a   :  { %6054 = vmatmul.f32.gmra.mxu1 %v8457_v14  ;;  %6136 = vmatmul.f32.gmra.mxu2 %v8473_v61  ;;  %v8464_v61 = vld [vmem:[%s14877_s12 + $0x348] sm:$0xff] }
0x132b   :  { %v5648_v17 = vpop.f32.mrf.mxu0 }
0x132c   :  { %v9073_v45 = vpack.i.bf16 %v5648_v17, %v5645_v50 }
0x132e   :  { %v5730_v37 = vpop.f32.mrf.mxu1  ;;  %9074 = vrot.lane.b32.xlu0 %v9073_v45, %s9561_s10 }
0x132f   :  { %v9078_v1 = vpack.i.bf16 %v5730_v37, %v5727_v34  ;;  %v8449_v37 = vld [vmem:[%s14877_s12 + $0x2d0] sm:$0xff] }
0x1330   :  { %5975 = vmatmul.f32.gmra.mxu0 %v8442_v60 }
0x1331   :  { %5893 = vmatmul.f32.gmra.mxu3 %v8426_v42  ;;  %9079 = vrot.lane.b32.xlu1 %v9078_v1, %s9562_s29  ;;  %v13403_v0 = vpop.f32.mrf.mxu3  ;;  %v8433_v42 = vld [vmem:[%s14877_s12 + $0x250] sm:$0xff] }
0x1332   :  { %v5812_v30 = vpop.f32.mrf.mxu2  ;;  %6057 = vmatmul.f32.gmra.mxu1 %v8458_v39  ;;  %6139 = vmatmul.f32.gmra.mxu2 %v8474_v3  ;;  %v8465_v39 = vld [vmem:[%s14877_s12 + $0x350] sm:$0xff] }
0x1333   :  { %v9083_v59 = vpack.i.bf16 %v5812_v30, %v5809_v8  ;;  %v8480_v8 = vld [vmem:[%s14877_s12 + $0x3c8] sm:$0xff]  ;;  %v8481_v3 = vld [vmem:[%s14877_s12 + $0x3d0] sm:$0xff] }
0x1335   :  { %v5651_v10 = vpop.f32.mrf.mxu0  ;;  %9084 = vrot.lane.b32.xlu2 %v9083_v59, %s9563_s30 }
0x1337   :  { %v5733_v22 = vpop.f32.mrf.mxu1 }
0x1338   :  { %5978 = vmatmul.f32.gmra.mxu0 %v8443_v32  ;;  %v8450_v32 = vld [vmem:[%s14877_s12 + $0x2d8] sm:$0xff] }
0x1339   :  { %5896 = vmatmul.f32.gmra.mxu3 %v8427_v2  ;;  %v8434_v2 = vld [vmem:[%s14877_s12 + $0x258] sm:$0xff] }
0x133a   :  { %6060 = vmatmul.f32.gmra.mxu1 %v8459_v51  ;;  %6142 = vmatmul.f32.gmra.mxu2 %v8475_v62  ;;  %v8466_v51 = vld [vmem:[%s14877_s12 + $0x358] sm:$0xff] }
0x133b   :  { %v8482_v62 = vld [vmem:[%s14877_s12 + $0x3d8] sm:$0xff] }
0x133c   :  { %v13418_v16 = vpop.f32.mrf.mxu3  ;;  %v5815_v49 = vpop.f32.mrf.mxu2 }
0x133d   :  { %v5654_v29 = vpop.f32.mrf.mxu0 }
0x133e   :  { %v9088_v6 = vpack.i.bf16 %v5654_v29, %v5651_v10 }
0x133f   :  { %v5736_v24 = vpop.f32.mrf.mxu1 }
0x1340   :  { %v9093_v44 = vpack.i.bf16 %v5736_v24, %v5733_v22  ;;  %9089 = vrot.lane.b32.xlu1 %v9088_v6, %s9561_s10  ;;  %5981 = vmatmul.f32.gmra.mxu0 %v8444_v13  ;;  %v8451_v6 = vld [vmem:[%s14877_s12 + $0x2e0] sm:$0xff] }
0x1341   :  { %5899 = vmatmul.f32.gmra.mxu3 %v8428_v58  ;;  %v8435_v58 = vld [vmem:[%s14877_s12 + $0x260] sm:$0xff] }
0x1342   :  { %6063 = vmatmul.f32.gmra.mxu1 %v8460_v19  ;;  %6145 = vmatmul.f32.gmra.mxu2 %v8476_v57  ;;  %v8483_v19 = vld [vmem:[%s14877_s12 + $0x3e0] sm:$0xff] }
0x1343   :  { %9094 = vrot.lane.b32.xlu2 %v9093_v44, %s9562_s29  ;;  %v8467_v57 = vld [vmem:[%s14877_s12 + $0x360] sm:$0xff] }
0x1344   :  { %v13434_v9 = vpop.f32.mrf.mxu3  ;;  %v5818_v5 = vpop.f32.mrf.mxu2 }
0x1345   :  { %v9098_v63 = vpack.i.bf16 %v5818_v5, %v5815_v49  ;;  %v13436_v46 = vpop.f32.mrf.mxu0 }
0x1347   :  { %v13444_v56 = vpop.f32.mrf.mxu1  ;;  %9099 = vrot.lane.b32.xlu0 %v9098_v63, %s9563_s30 }
0x1348   :  { %5984 = vmatmul.f32.gmra.mxu0 %v8445_v43  ;;  %v8452_v43 = vld [vmem:[%s14877_s12 + $0x2e8] sm:$0xff] }
0x1349   :  { %5902 = vmatmul.f32.gmra.mxu3 %v8429_v36  ;;  %v8436_v36 = vld [vmem:[%s14877_s12 + $0x268] sm:$0xff] }
0x134a   :  { %6066 = vmatmul.f32.gmra.mxu1 %v8461_v12  ;;  %6148 = vmatmul.f32.gmra.mxu2 %v8477_v27  ;;  %v8484_v27 = vld [vmem:[%s14877_s12 + $0x3e8] sm:$0xff] }
0x134c   :  { %v13453_v18 = vpop.f32.mrf.mxu3  ;;  %v13455_v38 = vpop.f32.mrf.mxu2 }
0x134d   :  { %v13457_v47 = vpop.f32.mrf.mxu0 }
0x134f   :  { %v13465_v48 = vpop.f32.mrf.mxu1 }
0x1350   :  { %5987 = vmatmul.f32.gmra.mxu0 %v8446_v4  ;;  %v8468_v4 = vld [vmem:[%s14877_s12 + $0x368] sm:$0xff] }
0x1351   :  { %5905 = vmatmul.f32.gmra.mxu3 %v8430_v7 }
0x1352   :  { %6069 = vmatmul.f32.gmra.mxu1 %v8462_v21  ;;  %6151 = vmatmul.f32.gmra.mxu2 %v8478_v26 }
0x1354   :  { %v13473_v55 = vpop.f32.mrf.mxu3  ;;  %v13475_v35 = vpop.f32.mrf.mxu2 }
0x1355   :  { %v13477_v25 = vpop.f32.mrf.mxu0  ;;  %v9133_v52 = vpack.i.bf16 %v13475_v35, %v13455_v38  ;;  %v9123_v38 = vpack.i.bf16 %v13457_v47, %v13436_v46  ;;  %v8492_v46 = vld [vmem:[%s14877_s12 + $0x428] sm:$0xff] }
0x1357   :  { %v13487_v53 = vpop.f32.mrf.mxu1 }
0x1358   :  { %5990 = vmatmul.f32.gmra.mxu0 %v8447_v41  ;;  %v8453_v41 = vld [vmem:[%s14877_s12 + $0x2f0] sm:$0xff] }
0x1359   :  { %5908 = vmatmul.f32.gmra.mxu3 %v8431_v11  ;;  %v8437_v11 = vld [vmem:[%s14877_s12 + $0x270] sm:$0xff] }
0x135a   :  { %6072 = vmatmul.f32.gmra.mxu1 %v8463_v33  ;;  %6154 = vmatmul.f32.gmra.mxu2 %v8479_v15  ;;  %v8485_v15 = vld [vmem:[%s14877_s12 + $0x3f0] sm:$0xff] }
0x135c   :  { %v13495_v31 = vpop.f32.mrf.mxu3  ;;  %v13497_v50 = vpop.f32.mrf.mxu2 }
0x135d   :  { %v13499_v34 = vpop.f32.mrf.mxu0 }
0x135f   :  { %v13507_v14 = vpop.f32.mrf.mxu1 }
0x1360   :  { %5993 = vmatmul.f32.gmra.mxu0 %v8448_v20 }
0x1361   :  { %5911 = vmatmul.f32.gmra.mxu3 %v8432_v28 }
0x1362   :  { %6075 = vmatmul.f32.gmra.mxu1 %v8464_v61  ;;  %6157 = vmatmul.f32.gmra.mxu2 %v8480_v8  ;;  %v8454_v61 = vld [vmem:[%s14877_s12 + $0x2f8] sm:$0xff] }
0x1363   :  { %v8438_v8 = vld [vmem:[%s14877_s12 + $0x278] sm:$0xff] }
0x1364   :  { %v13515_v17 = vpop.f32.mrf.mxu3  ;;  %v13517_v45 = vpop.f32.mrf.mxu2 }
0x1365   :  { %v13519_v60 = vpop.f32.mrf.mxu0 }
0x1367   :  { %v13527_v1 = vpop.f32.mrf.mxu1 }
0x1368   :  { %5996 = vmatmul.f32.gmra.mxu0 %v8449_v37 }
0x1369   :  { %5914 = vmatmul.f32.gmra.mxu3 %v8433_v42 }
0x136a   :  { %6078 = vmatmul.f32.gmra.mxu1 %v8465_v39  ;;  %6160 = vmatmul.f32.gmra.mxu2 %v8481_v3  ;;  %v8486_v39 = vld [vmem:[%s14877_s12 + $0x3f8] sm:$0xff] }
0x136c   :  { %v13535_v30 = vpop.f32.mrf.mxu3  ;;  %v13537_v59 = vpop.f32.mrf.mxu2 }
0x136d   :  { %v13539_v10 = vpop.f32.mrf.mxu0 }
0x136f   :  { %v13547_v22 = vpop.f32.mrf.mxu1 }
0x1370   :  { %5999 = vmatmul.f32.gmra.mxu0 %v8450_v32 }
0x1371   :  { %5917 = vmatmul.f32.gmra.mxu3 %v8434_v2  ;;  %v8487_v2 = vld [vmem:[%s14877_s12 + $0x400] sm:$0xff] }
0x1372   :  { %6081 = vmatmul.f32.gmra.mxu1 %v8466_v51  ;;  %6163 = vmatmul.f32.gmra.mxu2 %v8482_v62 }
0x1374   :  { %v13555_v49 = vpop.f32.mrf.mxu3  ;;  %v13559_v13 = vpop.f32.mrf.mxu2 }
0x1375   :  { %v13557_v29 = vpop.f32.mrf.mxu0 }
0x1377   :  { %v13567_v24 = vpop.f32.mrf.mxu1 }
0x1378   :  { %6002 = vmatmul.f32.gmra.mxu0 %v8451_v6  ;;  %v8469_v6 = vld [vmem:[%s14877_s12 + $0x370] sm:$0xff] }
0x1379   :  { %5920 = vmatmul.f32.gmra.mxu3 %v8435_v58 }
0x137a   :  { %6166 = vmatmul.f32.gmra.mxu2 %v8483_v19  ;;  %6084 = vmatmul.f32.gmra.mxu1 %v8467_v57 }
0x137c   :  { %v13575_v44 = vpop.f32.mrf.mxu3  ;;  %v13579_v63 = vpop.f32.mrf.mxu2 }
0x137d   :  { %v13577_v5 = vpop.f32.mrf.mxu0 }
0x137f   :  { %v13587_v12 = vpop.f32.mrf.mxu1 }
0x1380   :  { %6005 = vmatmul.f32.gmra.mxu0 %v8452_v43  ;;  %v8488_v43 = vld [vmem:[%s14877_s12 + $0x408] sm:$0xff] }
0x1381   :  { %5923 = vmatmul.f32.gmra.mxu3 %v8436_v36 }
0x1382   :  { %6169 = vmatmul.f32.gmra.mxu2 %v8484_v27  ;;  %6087 = vmatmul.f32.gmra.mxu1 %v8468_v4 }
0x1384   :  { %v13595_v7 = vpop.f32.mrf.mxu3  ;;  %v13599_v26 = vpop.f32.mrf.mxu2 }
0x1385   :  { %v13597_v21 = vpop.f32.mrf.mxu0 }
0x1387   :  { %v13607_v33 = vpop.f32.mrf.mxu1 }
0x1388   :  { %6008 = vmatmul.f32.gmra.mxu0 %v8453_v41  ;;  %v8470_v41 = vld [vmem:[%s14877_s12 + $0x378] sm:$0xff] }
0x1389   :  { %5926 = vmatmul.f32.gmra.mxu3 %v8437_v11 }
0x138a   :  { %6172 = vmatmul.f32.gmra.mxu2 %v8485_v15  ;;  %6090 = vmatmul.f32.gmra.mxu1 %v8469_v6 }
0x138c   :  { %v13612_v20 = vpop.f32.mrf.mxu3  ;;  %v13622_v37 = vpop.f32.mrf.mxu2 }
0x138d   :  { %v13614_v28 = vpop.f32.mrf.mxu0 }
0x138f   :  { %v13624_v42 = vpop.f32.mrf.mxu1 }
0x1390   :  { %6011 = vmatmul.f32.gmra.mxu0 %v8454_v61 }
0x1391   :  { %5929 = vmatmul.f32.gmra.mxu3 %v8438_v8  ;;  %v9128_v8 = vpack.i.bf16 %v13465_v48, %v13444_v56  ;;  %v8490_v56 = vld [vmem:[%s14877_s12 + $0x418] sm:$0xff] }
0x1392   :  { %6175 = vmatmul.f32.gmra.mxu2 %v8486_v39  ;;  %6093 = vmatmul.f32.gmra.mxu1 %v8470_v41  ;;  %v8489_v39 = vld [vmem:[%s14877_s12 + $0x410] sm:$0xff] }
0x1394   :  { %v13629_v3 = vpop.f32.mrf.mxu3  ;;  %v13634_v51 = vpop.f32.mrf.mxu2 }
0x1395   :  { %v5967_v32 = vpop.f32.mrf.mxu0 }
0x1397   :  { %v6049_v62 = vpop.f32.mrf.mxu1 }
0x1399   :  { %6212 = vmatmul.f32.vlgmr.msrb.gmra.mxu3 %v8487_v2 }
0x139c   :  { %v5885_v58 = vpop.f32.mrf.mxu3  ;;  %v6131_v36 = vpop.f32.mrf.mxu2 }
0x139d   :  { %v5970_v19 = vpop.f32.mrf.mxu0 }
0x139e   :  { %v9103_v57 = vpack.i.bf16 %v5970_v19, %v5967_v32 }
0x139f   :  { %v6052_v27 = vpop.f32.mrf.mxu1 }
0x13a0   :  { %v9108_v4 = vpack.i.bf16 %v6052_v27, %v6049_v62  ;;  %9104 = vrot.lane.b32.xlu0 %v9103_v57, %s9564_s1 }
0x13a1   :  { %6215 = vmatmul.f32.gmra.mxu3 %v8488_v43 }
0x13a2   :  { %9109 = vrot.lane.b32.xlu1 %v9108_v4, %s9566_s16 }
0x13a4   :  { %v5888_v11 = vpop.f32.mrf.mxu3 }
0x13a5   :  { %v9113_v15 = vpack.i.bf16 %v5888_v11, %v5885_v58  ;;  %v5973_v61 = vpop.f32.mrf.mxu0  ;;  %v6134_v32 = vpop.f32.mrf.mxu2 }
0x13a6   :  { %v9118_v6 = vpack.i.bf16 %v6134_v32, %v6131_v36  ;;  %v8491_v36 = vld [vmem:[%s14877_s12 + $0x420] sm:$0xff] }
0x13a7   :  { %9114 = vrot.lane.b32.xlu2 %v9113_v15, %s9560_s28  ;;  %v6055_v2 = vpop.f32.mrf.mxu1 }
0x13a8   :  { %9129 = vrot.lane.b32.xlu0 %v9128_v8, %s9562_s29 }
0x13a9   :  { %6218 = vmatmul.f32.gmra.mxu3 %v8489_v39 }
0x13aa   :  { %9134 = vrot.lane.b32.xlu1 %v9133_v52, %s9563_s30 }
0x13ac   :  { %v5891_v62 = vpop.f32.mrf.mxu3 }
0x13ad   :  { %v5976_v58 = vpop.f32.mrf.mxu0  ;;  %v6137_v48 = vpop.f32.mrf.mxu2 }
0x13ae   :  { %v9138_v19 = vpack.i.bf16 %v5976_v58, %v5973_v61 }
0x13af   :  { %9119 = vrot.lane.b32.xlu2 %v9118_v6, %s9565_s15  ;;  %v6058_v57 = vpop.f32.mrf.mxu1 }
0x13b0   :  { %v9143_v11 = vpack.i.bf16 %v6058_v57, %v6055_v2  ;;  %v8493_v2 = vld [vmem:[%s14877_s12 + $0x430] sm:$0xff]  ;;  %v9168_v57 = vpack.i.bf16 %v13499_v34, %v13477_v25 }
0x13b1   :  { %6221 = vmatmul.f32.gmra.mxu3 %v8490_v56 }
0x13b2   :  { %9139 = vrot.lane.b32.xlu1 %v9138_v19, %s9564_s1 }
0x13b4   :  { %v5894_v43 = vpop.f32.mrf.mxu3 }
0x13b5   :  { %v9148_v35 = vpack.i.bf16 %v5894_v43, %v5891_v62  ;;  %v5979_v52 = vpop.f32.mrf.mxu0  ;;  %v6140_v27 = vpop.f32.mrf.mxu2  ;;  %v9188_v43 = vpack.i.bf16 %v13517_v45, %v13497_v50  ;;  %v9183_v50 = vpack.i.bf16 %v13507_v14, %v13487_v53  ;;  %v8495_v45 = vld [vmem:[%s14877_s12 + $0x440] sm:$0xff]  ;;  %v8534_v53 = vld [vmem:[%s14878_s6 + $0x108] sm:$0xff] }
0x13b6   :  { %v9153_v15 = vpack.i.bf16 %v6140_v27, %v6137_v48  ;;  %7056 = vmatpush.msrb.mxu2 %v8534_v53  ;;  %v6829_v53 = vld [vmem:[%s14878_s6 + $0x38] sm:$0xff] }
0x13b7   :  { %9124 = vrot.lane.b32.xlu2 %v9123_v38, %s9561_s10  ;;  %9149 = vrot.lane.b32.xlu0 %v9148_v35, %s9560_s28  ;;  %v6061_v4 = vpop.f32.mrf.mxu1 }
0x13b9   :  { %6224 = vmatmul.f32.gmra.mxu3 %v8491_v36 }
0x13bc   :  { %v5897_v41 = vpop.f32.mrf.mxu3 }
0x13bd   :  { %v5982_v61 = vpop.f32.mrf.mxu0  ;;  %v6143_v47 = vpop.f32.mrf.mxu2 }
0x13be   :  { %v9158_v62 = vpack.i.bf16 %v5982_v61, %v5979_v52  ;;  %v8494_v52 = vld [vmem:[%s14877_s12 + $0x438] sm:$0xff] }
0x13bf   :  { %9144 = vrot.lane.b32.xlu2 %v9143_v11, %s9566_s16  ;;  %9154 = vrot.lane.b32.xlu0 %v9153_v15, %s9565_s15  ;;  %v6064_v8 = vpop.f32.mrf.mxu1  ;;  %v6837_v61 = vld [vmem:[%s14878_s6 + $0x78] sm:$0xff] }
0x13c0   :  { %v9163_v6 = vpack.i.bf16 %v6064_v8, %v6061_v4  ;;  %6891 = vmatpush.msrb.mxu0 %v6837_v61  ;;  %v9223_v8 = vpack.i.bf16 %v13559_v13, %v13537_v59  ;;  %v6834_v13 = vld [vmem:[%s14878_s6 + $0x60] sm:$0xff]  ;;  %v8527_v61 = vld [vmem:[%s14878_s6 + $0xd0] sm:$0xff] }
0x13c1   :  { %6227 = vmatmul.f32.gmra.mxu3 %v8492_v46  ;;  %v6836_v46 = vld [vmem:[%s14878_s6 + $0x70] sm:$0xff] }
0x13c2   :  { %6892 = vmatpush.msrb.mxu0 %v6836_v46 }
0x13c4   :  { %v5900_v39 = vpop.f32.mrf.mxu3 }
0x13c5   :  { %v9173_v32 = vpack.i.bf16 %v5900_v39, %v5897_v41  ;;  %v5985_v58 = vpop.f32.mrf.mxu0  ;;  %v6146_v56 = vpop.f32.mrf.mxu2 }
0x13c6   :  { %v9178_v35 = vpack.i.bf16 %v6146_v56, %v6143_v47  ;;  %v8533_v47 = vld [vmem:[%s14878_s6 + $0x100] sm:$0xff]  ;;  %v8532_v56 = vld [vmem:[%s14878_s6 + $0xf8] sm:$0xff] }
0x13c7   :  { %9159 = vrot.lane.b32.xlu2 %v9158_v62, %s9564_s1  ;;  %9164 = vrot.lane.b32.xlu0 %v9163_v6, %s9566_s16  ;;  %v6067_v48 = vpop.f32.mrf.mxu1  ;;  %v6835_v62 = vld [vmem:[%s14878_s6 + $0x68] sm:$0xff] }
0x13c8   :  { %9174 = vrot.lane.b32.xlu1 %v9173_v32, %s9560_s28  ;;  %7057 = vmatpush.msrb.mxu2 %v8533_v47 }
0x13c9   :  { %6230 = vmatmul.f32.gmra.mxu3 %v8493_v2  ;;  %6893 = vmatpush.msrb.mxu0 %v6835_v62 }
0x13ca   :  { %7058 = vmatpush.msrb.mxu2 %v8532_v56 }
0x13cb   :  { %6894 = vmatpush.msrb.mxu0 %v6834_v13 }
0x13cc   :  { %v5903_v19 = vpop.f32.mrf.mxu3 }
0x13cd   :  { %v5988_v38 = vpop.f32.mrf.mxu0  ;;  %v6149_v36 = vpop.f32.mrf.mxu2 }
0x13ce   :  { %v9193_v34 = vpack.i.bf16 %v5988_v38, %v5985_v58  ;;  %v8496_v58 = vld [vmem:[%s14877_s12 + $0x448] sm:$0xff]  ;;  %v8536_v38 = vld [vmem:[%s14878_s6 + $0x118] sm:$0xff] }
0x13cf   :  { %9189 = vrot.lane.b32.xlu2 %v9188_v43, %s9563_s30  ;;  %9169 = vrot.lane.b32.xlu0 %v9168_v57, %s9561_s10  ;;  %v6070_v27 = vpop.f32.mrf.mxu1  ;;  %v8530_v57 = vld [vmem:[%s14878_s6 + $0xe8] sm:$0xff] }
0x13d0   :  { %9179 = vrot.lane.b32.xlu1 %v9178_v35, %s9565_s15  ;;  %v9198_v6 = vpack.i.bf16 %v6070_v27, %v6067_v48  ;;  %v8531_v48 = vld [vmem:[%s14878_s6 + $0xf0] sm:$0xff]  ;;  %v9218_v35 = vpack.i.bf16 %v13547_v22, %v13527_v1  ;;  %7135 = vmatpush.msra.mxu3 %v8536_v38 }
0x13d1   :  { %6233 = vmatmul.f32.gmra.mxu3 %v8494_v52  ;;  %7059 = vmatpush.msrb.mxu2 %v8531_v48  ;;  %v6832_v27 = vld [vmem:[%s14878_s6 + $0x50] sm:$0xff] }
0x13d2   :  { %v8497_v1 = vld [vmem:[%s14877_s12 + $0x450] sm:$0xff] }
0x13d3   :  { %7060 = vmatpush.msrb.mxu2 %v8530_v57  ;;  %v8523_v48 = vld [vmem:[%s14878_s6 + $0xb0] sm:$0xff] }
0x13d4   :  { %v5906_v4 = vpop.f32.mrf.mxu3 }
0x13d5   :  { %v9208_v25 = vpack.i.bf16 %v5906_v4, %v5903_v19  ;;  %v13691_v41 = vpop.f32.mrf.mxu0  ;;  %v6152_v11 = vpop.f32.mrf.mxu2  ;;  %v6833_v19 = vld [vmem:[%s14878_s6 + $0x58] sm:$0xff]  ;;  %v8529_v4 = vld [vmem:[%s14878_s6 + $0xe0] sm:$0xff] }
0x13d6   :  { %v9213_v39 = vpack.i.bf16 %v6152_v11, %v6149_v36  ;;  %6895 = vmatpush.msrb.mxu0 %v6833_v19  ;;  %7061 = vmatpush.msrb.mxu2 %v8529_v4  ;;  %v13776_v11 = vpop.permute.xlu2 %9059  ;;  %v6825_v19 = vld [vmem:[%s14878_s6 + $0x18] sm:$0xff] }
0x13d7   :  { %9194 = vrot.lane.b32.xlu0 %v9193_v34, %s9564_s1  ;;  %9209 = vrot.lane.b32.xlu2 %v9208_v25, %s9560_s28  ;;  %v13700_v15 = vpop.f32.mrf.mxu1  ;;  %v9203_v25 = vpack.i.bf16 %v13539_v10, %v13519_v60  ;;  %v6831_v34 = vld [vmem:[%s14878_s6 + $0x48] sm:$0xff]  ;;  %v6830_v10 = vld [vmem:[%s14878_s6 + $0x40] sm:$0xff] }
0x13d8   :  { %9184 = vrot.lane.b32.xlu1 %v9183_v50, %s9562_s29  ;;  %6896 = vmatpush.msrb.mxu0 %v6832_v27  ;;  %v8528_v50 = vld [vmem:[%s14878_s6 + $0xd8] sm:$0xff]  ;;  %v8499_v27 = vld [vmem:[%s14877_s12 + $0x460] sm:$0xff] }
0x13d9   :  { %6236 = vmatmul.f32.gmra.mxu3 %v8495_v45  ;;  %v6839_v45 = vld [vmem:[%s14878_s6 + $0x88] sm:$0xff]  ;;  %7062 = vmatpush.msrb.mxu2 %v8528_v50  ;;  %v8520_v50 = vld [vmem:[%s14878_s6 + $0x98] sm:$0xff] }
0x13da   :  { %6897 = vmatpush.msrb.mxu0 %v6831_v34  ;;  %6970 = vmatpush.msra.mxu1 %v6839_v45  ;;  %v8519_v45 = vld [vmem:[%s14878_s6 + $0x90] sm:$0xff] }
0x13db   :  { %7063 = vmatpush.msrb.mxu2 %v8527_v61  ;;  %v13851_v61 = vpop.permute.xlu1 %9069 }
0x13dc   :  { %v5909_v14 = vpop.f32.mrf.mxu3  ;;  %6898 = vmatpush.msrb.mxu0 %v6830_v10  ;;  %v6822_v10 = vld [vmem:[%s14878_s6] sm:$0xff] }
0x13dd   :  { %v13717_v32 = vpop.f32.mrf.mxu0  ;;  %v6155_v2 = vpop.f32.mrf.mxu2 }
0x13de   :  { %6899 = vmatpush.msrb.mxu0 %v6829_v53  ;;  %v9228_v62 = vpack.i.bf16 %v13717_v32, %v13691_v41  ;;  %v8524_v41 = vld [vmem:[%s14878_s6 + $0xb8] sm:$0xff]  ;;  %v13808_v32 = vpop.permute.xlu2 %9084 }
0x13df   :  { %9224 = vrot.lane.b32.xlu0 %v9223_v8, %s9563_s30  ;;  %9214 = vrot.lane.b32.xlu2 %v9213_v39, %s9565_s15  ;;  %v6076_v59 = vpop.f32.mrf.mxu1  ;;  %v6828_v39 = vld [vmem:[%s14878_s6 + $0x30] sm:$0xff] }
0x13e0   :  { %9199 = vrot.lane.b32.xlu1 %v9198_v6, %s9566_s16  ;;  %v9233_v47 = vpack.i.bf16 %v6076_v59, %v13700_v15  ;;  %v8498_v6 = vld [vmem:[%s14877_s12 + $0x458] sm:$0xff]  ;;  %v8525_v15 = vld [vmem:[%s14878_s6 + $0xc0] sm:$0xff]  ;;  %6900 = vmatpush.msrb.mxu0 %v6828_v39 }
0x13e1   :  { %6239 = vmatmul.f32.gmra.mxu3 %v8496_v58  ;;  %v6826_v59 = vld [vmem:[%s14878_s6 + $0x20] sm:$0xff] }
0x13e4   :  { %v5912_v43 = vpop.f32.mrf.mxu3 }
0x13e5   :  { %v9238_v52 = vpack.i.bf16 %v5912_v43, %v5909_v14  ;;  %v13748_v36 = vpop.f32.mrf.mxu0  ;;  %v6158_v22 = vpop.f32.mrf.mxu2  ;;  %v8526_v14 = vld [vmem:[%s14878_s6 + $0xc8] sm:$0xff] }
0x13e6   :  { %v9243_v8 = vpack.i.bf16 %v6158_v22, %v6155_v2  ;;  %7064 = vmatpush.msrb.mxu2 %v8526_v14  ;;  %v6827_v2 = vld [vmem:[%s14878_s6 + $0x28] sm:$0xff]  ;;  %v13838_v34 = vpop.permute.xlu2 %9094  ;;  %v9253_v14 = vpack.i.bf16 %v13577_v5, %v13557_v29 }
0x13e7   :  { %9219 = vrot.lane.b32.xlu2 %v9218_v35, %s9562_s29  ;;  %9239 = vrot.lane.b32.xlu0 %v9238_v52, %s9560_s28  ;;  %v6079_v60 = vpop.f32.mrf.mxu1  ;;  %v8522_v52 = vld [vmem:[%s14878_s6 + $0xa8] sm:$0xff] }
0x13e8   :  { %9204 = vrot.lane.b32.xlu1 %v9203_v25, %s9561_s10  ;;  %7065 = vmatpush.msrb.mxu2 %v8525_v15  ;;  %v6824_v25 = vld [vmem:[%s14878_s6 + $0x10] sm:$0xff]  ;;  %v6823_v22 = vld [vmem:[%s14878_s6 + $0x8] sm:$0xff] }
0x13e9   :  { %6242 = vmatmul.f32.gmra.mxu3 %v8497_v1  ;;  %6901 = vmatpush.msrb.mxu0 %v6827_v2 }
0x13ea   :  { %7066 = vmatpush.msrb.mxu2 %v8524_v41  ;;  %v9278_v41 = vpack.i.bf16 %v13599_v26, %v13579_v63  ;;  %v9061_v26 = vunpack.i.l.bf16 %v13776_v11 }
0x13eb   :  { %6902 = vmatpush.msrb.mxu0 %v6826_v59  ;;  %v8501_v59 = vld [vmem:[%s14877_s12 + $0x470] sm:$0xff] }
0x13ec   :  { %v5915_v46 = vpop.f32.mrf.mxu3  ;;  %7067 = vmatpush.msrb.mxu2 %v8523_v48 }
0x13ed   :  { %v6000_v58 = vpop.f32.mrf.mxu0  ;;  %v6161_v56 = vpop.f32.mrf.mxu2  ;;  %6903 = vmatpush.msrb.mxu0 %v6825_v19 }
0x13ee   :  { %v9248_v38 = vpack.i.bf16 %v6000_v58, %v13748_v36  ;;  %v8521_v36 = vld [vmem:[%s14878_s6 + $0xa0] sm:$0xff]  ;;  %7068 = vmatpush.msrb.mxu2 %v8522_v52  ;;  %v13873_v58 = vpop.permute.xlu1 %9079 }
0x13ef   :  { %9234 = vrot.lane.b32.xlu2 %v9233_v47, %s9566_s16  ;;  %9244 = vrot.lane.b32.xlu0 %v9243_v8, %s9565_s15  ;;  %v6082_v13 = vpop.f32.mrf.mxu1  ;;  %v6838_v47 = vld [vmem:[%s14878_s6 + $0x80] sm:$0xff]  ;;  %v8535_v8 = vld [vmem:[%s14878_s6 + $0x110] sm:$0xff] }
0x13f0   :  { %9229 = vrot.lane.b32.xlu1 %v9228_v62, %s9564_s1  ;;  %v9258_v35 = vpack.i.bf16 %v6082_v13, %v6079_v60  ;;  %6904 = vmatpush.msrb.mxu0 %v6824_v25  ;;  %v13843_v60 = vpop.permute.xlu0 %9064  ;;  %v8500_v62 = vld [vmem:[%s14877_s12 + $0x468] sm:$0xff]  ;;  %v9071_v25 = vunpack.i.l.bf16 %v13851_v61 }
0x13f1   :  { %6245 = vmatmul.f32.gmra.mxu3 %v8498_v6  ;;  %7069 = vmatpush.msrb.mxu2 %v8521_v36  ;;  %v9066_v52 = vunpack.i.l.bf16 %v13843_v60  ;;  %v9062_v36 = vunpack.i.h.bf16 %v13776_v11 }
0x13f2   :  { %6905 = vmatpush.msrb.mxu0 %v6823_v22  ;;  %6971 = vmatpush.msra.mxu1 %v6838_v47 }
0x13f3   :  { %7070 = vmatpush.msrb.mxu2 %v8520_v50  ;;  %7136 = vmatpush.msra.mxu3 %v8535_v8  ;;  %v6710_v11 = vsel %vm186_vm1, %v13366_v54, %v9062_v36  ;;  %v9313_v8 = vpack.i.bf16 %v13634_v51, %v13622_v37 }
0x13f4   :  { %v5918_v57 = vpop.f32.mrf.mxu3  ;;  %6906 = vmatpush.msrb.mxu0 %v6822_v10  ;;  %v9067_v10 = vunpack.i.h.bf16 %v13843_v60 }
0x13f5   :  { %v9268_v43 = vpack.i.bf16 %v5918_v57, %v5915_v46  ;;  %v6164_v4 = vpop.f32.mrf.mxu2  ;;  %v6003_v1 = vpop.f32.mrf.mxu0  ;;  %v9263_v46 = vpack.i.bf16 %v13587_v12, %v13567_v24  ;;  %7071 = vmatpush.msrb.mxu2 %v8519_v45 }
0x13f6   :  { %v9273_v39 = vpack.i.bf16 %v6164_v4, %v6161_v56  ;;  %v8502_v4 = vld [vmem:[%s14877_s12 + $0x478] sm:$0xff] }
0x13f7   :  { %9249 = vrot.lane.b32.xlu2 %v9248_v38, %s9564_s1  ;;  %9259 = vrot.lane.b32.xlu0 %v9258_v35, %s9566_s16  ;;  %v6085_v24 = vpop.f32.mrf.mxu1  ;;  %v13887_v38 = vpop.permute.xlu1 %9089  ;;  %v9288_v35 = vpack.i.bf16 %v13614_v28, %v13597_v21  ;;  %v6709_v21 = vsel %vm186_vm1, %v13344_v40, %v9061_v26 }
0x13f8   :  { %9269 = vrot.lane.b32.xlu1 %v9268_v43, %s9560_s28  ;;  %v13871_v5 = vpop.permute.xlu0 %9074  ;;  %v6725_v22 = vsel %vm1147_vm5, %v6709_v21, %v9066_v52 }
0x13f9   :  { %6248 = vmatmul.f32.gmra.mxu3 %v8499_v27  ;;  %v6741_v45 = vsel %vm69_vm0, %v6725_v22, %v9071_v25  ;;  %v9076_v52 = vunpack.i.l.bf16 %v13871_v5  ;;  %v9081_v25 = vunpack.i.l.bf16 %v13873_v58 }
0x13fb   :  { %v6711_v21 = vsel %vm186_vm1, %v13387_v23, %v9076_v52  ;;  %v9082_v23 = vunpack.i.h.bf16 %v13873_v58  ;;  %v9096_v52 = vunpack.i.l.bf16 %v13838_v34 }
0x13fc   :  { %v5921_v53 = vpop.f32.mrf.mxu3  ;;  %v6727_v22 = vsel %vm1147_vm5, %v6711_v21, %v9081_v25 }
0x13fd   :  { %v6167_v6 = vpop.f32.mrf.mxu2  ;;  %v6006_v12 = vpop.f32.mrf.mxu0 }
0x13fe   :  { %v9283_v2 = vpack.i.bf16 %v6006_v12, %v6003_v1 }
0x13ff   :  { %9254 = vrot.lane.b32.xlu2 %v9253_v14, %s9561_s10  ;;  %9264 = vrot.lane.b32.xlu0 %v9263_v46, %s9562_s29  ;;  %v6088_v57 = vpop.f32.mrf.mxu1  ;;  %v9072_v14 = vunpack.i.h.bf16 %v13851_v61  ;;  %v6726_v61 = vsel %vm1147_vm5, %v6710_v11, %v9067_v10  ;;  %v9077_v10 = vunpack.i.h.bf16 %v13871_v5 }
0x1400   :  { %9274 = vrot.lane.b32.xlu1 %v9273_v39, %s9565_s15  ;;  %v13885_v19 = vpop.permute.xlu0 %9099  ;;  %v9293_v27 = vpack.i.bf16 %v6088_v57, %v6085_v24 }
0x1401   :  { %v13869_v29 = vpop.permute.xlu2 %9114  ;;  %6251 = vmatmul.f32.gmra.mxu3 %v8500_v62  ;;  %v6742_v37 = vsel %vm69_vm0, %v6726_v61, %v9072_v14  ;;  %v6712_v5 = vsel %vm186_vm1, %v13403_v0, %v9077_v10 }
0x1402   :  { %v9116_v1 = vunpack.i.l.bf16 %v13869_v29  ;;  %v9117_v39 = vunpack.i.h.bf16 %v13869_v29 }
0x1404   :  { %v5924_v56 = vpop.f32.mrf.mxu3  ;;  %v6757_v46 = vsel %vm1156_vm6, %v6741_v45, %v9116_v1  ;;  %v9086_v45 = vunpack.i.l.bf16 %v13808_v32 }
0x1405   :  { %v9303_v15 = vpack.i.bf16 %v5924_v56, %v5921_v53  ;;  %v6170_v13 = vpop.f32.mrf.mxu2 }
0x1406   :  { %v9308_v43 = vpack.i.bf16 %v6170_v13, %v6167_v6  ;;  %v9298_v6 = vpack.i.bf16 %v13624_v42, %v13607_v33  ;;  %v6758_v33 = vsel %vm1156_vm6, %v6742_v37, %v9117_v39  ;;  %v6743_v14 = vsel %vm69_vm0, %v6727_v22, %v9086_v45 }
0x1407   :  { %9284 = vrot.lane.b32.xlu0 %v9283_v2, %s9564_s1  ;;  %9304 = vrot.lane.b32.xlu2 %v9303_v15, %s9560_s28  ;;  %v6091_v2 = vpop.f32.mrf.mxu1  ;;  %v9091_v37 = vunpack.i.l.bf16 %v13887_v38 }
0x1408   :  { %9279 = vrot.lane.b32.xlu1 %v9278_v41, %s9563_s30  ;;  %v6009_v41 = vpop.f32.mrf.mxu0 }
0x1409   :  { %v13883_v48 = vpop.permute.xlu2 %9119  ;;  %6254 = vmatmul.f32.gmra.mxu3 %v8501_v59 }
0x140a   :  { %v9121_v24 = vunpack.i.l.bf16 %v13883_v48 }
0x140c   :  { %v5927_v63 = vpop.f32.mrf.mxu3 }
0x140d   :  { %v6173_v59 = vpop.f32.mrf.mxu2 }
0x140f   :  { %9289 = vrot.lane.b32.xlu0 %v9288_v35, %s9561_s10  ;;  %9309 = vrot.lane.b32.xlu2 %v9308_v43, %s9565_s15  ;;  %v9122_v43 = vunpack.i.h.bf16 %v13883_v48 }
0x1410   :  { %9294 = vrot.lane.b32.xlu1 %v9293_v27, %s9566_s16  ;;  %v6012_v36 = vpop.f32.mrf.mxu0 }
0x1411   :  { %v13904_v28 = vpop.permute.xlu2 %9124  ;;  %6257 = vmatmul.f32.gmra.mxu3 %v8502_v4  ;;  %v6094_v4 = vpop.f32.mrf.mxu1 }
0x1412   :  { %v9105_v50 = vpop.permute.xlu0 %9104 }
0x1413   :  { %v9106_v53 = vunpack.i.l.bf16 %v9105_v50  ;;  %v9107_v54 = vunpack.i.h.bf16 %v9105_v50 }
0x1414   :  { %v9110_v47 = vpop.permute.xlu1 %9109  ;;  %v5930_v40 = vpop.f32.mrf.mxu3 }
0x1415   :  { %v6773_v62 = vsel %vm1161_vm7, %v6757_v46, %v9106_v53  ;;  %v9111_v60 = vunpack.i.l.bf16 %v9110_v47  ;;  %v9318_v12 = vpack.i.bf16 %v5930_v40, %v5927_v63  ;;  %v9112_v42 = vunpack.i.h.bf16 %v9110_v47  ;;  %v6176_v1 = vpop.f32.mrf.mxu2 }
0x1416   :  { %v6774_v15 = vsel %vm1161_vm7, %v6758_v33, %v9107_v54 }
0x1417   :  { %v6789_v56 = vsel %vm1166_vm8, %v6773_v62, %v9111_v60  ;;  %9314 = vrot.lane.b32.xlu2 %v9313_v8, %s9563_s30  ;;  %9319 = vrot.lane.b32.xlu0 %v9318_v12, %s9560_s28  ;;  %v6790_v57 = vsel %vm1166_vm8, %v6774_v15, %v9112_v42  ;;  %v6728_v62 = vsel %vm1147_vm5, %v6712_v5, %v9082_v23  ;;  %v9097_v23 = vunpack.i.h.bf16 %v13838_v34 }
0x1418   :  { %9299 = vrot.lane.b32.xlu1 %v9298_v6, %s9562_s29  ;;  %v13926_v51 = vsel %vm1171_vm9, %v6789_v56, %v9121_v24  ;;  %v13946_v63 = vsel %vm1171_vm9, %v6790_v57, %v9122_v43  ;;  %v9087_v24 = vunpack.i.h.bf16 %v13808_v32 }
0x1419   :  { %v13930_v29 = vpop.permute.xlu2 %9144  ;;  %6907 = vmatmul.f32.vlgmr.msrb.gmra.mxu0 %v13926_v51  ;;  %7072 = vmatmul.f32.vlgmr.msrb.gmra.mxu2 %v13926_v51 }
0x141a   :  { %v13949_v26 = vpop.permute.xlu0 %9129  ;;  %v9146_v58 = vunpack.i.l.bf16 %v13930_v29  ;;  %v6744_v61 = vsel %vm69_vm0, %v6728_v62, %v9087_v24  ;;  %v9147_v57 = vunpack.i.h.bf16 %v13930_v29 }
0x141c   :  { %v13935_v13 = vpop.f32.mrf.mxu3  ;;  %v13951_v35 = vpop.permute.xlu1 %9134 }
0x141d   :  { %8503 = vmatmul.msk.f32.vlgmr.msra.gmra.mxu1 %vm186_vm1, %v13935_v13  ;;  %8537 = vmatmul.msk.f32.vlgmr.msra.gmra.mxu3 %vm186_vm1, %v13935_v13 }
0x141f   :  { %6625 = vrot.lane.b32.xlu2 %v6091_v2, %s9566_s16  ;;  %6689 = vrot.lane.b32.xlu0 %v6173_v59, %s9565_s15  ;;  %v9101_v59 = vunpack.i.l.bf16 %v13885_v19 }
0x1420   :  { %6561 = vrot.lane.b32.xlu1 %v6009_v41, %s9564_s1  ;;  %v6713_v41 = vsel %vm186_vm1, %v13418_v16, %v9091_v37  ;;  %v9092_v16 = vunpack.i.h.bf16 %v13887_v38  ;;  %v9102_v38 = vunpack.i.h.bf16 %v13885_v19 }
0x1421   :  { %6910 = vmatmul.f32.gmra.mxu0 %v13946_v63  ;;  %7075 = vmatmul.f32.gmra.mxu2 %v13946_v63  ;;  %v13956_v48 = vpop.permute.xlu2 %9159 }
0x1422   :  { %v9161_v10 = vunpack.i.l.bf16 %v13956_v48  ;;  %v6714_v45 = vsel %vm186_vm1, %v13434_v9, %v9092_v16 }
0x1423   :  { %v6730_v62 = vsel %vm1147_vm5, %v6714_v45, %v9097_v23  ;;  %v9137_v45 = vunpack.i.h.bf16 %v13951_v35 }
0x1424   :  { %v13958_v27 = vpop.f32.mrf.mxu3  ;;  %v9140_v11 = vpop.permute.xlu1 %9139  ;;  %v6746_v19 = vsel %vm69_vm0, %v6730_v62, %v9102_v38 }
0x1425   :  { %8504 = vmatmul.msk.f32.gmra.mxu1 %vm186_vm1, %v13958_v27  ;;  %8538 = vmatmul.msk.f32.gmra.mxu3 %vm186_vm1, %v13958_v27  ;;  %v9141_v8 = vunpack.i.l.bf16 %v9140_v11  ;;  %v9142_v32 = vunpack.i.h.bf16 %v9140_v11 }
0x1427   :  { %6627 = vrot.lane.b32.xlu2 %v6094_v4, %s9566_s16  ;;  %6691 = vrot.lane.b32.xlu0 %v6176_v1, %s9565_s15  ;;  %v6729_v1 = vsel %vm1147_vm5, %v6713_v41, %v9096_v52 }
0x1428   :  { %6563 = vrot.lane.b32.xlu1 %v6012_v36, %s9564_s1 }
0x1429   :  { %v9150_v50 = vpop.permute.xlu0 %9149  ;;  %v13977_v47 = vpop.permute.xlu2 %9189 }
0x142a   :  { %v9151_v53 = vunpack.i.l.bf16 %v9150_v50  ;;  %v9152_v60 = vunpack.i.h.bf16 %v9150_v50  ;;  %v6745_v50 = vsel %vm69_vm0, %v6729_v1, %v9101_v59 }
0x142c   :  { %v13974_v46 = vpop.f32.mrf.mxu3  ;;  %v6759_v40 = vsel %vm1156_vm6, %v6743_v14, %v9151_v53  ;;  %v6760_v33 = vsel %vm1156_vm6, %v6744_v61, %v9152_v60  ;;  %v9126_v61 = vunpack.i.l.bf16 %v13904_v28 }
0x142d   :  { %8505 = vmatmul.msk.f32.gmra.mxu1 %vm186_vm1, %v13974_v46  ;;  %8539 = vmatmul.msk.f32.gmra.mxu3 %vm186_vm1, %v13974_v46  ;;  %v6775_v39 = vsel %vm1161_vm7, %v6759_v40, %v9141_v8  ;;  %v6776_v15 = vsel %vm1161_vm7, %v6760_v33, %v9142_v32  ;;  %v9131_v32 = vunpack.i.l.bf16 %v13949_v26 }
0x142e   :  { %v6791_v12 = vsel %vm1166_vm8, %v6775_v39, %v9146_v58  ;;  %v6792_v36 = vsel %vm1166_vm8, %v6776_v15, %v9147_v57  ;;  %v6715_v59 = vsel %vm186_vm1, %v13453_v18, %v9126_v61  ;;  %v9136_v57 = vunpack.i.l.bf16 %v13951_v35 }
0x1431   :  { %v9155_v6 = vpop.permute.xlu0 %9154  ;;  %v14005_v42 = vpop.permute.xlu2 %9209 }
0x1432   :  { %v9156_v54 = vunpack.i.l.bf16 %v9155_v6  ;;  %v9157_v2 = vunpack.i.h.bf16 %v9155_v6  ;;  %v9162_v6 = vunpack.i.h.bf16 %v13956_v48  ;;  %v9211_v52 = vunpack.i.l.bf16 %v14005_v42 }
0x1433   :  { %v9212_v23 = vunpack.i.h.bf16 %v14005_v42 }
0x1434   :  { %v13992_v56 = vpop.f32.mrf.mxu3  ;;  %v13995_v0 = vsel %vm1171_vm9, %v6791_v12, %v9156_v54  ;;  %v14018_v22 = vsel %vm1171_vm9, %v6792_v36, %v9157_v2  ;;  %v9132_v36 = vunpack.i.h.bf16 %v13949_v26 }
0x1435   :  { %6913 = vmatmul.f32.gmra.mxu0 %v13995_v0  ;;  %8506 = vmatmul.msk.f32.gmra.mxu1 %vm186_vm1, %v13992_v56 }
0x1436   :  { %7078 = vmatmul.f32.gmra.mxu2 %v13995_v0  ;;  %8540 = vmatmul.msk.f32.gmra.mxu3 %vm186_vm1, %v13992_v56 }
0x1439   :  { %v9165_v43 = vpop.permute.xlu0 %9164  ;;  %v14033_v53 = vpop.permute.xlu2 %9214 }
0x143a   :  { %v9175_v4 = vpop.permute.xlu1 %9174  ;;  %v9166_v40 = vunpack.i.l.bf16 %v9165_v43  ;;  %v9167_v37 = vunpack.i.h.bf16 %v9165_v43  ;;  %v6731_v43 = vsel %vm1147_vm5, %v6715_v59, %v9131_v32  ;;  %v9216_v38 = vunpack.i.l.bf16 %v14033_v53 }
0x143b   :  { %v9176_v25 = vunpack.i.l.bf16 %v9175_v4  ;;  %v9177_v5 = vunpack.i.h.bf16 %v9175_v4  ;;  %v9127_v4 = vunpack.i.h.bf16 %v13904_v28  ;;  %v6747_v18 = vsel %vm69_vm0, %v6731_v43, %v9136_v57 }
0x143c   :  { %v14015_v21 = vpop.f32.mrf.mxu3 }
0x143d   :  { %6916 = vmatmul.f32.gmra.mxu0 %v14018_v22  ;;  %8507 = vmatmul.msk.f32.gmra.mxu1 %vm186_vm1, %v14015_v21  ;;  %v6761_v29 = vsel %vm1156_vm6, %v6745_v50, %v9176_v25  ;;  %v6762_v34 = vsel %vm1156_vm6, %v6746_v19, %v9177_v5  ;;  %v6763_v50 = vsel %vm1156_vm6, %v6747_v18, %v9211_v52 }
0x143e   :  { %7081 = vmatmul.f32.gmra.mxu2 %v14018_v22  ;;  %8541 = vmatmul.msk.f32.gmra.mxu3 %vm186_vm1, %v14015_v21  ;;  %v6777_v14 = vsel %vm1161_vm7, %v6761_v29, %v9161_v10  ;;  %v6778_v12 = vsel %vm1161_vm7, %v6762_v34, %v9162_v6  ;;  %v6716_v10 = vsel %vm186_vm1, %v13473_v55, %v9127_v4  ;;  %v9192_v4 = vunpack.i.h.bf16 %v13977_v47 }
0x143f   :  { %v6793_v9 = vsel %vm1166_vm8, %v6777_v14, %v9166_v40  ;;  %v6794_v48 = vsel %vm1166_vm8, %v6778_v12, %v9167_v37  ;;  %v6732_v26 = vsel %vm1147_vm5, %v6716_v10, %v9132_v36 }
0x1441   :  { %v14035_v11 = vpop.permute.xlu0 %9169  ;;  %v14060_v15 = vpop.permute.xlu2 %9219 }
0x1442   :  { %v9180_v8 = vpop.permute.xlu1 %9179  ;;  %v9171_v34 = vunpack.i.l.bf16 %v14035_v11  ;;  %v9172_v37 = vunpack.i.h.bf16 %v14035_v11  ;;  %v8602_v11 = vld [vmem:[%s14878_s6 + $0x228] sm:$0xff] }
0x1443   :  { %v9181_v39 = vunpack.i.l.bf16 %v9180_v8  ;;  %v9182_v24 = vunpack.i.h.bf16 %v9180_v8  ;;  %7386 = vmatpush.msra.mxu2 %v8602_v11 }
0x1444   :  { %v14040_v58 = vpop.f32.mrf.mxu3  ;;  %v6717_v32 = vsel %vm186_vm1, %v13495_v31, %v9171_v34  ;;  %v9191_v31 = vunpack.i.l.bf16 %v13977_v47 }
0x1445   :  { %v14045_v60 = vsel %vm1171_vm9, %v6793_v9, %v9181_v39  ;;  %8508 = vmatmul.msk.f32.gmra.mxu1 %vm186_vm1, %v14040_v58  ;;  %v14066_v41 = vsel %vm1171_vm9, %v6794_v48, %v9182_v24  ;;  %v6748_v39 = vsel %vm69_vm0, %v6732_v26, %v9137_v45  ;;  %v9217_v24 = vunpack.i.h.bf16 %v14033_v53  ;;  %v8604_v45 = vld [vmem:[%s14878_s6 + $0x238] sm:$0xff] }
0x1446   :  { %6919 = vmatmul.f32.gmra.mxu0 %v14045_v60  ;;  %7084 = vmatmul.f32.gmra.mxu2 %v14045_v60  ;;  %v6764_v42 = vsel %vm1156_vm6, %v6748_v39, %v9212_v23  ;;  %v8570_v39 = vld [vmem:[%s14878_s6 + $0x1a8] sm:$0xff] }
0x1447   :  { %8542 = vmatmul.msk.f32.gmra.mxu3 %vm186_vm1, %v14040_v58  ;;  %7300 = vmatpush.msrb.mxu1 %v8570_v39 }
0x1448   :  { %7465 = vmatpush.msrb.mxu3 %v8604_v45 }
0x1449   :  { %v9195_v54 = vpop.permute.xlu0 %9194  ;;  %v14094_v40 = vpop.permute.xlu2 %9234 }
0x144a   :  { %v14057_v33 = vpop.permute.xlu1 %9184  ;;  %v9196_v25 = vunpack.i.l.bf16 %v9195_v54  ;;  %v9197_v55 = vunpack.i.h.bf16 %v9195_v54 }
0x144b   :  { %v9186_v54 = vunpack.i.l.bf16 %v14057_v33  ;;  %v9187_v53 = vunpack.i.h.bf16 %v14057_v33 }
0x144c   :  { %v14062_v2 = vpop.f32.mrf.mxu3  ;;  %v6779_v28 = vsel %vm1161_vm7, %v6763_v50, %v9196_v25  ;;  %v6780_v9 = vsel %vm1161_vm7, %v6764_v42, %v9197_v55  ;;  %v6718_v25 = vsel %vm186_vm1, %v13515_v17, %v9172_v37  ;;  %v8568_v55 = vld [vmem:[%s14878_s6 + $0x198] sm:$0xff]  ;;  %v8601_v42 = vld [vmem:[%s14878_s6 + $0x220] sm:$0xff] }
0x144d   :  { %8509 = vmatmul.msk.f32.gmra.mxu1 %vm186_vm1, %v14062_v2  ;;  %v6733_v59 = vsel %vm1147_vm5, %v6717_v32, %v9186_v54  ;;  %v6734_v18 = vsel %vm1147_vm5, %v6718_v25, %v9187_v53  ;;  %7221 = vmatpush.msra.mxu0 %v8568_v55  ;;  %v9237_v54 = vunpack.i.h.bf16 %v14094_v40  ;;  %v8567_v32 = vld [vmem:[%s14878_s6 + $0x190] sm:$0xff] }
0x144e   :  { %6922 = vmatmul.f32.gmra.mxu0 %v14066_v41  ;;  %7087 = vmatmul.f32.gmra.mxu2 %v14066_v41  ;;  %v6749_v33 = vsel %vm69_vm0, %v6733_v59, %v9191_v31  ;;  %v6750_v23 = vsel %vm69_vm0, %v6734_v18, %v9192_v4  ;;  %v8600_v4 = vld [vmem:[%s14878_s6 + $0x218] sm:$0xff] }
0x144f   :  { %8543 = vmatmul.msk.f32.gmra.mxu3 %vm186_vm1, %v14062_v2  ;;  %7387 = vmatpush.msra.mxu2 %v8601_v42  ;;  %v8564_v18 = vld [vmem:[%s14878_s6 + $0x178] sm:$0xff] }
0x1450   :  { %7222 = vmatpush.msra.mxu0 %v8567_v32 }
0x1451   :  { %v14081_v1 = vpop.permute.xlu0 %9224  ;;  %v14125_v48 = vpop.permute.xlu2 %9249  ;;  %7388 = vmatpush.msra.mxu2 %v8600_v4  ;;  %v8594_v4 = vld [vmem:[%s14878_s6 + $0x1e8] sm:$0xff] }
0x1452   :  { %v9200_v16 = vpop.permute.xlu1 %9199  ;;  %v9226_v11 = vunpack.i.l.bf16 %v14081_v1  ;;  %v9227_v42 = vunpack.i.h.bf16 %v14081_v1 }
0x1453   :  { %v9201_v29 = vunpack.i.l.bf16 %v9200_v16  ;;  %v9202_v8 = vunpack.i.h.bf16 %v9200_v16  ;;  %v9236_v16 = vunpack.i.l.bf16 %v14094_v40  ;;  %v8566_v40 = vld [vmem:[%s14878_s6 + $0x188] sm:$0xff] }
0x1454   :  { %v14090_v14 = vpop.f32.mrf.mxu3  ;;  %7223 = vmatpush.msra.mxu0 %v8566_v40 }
0x1455   :  { %8510 = vmatmul.msk.f32.gmra.mxu1 %vm186_vm1, %v14090_v14  ;;  %v6795_v5 = vsel %vm1166_vm8, %v6779_v28, %v9201_v29  ;;  %v6796_v6 = vsel %vm1166_vm8, %v6780_v9, %v9202_v8 }
0x1456   :  { %v14100_v35 = vsel %vm1171_vm9, %v6795_v5, %v9216_v38  ;;  %v14120_v61 = vsel %vm1171_vm9, %v6796_v6, %v9217_v24  ;;  %v9221_v24 = vunpack.i.l.bf16 %v14060_v15 }
0x1457   :  { %8544 = vmatmul.msk.f32.gmra.mxu3 %vm186_vm1, %v14090_v14  ;;  %6925 = vmatmul.f32.gmra.mxu0 %v14100_v35 }
0x1458   :  { %7090 = vmatmul.f32.gmra.mxu2 %v14100_v35 }
0x1459   :  { %v9240_v62 = vpop.permute.xlu0 %9239  ;;  %v14174_v9 = vpop.permute.xlu2 %9254 }
0x145a   :  { %v14109_v19 = vpop.permute.xlu1 %9204  ;;  %v9241_v57 = vunpack.i.l.bf16 %v9240_v62  ;;  %v9242_v50 = vunpack.i.h.bf16 %v9240_v62  ;;  %v9256_v32 = vunpack.i.l.bf16 %v14174_v9 }
0x145b   :  { %v9206_v47 = vunpack.i.l.bf16 %v14109_v19  ;;  %v9207_v31 = vunpack.i.h.bf16 %v14109_v19 }
0x145c   :  { %v14115_v12 = vpop.f32.mrf.mxu3  ;;  %v6765_v29 = vsel %vm1156_vm6, %v6749_v33, %v9241_v57  ;;  %v6766_v8 = vsel %vm1156_vm6, %v6750_v23, %v9242_v50  ;;  %v8599_v33 = vld [vmem:[%s14878_s6 + $0x210] sm:$0xff]  ;;  %v9251_v50 = vunpack.i.l.bf16 %v14125_v48  ;;  %v8597_v23 = vld [vmem:[%s14878_s6 + $0x200] sm:$0xff] }
0x145d   :  { %8511 = vmatmul.msk.f32.gmra.mxu1 %vm186_vm1, %v14115_v12  ;;  %v6719_v62 = vsel %vm186_vm1, %v13535_v30, %v9206_v47  ;;  %7389 = vmatpush.msra.mxu2 %v8599_v33  ;;  %v9222_v47 = vunpack.i.h.bf16 %v14060_v15 }
0x145e   :  { %v6735_v30 = vsel %vm1147_vm5, %v6719_v62, %v9221_v24  ;;  %v8562_v62 = vld [vmem:[%s14878_s6 + $0x168] sm:$0xff]  ;;  %v8596_v24 = vld [vmem:[%s14878_s6 + $0x1f8] sm:$0xff] }
0x145f   :  { %8545 = vmatmul.msk.f32.gmra.mxu3 %vm186_vm1, %v14115_v12  ;;  %6928 = vmatmul.f32.gmra.mxu0 %v14120_v61  ;;  %v6751_v25 = vsel %vm69_vm0, %v6735_v30, %v9226_v11  ;;  %v9252_v11 = vunpack.i.h.bf16 %v14125_v48  ;;  %v8559_v48 = vld [vmem:[%s14878_s6 + $0x150] sm:$0xff] }
0x1460   :  { %7093 = vmatmul.f32.gmra.mxu2 %v14120_v61 }
0x1461   :  { %v9245_v43 = vpop.permute.xlu0 %9244 }
0x1462   :  { %v9230_v52 = vpop.permute.xlu1 %9229  ;;  %v9246_v28 = vunpack.i.l.bf16 %v9245_v43 }
0x1463   :  { %v9231_v36 = vunpack.i.l.bf16 %v9230_v52  ;;  %v9232_v38 = vunpack.i.h.bf16 %v9230_v52  ;;  %v9247_v52 = vunpack.i.h.bf16 %v9245_v43  ;;  %v8565_v43 = vld [vmem:[%s14878_s6 + $0x180] sm:$0xff] }
0x1464   :  { %v14144_v10 = vpop.f32.mrf.mxu3  ;;  %7224 = vmatpush.msra.mxu0 %v8565_v43 }
0x1465   :  { %v6781_v17 = vsel %vm1161_vm7, %v6765_v29, %v9231_v36  ;;  %8512 = vmatmul.msk.f32.gmra.mxu1 %vm186_vm1, %v14144_v10  ;;  %v6782_v34 = vsel %vm1161_vm7, %v6766_v8, %v9232_v38  ;;  %v6720_v29 = vsel %vm186_vm1, %v13555_v49, %v9207_v31  ;;  %v8563_v49 = vld [vmem:[%s14878_s6 + $0x170] sm:$0xff] }
0x1466   :  { %v6797_v26 = vsel %vm1166_vm8, %v6781_v17, %v9236_v16  ;;  %v6798_v57 = vsel %vm1166_vm8, %v6782_v34, %v9237_v54  ;;  %v8598_v16 = vld [vmem:[%s14878_s6 + $0x208] sm:$0xff]  ;;  %v14227_v17 = vpop.permute.xlu2 %9304  ;;  %7225 = vmatpush.msra.mxu0 %v8564_v18  ;;  %v6736_v15 = vsel %vm1147_vm5, %v6720_v29, %v9222_v47 }
0x1467   :  { %8546 = vmatmul.msk.f32.gmra.mxu3 %vm186_vm1, %v14144_v10  ;;  %v14158_v5 = vsel %vm1171_vm9, %v6797_v26, %v9246_v28  ;;  %v14202_v19 = vsel %vm1171_vm9, %v6798_v57, %v9247_v52  ;;  %7390 = vmatpush.msra.mxu2 %v8598_v16  ;;  %v6752_v54 = vsel %vm69_vm0, %v6736_v15, %v9227_v42  ;;  %v8560_v57 = vld [vmem:[%s14878_s6 + $0x158] sm:$0xff]  ;;  %v8591_v42 = vld [vmem:[%s14878_s6 + $0x1d0] sm:$0xff] }
0x1468   :  { %6931 = vmatmul.f32.gmra.mxu0 %v14158_v5  ;;  %7096 = vmatmul.f32.gmra.mxu2 %v14158_v5 }
0x1469   :  { %v14177_v6 = vpop.permute.xlu0 %9259  ;;  %7226 = vmatpush.msra.mxu0 %v8563_v49  ;;  %7391 = vmatpush.msra.mxu2 %v8597_v23  ;;  %v9257_v49 = vunpack.i.h.bf16 %v14174_v9  ;;  %v9306_v23 = vunpack.i.l.bf16 %v14227_v17  ;;  %v8557_v9 = vld [vmem:[%s14878_s6 + $0x140] sm:$0xff] }
0x146a   :  { %v9270_v37 = vpop.permute.xlu1 %9269  ;;  %v9261_v55 = vunpack.i.l.bf16 %v14177_v6  ;;  %v9262_v18 = vunpack.i.h.bf16 %v14177_v6 }
0x146b   :  { %v9271_v53 = vunpack.i.l.bf16 %v9270_v37  ;;  %v9272_v8 = vunpack.i.h.bf16 %v9270_v37  ;;  %7227 = vmatpush.msra.mxu0 %v8562_v62  ;;  %v8561_v37 = vld [vmem:[%s14878_s6 + $0x160] sm:$0xff]  ;;  %7392 = vmatpush.msra.mxu2 %v8596_v24 }
0x146c   :  { %v14185_v59 = vpop.f32.mrf.mxu3 }
0x146d   :  { %8513 = vmatmul.msk.f32.gmra.mxu1 %vm186_vm1, %v14185_v59  ;;  %v6767_v36 = vsel %vm1156_vm6, %v6751_v25, %v9271_v53  ;;  %v6768_v30 = vsel %vm1156_vm6, %v6752_v54, %v9272_v8  ;;  %v8595_v53 = vld [vmem:[%s14878_s6 + $0x1f0] sm:$0xff]  ;;  %7228 = vmatpush.msra.mxu0 %v8561_v37  ;;  %v8556_v37 = vld [vmem:[%s14878_s6 + $0x138] sm:$0xff] }
0x146e   :  { %v6783_v26 = vsel %vm1161_vm7, %v6767_v36, %v9251_v50  ;;  %v6784_v33 = vsel %vm1161_vm7, %v6768_v30, %v9252_v11  ;;  %7393 = vmatpush.msra.mxu2 %v8595_v53  ;;  %v6721_v36 = vsel %vm186_vm1, %v13575_v44, %v9256_v32  ;;  %v8593_v50 = vld [vmem:[%s14878_s6 + $0x1e0] sm:$0xff]  ;;  %v14290_v29 = vpop.permute.xlu2 %9309  ;;  %v6722_v32 = vsel %vm186_vm1, %v13595_v7, %v9257_v49  ;;  %v8590_v53 = vld [vmem:[%s14878_s6 + $0x1c8] sm:$0xff]  ;;  %v8587_v49 = vld [vmem:[%s14878_s6 + $0x1b0] sm:$0xff] }
0x146f   :  { %8547 = vmatmul.msk.f32.gmra.mxu3 %vm186_vm1, %v14185_v59  ;;  %v6799_v34 = vsel %vm1166_vm8, %v6783_v26, %v9261_v55  ;;  %7229 = vmatpush.msra.mxu0 %v8560_v57  ;;  %v8569_v44 = vld [vmem:[%s14878_s6 + $0x1a0] sm:$0xff]  ;;  %v8592_v26 = vld [vmem:[%s14878_s6 + $0x1d8] sm:$0xff]  ;;  %v8603_v55 = vld [vmem:[%s14878_s6 + $0x230] sm:$0xff]  ;;  %v9311_v57 = vunpack.i.l.bf16 %v14290_v29 }
0x1470   :  { %6934 = vmatmul.f32.gmra.mxu0 %v14202_v19  ;;  %7099 = vmatmul.f32.gmra.mxu2 %v14202_v19 }
0x1471   :  { %v14222_v45 = vpop.permute.xlu0 %9264  ;;  %7394 = vmatpush.msra.mxu2 %v8594_v4  ;;  %7230 = vmatpush.msra.mxu0 %v8559_v48  ;;  %v8555_v4 = vld [vmem:[%s14878_s6 + $0x130] sm:$0xff]  ;;  %v8589_v48 = vld [vmem:[%s14878_s6 + $0x1c0] sm:$0xff] }
0x1472   :  { %v14225_v38 = vpop.permute.xlu1 %9274  ;;  %v9266_v31 = vunpack.i.l.bf16 %v14222_v45  ;;  %7301 = vmatpush.msrb.mxu1 %v8569_v44  ;;  %v9267_v8 = vunpack.i.h.bf16 %v14222_v45  ;;  %7466 = vmatpush.msrb.mxu3 %v8603_v55  ;;  %v8588_v44 = vld [vmem:[%s14878_s6 + $0x1b8] sm:$0xff] }
0x1473   :  { %v9276_v28 = vunpack.i.l.bf16 %v14225_v38  ;;  %v9277_v25 = vunpack.i.h.bf16 %v14225_v38  ;;  %v6800_v38 = vsel %vm1166_vm8, %v6784_v33, %v9262_v18  ;;  %7395 = vmatpush.msra.mxu2 %v8593_v50 }
0x1474   :  { %v14239_v39 = vpop.f32.mrf.mxu3  ;;  %v6737_v47 = vsel %vm1147_vm5, %v6721_v36, %v9266_v31  ;;  %v6738_v11 = vsel %vm1147_vm5, %v6722_v32, %v9267_v8  ;;  %v8554_v36 = vld [vmem:[%s14878_s6 + $0x128] sm:$0xff] }
0x1475   :  { %8514 = vmatmul.msk.f32.gmra.mxu1 %vm186_vm1, %v14239_v39  ;;  %v14255_v1 = vsel %vm1171_vm9, %v6799_v34, %v9276_v28  ;;  %v8558_v28 = vld [vmem:[%s14878_s6 + $0x148] sm:$0xff]  ;;  %v14311_v15 = vsel %vm1171_vm9, %v6800_v38, %v9277_v25  ;;  %7396 = vmatpush.msra.mxu2 %v8592_v26 }
0x1476   :  { %7231 = vmatpush.msra.mxu0 %v8558_v28  ;;  %v9315_v18 = vpop.permute.xlu2 %9314 }
0x1477   :  { %8548 = vmatmul.msk.f32.gmra.mxu3 %vm186_vm1, %v14239_v39  ;;  %7397 = vmatpush.msra.mxu2 %v8591_v42  ;;  %v9312_v42 = vunpack.i.h.bf16 %v14290_v29 }
0x1478   :  { %6937 = vmatmul.f32.gmra.mxu0 %v14255_v1  ;;  %7102 = vmatmul.f32.gmra.mxu2 %v14255_v1 }
0x1479   :  { %v14272_v52 = vpop.permute.xlu0 %9284  ;;  %7232 = vmatpush.msra.mxu0 %v8557_v9  ;;  %7398 = vmatpush.msra.mxu2 %v8590_v53 }
0x147a   :  { %v9280_v40 = vpop.permute.xlu1 %9279  ;;  %v9286_v45 = vunpack.i.l.bf16 %v14272_v52  ;;  %v9287_v38 = vunpack.i.h.bf16 %v14272_v52 }
0x147b   :  { %v9281_v43 = vunpack.i.l.bf16 %v9280_v40  ;;  %v9282_v62 = vunpack.i.h.bf16 %v9280_v40  ;;  %7233 = vmatpush.msra.mxu0 %v8556_v37  ;;  %7399 = vmatpush.msra.mxu2 %v8589_v48 }
0x147c   :  { %v14285_v16 = vpop.f32.mrf.mxu3 }
0x147d   :  { %8515 = vmatmul.msk.f32.gmra.mxu1 %vm186_vm1, %v14285_v16  ;;  %v6753_v6 = vsel %vm69_vm0, %v6737_v47, %v9281_v43  ;;  %v6754_v7 = vsel %vm69_vm0, %v6738_v11, %v9282_v62  ;;  %v9307_v43 = vunpack.i.h.bf16 %v14227_v17  ;;  %7234 = vmatpush.msra.mxu0 %v8555_v4  ;;  %v9316_v62 = vunpack.i.l.bf16 %v9315_v18 }
0x147e   :  { %v6769_v34 = vsel %vm1156_vm6, %v6753_v6, %v9306_v23  ;;  %v8553_v6 = vld [vmem:[%s14878_s6 + $0x120] sm:$0xff]  ;;  %7400 = vmatpush.msra.mxu2 %v8588_v44  ;;  %v6626_v37 = vpop.permute.xlu2 %6625 }
0x147f   :  { %8549 = vmatmul.msk.f32.gmra.mxu3 %vm186_vm1, %v14285_v16  ;;  %v6785_v40 = vsel %vm1161_vm7, %v6769_v34, %v9286_v45  ;;  %v6770_v50 = vsel %vm1156_vm6, %v6754_v7, %v9307_v43  ;;  %7235 = vmatpush.msra.mxu0 %v8554_v36 }
0x1480   :  { %6940 = vmatmul.f32.gmra.mxu0 %v14311_v15  ;;  %7105 = vmatmul.f32.gmra.mxu2 %v14311_v15  ;;  %v6786_v55 = vsel %vm1161_vm7, %v6770_v50, %v9287_v38 }
0x1481   :  { %v14326_v24 = vpop.permute.xlu0 %9289  ;;  %7236 = vmatpush.msra.mxu0 %v8553_v6  ;;  %7401 = vmatpush.msra.mxu2 %v8587_v49 }
0x1482   :  { %v9295_v54 = vpop.permute.xlu1 %9294  ;;  %v9291_v17 = vunpack.i.l.bf16 %v14326_v24  ;;  %v9292_v45 = vunpack.i.h.bf16 %v14326_v24 }
0x1483   :  { %v9296_v30 = vunpack.i.l.bf16 %v9295_v54  ;;  %v9297_v47 = vunpack.i.h.bf16 %v9295_v54 }
0x1484   :  { %v14339_v31 = vpop.f32.mrf.mxu3  ;;  %v6723_v8 = vsel %vm186_vm1, %v13612_v20, %v9291_v17  ;;  %v6724_v24 = vsel %vm186_vm1, %v13629_v3, %v9292_v45 }
0x1485   :  { %8516 = vmatmul.msk.f32.gmra.mxu1 %vm186_vm1, %v14339_v31  ;;  %v6801_v25 = vsel %vm1166_vm8, %v6785_v40, %v9296_v30  ;;  %v6802_v52 = vsel %vm1166_vm8, %v6786_v55, %v9297_v47 }
0x1486   :  { %v14351_v33 = vsel %vm1171_vm9, %v6801_v25, %v9311_v57  ;;  %v14389_v20 = vsel %vm1171_vm9, %v6802_v52, %v9312_v42  ;;  %v9317_v25 = vunpack.i.h.bf16 %v9315_v18  ;;  %v6628_v36 = vpop.permute.xlu2 %6627 }
0x1487   :  { %8550 = vmatmul.msk.f32.gmra.mxu3 %vm186_vm1, %v14339_v31 }
0x1488   :  { %6943 = vmatmul.f32.gmra.mxu0 %v14351_v33  ;;  %7108 = vmatmul.f32.gmra.mxu2 %v14351_v33 }
0x1489   :  { %v9320_v26 = vpop.permute.xlu0 %9319 }
0x148a   :  { %v9300_v28 = vpop.permute.xlu1 %9299  ;;  %v9321_v29 = vunpack.i.l.bf16 %v9320_v26  ;;  %v9322_v48 = vunpack.i.h.bf16 %v9320_v26 }
0x148b   :  { %v9301_v23 = vunpack.i.l.bf16 %v9300_v28  ;;  %v9302_v32 = vunpack.i.h.bf16 %v9300_v28  ;;  %v14420_v28 = vld [vmem:[%s14879_s9] ss:$0 sm:$0xff] }
0x148c   :  { %v14378_v9 = vpop.f32.mrf.mxu3 }
0x148d   :  { %v6739_v34 = vsel %vm1147_vm5, %v6723_v8, %v9301_v23  ;;  %8517 = vmatmul.msk.f32.gmra.mxu1 %vm186_vm1, %v14378_v9  ;;  %v6740_v40 = vsel %vm1147_vm5, %v6724_v24, %v9302_v32  ;;  %vm7758_vm5 = vcmask 72704  }
0x148e   :  { %v6755_v54 = vsel %vm69_vm0, %v6739_v34, %v9316_v62  ;;  %v6756_v3 = vsel %vm69_vm0, %v6740_v40, %v9317_v25  ;;  %vm7724_vm0 = vcmask 23552  }
0x148f   :  { %8551 = vmatmul.msk.f32.gmra.mxu3 %vm186_vm1, %v14378_v9  ;;  %v6771_v53 = vsel %vm1156_vm6, %v6755_v54, %v9321_v29  ;;  %v6772_v18 = vsel %vm1156_vm6, %v6756_v3, %v9322_v48  ;;  %vm7775_vm6 = vcmask 97280  }
0x1490   :  { %6946 = vmatmul.f32.gmra.mxu0 %v14389_v20  ;;  %7111 = vmatmul.f32.gmra.mxu2 %v14389_v20 }
0x1491   :  { %v6690_v57 = vpop.permute.xlu0 %6689 }
0x1492   :  { %v6562_v30 = vpop.permute.xlu1 %6561 }
0x1493   :  { %v6787_v11 = vsel %vm1161_vm7, %v6771_v53, %v6562_v30 }
0x1494   :  { %v6803_v4 = vsel %vm1166_vm8, %v6787_v11, %v6626_v37  ;;  %v14400_v7 = vpop.f32.mrf.mxu3 }
0x1495   :  { %8518 = vmatmul.msk.f32.gmra.mxu1 %vm186_vm1, %v14400_v7  ;;  %v14405_v43 = vsel %vm1171_vm9, %v6803_v4, %v6690_v57 }
0x1496   :  { %v14430_v23 = vpop.f32.mrf.mxu0 }
0x1497   :  { %8552 = vmatmul.msk.f32.gmra.mxu3 %vm186_vm1, %v14400_v7 }
0x1498   :  { %6949 = vmatmul.f32.gmra.mxu0 %v14405_v43  ;;  %7114 = vmatmul.f32.gmra.mxu2 %v14405_v43 }
0x1499   :  { %v6692_v6 = vpop.permute.xlu0 %6691 }
0x149a   :  { %v6564_v50 = vpop.permute.xlu1 %6563  ;;  %v14413_v17 = vpop.f32.mrf.mxu1 }
0x149b   :  { %v6788_v47 = vsel %vm1161_vm7, %v6772_v18, %v6564_v50 }
0x149c   :  { %v6804_v44 = vsel %vm1166_vm8, %v6788_v47, %v6628_v36  ;;  %v7073_v38 = vpop.f32.mrf.mxu2 }
0x149d   :  { %8571 = vmatmul.msk.f32.vlgmr.msrb.gmra.mxu1 %vm186_vm1, %v13935_v13  ;;  %v14425_v26 = vsel %vm1171_vm9, %v6804_v44, %v6692_v6  ;;  %v7074_v49 = vadd.f32 %v14420_v28, %v7073_v38 }
0x149e   :  { %v14443_v54 = vpop.f32.mrf.mxu0 }
0x149f   :  { %8605 = vmatmul.msk.f32.vlgmr.msrb.gmra.mxu3 %vm186_vm1, %v13935_v13 }
0x14a0   :  { %6952 = vmatmul.f32.gmra.mxu0 %v14425_v26  ;;  %7117 = vmatmul.f32.gmra.mxu2 %v14425_v26  ;;  %v7138_v55 = vpop.f32.mrf.mxu3 }
0x14a1   :  { %v7139_v8 = vadd.f32 %v7138_v55, %v7074_v49 }
0x14a2   :  { %v14434_v52 = vpop.f32.mrf.mxu1 }
0x14a3   :  { %9359 = vtanh.f32 %v7139_v8 }
0x14a4   :  { %v7076_v42 = vpop.f32.mrf.mxu2 }
0x14a5   :  { %8572 = vmatmul.msk.f32.gmra.mxu1 %vm186_vm1, %v13958_v27  ;;  %v7077_v62 = vadd.f32 %v14420_v28, %v7076_v42 }
0x14a7   :  { %8606 = vmatmul.msk.f32.gmra.mxu3 %vm186_vm1, %v13958_v27 }
0x14a8   :  { %7237 = vmatmul.f32.vlgmr.msra.gmra.mxu0 %v13926_v51  ;;  %7402 = vmatmul.f32.vlgmr.msra.gmra.mxu2 %v13926_v51  ;;  %v7141_v13 = vpop.f32.mrf.mxu3 }
0x14a9   :  { %v9360_v34 = vpop.eup %9359  ;;  %v7142_v45 = vadd.f32 %v7141_v13, %v7077_v62 }
0x14aa   :  { %v14445_v37 = vpop.f32.mrf.mxu1  ;;  %7548 = vrot.lane.b32.xlu1 %v9360_v34, %s9567_s22 }
0x14ab   :  { %9361 = vtanh.f32 %v7142_v45 }
0x14ad   :  { %8573 = vmatmul.msk.f32.gmra.mxu1 %vm186_vm1, %v13974_v46 }
0x14af   :  { %8607 = vmatmul.msk.f32.gmra.mxu3 %vm186_vm1, %v13974_v46 }
0x14b0   :  { %7240 = vmatmul.f32.gmra.mxu0 %v13946_v63  ;;  %7405 = vmatmul.f32.gmra.mxu2 %v13946_v63  ;;  %v7144_v51 = vpop.f32.mrf.mxu3 }
0x14b1   :  { %v9362_v27 = vpop.eup %9361 }
0x14b2   :  { %v14454_v32 = vpop.f32.mrf.mxu0  ;;  %v14456_v29 = vpop.f32.mrf.mxu1  ;;  %7550 = vrot.lane.b32.xlu2 %v9362_v27, %s9567_s22 }
0x14b5   :  { %8574 = vmatmul.msk.f32.gmra.mxu1 %vm186_vm1, %v13992_v56 }
0x14b7   :  { %8608 = vmatmul.msk.f32.gmra.mxu3 %vm186_vm1, %v13992_v56 }
0x14b8   :  { %7243 = vmatmul.f32.gmra.mxu0 %v13995_v0  ;;  %7408 = vmatmul.f32.gmra.mxu2 %v13995_v0 }
0x14b9   :  { %v7079_v46 = vpop.f32.mrf.mxu2  ;;  %v7147_v63 = vpop.f32.mrf.mxu3 }
0x14ba   :  { %v7080_v30 = vadd.f32 %v14420_v28, %v7079_v46  ;;  %v14466_v53 = vpop.f32.mrf.mxu0  ;;  %v14468_v57 = vpop.f32.mrf.mxu1 }
0x14bc   :  { %v7145_v24 = vadd.f32 %v7144_v51, %v7080_v30 }
0x14bd   :  { %8575 = vmatmul.msk.f32.gmra.mxu1 %vm186_vm1, %v14015_v21 }
0x14be   :  { %9363 = vtanh.f32 %v7145_v24 }
0x14bf   :  { %8609 = vmatmul.msk.f32.gmra.mxu3 %vm186_vm1, %v14015_v21 }
0x14c0   :  { %7246 = vmatmul.f32.gmra.mxu0 %v14018_v22  ;;  %7411 = vmatmul.f32.gmra.mxu2 %v14018_v22 }
0x14c1   :  { %v7082_v56 = vpop.f32.mrf.mxu2  ;;  %v7150_v0 = vpop.f32.mrf.mxu3 }
0x14c2   :  { %v7083_v11 = vadd.f32 %v14420_v28, %v7082_v56  ;;  %v14477_v40 = vpop.f32.mrf.mxu1 }
0x14c3   :  { %v14479_v4 = vpop.f32.mrf.mxu0 }
0x14c4   :  { %v9364_v25 = vpop.eup %9363  ;;  %v7148_v3 = vadd.f32 %v7147_v63, %v7083_v11 }
0x14c5   :  { %7552 = vrot.lane.b32.xlu0 %v9364_v25, %s9567_s22  ;;  %8576 = vmatmul.msk.f32.gmra.mxu1 %vm186_vm1, %v14040_v58 }
0x14c6   :  { %9365 = vtanh.f32 %v7148_v3 }
0x14c7   :  { %8610 = vmatmul.msk.f32.gmra.mxu3 %vm186_vm1, %v14040_v58 }
0x14c8   :  { %7249 = vmatmul.f32.gmra.mxu0 %v14045_v60  ;;  %7414 = vmatmul.f32.gmra.mxu2 %v14045_v60 }
0x14c9   :  { %v7085_v21 = vpop.f32.mrf.mxu2 }
0x14ca   :  { %v7086_v22 = vadd.f32 %v14420_v28, %v7085_v21  ;;  %v7153_v48 = vpop.f32.mrf.mxu3  ;;  %v14489_v36 = vpop.f32.mrf.mxu1 }
0x14cb   :  { %v14491_v50 = vpop.f32.mrf.mxu0 }
0x14cc   :  { %v9366_v18 = vpop.eup %9365  ;;  %v7151_v47 = vadd.f32 %v7150_v0, %v7086_v22 }
0x14cd   :  { %7554 = vrot.lane.b32.xlu1 %v9366_v18, %s9567_s22  ;;  %8577 = vmatmul.msk.f32.gmra.mxu1 %vm186_vm1, %v14062_v2 }
0x14ce   :  { %9367 = vtanh.f32 %v7151_v47 }
0x14cf   :  { %8611 = vmatmul.msk.f32.gmra.mxu3 %vm186_vm1, %v14062_v2 }
0x14d0   :  { %7252 = vmatmul.f32.gmra.mxu0 %v14066_v41  ;;  %7417 = vmatmul.f32.gmra.mxu2 %v14066_v41 }
0x14d1   :  { %v7088_v58 = vpop.f32.mrf.mxu2 }
0x14d2   :  { %v7089_v60 = vadd.f32 %v14420_v28, %v7088_v58  ;;  %v7156_v44 = vpop.f32.mrf.mxu3  ;;  %v14501_v6 = vpop.f32.mrf.mxu1 }
0x14d4   :  { %v9368_v38 = vpop.eup %9367  ;;  %v7154_v49 = vadd.f32 %v7153_v48, %v7089_v60  ;;  %v14503_v55 = vpop.f32.mrf.mxu0 }
0x14d5   :  { %7556 = vrot.lane.b32.xlu2 %v9368_v38, %s9567_s22  ;;  %8578 = vmatmul.msk.f32.gmra.mxu1 %vm186_vm1, %v14090_v14 }
0x14d6   :  { %9369 = vtanh.f32 %v7154_v49 }
0x14d7   :  { %8612 = vmatmul.msk.f32.gmra.mxu3 %vm186_vm1, %v14090_v14 }
0x14d8   :  { %7255 = vmatmul.f32.gmra.mxu0 %v14100_v35  ;;  %7420 = vmatmul.f32.gmra.mxu2 %v14100_v35 }
0x14da   :  { %v7159_v2 = vpop.f32.mrf.mxu3  ;;  %v6997_v41 = vpop.f32.mrf.mxu1 }
0x14db   :  { %v7091_v8 = vpop.f32.mrf.mxu2 }
0x14dc   :  { %v9370_v42 = vpop.eup %9369  ;;  %v7092_v62 = vadd.f32 %v14420_v28, %v7091_v8  ;;  %v14513_v13 = vpop.f32.mrf.mxu0 }
0x14dd   :  { %7558 = vrot.lane.b32.xlu0 %v9370_v42, %s9567_s22  ;;  %8579 = vmatmul.msk.f32.gmra.mxu1 %vm186_vm1, %v14115_v12 }
0x14de   :  { %v7157_v34 = vadd.f32 %v7156_v44, %v7092_v62 }
0x14df   :  { %8613 = vmatmul.msk.f32.gmra.mxu3 %vm186_vm1, %v14115_v12 }
0x14e0   :  { %9371 = vtanh.f32 %v7157_v34  ;;  %7258 = vmatmul.f32.gmra.mxu0 %v14120_v61  ;;  %7423 = vmatmul.f32.gmra.mxu2 %v14120_v61 }
0x14e2   :  { %v7162_v14 = vpop.f32.mrf.mxu3  ;;  %v7000_v35 = vpop.f32.mrf.mxu1 }
0x14e3   :  { %v7094_v45 = vpop.f32.mrf.mxu2 }
0x14e4   :  { %v7095_v51 = vadd.f32 %v14420_v28, %v7094_v45 }
0x14e5   :  { %v6932_v27 = vpop.f32.mrf.mxu0  ;;  %8580 = vmatmul.msk.f32.gmra.mxu1 %vm186_vm1, %v14144_v10 }
0x14e6   :  { %v9372_v46 = vpop.eup %9371  ;;  %v7160_v63 = vadd.f32 %v7159_v2, %v7095_v51  ;;  %v6933_v30 = vadd.f32 %v14420_v28, %v6932_v27 }
0x14e7   :  { %8614 = vmatmul.msk.f32.gmra.mxu3 %vm186_vm1, %v14144_v10  ;;  %7560 = vrot.lane.b32.xlu1 %v9372_v46, %s9567_s22 }
0x14e8   :  { %9373 = vtanh.f32 %v7160_v63  ;;  %v14529_v12 = vadd.f32 %v6997_v41, %v6933_v30  ;;  %7261 = vmatmul.f32.gmra.mxu0 %v14158_v5  ;;  %7426 = vmatmul.f32.gmra.mxu2 %v14158_v5 }
0x14ea   :  { %v7165_v61 = vpop.f32.mrf.mxu3  ;;  %v7003_v24 = vpop.f32.mrf.mxu1 }
0x14eb   :  { %v7097_v56 = vpop.f32.mrf.mxu2 }
0x14ec   :  { %v7098_v0 = vadd.f32 %v14420_v28, %v7097_v56 }
0x14ed   :  { %v6935_v11 = vpop.f32.mrf.mxu0  ;;  %8581 = vmatmul.msk.f32.gmra.mxu1 %vm186_vm1, %v14185_v59 }
0x14ee   :  { %v9374_v25 = vpop.eup %9373  ;;  %v7163_v10 = vadd.f32 %v7162_v14, %v7098_v0  ;;  %v6936_v3 = vadd.f32 %v14420_v28, %v6935_v11 }
0x14ef   :  { %8615 = vmatmul.msk.f32.gmra.mxu3 %vm186_vm1, %v14185_v59  ;;  %7562 = vrot.lane.b32.xlu2 %v9374_v25, %s9567_s22 }
0x14f0   :  { %9375 = vtanh.f32 %v7163_v10  ;;  %v14540_v5 = vadd.f32 %v7000_v35, %v6936_v3  ;;  %7264 = vmatmul.f32.gmra.mxu0 %v14202_v19  ;;  %7429 = vmatmul.f32.gmra.mxu2 %v14202_v19 }
0x14f2   :  { %v7168_v21 = vpop.f32.mrf.mxu3  ;;  %v7006_v22 = vpop.f32.mrf.mxu1 }
0x14f3   :  { %v7100_v48 = vpop.f32.mrf.mxu2 }
0x14f4   :  { %v7101_v18 = vadd.f32 %v14420_v28, %v7100_v48 }
0x14f5   :  { %v6938_v47 = vpop.f32.mrf.mxu0  ;;  %8582 = vmatmul.msk.f32.gmra.mxu1 %vm186_vm1, %v14239_v39 }
0x14f6   :  { %v9376_v58 = vpop.eup %9375  ;;  %v7166_v59 = vadd.f32 %v7165_v61, %v7101_v18  ;;  %v6939_v60 = vadd.f32 %v14420_v28, %v6938_v47 }
0x14f7   :  { %8616 = vmatmul.msk.f32.gmra.mxu3 %vm186_vm1, %v14239_v39  ;;  %7564 = vrot.lane.b32.xlu0 %v9376_v58, %s9567_s22 }
0x14f8   :  { %9377 = vtanh.f32 %v7166_v59  ;;  %v14551_v19 = vadd.f32 %v7003_v24, %v6939_v60  ;;  %7267 = vmatmul.f32.gmra.mxu0 %v14255_v1  ;;  %7432 = vmatmul.f32.gmra.mxu2 %v14255_v1 }
0x14fa   :  { %v7171_v44 = vpop.f32.mrf.mxu3  ;;  %v7009_v38 = vpop.f32.mrf.mxu1 }
0x14fb   :  { %v7103_v49 = vpop.f32.mrf.mxu2 }
0x14fc   :  { %v7104_v2 = vadd.f32 %v14420_v28, %v7103_v49 }
0x14fd   :  { %v6941_v41 = vpop.f32.mrf.mxu0  ;;  %8583 = vmatmul.msk.f32.gmra.mxu1 %vm186_vm1, %v14285_v16 }
0x14fe   :  { %v9378_v8 = vpop.eup %9377  ;;  %v7169_v39 = vadd.f32 %v7168_v21, %v7104_v2  ;;  %v6942_v42 = vadd.f32 %v14420_v28, %v6941_v41 }
0x14ff   :  { %8617 = vmatmul.msk.f32.gmra.mxu3 %vm186_vm1, %v14285_v16  ;;  %7566 = vrot.lane.b32.xlu1 %v9378_v8, %s9567_s22 }
0x1500   :  { %9379 = vtanh.f32 %v7169_v39  ;;  %v14562_v1 = vadd.f32 %v7006_v22, %v6942_v42  ;;  %7270 = vmatmul.f32.gmra.mxu0 %v14311_v15  ;;  %7435 = vmatmul.f32.gmra.mxu2 %v14311_v15 }
0x1502   :  { %v7174_v62 = vpop.f32.mrf.mxu3  ;;  %v7012_v34 = vpop.f32.mrf.mxu1 }
0x1503   :  { %v7106_v14 = vpop.f32.mrf.mxu2 }
0x1504   :  { %v7107_v35 = vadd.f32 %v14420_v28, %v7106_v14 }
0x1505   :  { %v6944_v45 = vpop.f32.mrf.mxu0  ;;  %8584 = vmatmul.msk.f32.gmra.mxu1 %vm186_vm1, %v14339_v31 }
0x1506   :  { %v9380_v51 = vpop.eup %9379  ;;  %v7172_v16 = vadd.f32 %v7171_v44, %v7107_v35  ;;  %v6945_v27 = vadd.f32 %v14420_v28, %v6944_v45 }
0x1507   :  { %8618 = vmatmul.msk.f32.gmra.mxu3 %vm186_vm1, %v14339_v31  ;;  %7568 = vrot.lane.b32.xlu2 %v9380_v51, %s9567_s22 }
0x1508   :  { %9381 = vtanh.f32 %v7172_v16  ;;  %v14573_v15 = vadd.f32 %v7009_v38, %v6945_v27  ;;  %7273 = vmatmul.f32.gmra.mxu0 %v14351_v33  ;;  %7438 = vmatmul.f32.gmra.mxu2 %v14351_v33 }
0x150a   :  { %v7177_v46 = vpop.f32.mrf.mxu3  ;;  %v7015_v63 = vpop.f32.mrf.mxu1 }
0x150b   :  { %v7109_v30 = vpop.f32.mrf.mxu2 }
0x150c   :  { %v7110_v61 = vadd.f32 %v14420_v28, %v7109_v30  ;;  %v14611_v45 = vpop.permute.xlu2 %7550 }
0x150d   :  { %v6947_v24 = vpop.f32.mrf.mxu0  ;;  %8585 = vmatmul.msk.f32.gmra.mxu1 %vm186_vm1, %v14378_v9 }
0x150e   :  { %v9382_v56 = vpop.eup %9381  ;;  %v7175_v31 = vadd.f32 %v7174_v62, %v7110_v61  ;;  %v6948_v0 = vadd.f32 %v14420_v28, %v6947_v24 }
0x150f   :  { %8619 = vmatmul.msk.f32.gmra.mxu3 %vm186_vm1, %v14378_v9  ;;  %7570 = vrot.lane.b32.xlu0 %v9382_v56, %s9567_s22 }
0x1510   :  { %9383 = vtanh.f32 %v7175_v31  ;;  %v14584_v33 = vadd.f32 %v7012_v34, %v6948_v0  ;;  %7276 = vmatmul.f32.gmra.mxu0 %v14389_v20  ;;  %7441 = vmatmul.f32.gmra.mxu2 %v14389_v20 }
0x1512   :  { %v7180_v11 = vpop.f32.mrf.mxu3  ;;  %v7018_v25 = vpop.f32.mrf.mxu1 }
0x1513   :  { %v7112_v10 = vpop.f32.mrf.mxu2 }
0x1514   :  { %v7113_v3 = vadd.f32 %v14420_v28, %v7112_v10 }
0x1515   :  { %v6950_v21 = vpop.f32.mrf.mxu0  ;;  %8586 = vmatmul.msk.f32.gmra.mxu1 %vm186_vm1, %v14400_v7 }
0x1516   :  { %v9384_v22 = vpop.eup %9383  ;;  %v7178_v9 = vadd.f32 %v7177_v46, %v7113_v3  ;;  %v6951_v48 = vadd.f32 %v14420_v28, %v6950_v21 }
0x1517   :  { %8620 = vmatmul.msk.f32.gmra.mxu3 %vm186_vm1, %v14400_v7  ;;  %7572 = vrot.lane.b32.xlu1 %v9384_v22, %s9567_s22  ;;  %vm7741_vm1 = vcmask 48128  }
0x1518   :  { %9385 = vtanh.f32 %v7178_v9  ;;  %v14595_v20 = vadd.f32 %v7015_v63, %v6951_v48  ;;  %7279 = vmatmul.f32.gmra.mxu0 %v14405_v43  ;;  %7444 = vmatmul.f32.gmra.mxu2 %v14405_v43  ;;  %v6921_v43 = vadd.f32 %v14420_v28, %v14479_v4 }
0x151a   :  { %v7183_v18 = vpop.f32.mrf.mxu3  ;;  %v7303_v47 = vpop.f32.mrf.mxu1  ;;  %v6986_v42 = vadd.f32 %v14468_v57, %v6921_v43 }
0x151b   :  { %v7115_v58 = vpop.f32.mrf.mxu2 }
0x151c   :  { %v7116_v59 = vadd.f32 %v14420_v28, %v7115_v58  ;;  %v6930_v58 = vadd.f32 %v14420_v28, %v14513_v13  ;;  %v6924_v13 = vadd.f32 %v14420_v28, %v14491_v50 }
0x151d   :  { %v6953_v60 = vpop.f32.mrf.mxu0 }
0x151e   :  { %v9386_v44 = vpop.eup %9385  ;;  %v7181_v38 = vadd.f32 %v7180_v11, %v7116_v59  ;;  %v6954_v49 = vadd.f32 %v14420_v28, %v6953_v60 }
0x151f   :  { %7574 = vrot.lane.b32.xlu2 %v9386_v44, %s9567_s22 }
0x1520   :  { %9387 = vtanh.f32 %v7181_v38  ;;  %v14602_v7 = vadd.f32 %v7018_v25, %v6954_v49  ;;  %7282 = vmatmul.f32.gmra.mxu0 %v14425_v26  ;;  %7447 = vmatmul.f32.gmra.mxu2 %v14425_v26 }
0x1522   :  { %v7468_v2 = vpop.f32.mrf.mxu3  ;;  %v7306_v41 = vpop.f32.mrf.mxu1 }
0x1523   :  { %v7118_v8 = vpop.f32.mrf.mxu2 }
0x1524   :  { %v7119_v39 = vadd.f32 %v14420_v28, %v7118_v8 }
0x1525   :  { %v7238_v62 = vpop.f32.mrf.mxu0 }
0x1526   :  { %v9388_v34 = vpop.eup %9387  ;;  %v7184_v14 = vadd.f32 %v7183_v18, %v7119_v39  ;;  %v7239_v35 = vadd.f32 %v14420_v28, %v7238_v62 }
0x1527   :  { %7576 = vrot.lane.b32.xlu0 %v9388_v34, %s9567_s22 }
0x1528   :  { %9389 = vtanh.f32 %v7184_v14  ;;  %v7304_v26 = vadd.f32 %v7303_v47, %v7239_v35 }
0x1529   :  { %9391 = vtanh.f32 %v6986_v42 }
0x152a   :  { %9393 = vtanh.f32 %v7304_v26  ;;  %v7471_v4 = vpop.f32.mrf.mxu3  ;;  %v7309_v51 = vpop.f32.mrf.mxu1 }
0x152b   :  { %v7403_v16 = vpop.f32.mrf.mxu2 }
0x152c   :  { %v7404_v27 = vadd.f32 %v14420_v28, %v7403_v16 }
0x152d   :  { %v7241_v46 = vpop.f32.mrf.mxu0 }
0x152e   :  { %v9390_v57 = vpop.eup %9389  ;;  %v7469_v63 = vadd.f32 %v7468_v2, %v7404_v27  ;;  %v7242_v61 = vadd.f32 %v14420_v28, %v7241_v46  ;;  %v14640_v46 = vpop.permute.xlu1 %7548 }
0x152f   :  { %v9392_v30 = vpop.eup %9391  ;;  %v7557_v24 = vpop.permute.xlu2 %7556  ;;  %7578 = vrot.lane.b32.xlu1 %v9390_v57, %s9567_s22 }
0x1530   :  { %v9394_v56 = vpop.eup %9393  ;;  %9395 = vtanh.f32 %v7469_v63  ;;  %v14618_v31 = vsel %vm7724_vm0, %v9392_v30, %v7557_v24  ;;  %v7307_v25 = vadd.f32 %v7306_v41, %v7242_v61  ;;  %v6995_v41 = vadd.f32 %v14501_v6, %v6930_v58 }
0x1531   :  { %7612 = vrot.lane.b32.xlu2 %v9394_v56, %s9568_s0  ;;  %v6989_v6 = vadd.f32 %v14477_v40, %v6924_v13  ;;  %v6927_v61 = vadd.f32 %v14420_v28, %v14503_v55 }
0x1532   :  { %v7474_v0 = vpop.f32.mrf.mxu3  ;;  %v7312_v11 = vpop.f32.mrf.mxu1  ;;  %9397 = vtanh.f32 %v7307_v25 }
0x1533   :  { %v7406_v10 = vpop.f32.mrf.mxu2 }
0x1534   :  { %v7407_v3 = vadd.f32 %v14420_v28, %v7406_v10 }
0x1535   :  { %v7244_v21 = vpop.f32.mrf.mxu0 }
0x1536   :  { %v9396_v22 = vpop.eup %9395  ;;  %v7472_v9 = vadd.f32 %v7471_v4, %v7407_v3  ;;  %v7245_v48 = vadd.f32 %v14420_v28, %v7244_v21 }
0x1537   :  { %7676 = vrot.lane.b32.xlu0 %v9396_v22, %s9569_s23  ;;  %v14635_v16 = vpop.permute.xlu0 %7552  ;;  %v6992_v22 = vadd.f32 %v14489_v36, %v6927_v61 }
0x1538   :  { %9399 = vtanh.f32 %v7472_v9  ;;  %v7310_v59 = vadd.f32 %v7309_v51, %v7245_v48  ;;  %v9398_v38 = vpop.eup %9397 }
0x153a   :  { %v7477_v18 = vpop.f32.mrf.mxu3  ;;  %v7315_v47 = vpop.f32.mrf.mxu1  ;;  %9401 = vtanh.f32 %v7310_v59 }
0x153b   :  { %v7409_v60 = vpop.f32.mrf.mxu2 }
0x153c   :  { %v7410_v44 = vadd.f32 %v14420_v28, %v7409_v60 }
0x153d   :  { %v7247_v49 = vpop.f32.mrf.mxu0 }
0x153e   :  { %v9400_v43 = vpop.eup %9399  ;;  %v7475_v2 = vadd.f32 %v7474_v0, %v7410_v44  ;;  %v7248_v8 = vadd.f32 %v14420_v28, %v7247_v49 }
0x153f   :  { %7678 = vrot.lane.b32.xlu1 %v9400_v43, %s9569_s23  ;;  %7614 = vrot.lane.b32.xlu0 %v9398_v38, %s9568_s0 }
0x1540   :  { %9403 = vtanh.f32 %v7475_v2  ;;  %v7313_v62 = vadd.f32 %v7312_v11, %v7248_v8  ;;  %v9402_v35 = vpop.eup %9401 }
0x1541   :  { %9405 = vtanh.f32 %v6995_v41 }
0x1542   :  { %v7480_v39 = vpop.f32.mrf.mxu3  ;;  %v7318_v42 = vpop.f32.mrf.mxu1  ;;  %9407 = vtanh.f32 %v7313_v62 }
0x1543   :  { %v7412_v34 = vpop.f32.mrf.mxu2 }
0x1544   :  { %v7413_v14 = vadd.f32 %v14420_v28, %v7412_v34 }
0x1545   :  { %v7250_v26 = vpop.f32.mrf.mxu0 }
0x1546   :  { %v9404_v4 = vpop.eup %9403  ;;  %v7478_v51 = vadd.f32 %v7477_v18, %v7413_v14  ;;  %v7251_v27 = vadd.f32 %v14420_v28, %v7250_v26  ;;  %v14655_v18 = vpop.permute.xlu1 %7554 }
0x1547   :  { %7616 = vrot.lane.b32.xlu1 %v9402_v35, %s9568_s0  ;;  %7680 = vrot.lane.b32.xlu2 %v9404_v4, %s9569_s23  ;;  %v9406_v50 = vpop.eup %9405 }
0x1548   :  { %9409 = vtanh.f32 %v7478_v51  ;;  %v7316_v24 = vadd.f32 %v7315_v47, %v7251_v27  ;;  %v9408_v11 = vpop.eup %9407 }
0x1549   :  { %9411 = vtanh.f32 %v6989_v6  ;;  %v7563_v57 = vpop.permute.xlu2 %7562 }
0x154a   :  { %v14643_v40 = vsel %vm7724_vm0, %v9406_v50, %v7563_v57  ;;  %v7483_v63 = vpop.f32.mrf.mxu3  ;;  %v7321_v30 = vpop.f32.mrf.mxu1  ;;  %9413 = vtanh.f32 %v7316_v24 }
0x154b   :  { %v7415_v56 = vpop.f32.mrf.mxu2 }
0x154c   :  { %v7416_v0 = vadd.f32 %v14420_v28, %v7415_v56 }
0x154d   :  { %v7253_v25 = vpop.f32.mrf.mxu0 }
0x154e   :  { %v9410_v10 = vpop.eup %9409  ;;  %v7481_v3 = vadd.f32 %v7480_v39, %v7416_v0  ;;  %v7254_v9 = vadd.f32 %v14420_v28, %v7253_v25 }
0x154f   :  { %v9412_v21 = vpop.eup %9411  ;;  %v7559_v48 = vpop.permute.xlu0 %7558  ;;  %7682 = vrot.lane.b32.xlu0 %v9410_v10, %s9569_s23  ;;  %7618 = vrot.lane.b32.xlu2 %v9408_v11, %s9568_s0 }
0x1550   :  { %9415 = vtanh.f32 %v7481_v3  ;;  %v14653_v55 = vsel %vm7724_vm0, %v9412_v21, %v7559_v48  ;;  %v7319_v59 = vadd.f32 %v7318_v42, %v7254_v9  ;;  %v9414_v44 = vpop.eup %9413 }
0x1551   :  { %9417 = vtanh.f32 %v6992_v22 }
0x1552   :  { %v7486_v47 = vpop.f32.mrf.mxu3  ;;  %v7324_v58 = vpop.f32.mrf.mxu1  ;;  %9419 = vtanh.f32 %v7319_v59 }
0x1553   :  { %v7418_v60 = vpop.f32.mrf.mxu2 }
0x1554   :  { %v7419_v36 = vadd.f32 %v14420_v28, %v7418_v60 }
0x1555   :  { %v7256_v38 = vpop.f32.mrf.mxu0 }
0x1556   :  { %v9416_v49 = vpop.eup %9415  ;;  %v7484_v43 = vadd.f32 %v7483_v63, %v7419_v36  ;;  %v7257_v2 = vadd.f32 %v14420_v28, %v7256_v38 }
0x1557   :  { %7684 = vrot.lane.b32.xlu1 %v9416_v49, %s9569_s23  ;;  %7620 = vrot.lane.b32.xlu0 %v9414_v44, %s9568_s0  ;;  %v9418_v41 = vpop.eup %9417 }
0x1558   :  { %9421 = vtanh.f32 %v7484_v43  ;;  %v7322_v62 = vadd.f32 %v7321_v30, %v7257_v2  ;;  %v9420_v35 = vpop.eup %9419 }
0x1559   :  { %v7561_v8 = vpop.permute.xlu1 %7560  ;;  %9423 = vtanh.f32 %v14551_v19 }
0x155a   :  { %v14662_v13 = vsel %vm7724_vm0, %v9418_v41, %v7561_v8  ;;  %v7489_v39 = vpop.f32.mrf.mxu3  ;;  %v7327_v42 = vpop.f32.mrf.mxu1  ;;  %9425 = vtanh.f32 %v7322_v62 }
0x155b   :  { %v7421_v34 = vpop.f32.mrf.mxu2 }
0x155c   :  { %v7422_v14 = vadd.f32 %v14420_v28, %v7421_v34 }
0x155d   :  { %v7259_v6 = vpop.f32.mrf.mxu0 }
0x155e   :  { %v9422_v26 = vpop.eup %9421  ;;  %v7487_v4 = vadd.f32 %v7486_v47, %v7422_v14  ;;  %v7260_v51 = vadd.f32 %v14420_v28, %v7259_v6 }
0x155f   :  { %7622 = vrot.lane.b32.xlu1 %v9420_v35, %s9568_s0  ;;  %7686 = vrot.lane.b32.xlu2 %v9422_v26, %s9569_s23  ;;  %v9424_v27 = vpop.eup %9423 }
0x1560   :  { %9427 = vtanh.f32 %v7487_v4  ;;  %v7325_v63 = vadd.f32 %v7324_v58, %v7260_v51  ;;  %v9426_v56 = vpop.eup %9425 }
0x1561   :  { %v7569_v50 = vpop.permute.xlu2 %7568  ;;  %9429 = vtanh.f32 %v14529_v12 }
0x1562   :  { %v7492_v57 = vpop.f32.mrf.mxu3  ;;  %v14670_v19 = vsel %vm7724_vm0, %v9424_v27, %v7569_v50  ;;  %v7330_v30 = vpop.f32.mrf.mxu1  ;;  %9431 = vtanh.f32 %v7325_v63 }
0x1563   :  { %v7424_v61 = vpop.f32.mrf.mxu2 }
0x1564   :  { %v7425_v24 = vadd.f32 %v14420_v28, %v7424_v61 }
0x1565   :  { %v7262_v0 = vpop.f32.mrf.mxu0 }
0x1566   :  { %v9428_v11 = vpop.eup %9427  ;;  %v7490_v25 = vadd.f32 %v7489_v39, %v7425_v24  ;;  %v7263_v10 = vadd.f32 %v14420_v28, %v7262_v0 }
0x1567   :  { %7688 = vrot.lane.b32.xlu0 %v9428_v11, %s9569_s23  ;;  %7624 = vrot.lane.b32.xlu2 %v9426_v56, %s9568_s0  ;;  %v9430_v3 = vpop.eup %9429 }
0x1568   :  { %9433 = vtanh.f32 %v7490_v25  ;;  %v7328_v9 = vadd.f32 %v7327_v42, %v7263_v10  ;;  %v9432_v58 = vpop.eup %9431 }
0x1569   :  { %v7565_v21 = vpop.permute.xlu0 %7564  ;;  %9435 = vtanh.f32 %v14540_v5 }
0x156a   :  { %v7495_v12 = vpop.f32.mrf.mxu3  ;;  %v14678_v22 = vsel %vm7724_vm0, %v9430_v3, %v7565_v21  ;;  %v7333_v59 = vpop.f32.mrf.mxu1  ;;  %9437 = vtanh.f32 %v7328_v9 }
0x156b   :  { %v7427_v48 = vpop.f32.mrf.mxu2 }
0x156c   :  { %v7428_v47 = vadd.f32 %v14420_v28, %v7427_v48 }
0x156d   :  { %v7265_v60 = vpop.f32.mrf.mxu0 }
0x156e   :  { %v9434_v36 = vpop.eup %9433  ;;  %v7493_v44 = vadd.f32 %v7492_v57, %v7428_v47  ;;  %v7266_v38 = vadd.f32 %v14420_v28, %v7265_v60 }
0x156f   :  { %7690 = vrot.lane.b32.xlu1 %v9434_v36, %s9569_s23  ;;  %7626 = vrot.lane.b32.xlu0 %v9432_v58, %s9568_s0  ;;  %v9436_v49 = vpop.eup %9435 }
0x1570   :  { %9439 = vtanh.f32 %v7493_v44  ;;  %v7331_v2 = vadd.f32 %v7330_v30, %v7266_v38  ;;  %v9438_v42 = vpop.eup %9437 }
0x1571   :  { %v7567_v43 = vpop.permute.xlu1 %7566  ;;  %9441 = vtanh.f32 %v14584_v33 }
0x1572   :  { %v14686_v5 = vsel %vm7724_vm0, %v9436_v49, %v7567_v43  ;;  %v7498_v41 = vpop.f32.mrf.mxu3  ;;  %9443 = vtanh.f32 %v7331_v2  ;;  %v7336_v35 = vpop.f32.mrf.mxu1 }
0x1573   :  { %v7430_v8 = vpop.f32.mrf.mxu2 }
0x1574   :  { %v7431_v39 = vadd.f32 %v14420_v28, %v7430_v8 }
0x1575   :  { %v7268_v62 = vpop.f32.mrf.mxu0 }
0x1576   :  { %v9440_v34 = vpop.eup %9439  ;;  %v7496_v14 = vadd.f32 %v7495_v12, %v7431_v39  ;;  %v7269_v6 = vadd.f32 %v14420_v28, %v7268_v62 }
0x1577   :  { %7628 = vrot.lane.b32.xlu1 %v9438_v42, %s9568_s0  ;;  %7692 = vrot.lane.b32.xlu2 %v9440_v34, %s9569_s23  ;;  %v9442_v26 = vpop.eup %9441 }
0x1578   :  { %9445 = vtanh.f32 %v7496_v14  ;;  %v7334_v51 = vadd.f32 %v7333_v59, %v7269_v6  ;;  %v9444_v57 = vpop.eup %9443 }
0x1579   :  { %v7575_v33 = vpop.permute.xlu2 %7574  ;;  %9447 = vtanh.f32 %v14562_v1 }
0x157a   :  { %v14694_v4 = vsel %vm7724_vm0, %v9442_v26, %v7575_v33  ;;  %v7501_v63 = vpop.f32.mrf.mxu3  ;;  %9449 = vtanh.f32 %v7334_v51  ;;  %v7339_v11 = vpop.f32.mrf.mxu1 }
0x157b   :  { %v7433_v27 = vpop.f32.mrf.mxu2 }
0x157c   :  { %v7434_v50 = vadd.f32 %v14420_v28, %v7433_v27 }
0x157d   :  { %v7271_v30 = vpop.f32.mrf.mxu0 }
0x157e   :  { %v9446_v61 = vpop.eup %9445  ;;  %v7499_v24 = vadd.f32 %v7498_v41, %v7434_v50  ;;  %v7272_v56 = vadd.f32 %v14420_v28, %v7271_v30 }
0x157f   :  { %7694 = vrot.lane.b32.xlu0 %v9446_v61, %s9569_s23  ;;  %7630 = vrot.lane.b32.xlu2 %v9444_v57, %s9568_s0  ;;  %v9448_v0 = vpop.eup %9447 }
0x1580   :  { %9451 = vtanh.f32 %v7499_v24  ;;  %v7337_v10 = vadd.f32 %v7336_v35, %v7272_v56  ;;  %v9450_v12 = vpop.eup %9449 }
0x1581   :  { %v7571_v1 = vpop.permute.xlu0 %7570  ;;  %9453 = vtanh.f32 %v14573_v15 }
0x1582   :  { %v14702_v25 = vsel %vm7724_vm0, %v9448_v0, %v7571_v1  ;;  %9455 = vtanh.f32 %v7337_v10  ;;  %v7504_v58 = vpop.f32.mrf.mxu3  ;;  %v7342_v44 = vpop.f32.mrf.mxu1 }
0x1583   :  { %v7436_v3 = vpop.f32.mrf.mxu2 }
0x1584   :  { %v7437_v21 = vadd.f32 %v14420_v28, %v7436_v3 }
0x1585   :  { %v7274_v9 = vpop.f32.mrf.mxu0 }
0x1586   :  { %v9452_v48 = vpop.eup %9451  ;;  %v7502_v47 = vadd.f32 %v7501_v63, %v7437_v21  ;;  %v7275_v59 = vadd.f32 %v14420_v28, %v7274_v9 }
0x1587   :  { %7696 = vrot.lane.b32.xlu1 %v9452_v48, %s9569_s23  ;;  %7632 = vrot.lane.b32.xlu0 %v9450_v12, %s9568_s0  ;;  %v9454_v60 = vpop.eup %9453  ;;  %v6912_v48 = vadd.f32 %v14420_v28, %v14443_v54 }
0x1588   :  { %9457 = vtanh.f32 %v7502_v47  ;;  %v7340_v38 = vadd.f32 %v7339_v11, %v7275_v59  ;;  %v9456_v2 = vpop.eup %9455 }
0x1589   :  { %v7573_v36 = vpop.permute.xlu1 %7572  ;;  %v6977_v59 = vadd.f32 %v14434_v52, %v6912_v48  ;;  %v9559_v52 = vld [vmem:[%s14879_s9] ss:$0 sm:$0xff] }
0x158a   :  { %v14710_v15 = vsel %vm7724_vm0, %v9454_v60, %v7573_v36  ;;  %9459 = vtanh.f32 %v7340_v38  ;;  %v7507_v62 = vpop.f32.mrf.mxu3  ;;  %v7345_v6 = vpop.f32.mrf.mxu1 }
0x158b   :  { %v7439_v49 = vpop.f32.mrf.mxu2 }
0x158c   :  { %v7440_v43 = vadd.f32 %v14420_v28, %v7439_v49 }
0x158d   :  { %v7277_v41 = vpop.f32.mrf.mxu0 }
0x158e   :  { %v9458_v8 = vpop.eup %9457  ;;  %v7505_v39 = vadd.f32 %v7504_v58, %v7440_v43  ;;  %v7278_v42 = vadd.f32 %v14420_v28, %v7277_v41 }
0x158f   :  { %7634 = vrot.lane.b32.xlu1 %v9456_v2, %s9568_s0  ;;  %7698 = vrot.lane.b32.xlu2 %v9458_v8, %s9569_s23  ;;  %v6915_v8 = vadd.f32 %v9559_v52, %v14454_v32 }
0x1590   :  { %9461 = vtanh.f32 %v7505_v39  ;;  %v7343_v14 = vadd.f32 %v7342_v44, %v7278_v42  ;;  %v9460_v35 = vpop.eup %9459  ;;  %v7613_v44 = vpop.permute.xlu2 %7612 }
0x1591   :  { %9463 = vtanh.f32 %v14595_v20  ;;  %v6909_v20 = vadd.f32 %v14420_v28, %v14430_v23  ;;  %v6980_v42 = vadd.f32 %v14445_v37, %v6915_v8 }
0x1592   :  { %9465 = vtanh.f32 %v7343_v14  ;;  %v7510_v61 = vpop.f32.mrf.mxu3  ;;  %v7348_v3 = vpop.f32.mrf.mxu1  ;;  %v6918_v14 = vadd.f32 %v9559_v52, %v14466_v53 }
0x1593   :  { %v7442_v34 = vpop.f32.mrf.mxu2  ;;  %v6974_v56 = vadd.f32 %v14413_v17, %v6909_v20 }
0x1594   :  { %v7443_v57 = vadd.f32 %v14420_v28, %v7442_v34  ;;  %v6983_v37 = vadd.f32 %v14456_v29, %v6918_v14 }
0x1595   :  { %v7280_v26 = vpop.f32.mrf.mxu0 }
0x1596   :  { %v9462_v33 = vpop.eup %9461  ;;  %v7281_v51 = vadd.f32 %v14420_v28, %v7280_v26  ;;  %v7508_v0 = vadd.f32 %v7507_v62, %v7443_v57 }
0x1597   :  { %7700 = vrot.lane.b32.xlu0 %v9462_v33, %s9569_s23  ;;  %7636 = vrot.lane.b32.xlu2 %v9460_v35, %s9568_s0  ;;  %v9464_v50 = vpop.eup %9463 }
0x1598   :  { %v7346_v27 = vadd.f32 %v7345_v6, %v7281_v51  ;;  %v9466_v1 = vpop.eup %9465 }
0x1599   :  { %v7577_v63 = vpop.permute.xlu0 %7576 }
0x159a   :  { %9467 = vtanh.f32 %v7346_v27  ;;  %v14724_v30 = vsel %vm7724_vm0, %v9464_v50, %v7577_v63  ;;  %v7513_v60 = vpop.f32.mrf.mxu3 }
0x159b   :  { %9469 = vtanh.f32 %v14602_v7  ;;  %v7445_v24 = vpop.f32.mrf.mxu2 }
0x159c   :  { %9471 = vtanh.f32 %v6974_v56  ;;  %v7446_v7 = vadd.f32 %v14420_v28, %v7445_v24 }
0x159d   :  { %v7283_v11 = vpop.f32.mrf.mxu0  ;;  %9473 = vtanh.f32 %v7508_v0 }
0x159e   :  { %v7284_v10 = vadd.f32 %v14420_v28, %v7283_v11  ;;  %v7511_v38 = vadd.f32 %v7510_v61, %v7446_v7 }
0x159f   :  { %7638 = vrot.lane.b32.xlu0 %v9466_v1, %s9568_s0 }
0x15a0   :  { %v9468_v21 = vpop.eup %9467  ;;  %v7349_v23 = vadd.f32 %v7348_v3, %v7284_v10 }
0x15a1   :  { %v9470_v12 = vpop.eup %9469  ;;  %v7579_v9 = vpop.permute.xlu1 %7578  ;;  %7640 = vrot.lane.b32.xlu1 %v9468_v21, %s9568_s0 }
0x15a2   :  { %9475 = vtanh.f32 %v7349_v23  ;;  %v14733_v17 = vsel %vm7724_vm0, %v9470_v12, %v7579_v9  ;;  %v9472_v36 = vpop.eup %9471  ;;  %v7681_v51 = vpop.permute.xlu2 %7680 }
0x15a3   :  { %v7448_v47 = vpop.f32.mrf.mxu2  ;;  %v9474_v43 = vpop.eup %9473  ;;  %v7725_v41 = vsel %vm7724_vm0, %v9472_v36, %v14640_v46 }
0x15a4   :  { %v7449_v58 = vadd.f32 %v14420_v28, %v7448_v47  ;;  %v7742_v54 = vsel %vm7741_vm1, %v7725_v41, %v7613_v44 }
0x15a6   :  { %v7514_v49 = vadd.f32 %v7513_v60, %v7449_v58 }
0x15a8   :  { %v9476_v2 = vpop.eup %9475  ;;  %9477 = vtanh.f32 %v7514_v49 }
0x15a9   :  { %9479 = vtanh.f32 %v6977_v59  ;;  %v7677_v28 = vpop.permute.xlu0 %7676  ;;  %7702 = vrot.lane.b32.xlu1 %v9474_v43, %s9569_s23  ;;  %7642 = vrot.lane.b32.xlu2 %v9476_v2, %s9568_s0 }
0x15aa   :  { %9481 = vtanh.f32 %v7511_v38  ;;  %v7759_v39 = vsel %vm7758_vm5, %v7742_v54, %v7677_v28  ;;  %v7619_v63 = vpop.permute.xlu2 %7618 }
0x15ab   :  { %7776 = vst.msk [vmem:[%s14880_s14] sm:$0xff] %vm7775_vm6, %v7759_v39  ;;  %9483 = vtanh.f32 %v6980_v42 }
0x15ac   :  { %9485 = vtanh.f32 %v6983_v37 }
0x15ae   :  { %v9478_v46 = vpop.eup %9477 }
0x15af   :  { %v9480_v62 = vpop.eup %9479  ;;  %7706 = vrot.lane.b32.xlu0 %v9478_v46, %s9569_s23 }
0x15b0   :  { %v9482_v34 = vpop.eup %9481  ;;  %v7726_v32 = vsel %vm7724_vm0, %v9480_v62, %v14611_v45 }
0x15b1   :  { %v7679_v35 = vpop.permute.xlu1 %7678  ;;  %v7615_v6 = vpop.permute.xlu0 %7614  ;;  %7704 = vrot.lane.b32.xlu2 %v9482_v34, %s9569_s23 }
0x15b2   :  { %v7743_v26 = vsel %vm7741_vm1, %v7726_v32, %v7615_v6  ;;  %v9484_v53 = vpop.eup %9483 }
0x15b3   :  { %v7760_v33 = vsel %vm7758_vm5, %v7743_v26, %v7679_v35  ;;  %v7727_v45 = vsel %vm7724_vm0, %v9484_v53, %v14635_v16  ;;  %v9486_v20 = vpop.eup %9485 }
0x15b4   :  { %7777 = vst.msk [vmem:[%s14880_s14 + $0x8] sm:$0xff] %vm7775_vm6, %v7760_v33  ;;  %v7728_v29 = vsel %vm7724_vm0, %v9486_v20, %v14655_v18 }
0x15b5   :  { %v7745_v61 = vsel %vm7741_vm1, %v7728_v29, %v7619_v63 }
0x15b9   :  { %v7617_v27 = vpop.permute.xlu1 %7616  ;;  %v7687_v10 = vpop.permute.xlu2 %7686 }
0x15ba   :  { %v7744_v50 = vsel %vm7741_vm1, %v7727_v45, %v7617_v27 }
0x15bb   :  { %v7761_v57 = vsel %vm7758_vm5, %v7744_v50, %v7681_v51 }
0x15bc   :  { %7778 = vst.msk [vmem:[%s14880_s14 + $0x10] sm:$0xff] %vm7775_vm6, %v7761_v57 }
0x15c1   :  { %v7683_v24 = vpop.permute.xlu0 %7682 }
0x15c2   :  { %v7762_v16 = vsel %vm7758_vm5, %v7745_v61, %v7683_v24 }
0x15c3   :  { %7779 = vst.msk [vmem:[%s14880_s14 + $0x18] sm:$0xff] %vm7775_vm6, %v7762_v16 }
0x15c9   :  { %v7685_v56 = vpop.permute.xlu1 %7684  ;;  %v7621_v0 = vpop.permute.xlu0 %7620 }
0x15ca   :  { %v7746_v11 = vsel %vm7741_vm1, %v14618_v31, %v7621_v0  ;;  %v7625_v31 = vpop.permute.xlu2 %7624 }
0x15cb   :  { %v7763_v1 = vsel %vm7758_vm5, %v7746_v11, %v7685_v56  ;;  %v7748_v23 = vsel %vm7741_vm1, %v14662_v13, %v7625_v31 }
0x15cc   :  { %7780 = vst.msk [vmem:[%s14880_s14 + $0x20] sm:$0xff] %vm7775_vm6, %v7763_v1 }
0x15d1   :  { %v7623_v18 = vpop.permute.xlu1 %7622 }
0x15d2   :  { %v7747_v3 = vsel %vm7741_vm1, %v14653_v55, %v7623_v18  ;;  %v7693_v58 = vpop.permute.xlu2 %7692 }
0x15d3   :  { %v7764_v21 = vsel %vm7758_vm5, %v7747_v3, %v7687_v10 }
0x15d4   :  { %7781 = vst.msk [vmem:[%s14880_s14 + $0x28] sm:$0xff] %vm7775_vm6, %v7764_v21 }
0x15d9   :  { %v7689_v12 = vpop.permute.xlu0 %7688 }
0x15da   :  { %v7765_v9 = vsel %vm7758_vm5, %v7748_v23, %v7689_v12 }
0x15db   :  { %7782 = vst.msk [vmem:[%s14880_s14 + $0x30] sm:$0xff] %vm7775_vm6, %v7765_v9 }
0x15e1   :  { %v7691_v55 = vpop.permute.xlu1 %7690  ;;  %v7627_v7 = vpop.permute.xlu0 %7626 }
0x15e2   :  { %v7749_v48 = vsel %vm7741_vm1, %v14643_v40, %v7627_v7  ;;  %v7631_v40 = vpop.permute.xlu2 %7630 }
0x15e3   :  { %v7766_v47 = vsel %vm7758_vm5, %v7749_v48, %v7691_v55  ;;  %v7751_v36 = vsel %vm7741_vm1, %v14686_v5, %v7631_v40 }
0x15e4   :  { %7783 = vst.msk [vmem:[%s14880_s14 + $0x38] sm:$0xff] %vm7775_vm6, %v7766_v47 }
0x15e9   :  { %v7629_v13 = vpop.permute.xlu1 %7628 }
0x15ea   :  { %v7750_v59 = vsel %vm7741_vm1, %v14678_v22, %v7629_v13  ;;  %v7699_v22 = vpop.permute.xlu2 %7698 }
0x15eb   :  { %v7767_v60 = vsel %vm7758_vm5, %v7750_v59, %v7693_v58 }
0x15ec   :  { %7784 = vst.msk [vmem:[%s14880_s14 + $0x40] sm:$0xff] %vm7775_vm6, %v7767_v60 }
0x15f1   :  { %v7695_v44 = vpop.permute.xlu0 %7694 }
0x15f2   :  { %v7768_v38 = vsel %vm7758_vm5, %v7751_v36, %v7695_v44  ;;  %v7637_v54 = vpop.permute.xlu2 %7636 }
0x15f3   :  { %7785 = vst.msk [vmem:[%s14880_s14 + $0x48] sm:$0xff] %vm7775_vm6, %v7768_v38 }
0x15f9   :  { %v7697_v49 = vpop.permute.xlu1 %7696  ;;  %v7633_v43 = vpop.permute.xlu0 %7632 }
0x15fa   :  { %v7752_v2 = vsel %vm7741_vm1, %v14670_v19, %v7633_v43  ;;  %v7754_v19 = vsel %vm7741_vm1, %v14710_v15, %v7637_v54 }
0x15fb   :  { %v7769_v41 = vsel %vm7758_vm5, %v7752_v2, %v7697_v49 }
0x15fc   :  { %7786 = vst.msk [vmem:[%s14880_s14 + $0x50] sm:$0xff] %vm7775_vm6, %v7769_v41 }
0x1601   :  { %v7635_v5 = vpop.permute.xlu1 %7634 }
0x1602   :  { %v7753_v28 = vsel %vm7741_vm1, %v14702_v25, %v7635_v5 }
0x1603   :  { %v7770_v52 = vsel %vm7758_vm5, %v7753_v28, %v7699_v22  ;;  %v7643_v39 = vpop.permute.xlu2 %7642 }
0x1604   :  { %7787 = vst.msk [vmem:[%s14880_s14 + $0x58] sm:$0xff] %vm7775_vm6, %v7770_v52 }
0x1609   :  { %v7701_v8 = vpop.permute.xlu0 %7700 }
0x160a   :  { %v7771_v46 = vsel %vm7758_vm5, %v7754_v19, %v7701_v8 }
0x160b   :  { %7788 = vst.msk [vmem:[%s14880_s14 + $0x60] sm:$0xff] %vm7775_vm6, %v7771_v46  ;;  %v7705_v42 = vpop.permute.xlu2 %7704 }
0x1611   :  { %v7639_v15 = vpop.permute.xlu0 %7638 }
0x1612   :  { %v7755_v14 = vsel %vm7741_vm1, %v14694_v4, %v7639_v15 }
0x1613   :  { %v7641_v25 = vpop.permute.xlu1 %7640 }
0x1614   :  { %v7756_v62 = vsel %vm7741_vm1, %v14724_v30, %v7641_v25  ;;  %v7757_v30 = vsel %vm7741_vm1, %v14733_v17, %v7643_v39 }
0x1615   :  { %v7773_v34 = vsel %vm7758_vm5, %v7756_v62, %v7705_v42 }
0x1616   :  { %7790 = vst.msk [vmem:[%s14880_s14 + $0x70] sm:$0xff] %vm7775_vm6, %v7773_v34 }
0x161b   :  { %v7703_v32 = vpop.permute.xlu1 %7702 }
0x161c   :  { %v7772_v35 = vsel %vm7758_vm5, %v7755_v14, %v7703_v32 }
0x161d   :  { %7789 = vst.msk [vmem:[%s14880_s14 + $0x68] sm:$0xff] %vm7775_vm6, %v7772_v35 }
0x1621   :  { %v7707_v6 = vpop.permute.xlu0 %7706 }
0x1622   :  { %v7774_v26 = vsel %vm7758_vm5, %v7757_v30, %v7707_v6 }
0x1623   :  { %7791 = vst.msk [vmem:[%s14880_s14 + $0x78] sm:$0xff] %vm7775_vm6, %v7774_v26 }

</bundles_post_ra>
